<compile_context>
chip_gen: v7x
topology: tpu7x:2x2x1
jax: 0.10.0
libtpu: 0.0.40
codegen_flags: <defaults>
</compile_context>

<pallas_src>
import functools

import jax
import jax.numpy as jnp
import numpy as np
from jax.experimental import pallas as pl
from jax.experimental.pallas import tpu as pltpu


# ---------------------------------------------------------------------------
# VMEM budgeting helpers (do not hard-code a limit)
# ---------------------------------------------------------------------------
def _round_up(x, m):
    return (x + m - 1) // m * m


def _block_bytes(shape, itemsize=4):
    """Padded VMEM footprint of one buffer ((8,128) tiling on last two dims)."""
    dims = [int(d) for d in shape if d is not None]
    if not dims:
        return itemsize
    if len(dims) == 1:
        lead, sub, lane = 1, 1, dims[0]
    else:
        lead = 1
        for d in dims[:-2]:
            lead *= d
        sub, lane = dims[-2], dims[-1]
    return lead * _round_up(sub, 8) * _round_up(lane, 128) * itemsize


def _vmem_limit(blocks, extra_bytes=8 * 1024 * 1024):
    """Double-buffered block footprints + margin, clamped to a v7x-safe range."""
    total = sum(2 * _block_bytes(s, isz) for s, isz in blocks) + extra_bytes
    return int(min(max(total, 16 * 1024 * 1024), 48 * 1024 * 1024))


# ---------------------------------------------------------------------------
# conv1 (Cin == 1): VPU broadcast-MAC + bias + ReLU + vertical pool half
# ---------------------------------------------------------------------------
def _conv1_pool_rows_kernel(x_ref, w_ref, b_ref, o_ref, *, H, W, Cout):
    """One batch element per grid step.

    x_ref : (H+2, 1, W+2)   zero-padded input image
    w_ref : (3, 3, Cout, 1) conv weights, (ky, kx, Cout, Cin)
    b_ref : (Cout, 1)
    o_ref : (H//2, Cout, W) relu(conv + bias), max-pooled over row pairs
    """
    bias = b_ref[...]                                     # (Cout, 1)

    def row_body(ho, carry):
        base = 2 * ho                                     # top padded row of pair
        acc0 = jnp.zeros((Cout, W), jnp.float32)          # conv row 2*ho
        acc1 = jnp.zeros((Cout, W), jnp.float32)          # conv row 2*ho + 1
        for k in range(4):                                # padded rows base+k
            for dx in range(3):
                xs = x_ref[base + k, :, dx:dx + W]        # (1, W)
                if k <= 2:
                    acc0 = acc0 + w_ref[k, dx] * xs
                if k >= 1:
                    acc1 = acc1 + w_ref[k - 1, dx] * xs
        # relu(max(a,b)+bias) == max(relu(a+bias), relu(b+bias))
        y = jnp.maximum(jnp.maximum(acc0, acc1) + bias, 0.0)
        o_ref[ho] = y
        return carry

    jax.lax.fori_loop(0, H // 2, row_body, 0)


def conv1_relu_vpool(x_pad, w_taps, b_col):
    """x_pad: (B, H+2, 1, W+2). Returns (B, H//2, Cout, W), vertically pooled."""
    B, Hp, Cin, Wp = x_pad.shape
    H, W = Hp - 2, Wp - 2
    Cout = w_taps.shape[2]
    assert Cin == 1 and H % 2 == 0 and W % 128 == 0

    kernel = functools.partial(_conv1_pool_rows_kernel, H=H, W=W, Cout=Cout)
    return pl.pallas_call(
        kernel,
        out_shape=jax.ShapeDtypeStruct((B, H // 2, Cout, W), jnp.float32),
        grid_spec=pltpu.PrefetchScalarGridSpec(
            num_scalar_prefetch=0,
            grid=(B,),
            in_specs=[
                pl.BlockSpec((None, Hp, Cin, Wp), lambda b: (b, 0, 0, 0)),
                pl.BlockSpec((3, 3, Cout, Cin), lambda b: (0, 0, 0, 0)),
                pl.BlockSpec((Cout, 1), lambda b: (0, 0)),
            ],
            out_specs=pl.BlockSpec((None, H // 2, Cout, W),
                                   lambda b: (b, 0, 0, 0)),
        ),
        compiler_params=pltpu.CompilerParams(
            dimension_semantics=("parallel",),
            vmem_limit_bytes=_vmem_limit([
                ((Hp, Cin, Wp), 4), ((H // 2, Cout, W), 4),
                ((3, 3, Cout, Cin), 4), ((Cout, 1), 4)]),
        ),
    )(x_pad, w_taps, b_col)


# ---------------------------------------------------------------------------
# conv2 / conv3: consolidated MXU matmuls (M = 2*Cout, K = 4*Cin per dx)
# ---------------------------------------------------------------------------
def _conv_mxu_pool_rows_kernel(x_ref, w_ref, b_ref, o_ref, *, H, W, Cin, Cout):
    """One batch element per grid step.

    x_ref : ((H+2)*Cin, W+2)   flat zero-padded input, row index = row*Cin + ci
    w_ref : (3, 2*Cout, 4*Cin) consolidated per-dx tap matrices
    b_ref : (Cout, 1)
    o_ref : (H//2, Cout, W)    relu(conv + bias), max-pooled over row pairs
    """
    bias = b_ref[...]                                     # (Cout, 1)

    def row_body(ho, carry):
        # 4 consecutive padded rows (all Cin channels) as one aligned K slab.
        row0 = pl.multiple_of(2 * Cin * ho, 2 * Cin)
        acc = jnp.zeros((2 * Cout, W), jnp.float32)
        for dx in range(3):
            slab = x_ref[pl.ds(row0, 4 * Cin), pl.ds(dx, W)]   # (4*Cin, W)
            acc = acc + jnp.dot(w_ref[dx], slab,
                                preferred_element_type=jnp.float32)
        # rows [0:Cout] = conv row 2*ho, rows [Cout:] = conv row 2*ho+1
        y = jnp.maximum(jnp.maximum(acc[:Cout], acc[Cout:]) + bias, 0.0)
        o_ref[ho] = y
        return carry

    jax.lax.fori_loop(0, H // 2, row_body, 0)


def conv_mxu_relu_vpool(x_flat, w_taps, b_col):
    """x_flat: (B, (H+2)*Cin, W+2). Returns (B, H//2, Cout, W), vertically pooled."""
    B, RC, Wp = x_flat.shape
    Cout = w_taps.shape[1] // 2
    Cin = w_taps.shape[2] // 4
    H = RC // Cin - 2
    W = Wp - 2
    assert RC == (H + 2) * Cin and H % 2 == 0 and W % 128 == 0 and Cin % 8 == 0

    kernel = functools.partial(_conv_mxu_pool_rows_kernel,
                               H=H, W=W, Cin=Cin, Cout=Cout)
    return pl.pallas_call(
        kernel,
        out_shape=jax.ShapeDtypeStruct((B, H // 2, Cout, W), jnp.float32),
        grid_spec=pltpu.PrefetchScalarGridSpec(
            num_scalar_prefetch=0,
            grid=(B,),
            in_specs=[
                pl.BlockSpec((None, RC, Wp), lambda b: (b, 0, 0)),
                pl.BlockSpec((3, 2 * Cout, 4 * Cin), lambda b: (0, 0, 0)),
                pl.BlockSpec((Cout, 1), lambda b: (0, 0)),
            ],
            out_specs=pl.BlockSpec((None, H // 2, Cout, W),
                                   lambda b: (b, 0, 0, 0)),
        ),
        compiler_params=pltpu.CompilerParams(
            dimension_semantics=("parallel",),
            vmem_limit_bytes=_vmem_limit([
                ((RC, Wp), 4), ((H // 2, Cout, W), 4),
                ((3, 2 * Cout, 4 * Cin), 4), ((Cout, 1), 4)]),
        ),
    )(x_flat, w_taps, b_col)


# ---------------------------------------------------------------------------
# Inter-layer XLA glue: horizontal pool half + pad + flatten in ONE pass
# ---------------------------------------------------------------------------
def _hpool_pad_flat(y):
    """y: (B, H, C, 2W) vertically-pooled conv output -> (B, (H+2)*C, W+2)."""
    m = jnp.maximum(y[..., 0::2], y[..., 1::2])            # horizontal pool half
    m = jnp.pad(m, ((0, 0), (1, 1), (0, 0), (1, 1)))       # halo for next conv
    B, Hp, C, Wp = m.shape
    return m.reshape(B, Hp * C, Wp)                        # free (contiguous)


# ---------------------------------------------------------------------------
# fc1: (B, K) @ (K, 128) with bf16 operands, f32 accumulation
# ---------------------------------------------------------------------------
def _fc1_partial_kernel(x_ref, w_ref, o_ref, acc_ref):
    @pl.when(pl.program_id(1) == 0)
    def _():
        acc_ref[...] = jnp.zeros_like(acc_ref)

    acc_ref[...] += jnp.dot(x_ref[...].astype(jnp.bfloat16), w_ref[...],
                            preferred_element_type=jnp.float32)

    @pl.when(pl.program_id(1) == pl.num_programs(1) - 1)
    def _():
        o_ref[...] = acc_ref[...]


def fc1_partials(x, w_bf16, *, tk=16384, k_splits=2):
    """Returns per-K-half partial products (k_splits, B, N) in float32."""
    B, K = x.shape
    Kw, N = w_bf16.shape
    assert K == Kw and K % (k_splits * tk) == 0
    nk = K // (k_splits * tk)

    return pl.pallas_call(
        _fc1_partial_kernel,
        out_shape=jax.ShapeDtypeStruct((k_splits, B, N), jnp.float32),
        grid_spec=pltpu.PrefetchScalarGridSpec(
            num_scalar_prefetch=0,
            grid=(k_splits, nk),
            in_specs=[
                pl.BlockSpec((B, tk), lambda i, k: (0, i * nk + k)),
                pl.BlockSpec((tk, N), lambda i, k: (i * nk + k, 0)),
            ],
            out_specs=pl.BlockSpec((None, B, N), lambda i, k: (i, 0, 0)),
            scratch_shapes=[pltpu.VMEM((B, N), jnp.float32)],
        ),
        compiler_params=pltpu.CompilerParams(
            dimension_semantics=("parallel", "arbitrary"),
            vmem_limit_bytes=_vmem_limit([((B, tk), 4), ((tk, N), 2),
                                          ((B, N), 4)]),
        ),
    )(x, w_bf16)


# ---------------------------------------------------------------------------
# Head: fc1 partial-sum + bias, ReLU, fc2, bias, sigmoid — one tiny kernel
# ---------------------------------------------------------------------------
def _head_kernel(part_ref, bf1_ref, w_ref, b_ref, feat_ref, out_ref, *, k_splits):
    feat = bf1_ref[...]                                    # (1, N) broadcasts
    for s in range(k_splits):
        feat = feat + part_ref[s]                          # (B, N)
    feat_ref[...] = feat                                   # pre-ReLU feature
    y = jnp.dot(jnp.maximum(feat, 0.0), w_ref[...],
                preferred_element_type=jnp.float32) + b_ref[...]
    out_ref[...] = jax.nn.sigmoid(y)


def fc_head(partials, bf1, wf2, bf2):
    k_splits, B, N = partials.shape
    n_cls = wf2.shape[1]
    kernel = functools.partial(_head_kernel, k_splits=k_splits)
    return pl.pallas_call(
        kernel,
        out_shape=(jax.ShapeDtypeStruct((B, N), jnp.float32),
                   jax.ShapeDtypeStruct((B, n_cls), jnp.float32)),
        grid_spec=pltpu.PrefetchScalarGridSpec(
            num_scalar_prefetch=0,
            grid=(1,),
            in_specs=[
                pl.BlockSpec((k_splits, B, N), lambda i: (0, 0, 0)),
                pl.BlockSpec((1, N), lambda i: (0, 0)),
                pl.BlockSpec((N, n_cls), lambda i: (0, 0)),
                pl.BlockSpec((1, n_cls), lambda i: (0, 0)),
            ],
            out_specs=[pl.BlockSpec((B, N), lambda i: (0, 0)),
                       pl.BlockSpec((B, n_cls), lambda i: (0, 0))],
        ),
        compiler_params=pltpu.CompilerParams(
            dimension_semantics=("arbitrary",),
            vmem_limit_bytes=_vmem_limit([((k_splits, B, N), 4), ((1, N), 4),
                                          ((N, n_cls), 4), ((1, n_cls), 4),
                                          ((B, N), 4), ((B, n_cls), 4)]),
        ),
    )(partials, bf1, wf2, bf2)


# ---------------------------------------------------------------------------
# Parameter prep (done ONCE, outside the forward)
# ---------------------------------------------------------------------------
def _conv_tap_matrix(w_oihw):
    """(Cout, Cin, 3, 3) PyTorch weight -> (3, 2*Cout, 4*Cin) per-dx matrices.

    Rows [0:Cout] produce conv output row 2*ho (padded rows base..base+2),
    rows [Cout:]  produce conv output row 2*ho+1 (padded rows base+1..base+3).
    """
    w = np.asarray(w_oihw, np.float32)
    Cout, Cin = w.shape[0], w.shape[1]
    m = np.zeros((3, 2 * Cout, 4 * Cin), np.float32)
    for dx in range(3):
        for k in range(4):
            if k <= 2:
                m[dx, :Cout, k * Cin:(k + 1) * Cin] = w[:, :, k, dx]
            if k >= 1:
                m[dx, Cout:, k * Cin:(k + 1) * Cin] = w[:, :, k - 1, dx]
    return jnp.asarray(m)


def prepare_params(params):
    """Re-lay-out the PyTorch-shaped parameters for the kernels (one time)."""
    C3, H3, W3 = 64, 16, 128
    n_out = params["wf1"].shape[0]
    # fc1: (K, N), rows permuted from PyTorch's (c, h, w) flatten to our
    # (h, c, w) flatten, stored bf16 (HBM-bandwidth dominated stream).
    wf1_t = (params["wf1"].reshape(n_out, C3, H3, W3)
             .transpose(2, 1, 3, 0)                        # (H3, C3, W3, N)
             .reshape(H3 * C3 * W3, n_out)
             .astype(jnp.bfloat16))
    return {
        "w1": jnp.transpose(params["w1"], (2, 3, 0, 1)),   # (3, 3, 16, 1)
        "b1": params["b1"].reshape(-1, 1),
        "w2t": _conv_tap_matrix(params["w2"]),             # (3, 64, 64)
        "b2": params["b2"].reshape(-1, 1),
        "w3t": _conv_tap_matrix(params["w3"]),             # (3, 128, 128)
        "b3": params["b3"].reshape(-1, 1),
        "wf1_t": wf1_t,                                    # (131072, 128) bf16
        "bf1": params["bf1"].reshape(1, -1),
        "wf2_t": params["wf2"].T,                          # (128, 2)
        "bf2": params["bf2"].reshape(1, -1),
    }


# ---------------------------------------------------------------------------
# Forward pass (mirrors AudioCNN.forward)
# ---------------------------------------------------------------------------
def audio_cnn_forward(p, x_nchw):
    """x_nchw: (B, 1, 128, 1024) float32.  Returns (feature, output)."""
    B = x_nchw.shape[0]

    # NCHW -> (B, H, C, W): channels on sublanes, width on lanes.
    x = jnp.transpose(x_nchw, (0, 2, 1, 3))                # (B, 128, 1, 1024)
    x = jnp.pad(x, ((0, 0), (1, 1), (0, 0), (1, 1)))       # (B, 130, 1, 1026)

    y1 = conv1_relu_vpool(x, p["w1"], p["b1"])             # (B, 64, 16, 1024)
    y2 = conv_mxu_relu_vpool(_hpool_pad_flat(y1),          # (B, 32, 32, 512)
                             p["w2t"], p["b2"])
    y3 = conv_mxu_relu_vpool(_hpool_pad_flat(y2),          # (B, 16, 64, 256)
                             p["w3t"], p["b3"])

    x3 = jnp.maximum(y3[..., 0::2], y3[..., 1::2])         # (B, 16, 64, 128)
    flat = x3.reshape(B, -1)                               # (h, c, w) flatten

    partials = fc1_partials(flat, p["wf1_t"])              # (2, B, 128)
    feature, output = fc_head(partials, p["bf1"], p["wf2_t"], p["bf2"])
    return feature, output


# ---------------------------------------------------------------------------
# Deterministic parameter init (synthetic, same shapes as the nn.Module)
# ---------------------------------------------------------------------------
def init_params(key):
    ks = jax.random.split(key, 10)

    def rnd(k, shape, scale):
        return scale * jax.random.normal(k, shape, jnp.float32)

    fc1_in = 64 * 16 * 128
    return {
        "w1": rnd(ks[0], (16, 1, 3, 3), 0.30), "b1": rnd(ks[1], (16,), 0.10),
        "w2": rnd(ks[2], (32, 16, 3, 3), 0.08), "b2": rnd(ks[3], (32,), 0.10),
        "w3": rnd(ks[4], (64, 32, 3, 3), 0.06), "b3": rnd(ks[5], (64,), 0.10),
        "wf1": rnd(ks[6], (128, fc1_in), 1.0 / np.sqrt(fc1_in)),
        "bf1": rnd(ks[7], (128,), 0.01),
        "wf2": rnd(ks[8], (2, 128), 1.0 / np.sqrt(128)),
        "bf2": rnd(ks[9], (2,), 0.01),
    }


# ---------------------------------------------------------------------------
# Pure-JAX reference (PyTorch semantics) for a correctness check
# ---------------------------------------------------------------------------
def reference_forward(params, x_nchw):
    hp = jax.lax.Precision.HIGHEST

    def conv(x, w, b):
        y = jax.lax.conv_general_dilated(
            x, w, window_strides=(1, 1), padding=((1, 1), (1, 1)),
            dimension_numbers=("NCHW", "OIHW", "NCHW"), precision=hp)
        return jax.nn.relu(y + b[None, :, None, None])

    def pool(x):
        return jax.lax.reduce_window(x, -jnp.inf, jax.lax.max,
                                     (1, 1, 2, 2), (1, 1, 2, 2), "VALID")

    x = pool(conv(x_nchw, params["w1"], params["b1"]))
    x = pool(conv(x, params["w2"], params["b2"]))
    x = pool(conv(x, params["w3"], params["b3"]))
    flat = x.reshape(x.shape[0], -1)
    feature = jnp.dot(flat, params["wf1"].T, precision=hp) + params["bf1"]
    out = jax.nn.sigmoid(
        jnp.dot(jax.nn.relu(feature), params["wf2"].T, precision=hp)
        + params["bf2"])
    return feature, out


if __name__ == "__main__":
    key = jax.random.PRNGKey(0)
    pkey, xkey = jax.random.split(key)
    params = init_params(pkey)
    prepared = prepare_params(params)   # one-time weight re-layout

    # fc1 hard-codes 64*16*128 input features => input must be (B, 1, 128, 1024).
    x = jax.random.normal(xkey, (2, 1, 128, 1024), jnp.float32)

    fwd = jax.jit(audio_cnn_forward)
    feature, output = fwd(prepared, x)
    jax.block_until_ready((feature, output))
    assert feature.shape == (2, 128) and output.shape == (2, 2)

    ref_feature, ref_output = jax.jit(reference_forward)(params, x)
    jax.block_until_ready((ref_feature, ref_output))
    # Slightly relaxed atol on the feature: fc1 uses bf16 operands (f32 accum)
    # over a K=131072 reduction; convolutions remain f32.
    assert np.allclose(np.asarray(feature), np.asarray(ref_feature),
                       rtol=1e-2, atol=2e-2), "feature mismatch vs reference"
    assert np.allclose(np.asarray(output), np.asarray(ref_output),
                       rtol=1e-2, atol=1e-2), "output mismatch vs reference"

    print("KERNEL_OK")
</pallas_src>

<mosaic_0001>
module attributes {stable_mosaic.version = 11 : i64} {
  func.func @_conv1_pool_rows_kernel(%arg0: i32, %arg1: memref<1x130x1x1026xf32, #tpu.memory_space<vmem>>, %arg2: memref<3x3x16x1xf32, #tpu.memory_space<vmem>>, %arg3: memref<16x1xf32, #tpu.memory_space<vmem>>, %arg4: memref<1x64x16x1024xf32, #tpu.memory_space<vmem>>) attributes {dimension_semantics = [#tpu.dimension_semantics<parallel>], iteration_bounds = array<i64: 2>, scalar_prefetch = 0 : i64, scratch_operands = 0 : i64, tpu.core_type = #tpu.core_type<tc>, window_params = [{transform_indices = @transform_0, window_bounds = array<i64: 1, 130, 1, 1026>}, {pipeline_mode = #tpu.pipeline_mode<synchronous>, transform_indices = @transform_1, window_bounds = array<i64: 3, 3, 16, 1>}, {pipeline_mode = #tpu.pipeline_mode<synchronous>, transform_indices = @transform_2, window_bounds = array<i64: 16, 1>}, {transform_indices = @transform_3, window_bounds = array<i64: 1, 64, 16, 1024>}]} {
    %c0 = arith.constant 0 : index
    %c0_0 = arith.constant 0 : index
    %0 = vector.load %arg3[%c0, %c0_0] : memref<16x1xf32, #tpu.memory_space<vmem>>, vector<16x1xf32>
    %c0_i32 = arith.constant 0 : i32
    %c64_i32 = arith.constant 64 : i32
    %1 = arith.addi %c0_i32, %c64_i32 : i32
    %c1_i32 = arith.constant 1 : i32
    scf.for %arg5 = %c0_i32 to %1 step %c1_i32  : i32 {
      %c2_i32 = arith.constant 2 : i32
      %2 = arith.muli %c2_i32, %arg5 : i32
      %cst = arith.constant 0.000000e+00 : f32
      %3 = vector.broadcast %cst : f32 to vector<16x1024xf32>
      %cst_2 = arith.constant 0.000000e+00 : f32
      %4 = vector.broadcast %cst_2 : f32 to vector<16x1024xf32>
      %c0_i32_3 = arith.constant 0 : i32
      %5 = arith.addi %2, %c0_i32_3 : i32
      %c0_4 = arith.constant 0 : index
      %6 = arith.index_cast %5 : i32 to index
      %c0_5 = arith.constant 0 : index
      %c0_6 = arith.constant 0 : index
      %7 = vector.load %arg1[%c0_4, %6, %c0_5, %c0_6] : memref<1x130x1x1026xf32, #tpu.memory_space<vmem>>, vector<1x1x1x1024xf32>
      %8 = vector.shape_cast %7 : vector<1x1x1x1024xf32> to vector<1x1024xf32>
      %c0_7 = arith.constant 0 : index
      %c0_8 = arith.constant 0 : index
      %c0_9 = arith.constant 0 : index
      %c0_10 = arith.constant 0 : index
      %9 = vector.load %arg2[%c0_7, %c0_8, %c0_9, %c0_10] : memref<3x3x16x1xf32, #tpu.memory_space<vmem>>, vector<1x1x16x1xf32>
      %10 = vector.shape_cast %9 : vector<1x1x16x1xf32> to vector<16x1xf32>
      %11 = vector.broadcast %10 : vector<16x1xf32> to vector<16x1024xf32>
      %12 = vector.broadcast %8 : vector<1x1024xf32> to vector<16x1024xf32>
      %13 = arith.mulf %11, %12 : vector<16x1024xf32>
      %14 = arith.addf %3, %13 : vector<16x1024xf32>
      %c0_i32_11 = arith.constant 0 : i32
      %15 = arith.addi %2, %c0_i32_11 : i32
      %c0_12 = arith.constant 0 : index
      %16 = arith.index_cast %15 : i32 to index
      %c0_13 = arith.constant 0 : index
      %c1 = arith.constant 1 : index
      %17 = vector.load %arg1[%c0_12, %16, %c0_13, %c1] : memref<1x130x1x1026xf32, #tpu.memory_space<vmem>>, vector<1x1x1x1024xf32>
      %18 = vector.shape_cast %17 : vector<1x1x1x1024xf32> to vector<1x1024xf32>
      %c0_14 = arith.constant 0 : index
      %c1_15 = arith.constant 1 : index
      %c0_16 = arith.constant 0 : index
      %c0_17 = arith.constant 0 : index
      %19 = vector.load %arg2[%c0_14, %c1_15, %c0_16, %c0_17] : memref<3x3x16x1xf32, #tpu.memory_space<vmem>>, vector<1x1x16x1xf32>
      %20 = vector.shape_cast %19 : vector<1x1x16x1xf32> to vector<16x1xf32>
      %21 = vector.broadcast %20 : vector<16x1xf32> to vector<16x1024xf32>
      %22 = vector.broadcast %18 : vector<1x1024xf32> to vector<16x1024xf32>
      %23 = arith.mulf %21, %22 : vector<16x1024xf32>
      %24 = arith.addf %14, %23 : vector<16x1024xf32>
      %c0_i32_18 = arith.constant 0 : i32
      %25 = arith.addi %2, %c0_i32_18 : i32
      %c0_19 = arith.constant 0 : index
      %26 = arith.index_cast %25 : i32 to index
      %c0_20 = arith.constant 0 : index
      %c2 = arith.constant 2 : index
      %27 = vector.load %arg1[%c0_19, %26, %c0_20, %c2] : memref<1x130x1x1026xf32, #tpu.memory_space<vmem>>, vector<1x1x1x1024xf32>
      %28 = vector.shape_cast %27 : vector<1x1x1x1024xf32> to vector<1x1024xf32>
      %c0_21 = arith.constant 0 : index
      %c2_22 = arith.constant 2 : index
      %c0_23 = arith.constant 0 : index
      %c0_24 = arith.constant 0 : index
      %29 = vector.load %arg2[%c0_21, %c2_22, %c0_23, %c0_24] : memref<3x3x16x1xf32, #tpu.memory_space<vmem>>, vector<1x1x16x1xf32>
      %30 = vector.shape_cast %29 : vector<1x1x16x1xf32> to vector<16x1xf32>
      %31 = vector.broadcast %30 : vector<16x1xf32> to vector<16x1024xf32>
      %32 = vector.broadcast %28 : vector<1x1024xf32> to vector<16x1024xf32>
      %33 = arith.mulf %31, %32 : vector<16x1024xf32>
      %34 = arith.addf %24, %33 : vector<16x1024xf32>
      %c1_i32_25 = arith.constant 1 : i32
      %35 = arith.addi %2, %c1_i32_25 : i32
      %c0_26 = arith.constant 0 : index
      %36 = arith.index_cast %35 : i32 to index
      %c0_27 = arith.constant 0 : index
      %c0_28 = arith.constant 0 : index
      %37 = vector.load %arg1[%c0_26, %36, %c0_27, %c0_28] : memref<1x130x1x1026xf32, #tpu.memory_space<vmem>>, vector<1x1x1x1024xf32>
      %38 = vector.shape_cast %37 : vector<1x1x1x1024xf32> to vector<1x1024xf32>
      %c1_29 = arith.constant 1 : index
      %c0_30 = arith.constant 0 : index
      %c0_31 = arith.constant 0 : index
      %c0_32 = arith.constant 0 : index
      %39 = vector.load %arg2[%c1_29, %c0_30, %c0_31, %c0_32] : memref<3x3x16x1xf32, #tpu.memory_space<vmem>>, vector<1x1x16x1xf32>
      %40 = vector.shape_cast %39 : vector<1x1x16x1xf32> to vector<16x1xf32>
      %41 = vector.broadcast %40 : vector<16x1xf32> to vector<16x1024xf32>
      %42 = vector.broadcast %38 : vector<1x1024xf32> to vector<16x1024xf32>
      %43 = arith.mulf %41, %42 : vector<16x1024xf32>
      %44 = arith.addf %34, %43 : vector<16x1024xf32>
      %c0_33 = arith.constant 0 : index
      %c0_34 = arith.constant 0 : index
      %c0_35 = arith.constant 0 : index
      %c0_36 = arith.constant 0 : index
      %45 = vector.load %arg2[%c0_33, %c0_34, %c0_35, %c0_36] : memref<3x3x16x1xf32, #tpu.memory_space<vmem>>, vector<1x1x16x1xf32>
      %46 = vector.shape_cast %45 : vector<1x1x16x1xf32> to vector<16x1xf32>
      %47 = vector.broadcast %46 : vector<16x1xf32> to vector<16x1024xf32>
      %48 = vector.broadcast %38 : vector<1x1024xf32> to vector<16x1024xf32>
      %49 = arith.mulf %47, %48 : vector<16x1024xf32>
      %50 = arith.addf %4, %49 : vector<16x1024xf32>
      %c1_i32_37 = arith.constant 1 : i32
      %51 = arith.addi %2, %c1_i32_37 : i32
      %c0_38 = arith.constant 0 : index
      %52 = arith.index_cast %51 : i32 to index
      %c0_39 = arith.constant 0 : index
      %c1_40 = arith.constant 1 : index
      %53 = vector.load %arg1[%c0_38, %52, %c0_39, %c1_40] : memref<1x130x1x1026xf32, #tpu.memory_space<vmem>>, vector<1x1x1x1024xf32>
      %54 = vector.shape_cast %53 : vector<1x1x1x1024xf32> to vector<1x1024xf32>
      %c1_41 = arith.constant 1 : index
      %c1_42 = arith.constant 1 : index
      %c0_43 = arith.constant 0 : index
      %c0_44 = arith.constant 0 : index
      %55 = vector.load %arg2[%c1_41, %c1_42, %c0_43, %c0_44] : memref<3x3x16x1xf32, #tpu.memory_space<vmem>>, vector<1x1x16x1xf32>
      %56 = vector.shape_cast %55 : vector<1x1x16x1xf32> to vector<16x1xf32>
      %57 = vector.broadcast %56 : vector<16x1xf32> to vector<16x1024xf32>
      %58 = vector.broadcast %54 : vector<1x1024xf32> to vector<16x1024xf32>
      %59 = arith.mulf %57, %58 : vector<16x1024xf32>
      %60 = arith.addf %44, %59 : vector<16x1024xf32>
      %c0_45 = arith.constant 0 : index
      %c1_46 = arith.constant 1 : index
      %c0_47 = arith.constant 0 : index
      %c0_48 = arith.constant 0 : index
      %61 = vector.load %arg2[%c0_45, %c1_46, %c0_47, %c0_48] : memref<3x3x16x1xf32, #tpu.memory_space<vmem>>, vector<1x1x16x1xf32>
      %62 = vector.shape_cast %61 : vector<1x1x16x1xf32> to vector<16x1xf32>
      %63 = vector.broadcast %62 : vector<16x1xf32> to vector<16x1024xf32>
      %64 = vector.broadcast %54 : vector<1x1024xf32> to vector<16x1024xf32>
      %65 = arith.mulf %63, %64 : vector<16x1024xf32>
      %66 = arith.addf %50, %65 : vector<16x1024xf32>
      %c1_i32_49 = arith.constant 1 : i32
      %67 = arith.addi %2, %c1_i32_49 : i32
      %c0_50 = arith.constant 0 : index
      %68 = arith.index_cast %67 : i32 to index
      %c0_51 = arith.constant 0 : index
      %c2_52 = arith.constant 2 : index
      %69 = vector.load %arg1[%c0_50, %68, %c0_51, %c2_52] : memref<1x130x1x1026xf32, #tpu.memory_space<vmem>>, vector<1x1x1x1024xf32>
      %70 = vector.shape_cast %69 : vector<1x1x1x1024xf32> to vector<1x1024xf32>
      %c1_53 = arith.constant 1 : index
      %c2_54 = arith.constant 2 : index
      %c0_55 = arith.constant 0 : index
      %c0_56 = arith.constant 0 : index
      %71 = vector.load %arg2[%c1_53, %c2_54, %c0_55, %c0_56] : memref<3x3x16x1xf32, #tpu.memory_space<vmem>>, vector<1x1x16x1xf32>
      %72 = vector.shape_cast %71 : vector<1x1x16x1xf32> to vector<16x1xf32>
      %73 = vector.broadcast %72 : vector<16x1xf32> to vector<16x1024xf32>
      %74 = vector.broadcast %70 : vector<1x1024xf32> to vector<16x1024xf32>
      %75 = arith.mulf %73, %74 : vector<16x1024xf32>
      %76 = arith.addf %60, %75 : vector<16x1024xf32>
      %c0_57 = arith.constant 0 : index
      %c2_58 = arith.constant 2 : index
      %c0_59 = arith.constant 0 : index
      %c0_60 = arith.constant 0 : index
      %77 = vector.load %arg2[%c0_57, %c2_58, %c0_59, %c0_60] : memref<3x3x16x1xf32, #tpu.memory_space<vmem>>, vector<1x1x16x1xf32>
      %78 = vector.shape_cast %77 : vector<1x1x16x1xf32> to vector<16x1xf32>
      %79 = vector.broadcast %78 : vector<16x1xf32> to vector<16x1024xf32>
      %80 = vector.broadcast %70 : vector<1x1024xf32> to vector<16x1024xf32>
      %81 = arith.mulf %79, %80 : vector<16x1024xf32>
      %82 = arith.addf %66, %81 : vector<16x1024xf32>
      %c2_i32_61 = arith.constant 2 : i32
      %83 = arith.addi %2, %c2_i32_61 : i32
      %c0_62 = arith.constant 0 : index
      %84 = arith.index_cast %83 : i32 to index
      %c0_63 = arith.constant 0 : index
      %c0_64 = arith.constant 0 : index
      %85 = vector.load %arg1[%c0_62, %84, %c0_63, %c0_64] : memref<1x130x1x1026xf32, #tpu.memory_space<vmem>>, vector<1x1x1x1024xf32>
      %86 = vector.shape_cast %85 : vector<1x1x1x1024xf32> to vector<1x1024xf32>
      %c2_65 = arith.constant 2 : index
      %c0_66 = arith.constant 0 : index
      %c0_67 = arith.constant 0 : index
      %c0_68 = arith.constant 0 : index
      %87 = vector.load %arg2[%c2_65, %c0_66, %c0_67, %c0_68] : memref<3x3x16x1xf32, #tpu.memory_space<vmem>>, vector<1x1x16x1xf32>
      %88 = vector.shape_cast %87 : vector<1x1x16x1xf32> to vector<16x1xf32>
      %89 = vector.broadcast %88 : vector<16x1xf32> to vector<16x1024xf32>
      %90 = vector.broadcast %86 : vector<1x1024xf32> to vector<16x1024xf32>
      %91 = arith.mulf %89, %90 : vector<16x1024xf32>
      %92 = arith.addf %76, %91 : vector<16x1024xf32>
      %c1_69 = arith.constant 1 : index
      %c0_70 = arith.constant 0 : index
      %c0_71 = arith.constant 0 : index
      %c0_72 = arith.constant 0 : index
      %93 = vector.load %arg2[%c1_69, %c0_70, %c0_71, %c0_72] : memref<3x3x16x1xf32, #tpu.memory_space<vmem>>, vector<1x1x16x1xf32>
      %94 = vector.shape_cast %93 : vector<1x1x16x1xf32> to vector<16x1xf32>
      %95 = vector.broadcast %94 : vector<16x1xf32> to vector<16x1024xf32>
      %96 = vector.broadcast %86 : vector<1x1024xf32> to vector<16x1024xf32>
      %97 = arith.mulf %95, %96 : vector<16x1024xf32>
      %98 = arith.addf %82, %97 : vector<16x1024xf32>
      %c2_i32_73 = arith.constant 2 : i32
      %99 = arith.addi %2, %c2_i32_73 : i32
      %c0_74 = arith.constant 0 : index
      %100 = arith.index_cast %99 : i32 to index
      %c0_75 = arith.constant 0 : index
      %c1_76 = arith.constant 1 : index
      %101 = vector.load %arg1[%c0_74, %100, %c0_75, %c1_76] : memref<1x130x1x1026xf32, #tpu.memory_space<vmem>>, vector<1x1x1x1024xf32>
      %102 = vector.shape_cast %101 : vector<1x1x1x1024xf32> to vector<1x1024xf32>
      %c2_77 = arith.constant 2 : index
      %c1_78 = arith.constant 1 : index
      %c0_79 = arith.constant 0 : index
      %c0_80 = arith.constant 0 : index
      %103 = vector.load %arg2[%c2_77, %c1_78, %c0_79, %c0_80] : memref<3x3x16x1xf32, #tpu.memory_space<vmem>>, vector<1x1x16x1xf32>
      %104 = vector.shape_cast %103 : vector<1x1x16x1xf32> to vector<16x1xf32>
      %105 = vector.broadcast %104 : vector<16x1xf32> to vector<16x1024xf32>
      %106 = vector.broadcast %102 : vector<1x1024xf32> to vector<16x1024xf32>
      %107 = arith.mulf %105, %106 : vector<16x1024xf32>
      %108 = arith.addf %92, %107 : vector<16x1024xf32>
      %c1_81 = arith.constant 1 : index
      %c1_82 = arith.constant 1 : index
      %c0_83 = arith.constant 0 : index
      %c0_84 = arith.constant 0 : index
      %109 = vector.load %arg2[%c1_81, %c1_82, %c0_83, %c0_84] : memref<3x3x16x1xf32, #tpu.memory_space<vmem>>, vector<1x1x16x1xf32>
      %110 = vector.shape_cast %109 : vector<1x1x16x1xf32> to vector<16x1xf32>
      %111 = vector.broadcast %110 : vector<16x1xf32> to vector<16x1024xf32>
      %112 = vector.broadcast %102 : vector<1x1024xf32> to vector<16x1024xf32>
      %113 = arith.mulf %111, %112 : vector<16x1024xf32>
      %114 = arith.addf %98, %113 : vector<16x1024xf32>
      %c2_i32_85 = arith.constant 2 : i32
      %115 = arith.addi %2, %c2_i32_85 : i32
      %c0_86 = arith.constant 0 : index
      %116 = arith.index_cast %115 : i32 to index
      %c0_87 = arith.constant 0 : index
      %c2_88 = arith.constant 2 : index
      %117 = vector.load %arg1[%c0_86, %116, %c0_87, %c2_88] : memref<1x130x1x1026xf32, #tpu.memory_space<vmem>>, vector<1x1x1x1024xf32>
      %118 = vector.shape_cast %117 : vector<1x1x1x1024xf32> to vector<1x1024xf32>
      %c2_89 = arith.constant 2 : index
      %c2_90 = arith.constant 2 : index
      %c0_91 = arith.constant 0 : index
      %c0_92 = arith.constant 0 : index
      %119 = vector.load %arg2[%c2_89, %c2_90, %c0_91, %c0_92] : memref<3x3x16x1xf32, #tpu.memory_space<vmem>>, vector<1x1x16x1xf32>
      %120 = vector.shape_cast %119 : vector<1x1x16x1xf32> to vector<16x1xf32>
      %121 = vector.broadcast %120 : vector<16x1xf32> to vector<16x1024xf32>
      %122 = vector.broadcast %118 : vector<1x1024xf32> to vector<16x1024xf32>
      %123 = arith.mulf %121, %122 : vector<16x1024xf32>
      %124 = arith.addf %108, %123 : vector<16x1024xf32>
      %c1_93 = arith.constant 1 : index
      %c2_94 = arith.constant 2 : index
      %c0_95 = arith.constant 0 : index
      %c0_96 = arith.constant 0 : index
      %125 = vector.load %arg2[%c1_93, %c2_94, %c0_95, %c0_96] : memref<3x3x16x1xf32, #tpu.memory_space<vmem>>, vector<1x1x16x1xf32>
      %126 = vector.shape_cast %125 : vector<1x1x16x1xf32> to vector<16x1xf32>
      %127 = vector.broadcast %126 : vector<16x1xf32> to vector<16x1024xf32>
      %128 = vector.broadcast %118 : vector<1x1024xf32> to vector<16x1024xf32>
      %129 = arith.mulf %127, %128 : vector<16x1024xf32>
      %130 = arith.addf %114, %129 : vector<16x1024xf32>
      %c3_i32 = arith.constant 3 : i32
      %131 = arith.addi %2, %c3_i32 : i32
      %c0_97 = arith.constant 0 : index
      %132 = arith.index_cast %131 : i32 to index
      %c0_98 = arith.constant 0 : index
      %c0_99 = arith.constant 0 : index
      %133 = vector.load %arg1[%c0_97, %132, %c0_98, %c0_99] : memref<1x130x1x1026xf32, #tpu.memory_space<vmem>>, vector<1x1x1x1024xf32>
      %134 = vector.shape_cast %133 : vector<1x1x1x1024xf32> to vector<1x1024xf32>
      %c2_100 = arith.constant 2 : index
      %c0_101 = arith.constant 0 : index
      %c0_102 = arith.constant 0 : index
      %c0_103 = arith.constant 0 : index
      %135 = vector.load %arg2[%c2_100, %c0_101, %c0_102, %c0_103] : memref<3x3x16x1xf32, #tpu.memory_space<vmem>>, vector<1x1x16x1xf32>
      %136 = vector.shape_cast %135 : vector<1x1x16x1xf32> to vector<16x1xf32>
      %137 = vector.broadcast %136 : vector<16x1xf32> to vector<16x1024xf32>
      %138 = vector.broadcast %134 : vector<1x1024xf32> to vector<16x1024xf32>
      %139 = arith.mulf %137, %138 : vector<16x1024xf32>
      %140 = arith.addf %130, %139 : vector<16x1024xf32>
      %c3_i32_104 = arith.constant 3 : i32
      %141 = arith.addi %2, %c3_i32_104 : i32
      %c0_105 = arith.constant 0 : index
      %142 = arith.index_cast %141 : i32 to index
      %c0_106 = arith.constant 0 : index
      %c1_107 = arith.constant 1 : index
      %143 = vector.load %arg1[%c0_105, %142, %c0_106, %c1_107] : memref<1x130x1x1026xf32, #tpu.memory_space<vmem>>, vector<1x1x1x1024xf32>
      %144 = vector.shape_cast %143 : vector<1x1x1x1024xf32> to vector<1x1024xf32>
      %c2_108 = arith.constant 2 : index
      %c1_109 = arith.constant 1 : index
      %c0_110 = arith.constant 0 : index
      %c0_111 = arith.constant 0 : index
      %145 = vector.load %arg2[%c2_108, %c1_109, %c0_110, %c0_111] : memref<3x3x16x1xf32, #tpu.memory_space<vmem>>, vector<1x1x16x1xf32>
      %146 = vector.shape_cast %145 : vector<1x1x16x1xf32> to vector<16x1xf32>
      %147 = vector.broadcast %146 : vector<16x1xf32> to vector<16x1024xf32>
      %148 = vector.broadcast %144 : vector<1x1024xf32> to vector<16x1024xf32>
      %149 = arith.mulf %147, %148 : vector<16x1024xf32>
      %150 = arith.addf %140, %149 : vector<16x1024xf32>
      %c3_i32_112 = arith.constant 3 : i32
      %151 = arith.addi %2, %c3_i32_112 : i32
      %c0_113 = arith.constant 0 : index
      %152 = arith.index_cast %151 : i32 to index
      %c0_114 = arith.constant 0 : index
      %c2_115 = arith.constant 2 : index
      %153 = vector.load %arg1[%c0_113, %152, %c0_114, %c2_115] : memref<1x130x1x1026xf32, #tpu.memory_space<vmem>>, vector<1x1x1x1024xf32>
      %154 = vector.shape_cast %153 : vector<1x1x1x1024xf32> to vector<1x1024xf32>
      %c2_116 = arith.constant 2 : index
      %c2_117 = arith.constant 2 : index
      %c0_118 = arith.constant 0 : index
      %c0_119 = arith.constant 0 : index
      %155 = vector.load %arg2[%c2_116, %c2_117, %c0_118, %c0_119] : memref<3x3x16x1xf32, #tpu.memory_space<vmem>>, vector<1x1x16x1xf32>
      %156 = vector.shape_cast %155 : vector<1x1x16x1xf32> to vector<16x1xf32>
      %157 = vector.broadcast %156 : vector<16x1xf32> to vector<16x1024xf32>
      %158 = vector.broadcast %154 : vector<1x1024xf32> to vector<16x1024xf32>
      %159 = arith.mulf %157, %158 : vector<16x1024xf32>
      %160 = arith.addf %150, %159 : vector<16x1024xf32>
      %161 = arith.maximumf %124, %160 : vector<16x1024xf32>
      %162 = vector.broadcast %0 : vector<16x1xf32> to vector<16x1024xf32>
      %163 = arith.addf %161, %162 : vector<16x1024xf32>
      %cst_120 = arith.constant 0.000000e+00 : f32
      %164 = vector.broadcast %cst_120 : f32 to vector<16x1024xf32>
      %165 = arith.maximumf %163, %164 : vector<16x1024xf32>
      %c0_121 = arith.constant 0 : index
      %166 = arith.index_cast %arg5 : i32 to index
      %c0_122 = arith.constant 0 : index
      %c0_123 = arith.constant 0 : index
      %167 = vector.load %arg4[%c0_121, %166, %c0_122, %c0_123] : memref<1x64x16x1024xf32, #tpu.memory_space<vmem>>, vector<1x1x16x1024xf32>
      %168 = vector.shape_cast %167 : vector<1x1x16x1024xf32> to vector<16x1024xf32>
      %169 = vector.shape_cast %165 : vector<16x1024xf32> to vector<1x1x16x1024xf32>
      tpu.vector_store %arg4[%c0_121, %166, %c0_122, %c0_123], %169 {strides = array<i32>} : memref<1x64x16x1024xf32, #tpu.memory_space<vmem>>, vector<1x1x16x1024xf32>,
    }
    %c64_i32_1 = arith.constant 64 : i32
    return
  }
  func.func @transform_0(%arg0: i32) -> (i32, i32, i32, i32) {
    %c0_i32 = arith.constant 0 : i32
    %c0_i32_0 = arith.constant 0 : i32
    %c0_i32_1 = arith.constant 0 : i32
    %c0_i32_2 = arith.constant 0 : i32
    return %arg0, %c0_i32, %c0_i32_0, %c0_i32_1 : i32, i32, i32, i32
  }
  func.func @transform_1(%arg0: i32) -> (i32, i32, i32, i32) {
    %c0_i32 = arith.constant 0 : i32
    %c0_i32_0 = arith.constant 0 : i32
    %c0_i32_1 = arith.constant 0 : i32
    %c0_i32_2 = arith.constant 0 : i32
    %c0_i32_3 = arith.constant 0 : i32
    return %c0_i32, %c0_i32_0, %c0_i32_1, %c0_i32_2 : i32, i32, i32, i32
  }
  func.func @transform_2(%arg0: i32) -> (i32, i32) {
    %c0_i32 = arith.constant 0 : i32
    %c0_i32_0 = arith.constant 0 : i32
    %c0_i32_1 = arith.constant 0 : i32
    return %c0_i32, %c0_i32_0 : i32, i32
  }
  func.func @transform_3(%arg0: i32) -> (i32, i32, i32, i32) {
    %c0_i32 = arith.constant 0 : i32
    %c0_i32_0 = arith.constant 0 : i32
    %c0_i32_1 = arith.constant 0 : i32
    %c0_i32_2 = arith.constant 0 : i32
    return %arg0, %c0_i32, %c0_i32_0, %c0_i32_1 : i32, i32, i32, i32
  }
}

module attributes {stable_mosaic.version = 11 : i64} {
  func.func @_conv_mxu_pool_rows_kernel(%arg0: i32, %arg1: memref<1x1056x514xf32, #tpu.memory_space<vmem>>, %arg2: memref<3x64x64xf32, #tpu.memory_space<vmem>>, %arg3: memref<32x1xf32, #tpu.memory_space<vmem>>, %arg4: memref<1x32x32x512xf32, #tpu.memory_space<vmem>>) attributes {dimension_semantics = [#tpu.dimension_semantics<parallel>], iteration_bounds = array<i64: 2>, scalar_prefetch = 0 : i64, scratch_operands = 0 : i64, tpu.core_type = #tpu.core_type<tc>, window_params = [{transform_indices = @transform_0, window_bounds = array<i64: 1, 1056, 514>}, {pipeline_mode = #tpu.pipeline_mode<synchronous>, transform_indices = @transform_1, window_bounds = array<i64: 3, 64, 64>}, {pipeline_mode = #tpu.pipeline_mode<synchronous>, transform_indices = @transform_2, window_bounds = array<i64: 32, 1>}, {transform_indices = @transform_3, window_bounds = array<i64: 1, 32, 32, 512>}]} {
    %c0 = arith.constant 0 : index
    %c0_0 = arith.constant 0 : index
    %0 = vector.load %arg3[%c0, %c0_0] : memref<32x1xf32, #tpu.memory_space<vmem>>, vector<32x1xf32>
    %c0_i32 = arith.constant 0 : i32
    %c32_i32 = arith.constant 32 : i32
    %1 = arith.addi %c0_i32, %c32_i32 : i32
    %c1_i32 = arith.constant 1 : i32
    scf.for %arg5 = %c0_i32 to %1 step %c1_i32  : i32 {
      %c32_i32_2 = arith.constant 32 : i32
      %2 = arith.muli %c32_i32_2, %arg5 : i32
      %3 = tpu.assume_multiple %2, 32 : i32
      %cst = arith.constant 0.000000e+00 : f32
      %4 = vector.broadcast %cst : f32 to vector<64x512xf32>
      %c0_3 = arith.constant 0 : index
      %5 = arith.index_cast %3 : i32 to index
      %c0_4 = arith.constant 0 : index
      %6 = vector.load %arg1[%c0_3, %5, %c0_4] : memref<1x1056x514xf32, #tpu.memory_space<vmem>>, vector<1x64x512xf32>
      %7 = vector.shape_cast %6 : vector<1x64x512xf32> to vector<64x512xf32>
      %c0_5 = arith.constant 0 : index
      %c0_6 = arith.constant 0 : index
      %c0_7 = arith.constant 0 : index
      %8 = vector.load %arg2[%c0_5, %c0_6, %c0_7] : memref<3x64x64xf32, #tpu.memory_space<vmem>>, vector<1x64x64xf32>
      %9 = vector.shape_cast %8 : vector<1x64x64xf32> to vector<64x64xf32>
      %cst_8 = arith.constant dense<0.000000e+00> : vector<64x512xf32>
      %10 = tpu.matmul %9, %7, %cst_8 {dimension_numbers = #tpu.dot_dimension_numbers<[1], [0], [0], [1], [0, 0, 1, 1], [], []>} : vector<64x64xf32>, vector<64x512xf32>, vector<64x512xf32> -> vector<64x512xf32>
      %11 = arith.addf %4, %10 : vector<64x512xf32>
      %c0_9 = arith.constant 0 : index
      %12 = arith.index_cast %3 : i32 to index
      %c1 = arith.constant 1 : index
      %13 = vector.load %arg1[%c0_9, %12, %c1] : memref<1x1056x514xf32, #tpu.memory_space<vmem>>, vector<1x64x512xf32>
      %14 = vector.shape_cast %13 : vector<1x64x512xf32> to vector<64x512xf32>
      %c1_10 = arith.constant 1 : index
      %c0_11 = arith.constant 0 : index
      %c0_12 = arith.constant 0 : index
      %15 = vector.load %arg2[%c1_10, %c0_11, %c0_12] : memref<3x64x64xf32, #tpu.memory_space<vmem>>, vector<1x64x64xf32>
      %16 = vector.shape_cast %15 : vector<1x64x64xf32> to vector<64x64xf32>
      %cst_13 = arith.constant dense<0.000000e+00> : vector<64x512xf32>
      %17 = tpu.matmul %16, %14, %cst_13 {dimension_numbers = #tpu.dot_dimension_numbers<[1], [0], [0], [1], [0, 0, 1, 1], [], []>} : vector<64x64xf32>, vector<64x512xf32>, vector<64x512xf32> -> vector<64x512xf32>
      %18 = arith.addf %11, %17 : vector<64x512xf32>
      %c0_14 = arith.constant 0 : index
      %19 = arith.index_cast %3 : i32 to index
      %c2 = arith.constant 2 : index
      %20 = vector.load %arg1[%c0_14, %19, %c2] : memref<1x1056x514xf32, #tpu.memory_space<vmem>>, vector<1x64x512xf32>
      %21 = vector.shape_cast %20 : vector<1x64x512xf32> to vector<64x512xf32>
      %c2_15 = arith.constant 2 : index
      %c0_16 = arith.constant 0 : index
      %c0_17 = arith.constant 0 : index
      %22 = vector.load %arg2[%c2_15, %c0_16, %c0_17] : memref<3x64x64xf32, #tpu.memory_space<vmem>>, vector<1x64x64xf32>
      %23 = vector.shape_cast %22 : vector<1x64x64xf32> to vector<64x64xf32>
      %cst_18 = arith.constant dense<0.000000e+00> : vector<64x512xf32>
      %24 = tpu.matmul %23, %21, %cst_18 {dimension_numbers = #tpu.dot_dimension_numbers<[1], [0], [0], [1], [0, 0, 1, 1], [], []>} : vector<64x64xf32>, vector<64x512xf32>, vector<64x512xf32> -> vector<64x512xf32>
      %25 = arith.addf %18, %24 : vector<64x512xf32>
      %26 = vector.extract_strided_slice %25 {offsets = [0, 0], sizes = [32, 512], strides = [1, 1]} : vector<64x512xf32> to vector<32x512xf32>
      %27 = vector.extract_strided_slice %25 {offsets = [32, 0], sizes = [32, 512], strides = [1, 1]} : vector<64x512xf32> to vector<32x512xf32>
      %28 = arith.maximumf %26, %27 : vector<32x512xf32>
      %29 = vector.broadcast %0 : vector<32x1xf32> to vector<32x512xf32>
      %30 = arith.addf %28, %29 : vector<32x512xf32>
      %cst_19 = arith.constant 0.000000e+00 : f32
      %31 = vector.broadcast %cst_19 : f32 to vector<32x512xf32>
      %32 = arith.maximumf %30, %31 : vector<32x512xf32>
      %c0_20 = arith.constant 0 : index
      %33 = arith.index_cast %arg5 : i32 to index
      %c0_21 = arith.constant 0 : index
      %c0_22 = arith.constant 0 : index
      %34 = vector.load %arg4[%c0_20, %33, %c0_21, %c0_22] : memref<1x32x32x512xf32, #tpu.memory_space<vmem>>, vector<1x1x32x512xf32>
      %35 = vector.shape_cast %34 : vector<1x1x32x512xf32> to vector<32x512xf32>
      %36 = vector.shape_cast %32 : vector<32x512xf32> to vector<1x1x32x512xf32>
      tpu.vector_store %arg4[%c0_20, %33, %c0_21, %c0_22], %36 {strides = array<i32>} : memref<1x32x32x512xf32, #tpu.memory_space<vmem>>, vector<1x1x32x512xf32>,
    }
    %c32_i32_1 = arith.constant 32 : i32
    return
  }
  func.func @transform_0(%arg0: i32) -> (i32, i32, i32) {
    %c0_i32 = arith.constant 0 : i32
    %c0_i32_0 = arith.constant 0 : i32
    %c0_i32_1 = arith.constant 0 : i32
    return %arg0, %c0_i32, %c0_i32_0 : i32, i32, i32
  }
  func.func @transform_1(%arg0: i32) -> (i32, i32, i32) {
    %c0_i32 = arith.constant 0 : i32
    %c0_i32_0 = arith.constant 0 : i32
    %c0_i32_1 = arith.constant 0 : i32
    %c0_i32_2 = arith.constant 0 : i32
    return %c0_i32, %c0_i32_0, %c0_i32_1 : i32, i32, i32
  }
  func.func @transform_2(%arg0: i32) -> (i32, i32) {
    %c0_i32 = arith.constant 0 : i32
    %c0_i32_0 = arith.constant 0 : i32
    %c0_i32_1 = arith.constant 0 : i32
    return %c0_i32, %c0_i32_0 : i32, i32
  }
  func.func @transform_3(%arg0: i32) -> (i32, i32, i32, i32) {
    %c0_i32 = arith.constant 0 : i32
    %c0_i32_0 = arith.constant 0 : i32
    %c0_i32_1 = arith.constant 0 : i32
    %c0_i32_2 = arith.constant 0 : i32
    return %arg0, %c0_i32, %c0_i32_0, %c0_i32_1 : i32, i32, i32, i32
  }
}

module attributes {stable_mosaic.version = 11 : i64} {
  func.func @_conv_mxu_pool_rows_kernel(%arg0: i32, %arg1: memref<1x1088x258xf32, #tpu.memory_space<vmem>>, %arg2: memref<3x128x128xf32, #tpu.memory_space<vmem>>, %arg3: memref<64x1xf32, #tpu.memory_space<vmem>>, %arg4: memref<1x16x64x256xf32, #tpu.memory_space<vmem>>) attributes {dimension_semantics = [#tpu.dimension_semantics<parallel>], iteration_bounds = array<i64: 2>, scalar_prefetch = 0 : i64, scratch_operands = 0 : i64, tpu.core_type = #tpu.core_type<tc>, window_params = [{transform_indices = @transform_0, window_bounds = array<i64: 1, 1088, 258>}, {pipeline_mode = #tpu.pipeline_mode<synchronous>, transform_indices = @transform_1, window_bounds = array<i64: 3, 128, 128>}, {pipeline_mode = #tpu.pipeline_mode<synchronous>, transform_indices = @transform_2, window_bounds = array<i64: 64, 1>}, {transform_indices = @transform_3, window_bounds = array<i64: 1, 16, 64, 256>}]} {
    %c0 = arith.constant 0 : index
    %c0_0 = arith.constant 0 : index
    %0 = vector.load %arg3[%c0, %c0_0] : memref<64x1xf32, #tpu.memory_space<vmem>>, vector<64x1xf32>
    %c0_i32 = arith.constant 0 : i32
    %c16_i32 = arith.constant 16 : i32
    %1 = arith.addi %c0_i32, %c16_i32 : i32
    %c1_i32 = arith.constant 1 : i32
    scf.for %arg5 = %c0_i32 to %1 step %c1_i32  : i32 {
      %c64_i32 = arith.constant 64 : i32
      %2 = arith.muli %c64_i32, %arg5 : i32
      %3 = tpu.assume_multiple %2, 64 : i32
      %cst = arith.constant 0.000000e+00 : f32
      %4 = vector.broadcast %cst : f32 to vector<128x256xf32>
      %c0_2 = arith.constant 0 : index
      %5 = arith.index_cast %3 : i32 to index
      %c0_3 = arith.constant 0 : index
      %6 = vector.load %arg1[%c0_2, %5, %c0_3] : memref<1x1088x258xf32, #tpu.memory_space<vmem>>, vector<1x128x256xf32>
      %7 = vector.shape_cast %6 : vector<1x128x256xf32> to vector<128x256xf32>
      %c0_4 = arith.constant 0 : index
      %c0_5 = arith.constant 0 : index
      %c0_6 = arith.constant 0 : index
      %8 = vector.load %arg2[%c0_4, %c0_5, %c0_6] : memref<3x128x128xf32, #tpu.memory_space<vmem>>, vector<1x128x128xf32>
      %9 = vector.shape_cast %8 : vector<1x128x128xf32> to vector<128x128xf32>
      %cst_7 = arith.constant dense<0.000000e+00> : vector<128x256xf32>
      %10 = tpu.matmul %9, %7, %cst_7 {dimension_numbers = #tpu.dot_dimension_numbers<[1], [0], [0], [1], [0, 0, 1, 1], [], []>} : vector<128x128xf32>, vector<128x256xf32>, vector<128x256xf32> -> vector<128x256xf32>
      %11 = arith.addf %4, %10 : vector<128x256xf32>
      %c0_8 = arith.constant 0 : index
      %12 = arith.index_cast %3 : i32 to index
      %c1 = arith.constant 1 : index
      %13 = vector.load %arg1[%c0_8, %12, %c1] : memref<1x1088x258xf32, #tpu.memory_space<vmem>>, vector<1x128x256xf32>
      %14 = vector.shape_cast %13 : vector<1x128x256xf32> to vector<128x256xf32>
      %c1_9 = arith.constant 1 : index
      %c0_10 = arith.constant 0 : index
      %c0_11 = arith.constant 0 : index
      %15 = vector.load %arg2[%c1_9, %c0_10, %c0_11] : memref<3x128x128xf32, #tpu.memory_space<vmem>>, vector<1x128x128xf32>
      %16 = vector.shape_cast %15 : vector<1x128x128xf32> to vector<128x128xf32>
      %cst_12 = arith.constant dense<0.000000e+00> : vector<128x256xf32>
      %17 = tpu.matmul %16, %14, %cst_12 {dimension_numbers = #tpu.dot_dimension_numbers<[1], [0], [0], [1], [0, 0, 1, 1], [], []>} : vector<128x128xf32>, vector<128x256xf32>, vector<128x256xf32> -> vector<128x256xf32>
      %18 = arith.addf %11, %17 : vector<128x256xf32>
      %c0_13 = arith.constant 0 : index
      %19 = arith.index_cast %3 : i32 to index
      %c2 = arith.constant 2 : index
      %20 = vector.load %arg1[%c0_13, %19, %c2] : memref<1x1088x258xf32, #tpu.memory_space<vmem>>, vector<1x128x256xf32>
      %21 = vector.shape_cast %20 : vector<1x128x256xf32> to vector<128x256xf32>
      %c2_14 = arith.constant 2 : index
      %c0_15 = arith.constant 0 : index
      %c0_16 = arith.constant 0 : index
      %22 = vector.load %arg2[%c2_14, %c0_15, %c0_16] : memref<3x128x128xf32, #tpu.memory_space<vmem>>, vector<1x128x128xf32>
      %23 = vector.shape_cast %22 : vector<1x128x128xf32> to vector<128x128xf32>
      %cst_17 = arith.constant dense<0.000000e+00> : vector<128x256xf32>
      %24 = tpu.matmul %23, %21, %cst_17 {dimension_numbers = #tpu.dot_dimension_numbers<[1], [0], [0], [1], [0, 0, 1, 1], [], []>} : vector<128x128xf32>, vector<128x256xf32>, vector<128x256xf32> -> vector<128x256xf32>
      %25 = arith.addf %18, %24 : vector<128x256xf32>
      %26 = vector.extract_strided_slice %25 {offsets = [0, 0], sizes = [64, 256], strides = [1, 1]} : vector<128x256xf32> to vector<64x256xf32>
      %27 = vector.extract_strided_slice %25 {offsets = [64, 0], sizes = [64, 256], strides = [1, 1]} : vector<128x256xf32> to vector<64x256xf32>
      %28 = arith.maximumf %26, %27 : vector<64x256xf32>
      %29 = vector.broadcast %0 : vector<64x1xf32> to vector<64x256xf32>
      %30 = arith.addf %28, %29 : vector<64x256xf32>
      %cst_18 = arith.constant 0.000000e+00 : f32
      %31 = vector.broadcast %cst_18 : f32 to vector<64x256xf32>
      %32 = arith.maximumf %30, %31 : vector<64x256xf32>
      %c0_19 = arith.constant 0 : index
      %33 = arith.index_cast %arg5 : i32 to index
      %c0_20 = arith.constant 0 : index
      %c0_21 = arith.constant 0 : index
      %34 = vector.load %arg4[%c0_19, %33, %c0_20, %c0_21] : memref<1x16x64x256xf32, #tpu.memory_space<vmem>>, vector<1x1x64x256xf32>
      %35 = vector.shape_cast %34 : vector<1x1x64x256xf32> to vector<64x256xf32>
      %36 = vector.shape_cast %32 : vector<64x256xf32> to vector<1x1x64x256xf32>
      tpu.vector_store %arg4[%c0_19, %33, %c0_20, %c0_21], %36 {strides = array<i32>} : memref<1x16x64x256xf32, #tpu.memory_space<vmem>>, vector<1x1x64x256xf32>,
    }
    %c16_i32_1 = arith.constant 16 : i32
    return
  }
  func.func @transform_0(%arg0: i32) -> (i32, i32, i32) {
    %c0_i32 = arith.constant 0 : i32
    %c0_i32_0 = arith.constant 0 : i32
    %c0_i32_1 = arith.constant 0 : i32
    return %arg0, %c0_i32, %c0_i32_0 : i32, i32, i32
  }
  func.func @transform_1(%arg0: i32) -> (i32, i32, i32) {
    %c0_i32 = arith.constant 0 : i32
    %c0_i32_0 = arith.constant 0 : i32
    %c0_i32_1 = arith.constant 0 : i32
    %c0_i32_2 = arith.constant 0 : i32
    return %c0_i32, %c0_i32_0, %c0_i32_1 : i32, i32, i32
  }
  func.func @transform_2(%arg0: i32) -> (i32, i32) {
    %c0_i32 = arith.constant 0 : i32
    %c0_i32_0 = arith.constant 0 : i32
    %c0_i32_1 = arith.constant 0 : i32
    return %c0_i32, %c0_i32_0 : i32, i32
  }
  func.func @transform_3(%arg0: i32) -> (i32, i32, i32, i32) {
    %c0_i32 = arith.constant 0 : i32
    %c0_i32_0 = arith.constant 0 : i32
    %c0_i32_1 = arith.constant 0 : i32
    %c0_i32_2 = arith.constant 0 : i32
    return %arg0, %c0_i32, %c0_i32_0, %c0_i32_1 : i32, i32, i32, i32
  }
}

module attributes {stable_mosaic.version = 11 : i64} {
  func.func @_fc1_partial_kernel(%arg0: i32, %arg1: i32, %arg2: memref<2x16384xf32, #tpu.memory_space<vmem>>, %arg3: memref<16384x128xbf16, #tpu.memory_space<vmem>>, %arg4: memref<1x2x128xf32, #tpu.memory_space<vmem>>, %arg5: memref<2x128xf32, #tpu.memory_space<vmem>>) attributes {dimension_semantics = [#tpu.dimension_semantics<parallel>, #tpu.dimension_semantics<arbitrary>], iteration_bounds = array<i64: 2, 4>, scalar_prefetch = 0 : i64, scratch_operands = 1 : i64, tpu.core_type = #tpu.core_type<tc>, window_params = [{transform_indices = @transform_0, window_bounds = array<i64: 2, 16384>}, {transform_indices = @transform_1, window_bounds = array<i64: 16384, 128>}, {transform_indices = @transform_2, window_bounds = array<i64: 1, 2, 128>}]} {
    %c0_i32 = arith.constant 0 : i32
    %0 = arith.cmpi eq, %arg1, %c0_i32 : i32
    %1 = arith.extui %0 : i1 to i32
    %c0_i32_0 = arith.constant 0 : i32
    %2 = arith.cmpi ne, %1, %c0_i32_0 : i32
    scf.if %2 {
      %cst_9 = arith.constant 0.000000e+00 : f32
      %13 = vector.broadcast %cst_9 : f32 to vector<2x128xf32>
      %c0_10 = arith.constant 0 : index
      %c0_11 = arith.constant 0 : index
      %14 = vector.load %arg5[%c0_10, %c0_11] : memref<2x128xf32, #tpu.memory_space<vmem>>, vector<2x128xf32>
      tpu.vector_store %arg5[%c0_10, %c0_11], %13 {strides = array<i32>} : memref<2x128xf32, #tpu.memory_space<vmem>>, vector<2x128xf32>,
    } else {
    }
    %c0 = arith.constant 0 : index
    %c0_1 = arith.constant 0 : index
    %3 = vector.load %arg5[%c0, %c0_1] : memref<2x128xf32, #tpu.memory_space<vmem>>, vector<2x128xf32>
    %c0_2 = arith.constant 0 : index
    %c0_3 = arith.constant 0 : index
    %4 = vector.load %arg2[%c0_2, %c0_3] : memref<2x16384xf32, #tpu.memory_space<vmem>>, vector<2x16384xf32>
    %5 = arith.truncf %4 : vector<2x16384xf32> to vector<2x16384xbf16>
    %c0_4 = arith.constant 0 : index
    %c0_5 = arith.constant 0 : index
    %6 = vector.load %arg3[%c0_4, %c0_5] : memref<16384x128xbf16, #tpu.memory_space<vmem>>, vector<16384x128xbf16>
    %cst = arith.constant dense<0.000000e+00> : vector<2x128xf32>
    %7 = tpu.matmul %5, %6, %cst {dimension_numbers = #tpu.dot_dimension_numbers<[1], [0], [0], [1], [0, 0, 1, 1], [], []>} : vector<2x16384xbf16>, vector<16384x128xbf16>, vector<2x128xf32> -> vector<2x128xf32>
    %8 = arith.addf %3, %7 : vector<2x128xf32>
    %c0_6 = arith.constant 0 : index
    %c0_7 = arith.constant 0 : index
    %9 = vector.load %arg5[%c0_6, %c0_7] : memref<2x128xf32, #tpu.memory_space<vmem>>, vector<2x128xf32>
    tpu.vector_store %arg5[%c0_6, %c0_7], %8 {strides = array<i32>} : memref<2x128xf32, #tpu.memory_space<vmem>>, vector<2x128xf32>,
    %c3_i32 = arith.constant 3 : i32
    %10 = arith.cmpi eq, %arg1, %c3_i32 : i32
    %11 = arith.extui %10 : i1 to i32
    %c0_i32_8 = arith.constant 0 : i32
    %12 = arith.cmpi ne, %11, %c0_i32_8 : i32
    scf.if %12 {
      %c0_9 = arith.constant 0 : index
      %c0_10 = arith.constant 0 : index
      %13 = vector.load %arg5[%c0_9, %c0_10] : memref<2x128xf32, #tpu.memory_space<vmem>>, vector<2x128xf32>
      %c0_11 = arith.constant 0 : index
      %c0_12 = arith.constant 0 : index
      %c0_13 = arith.constant 0 : index
      %14 = vector.load %arg4[%c0_11, %c0_12, %c0_13] : memref<1x2x128xf32, #tpu.memory_space<vmem>>, vector<1x2x128xf32>
      %15 = vector.shape_cast %14 : vector<1x2x128xf32> to vector<2x128xf32>
      %16 = vector.shape_cast %13 : vector<2x128xf32> to vector<1x2x128xf32>
      tpu.vector_store %arg4[%c0_11, %c0_12, %c0_13], %16 {strides = array<i32>} : memref<1x2x128xf32, #tpu.memory_space<vmem>>, vector<1x2x128xf32>,
    } else {
    }
    return
  }
  func.func @transform_0(%arg0: i32, %arg1: i32) -> (i32, i32) {
    %c4_i32 = arith.constant 4 : i32
    %0 = arith.muli %arg0, %c4_i32 : i32
    %1 = arith.addi %0, %arg1 : i32
    %c0_i32 = arith.constant 0 : i32
    %c0_i32_0 = arith.constant 0 : i32
    return %c0_i32, %1 : i32, i32
  }
  func.func @transform_1(%arg0: i32, %arg1: i32) -> (i32, i32) {
    %c4_i32 = arith.constant 4 : i32
    %0 = arith.muli %arg0, %c4_i32 : i32
    %1 = arith.addi %0, %arg1 : i32
    %c0_i32 = arith.constant 0 : i32
    %c0_i32_0 = arith.constant 0 : i32
    return %1, %c0_i32 : i32, i32
  }
  func.func @transform_2(%arg0: i32, %arg1: i32) -> (i32, i32, i32) {
    %c0_i32 = arith.constant 0 : i32
    %c0_i32_0 = arith.constant 0 : i32
    %c0_i32_1 = arith.constant 0 : i32
    return %arg0, %c0_i32, %c0_i32_0 : i32, i32, i32
  }
}

module attributes {stable_mosaic.version = 11 : i64} {
  func.func @_head_kernel(%arg0: i32, %arg1: memref<2x2x128xf32, #tpu.memory_space<vmem>>, %arg2: memref<1x128xf32, #tpu.memory_space<vmem>>, %arg3: memref<128x2xf32, #tpu.memory_space<vmem>>, %arg4: memref<1x2xf32, #tpu.memory_space<vmem>>, %arg5: memref<2x128xf32, #tpu.memory_space<vmem>>, %arg6: memref<2x2xf32, #tpu.memory_space<vmem>>) attributes {dimension_semantics = [#tpu.dimension_semantics<arbitrary>], iteration_bounds = array<i64: 1>, scalar_prefetch = 0 : i64, scratch_operands = 0 : i64, tpu.core_type = #tpu.core_type<tc>, window_params = [{pipeline_mode = #tpu.pipeline_mode<synchronous>, transform_indices = @transform_0, window_bounds = array<i64: 2, 2, 128>}, {pipeline_mode = #tpu.pipeline_mode<synchronous>, transform_indices = @transform_1, window_bounds = array<i64: 1, 128>}, {pipeline_mode = #tpu.pipeline_mode<synchronous>, transform_indices = @transform_2, window_bounds = array<i64: 128, 2>}, {pipeline_mode = #tpu.pipeline_mode<synchronous>, transform_indices = @transform_3, window_bounds = array<i64: 1, 2>}, {pipeline_mode = #tpu.pipeline_mode<synchronous>, transform_indices = @transform_4, window_bounds = array<i64: 2, 128>}, {pipeline_mode = #tpu.pipeline_mode<synchronous>, transform_indices = @transform_5, window_bounds = array<i64: 2, 2>}]} {
    %c0 = arith.constant 0 : index
    %c0_0 = arith.constant 0 : index
    %0 = vector.load %arg2[%c0, %c0_0] : memref<1x128xf32, #tpu.memory_space<vmem>>, vector<1x128xf32>
    %c0_1 = arith.constant 0 : index
    %c0_2 = arith.constant 0 : index
    %c0_3 = arith.constant 0 : index
    %1 = vector.load %arg1[%c0_1, %c0_2, %c0_3] : memref<2x2x128xf32, #tpu.memory_space<vmem>>, vector<1x2x128xf32>
    %2 = vector.shape_cast %1 : vector<1x2x128xf32> to vector<2x128xf32>
    %3 = vector.broadcast %0 : vector<1x128xf32> to vector<2x128xf32>
    %4 = arith.addf %3, %2 : vector<2x128xf32>
    %c1 = arith.constant 1 : index
    %c0_4 = arith.constant 0 : index
    %c0_5 = arith.constant 0 : index
    %5 = vector.load %arg1[%c1, %c0_4, %c0_5] : memref<2x2x128xf32, #tpu.memory_space<vmem>>, vector<1x2x128xf32>
    %6 = vector.shape_cast %5 : vector<1x2x128xf32> to vector<2x128xf32>
    %7 = arith.addf %4, %6 : vector<2x128xf32>
    %c0_6 = arith.constant 0 : index
    %c0_7 = arith.constant 0 : index
    %8 = vector.load %arg5[%c0_6, %c0_7] : memref<2x128xf32, #tpu.memory_space<vmem>>, vector<2x128xf32>
    tpu.vector_store %arg5[%c0_6, %c0_7], %7 {strides = array<i32>} : memref<2x128xf32, #tpu.memory_space<vmem>>, vector<2x128xf32>,
    %cst = arith.constant 0.000000e+00 : f32
    %9 = vector.broadcast %cst : f32 to vector<2x128xf32>
    %10 = arith.maximumf %7, %9 : vector<2x128xf32>
    %c0_8 = arith.constant 0 : index
    %c0_9 = arith.constant 0 : index
    %11 = vector.load %arg3[%c0_8, %c0_9] : memref<128x2xf32, #tpu.memory_space<vmem>>, vector<128x2xf32>
    %cst_10 = arith.constant dense<0.000000e+00> : vector<2x2xf32>
    %12 = tpu.matmul %10, %11, %cst_10 {dimension_numbers = #tpu.dot_dimension_numbers<[1], [0], [0], [1], [0, 0, 1, 1], [], []>} : vector<2x128xf32>, vector<128x2xf32>, vector<2x2xf32> -> vector<2x2xf32>
    %c0_11 = arith.constant 0 : index
    %c0_12 = arith.constant 0 : index
    %13 = vector.load %arg4[%c0_11, %c0_12] : memref<1x2xf32, #tpu.memory_space<vmem>>, vector<1x2xf32>
    %14 = vector.broadcast %13 : vector<1x2xf32> to vector<2x2xf32>
    %15 = arith.addf %12, %14 : vector<2x2xf32>
    %16 = arith.negf %15 : vector<2x2xf32>
    %17 = math.exp %16 : vector<2x2xf32>
    %cst_13 = arith.constant 1.000000e+00 : f32
    %18 = vector.broadcast %cst_13 : f32 to vector<2x2xf32>
    %19 = arith.addf %18, %17 : vector<2x2xf32>
    %20 = arith.divf %18, %19 : vector<2x2xf32>
    %c0_14 = arith.constant 0 : index
    %c0_15 = arith.constant 0 : index
    %21 = vector.load %arg6[%c0_14, %c0_15] : memref<2x2xf32, #tpu.memory_space<vmem>>, vector<2x2xf32>
    tpu.vector_store %arg6[%c0_14, %c0_15], %20 {strides = array<i32>} : memref<2x2xf32, #tpu.memory_space<vmem>>, vector<2x2xf32>,
    return
  }
  func.func @transform_0(%arg0: i32) -> (i32, i32, i32) {
    %c0_i32 = arith.constant 0 : i32
    %c0_i32_0 = arith.constant 0 : i32
    %c0_i32_1 = arith.constant 0 : i32
    %c0_i32_2 = arith.constant 0 : i32
    return %c0_i32, %c0_i32_0, %c0_i32_1 : i32, i32, i32
  }
  func.func @transform_1(%arg0: i32) -> (i32, i32) {
    %c0_i32 = arith.constant 0 : i32
    %c0_i32_0 = arith.constant 0 : i32
    %c0_i32_1 = arith.constant 0 : i32
    return %c0_i32, %c0_i32_0 : i32, i32
  }
  func.func @transform_2(%arg0: i32) -> (i32, i32) {
    %c0_i32 = arith.constant 0 : i32
    %c0_i32_0 = arith.constant 0 : i32
    %c0_i32_1 = arith.constant 0 : i32
    return %c0_i32, %c0_i32_0 : i32, i32
  }
  func.func @transform_3(%arg0: i32) -> (i32, i32) {
    %c0_i32 = arith.constant 0 : i32
    %c0_i32_0 = arith.constant 0 : i32
    %c0_i32_1 = arith.constant 0 : i32
    return %c0_i32, %c0_i32_0 : i32, i32
  }
  func.func @transform_4(%arg0: i32) -> (i32, i32) {
    %c0_i32 = arith.constant 0 : i32
    %c0_i32_0 = arith.constant 0 : i32
    %c0_i32_1 = arith.constant 0 : i32
    return %c0_i32, %c0_i32_0 : i32, i32
  }
  func.func @transform_5(%arg0: i32) -> (i32, i32) {
    %c0_i32 = arith.constant 0 : i32
    %c0_i32_0 = arith.constant 0 : i32
    %c0_i32_1 = arith.constant 0 : i32
    return %c0_i32, %c0_i32_0 : i32, i32
  }
}

</mosaic_0001>

<bundles_post_ra>
// kernel: audio_cnn_forward.5
= control target key start
LH: loop header
LB: loop body
LE: loop exit
PB: predicated region body
PF: predicated region fallthrough
CT: control target
= control target key end

     0   :  { %s2523_s12 = smov 0   ;;  %s4603_s0 = inlined_call_operand.vmem [shape: f32[2,130,1,1026], index: 0, kind: input, shape index: {}]   ;;  %s4604_s1 = inlined_call_operand.vmem [shape: f32[3,3,16,1], index: 1, kind: input, shape index: {}]   ;;  %s4605_s2 = inlined_call_operand.vmem [shape: f32[16,1], index: 2, kind: input, shape index: {}]   ;;  %s4606_s3 = inlined_call_operand.vmem [shape: f32[2,64,16,1024], index: 3, kind: output, shape index: {}]  }
   0x1 LB: > { %s2413_s13 = sadd.s32 4294967295, %s2494_s12   ;;  %p2417_p0 = scmp.ge.s32.totalorder %s2494_s12, 1  ;;  %s2494_s12 = sphi %s2523_s12, %s13_s12  }
   0x2   : > { %p136_p1 = scmp.lt.s32.totalorder %s2494_s12, 3 }
   0x4   : > { %p137_p2 = pnand %p2417_p0, %p136_p1 }
   0x5   : > { %p159_p3 = scmp.lt.s32.totalorder (!%p137_p2), %s2413_s13, 1  ;;  %v2534_v0 = vld [vmem:[%s4605_s2] sm:$0xff] (!%p137_p2)  ;;  %v2539_v1 = vld [vmem:[%s4605_s2 + $0x8] sm:$0xff] (!%p137_p2)  ;;  %s2551_s26 = smov (!%p137_p2), 0  }
   0x6   : > { %140 = sbr.rel (%p137_p2) target bundleno = 1113 (0x459), region = 32  ;;  %4730 = vst [vmem:[#allocation2_spill] sm:$0xff] (!%p137_p2), %v2534_v0  ;;  %4731 = vst [vmem:[#allocation3_spill] sm:$0xff] (!%p137_p2), %v2539_v1 }
   0xd   : > { %s5060_s13 = smov (!%p159_p3, %s2413_s13), 1 }
   0xe   : > { %s2462_s18 = smul.u32 1170, %s5060_s13  ;;  %s2460_s19 = sshll.u32 %s5060_s13, 13 }
   0xf   : > { %s2544_s22 = scalar_lea.vmem %s4606_s3, %s2460_s19 }
  0x10   : > { %s2549_s25 = scalar_lea.vmem %s4603_s0, %s2462_s18 }
  0x11 LB: >> { %v2422_v2 = vld [vmem:[%s4604_s1 + $0x10] sm:$0xff]  ;;  %v2500_v3 = vmov 0   ;;  %v180_v4 = vld [vmem:[%s4604_s1] sm:$0xff]  ;;  %v2423_v5 = vld [vmem:[%s4604_s1 + $0x18] sm:$0xff]  ;;  %v193_v13 = vlaneseq  ;;  %s2421_s21 = smul.u32 18, %s2498_s26  ;;  %s2501_s24 = smov 127   ;;  %s2498_s26 = sphi %s2551_s26, %s175_s26  }
  0x12   : >> { %2483 = vset.pattern.permute.xlu1 %v2500_v3  ;;  %2482 = vset.pattern.permute.xlu0 %v2500_v3  ;;  %v181_v6 = vld [vmem:[%s4604_s1 + $0x8] sm:$0xff]  ;;  %v2425_v8 = vld [vmem:[%s4604_s1 + $0x20] sm:$0xff]  ;;  %v2431_v9 = vld [vmem:[%s4604_s1 + $0x38] sm:$0xff]  ;;  %s2502_s27 = smov 126   ;;  %vm399_vm0 = vcmask 1039360   ;;  %vm533_vm1 = vcmask 1031168  }
  0x13   : >> { %272 = vperm.xlu1 %2483, %v2422_v2   ;;  %184 = vperm.xlu0 %2482, %v180_v4   ;;  %v2426_v7 = vld [vmem:[%s4604_s1 + $0x28] sm:$0xff]  ;;  %v2430_v10 = vld [vmem:[%s4604_s1 + $0x30] sm:$0xff]  ;;  %v2434_v12 = vld [vmem:[%s4604_s1 + $0x40] sm:$0xff]  ;;  %v194_v14 = vshrl.u32 %v193_v13, 7  ;;  %s2588_s23 = scalar_lea.vmem %s2549_s25, %s2421_s21  ;;  %s2461_s18 = sshll.u32 %s2498_s26, 7 }
  0x14   : >> { %v2435_v11 = vld [vmem:[%s4604_s1 + $0x48] sm:$0xff]  ;;  %v265_v17 = vld [vmem:[%s2588_s23] sm:$0xff]  ;;  %s4477_s19 = scalar_lea.vmem %s2544_s22, %s2461_s18  ;;  %s175_s26 = sadd.s32 1, %s2498_s26  }
  0x15   : >> { %v2590_v15 = vsub.s32 1, %v194_v14  ;;  %v2592_v16 = vsub.s32 0, %v194_v14  ;;  %v2601_v20 = vsub.s32 3, %v194_v14  ;;  %v2603_v21 = vsub.s32 2, %v194_v14  ;;  %v2424_v42 = vld [vmem:[%s2588_s23 + $0x8] ss:$0 sm:$0xff] }
  0x16   : >> { %v2607_v23 = vsub.s32 5, %v194_v14  ;;  %v2609_v24 = vsub.s32 4, %v194_v14  ;;  %v2623_v29 = vsub.s32 7, %v194_v14  ;;  %v2625_v30 = vsub.s32 6, %v194_v14  ;;  %p172_p4 = scmp.ge.s32.totalorder %s175_s26, 64  }
  0x17   : >> { %277 = vperm.xlu1 %2483, %v2423_v5   ;;  %189 = vperm.xlu0 %2482, %v181_v6   ;;  %v2596_v18 = vrot.slane %v265_v17, %v2590_v15  ;;  %v2599_v19 = vrot.slane %v265_v17, %v2592_v16  ;;  %v2616_v27 = vrot.slane %v265_v17, %v2601_v20 }
  0x18   : >> { %v2619_v28 = vrot.slane %v265_v17, %v2603_v21  ;;  %4732 = vst [vmem:[#allocation4_spill] sm:$0xff] %v2623_v29  ;;  %4733 = vst [vmem:[#allocation5_spill] sm:$0xff] %v2625_v30  ;;  %v2632_v33 = vrot.slane %v265_v17, %v2607_v23  ;;  %v2635_v34 = vrot.slane %v265_v17, %v2609_v24 }
  0x19   : >> { %v2644_v37 = vrot.slane %v265_v17, %v2623_v29  ;;  %v2647_v38 = vrot.slane %v265_v17, %v2625_v30 }
  0x1b   : >> { %458 = vperm.xlu1 %2483, %v2426_v7   ;;  %453 = vperm.xlu0 %2482, %v2425_v8  }
  0x1f   : >> { %596 = vperm.xlu1 %2483, %v2431_v9   ;;  %591 = vperm.xlu0 %2482, %v2430_v10  }
  0x23   : >> { %716 = vperm.xlu1 %2483, %v2435_v11   ;;  %711 = vperm.xlu0 %2482, %v2434_v12   ;;  %v2432_v12 = vld [vmem:[%s2588_s23 + $0x9] sm:$0xff] }
  0x92   : >> { %v2605_v22 = vpop.permute.xlu1 %272  ;;  %v2671_v47 = vpop.permute.xlu0 %184 }
  0x93   : >> { %v328_v25 = vmul.f32 %v2596_v18, %v2605_v22  ;;  %v327_v26 = vmul.f32 %v2599_v19, %v2605_v22  ;;  %v330_v31 = vmul.f32 %v2616_v27, %v2605_v22  ;;  %v329_v32 = vmul.f32 %v2619_v28, %v2605_v22  ;;  %4734 = vst [vmem:[#allocation6_spill] sm:$0xff] %v2671_v47 }
  0x94   : >> { %v332_v35 = vmul.f32 %v2632_v33, %v2605_v22  ;;  %v331_v36 = vmul.f32 %v2635_v34, %v2605_v22  ;;  %v334_v39 = vmul.f32 %v2644_v37, %v2605_v22  ;;  %v333_v40 = vmul.f32 %v2647_v38, %v2605_v22 }
  0x95   : >> { %365 = vrot.lane.b32.xlu1 %v328_v25, %s2501_s24  ;;  %363 = vrot.lane.b32.xlu0 %v327_v26, %s2501_s24  ;;  %v335_v44 = vmul.f32 %v2424_v42, %v2605_v22  ;;  %v2754_v25 = vrot.slane %v2432_v12, %v2590_v15  ;;  %v2757_v26 = vrot.slane %v2432_v12, %v2592_v16 }
  0x96   : >> { %v2655_v41 = vpop.permute.xlu1 %277  ;;  %v2683_v52 = vpop.permute.xlu0 %189 }
  0x97   : >> { %v336_v43 = vmul.f32 %v2599_v19, %v2655_v41  ;;  %v338_v45 = vmul.f32 %v2619_v28, %v2655_v41  ;;  %v337_v46 = vmul.f32 %v2596_v18, %v2655_v41  ;;  %v340_v48 = vmul.f32 %v2635_v34, %v2655_v41  ;;  %4735 = vst [vmem:[#allocation7_spill] sm:$0xff] %v2683_v52 }
  0x98   : >> { %v339_v49 = vmul.f32 %v2616_v27, %v2655_v41  ;;  %v342_v50 = vmul.f32 %v2647_v38, %v2655_v41  ;;  %v341_v51 = vmul.f32 %v2632_v33, %v2655_v41  ;;  %v344_v53 = vmul.f32 %v2424_v42, %v2655_v41  ;;  %4737 = vst [vmem:[#allocation9_spill] sm:$0xff] %v2754_v25 }
  0x99   : >> { %369 = vrot.lane.b32.xlu1 %v330_v31, %s2501_s24  ;;  %367 = vrot.lane.b32.xlu0 %v329_v32, %s2501_s24  ;;  %v343_v54 = vmul.f32 %v2644_v37, %v2655_v41  ;;  %4738 = vst [vmem:[#allocation10_spill] sm:$0xff] %v2757_v26 }
  0x9a   : >> { %v2692_v55 = vpop.permute.xlu0 %453  ;;  %v2716_v2 = vpop.permute.xlu1 %458 }
  0x9b   : >> { %v462_v56 = vmul.f32 %v2692_v55, %v2596_v18  ;;  %v461_v57 = vmul.f32 %v2692_v55, %v2599_v19  ;;  %v464_v58 = vmul.f32 %v2692_v55, %v2616_v27  ;;  %v463_v59 = vmul.f32 %v2692_v55, %v2619_v28 }
  0x9c   : >> { %v466_v60 = vmul.f32 %v2692_v55, %v2632_v33  ;;  %v465_v61 = vmul.f32 %v2692_v55, %v2635_v34  ;;  %v468_v62 = vmul.f32 %v2692_v55, %v2644_v37  ;;  %v467_v63 = vmul.f32 %v2692_v55, %v2647_v38 }
  0x9d   : >> { %373 = vrot.lane.b32.xlu1 %v332_v35, %s2501_s24  ;;  %371 = vrot.lane.b32.xlu0 %v331_v36, %s2501_s24  ;;  %v470_v3 = vmul.f32 %v2716_v2, %v2599_v19  ;;  %v469_v4 = vmul.f32 %v2424_v42, %v2692_v55  ;;  %v472_v5 = vmul.f32 %v2716_v2, %v2619_v28 }
  0x9e   : >> { %v471_v6 = vmul.f32 %v2716_v2, %v2596_v18  ;;  %v474_v7 = vmul.f32 %v2716_v2, %v2635_v34  ;;  %v473_v8 = vmul.f32 %v2716_v2, %v2616_v27  ;;  %v2737_v9 = vpop.permute.xlu0 %591  ;;  %v476_v10 = vmul.f32 %v2716_v2, %v2647_v38 }
  0x9f   : >> { %4736 = vst [vmem:[#allocation8_spill] sm:$0xff] %v2737_v9  ;;  %v475_v11 = vmul.f32 %v2716_v2, %v2632_v33  ;;  %v478_v13 = vmul.f32 %v2424_v42, %v2716_v2  ;;  %v477_v14 = vmul.f32 %v2716_v2, %v2644_v37  ;;  %v2766_v35 = vrot.slane %v2432_v12, %v2601_v20 }
  0xa0   : >> { %v2769_v36 = vrot.slane %v2432_v12, %v2603_v21  ;;  %v2778_v42 = vrot.slane %v2432_v12, %v2607_v23 }
  0xa1   : >> { %377 = vrot.lane.b32.xlu1 %v334_v39, %s2501_s24  ;;  %375 = vrot.lane.b32.xlu0 %v333_v40, %s2501_s24  ;;  %4739 = vst [vmem:[#allocation11_spill] sm:$0xff] %v2766_v35 }
  0xa2   : >> { %v2749_v17 = vpop.permute.xlu0 %711  ;;  %4740 = vst [vmem:[#allocation12_spill] sm:$0xff] %v2769_v36  ;;  %4741 = vst [vmem:[#allocation13_spill] sm:$0xff] %v2778_v42 }
  0xa3   : >> { %v767_v31 = vmul.f32 %v2754_v25, %v2749_v17  ;;  %v766_v32 = vmul.f32 %v2757_v26, %v2749_v17  ;;  %v769_v39 = vmul.f32 %v2766_v35, %v2749_v17  ;;  %v768_v40 = vmul.f32 %v2769_v36, %v2749_v17 }
  0xa5   : >> { %381 = vrot.lane.b32.xlu1 %v336_v43, %s2501_s24  ;;  %379 = vrot.lane.b32.xlu0 %v335_v44, %s2501_s24  ;;  %v2781_v43 = vrot.slane %v2432_v12, %v2609_v24  ;;  %v2783_v44 = vpop.permute.xlu1 %596 }
  0xa6   : >> { %4743 = vst [vmem:[#allocation15_spill] sm:$0xff] %v2783_v44 }
  0xa7   : >> { %4742 = vst [vmem:[#allocation14_spill] sm:$0xff] %v2781_v43 }
  0xa9   : >> { %385 = vrot.lane.b32.xlu1 %v338_v45, %s2501_s24  ;;  %383 = vrot.lane.b32.xlu0 %v337_v46, %s2501_s24  ;;  %v771_v45 = vmul.f32 %v2778_v42, %v2749_v17  ;;  %v770_v46 = vmul.f32 %v2781_v43, %v2749_v17 }
  0xad   : >> { %389 = vrot.lane.b32.xlu1 %v340_v48, %s2501_s24  ;;  %387 = vrot.lane.b32.xlu0 %v339_v49, %s2501_s24  ;;  %v2792_v48 = vrot.slane %v2432_v12, %v2623_v29  ;;  %v2795_v49 = vrot.slane %v2432_v12, %v2625_v30  ;;  %v891_v12 = vmul.f32 %v2778_v42, %v2605_v22 }
  0xaf   : >> { %4744 = vst [vmem:[#allocation16_spill] sm:$0xff] %v2792_v48  ;;  %4745 = vst [vmem:[#allocation17_spill] sm:$0xff] %v2795_v49 }
  0xb1   : >> { %393 = vrot.lane.b32.xlu1 %v342_v50, %s2501_s24  ;;  %391 = vrot.lane.b32.xlu0 %v341_v51, %s2501_s24  ;;  %v773_v50 = vmul.f32 %v2792_v48, %v2749_v17  ;;  %v772_v51 = vmul.f32 %v2795_v49, %v2749_v17 }
  0xb5   : >> { %397 = vrot.lane.b32.xlu1 %v344_v53, %s2501_s24  ;;  %395 = vrot.lane.b32.xlu0 %v343_v54, %s2501_s24  ;;  %v2801_v53 = vpop.permute.xlu1 %716  ;;  %v2806_v54 = vld [vmem:[%s2588_s23 + $0x11] ss:$0 sm:$0xff] }
  0xb9   : >> { %499 = vrot.lane.b32.xlu1 %v462_v56, %s2502_s27  ;;  %497 = vrot.lane.b32.xlu0 %v461_v57, %s2502_s27  ;;  %v775_v56 = vmul.f32 %v2757_v26, %v2801_v53  ;;  %v774_v57 = vmul.f32 %v2806_v54, %v2749_v17 }
  0xbd   : >> { %503 = vrot.lane.b32.xlu1 %v464_v58, %s2502_s27  ;;  %501 = vrot.lane.b32.xlu0 %v463_v59, %s2502_s27  ;;  %v777_v58 = vmul.f32 %v2769_v36, %v2801_v53  ;;  %v776_v59 = vmul.f32 %v2754_v25, %v2801_v53 }
  0xc1   : >> { %507 = vrot.lane.b32.xlu1 %v466_v60, %s2502_s27  ;;  %505 = vrot.lane.b32.xlu0 %v465_v61, %s2502_s27  ;;  %v779_v60 = vmul.f32 %v2781_v43, %v2801_v53  ;;  %v778_v61 = vmul.f32 %v2766_v35, %v2801_v53 }
  0xc5   : >> { %511 = vrot.lane.b32.xlu1 %v468_v62, %s2502_s27  ;;  %509 = vrot.lane.b32.xlu0 %v467_v63, %s2502_s27  ;;  %v781_v62 = vmul.f32 %v2795_v49, %v2801_v53  ;;  %v780_v63 = vmul.f32 %v2778_v42, %v2801_v53 }
  0xc9   : >> { %515 = vrot.lane.b32.xlu1 %v470_v3, %s2502_s27  ;;  %513 = vrot.lane.b32.xlu0 %v469_v4, %s2502_s27  ;;  %v783_v3 = vmul.f32 %v2806_v54, %v2801_v53  ;;  %v782_v4 = vmul.f32 %v2792_v48, %v2801_v53 }
  0xcd   : >> { %519 = vrot.lane.b32.xlu1 %v472_v5, %s2502_s27  ;;  %517 = vrot.lane.b32.xlu0 %v471_v6, %s2502_s27  ;;  %v887_v5 = vmul.f32 %v2754_v25, %v2605_v22  ;;  %v886_v6 = vmul.f32 %v2757_v26, %v2605_v22 }
  0xd1   : >> { %523 = vrot.lane.b32.xlu1 %v474_v7, %s2502_s27  ;;  %521 = vrot.lane.b32.xlu0 %v473_v8, %s2502_s27  ;;  %v889_v7 = vmul.f32 %v2766_v35, %v2605_v22  ;;  %v888_v8 = vmul.f32 %v2769_v36, %v2605_v22 }
  0xd5   : >> { %527 = vrot.lane.b32.xlu1 %v476_v10, %s2502_s27  ;;  %525 = vrot.lane.b32.xlu0 %v475_v11, %s2502_s27 }
  0xd9   : >> { %531 = vrot.lane.b32.xlu1 %v478_v13, %s2502_s27  ;;  %529 = vrot.lane.b32.xlu0 %v477_v14, %s2502_s27  ;;  %v890_v13 = vmul.f32 %v2781_v43, %v2605_v22 }
  0xdd   : >> { %804 = vrot.lane.b32.xlu1 %v767_v31, %s2501_s24  ;;  %802 = vrot.lane.b32.xlu0 %v766_v32, %s2501_s24  ;;  %v893_v32 = vmul.f32 %v2792_v48, %v2605_v22 }
  0xe1   : >> { %808 = vrot.lane.b32.xlu1 %v769_v39, %s2501_s24  ;;  %806 = vrot.lane.b32.xlu0 %v768_v40, %s2501_s24  ;;  %v892_v39 = vmul.f32 %v2795_v49, %v2605_v22 }
  0xe5   : >> { %812 = vrot.lane.b32.xlu1 %v771_v45, %s2501_s24  ;;  %810 = vrot.lane.b32.xlu0 %v770_v46, %s2501_s24  ;;  %v895_v46 = vmul.f32 %v2757_v26, %v2655_v41 }
  0xe9   : >> { %816 = vrot.lane.b32.xlu1 %v773_v50, %s2501_s24  ;;  %814 = vrot.lane.b32.xlu0 %v772_v51, %s2501_s24  ;;  %v894_v50 = vmul.f32 %v2806_v54, %v2605_v22 }
  0xed   : >> { %820 = vrot.lane.b32.xlu1 %v775_v56, %s2501_s24  ;;  %818 = vrot.lane.b32.xlu0 %v774_v57, %s2501_s24  ;;  %v897_v57 = vmul.f32 %v2769_v36, %v2655_v41 }
  0xf1   : >> { %824 = vrot.lane.b32.xlu1 %v777_v58, %s2501_s24  ;;  %822 = vrot.lane.b32.xlu0 %v776_v59, %s2501_s24  ;;  %v896_v58 = vmul.f32 %v2754_v25, %v2655_v41 }
  0xf5   : >> { %828 = vrot.lane.b32.xlu1 %v779_v60, %s2501_s24  ;;  %826 = vrot.lane.b32.xlu0 %v778_v61, %s2501_s24  ;;  %v899_v60 = vmul.f32 %v2781_v43, %v2655_v41  ;;  %v898_v61 = vmul.f32 %v2766_v35, %v2655_v41 }
  0xf9   : >> { %832 = vrot.lane.b32.xlu1 %v781_v62, %s2501_s24  ;;  %830 = vrot.lane.b32.xlu0 %v780_v63, %s2501_s24 }
  0xfd   : >> { %836 = vrot.lane.b32.xlu1 %v783_v3, %s2501_s24  ;;  %834 = vrot.lane.b32.xlu0 %v782_v4, %s2501_s24  ;;  %v901_v3 = vmul.f32 %v2795_v49, %v2655_v41  ;;  %v900_v4 = vmul.f32 %v2778_v42, %v2655_v41 }
 0x101   : >> { %924 = vrot.lane.b32.xlu1 %v887_v5, %s2501_s24  ;;  %922 = vrot.lane.b32.xlu0 %v886_v6, %s2501_s24 }
 0x105   : >> { %928 = vrot.lane.b32.xlu1 %v889_v7, %s2501_s24  ;;  %926 = vrot.lane.b32.xlu0 %v888_v8, %s2501_s24  ;;  %v903_v7 = vmul.f32 %v2806_v54, %v2655_v41  ;;  %v902_v8 = vmul.f32 %v2792_v48, %v2655_v41 }
 0x107   : >> { %v2850_v10 = vpop.permute.xlu1 %365  ;;  %v2852_v11 = vpop.permute.xlu0 %363 }
 0x108   : >> { %4746 = vst [vmem:[#allocation18_spill] sm:$0xff] %v2850_v10  ;;  %4747 = vst [vmem:[#allocation19_spill] sm:$0xff] %v2852_v11 }
 0x109   : >> { %932 = vrot.lane.b32.xlu1 %v891_v12, %s2501_s24  ;;  %930 = vrot.lane.b32.xlu0 %v890_v13, %s2501_s24  ;;  %v2438_v12 = vld [vmem:[%s4604_s1 + $0x58] sm:$0xff]  ;;  %v2437_v13 = vld [vmem:[%s4604_s1 + $0x50] sm:$0xff] }
 0x10b   : >> { %v2860_v14 = vpop.permute.xlu1 %369  ;;  %v2862_v31 = vpop.permute.xlu0 %367 }
 0x10c   : >> { %4748 = vst [vmem:[#allocation20_spill] sm:$0xff] %v2860_v14  ;;  %4749 = vst [vmem:[#allocation21_spill] sm:$0xff] %v2862_v31 }
 0x10d   : >> { %936 = vrot.lane.b32.xlu1 %v893_v32, %s2501_s24  ;;  %934 = vrot.lane.b32.xlu0 %v892_v39, %s2501_s24 }
 0x10f   : >> { %v2870_v40 = vpop.permute.xlu1 %373  ;;  %v2872_v45 = vpop.permute.xlu0 %371 }
 0x110   : >> { %4750 = vst [vmem:[#allocation22_spill] sm:$0xff] %v2870_v40  ;;  %4751 = vst [vmem:[#allocation23_spill] sm:$0xff] %v2872_v45 }
 0x111   : >> { %940 = vrot.lane.b32.xlu1 %v895_v46, %s2501_s24  ;;  %938 = vrot.lane.b32.xlu0 %v894_v50, %s2501_s24 }
 0x113   : >> { %v2880_v51 = vpop.permute.xlu1 %377  ;;  %v2882_v56 = vpop.permute.xlu0 %375 }
 0x114   : >> { %4752 = vst [vmem:[#allocation24_spill] sm:$0xff] %v2880_v51  ;;  %4753 = vst [vmem:[#allocation25_spill] sm:$0xff] %v2882_v56 }
 0x115   : >> { %944 = vrot.lane.b32.xlu1 %v897_v57, %s2501_s24  ;;  %942 = vrot.lane.b32.xlu0 %v896_v58, %s2501_s24 }
 0x117   : >> { %v2890_v59 = vpop.permute.xlu1 %381  ;;  %v2892_v22 = vpop.permute.xlu0 %379 }
 0x118   : >> { %4754 = vst [vmem:[#allocation26_spill] sm:$0xff] %v2890_v59  ;;  %4755 = vst [vmem:[#allocation27_spill] sm:$0xff] %v2892_v22 }
 0x119   : >> { %948 = vrot.lane.b32.xlu1 %v899_v60, %s2501_s24  ;;  %946 = vrot.lane.b32.xlu0 %v898_v61, %s2501_s24 }
 0x11b   : >> { %v2900_v62 = vpop.permute.xlu1 %385  ;;  %v2902_v63 = vpop.permute.xlu0 %383 }
 0x11c   : >> { %4756 = vst [vmem:[#allocation28_spill] sm:$0xff] %v2900_v62  ;;  %4757 = vst [vmem:[#allocation29_spill] sm:$0xff] %v2902_v63 }
 0x11d   : >> { %952 = vrot.lane.b32.xlu1 %v901_v3, %s2501_s24  ;;  %950 = vrot.lane.b32.xlu0 %v900_v4, %s2501_s24 }
 0x11f   : >> { %v2910_v5 = vpop.permute.xlu1 %389  ;;  %v2912_v6 = vpop.permute.xlu0 %387 }
 0x120   : >> { %4758 = vst [vmem:[#allocation30_spill] sm:$0xff] %v2910_v5  ;;  %4759 = vst [vmem:[#allocation31_spill] sm:$0xff] %v2912_v6 }
 0x121   : >> { %956 = vrot.lane.b32.xlu1 %v903_v7, %s2501_s24  ;;  %954 = vrot.lane.b32.xlu0 %v902_v8, %s2501_s24 }
 0x123   : >> { %v2926_v32 = vpop.permute.xlu1 %393  ;;  %v2928_v39 = vpop.permute.xlu0 %391 }
 0x125   : >> { %1016 = vperm.xlu1 %2483, %v2438_v12   ;;  %1011 = vperm.xlu0 %2482, %v2437_v13  }
 0x127   : >> { %v2930_v46 = vpop.permute.xlu1 %397  ;;  %v2932_v41 = vpop.permute.xlu0 %395 }
 0x12b   : >> { %v2934_v50 = vpop.permute.xlu1 %499  ;;  %v2936_v57 = vpop.permute.xlu0 %497 }
 0x12c   : >> { %4760 = vst [vmem:[#allocation32_spill] sm:$0xff] %v2934_v50  ;;  %4761 = vst [vmem:[#allocation33_spill] sm:$0xff] %v2936_v57 }
 0x12f   : >> { %v2938_v58 = vpop.permute.xlu1 %503  ;;  %v2940_v60 = vpop.permute.xlu0 %501 }
 0x130   : >> { %4762 = vst [vmem:[#allocation34_spill] sm:$0xff] %v2938_v58  ;;  %4763 = vst [vmem:[#allocation35_spill] sm:$0xff] %v2940_v60 }
 0x133   : >> { %v2942_v61 = vpop.permute.xlu1 %507  ;;  %v2944_v3 = vpop.permute.xlu0 %505 }
 0x134   : >> { %4764 = vst [vmem:[#allocation36_spill] sm:$0xff] %v2942_v61  ;;  %4765 = vst [vmem:[#allocation37_spill] sm:$0xff] %v2944_v3 }
 0x137   : >> { %v2946_v4 = vpop.permute.xlu1 %511  ;;  %v2948_v7 = vpop.permute.xlu0 %509 }
 0x138   : >> { %4766 = vst [vmem:[#allocation38_spill] sm:$0xff] %v2946_v4  ;;  %4767 = vst [vmem:[#allocation39_spill] sm:$0xff] %v2948_v7 }
 0x13b   : >> { %v2950_v8 = vpop.permute.xlu1 %515  ;;  %v2952_v12 = vpop.permute.xlu0 %513 }
 0x13c   : >> { %4768 = vst [vmem:[#allocation40_spill] sm:$0xff] %v2950_v8  ;;  %4769 = vst [vmem:[#allocation41_spill] sm:$0xff] %v2952_v12 }
 0x13f   : >> { %v2954_v13 = vpop.permute.xlu1 %519  ;;  %v2956_v0 = vpop.permute.xlu0 %517 }
 0x140   : >> { %4770 = vst [vmem:[#allocation42_spill] sm:$0xff] %v2954_v13  ;;  %4771 = vst [vmem:[#allocation43_spill] sm:$0xff] %v2956_v0 }
 0x143   : >> { %v2958_v1 = vpop.permute.xlu1 %523  ;;  %v2960_v58 = vpop.permute.xlu0 %521 }
 0x144   : >> { %4772 = vst [vmem:[#allocation44_spill] sm:$0xff] %v2958_v1  ;;  %4773 = vst [vmem:[#allocation45_spill] sm:$0xff] %v2960_v58 }
 0x147   : >> { %v2962_v60 = vpop.permute.xlu1 %527  ;;  %v2964_v61 = vpop.permute.xlu0 %525 }
 0x14b   : >> { %v2966_v3 = vpop.permute.xlu1 %531  ;;  %v2968_v4 = vpop.permute.xlu0 %529 }
 0x14f   : >> { %v2970_v7 = vpop.permute.xlu1 %804  ;;  %v2972_v8 = vpop.permute.xlu0 %802 }
 0x150   : >> { %4774 = vst [vmem:[#allocation46_spill] sm:$0xff] %v2970_v7  ;;  %4775 = vst [vmem:[#allocation47_spill] sm:$0xff] %v2972_v8 }
 0x153   : >> { %v2974_v12 = vpop.permute.xlu1 %808  ;;  %v2976_v13 = vpop.permute.xlu0 %806 }
 0x154   : >> { %4776 = vst [vmem:[#allocation48_spill] sm:$0xff] %v2974_v12  ;;  %4777 = vst [vmem:[#allocation49_spill] sm:$0xff] %v2976_v13 }
 0x157   : >> { %v2978_v0 = vpop.permute.xlu1 %812  ;;  %v2980_v57 = vpop.permute.xlu0 %810 }
 0x158   : >> { %4778 = vst [vmem:[#allocation50_spill] sm:$0xff] %v2978_v0  ;;  %4779 = vst [vmem:[#allocation51_spill] sm:$0xff] %v2980_v57 }
 0x15b   : >> { %v2982_v58 = vpop.permute.xlu1 %816  ;;  %v2984_v50 = vpop.permute.xlu0 %814 }
 0x15c   : >> { %4780 = vst [vmem:[#allocation52_spill] sm:$0xff] %v2982_v58  ;;  %4781 = vst [vmem:[#allocation53_spill] sm:$0xff] %v2984_v50 }
 0x15f   : >> { %v2986_v6 = vpop.permute.xlu0 %818  ;;  %v2988_v62 = vpop.permute.xlu1 %820 }
 0x160   : >> { %4782 = vst [vmem:[#allocation54_spill] sm:$0xff] %v2986_v6  ;;  %4783 = vst [vmem:[#allocation55_spill] sm:$0xff] %v2988_v62 }
 0x163   : >> { %v2990_v59 = vpop.permute.xlu0 %822  ;;  %v2992_v7 = vpop.permute.xlu1 %824 }
 0x164   : >> { %4784 = vst [vmem:[#allocation56_spill] sm:$0xff] %v2990_v59  ;;  %4785 = vst [vmem:[#allocation57_spill] sm:$0xff] %v2992_v7 }
 0x167   : >> { %v2994_v8 = vpop.permute.xlu0 %826  ;;  %v2998_v13 = vpop.permute.xlu1 %828 }
 0x168   : >> { %4786 = vst [vmem:[#allocation58_spill] sm:$0xff] %v2994_v8 }
 0x16b   : >> { %v2996_v12 = vpop.permute.xlu0 %830  ;;  %v3002_v57 = vpop.permute.xlu1 %832 }
 0x16f   : >> { %v3000_v0 = vpop.permute.xlu0 %834  ;;  %v3008_v6 = vpop.permute.xlu1 %836 }
 0x173   : >> { %v3004_v58 = vpop.permute.xlu0 %922  ;;  %v3012_v59 = vpop.permute.xlu1 %924 }
 0x174   : >> { %4787 = vst [vmem:[#allocation59_spill] sm:$0xff] %v3004_v58  ;;  %4790 = vst [vmem:[#allocation62_spill] sm:$0xff] %v3012_v59 }
 0x177   : >> { %v3006_v50 = vpop.permute.xlu0 %926  ;;  %v3016_v8 = vpop.permute.xlu1 %928 }
 0x178   : >> { %4788 = vst [vmem:[#allocation60_spill] sm:$0xff] %v3006_v50  ;;  %4792 = vst [vmem:[#allocation64_spill] sm:$0xff] %v3016_v8 }
 0x17b   : >> { %v3010_v62 = vpop.permute.xlu0 %930  ;;  %v3020_v22 = vpop.permute.xlu1 %932 }
 0x17c   : >> { %4789 = vst [vmem:[#allocation61_spill] sm:$0xff] %v3010_v62  ;;  %4794 = vst [vmem:[#allocation66_spill] sm:$0xff] %v3020_v22 }
 0x17f   : >> { %v3014_v7 = vpop.permute.xlu0 %934  ;;  %v3024_v56 = vpop.permute.xlu1 %936 }
 0x180   : >> { %4791 = vst [vmem:[#allocation63_spill] sm:$0xff] %v3014_v7  ;;  %4796 = vst [vmem:[#allocation68_spill] sm:$0xff] %v3024_v56 }
 0x183   : >> { %v3018_v63 = vpop.permute.xlu0 %938  ;;  %v3028_v50 = vpop.permute.xlu1 %940 }
 0x184   : >> { %4793 = vst [vmem:[#allocation65_spill] sm:$0xff] %v3018_v63  ;;  %4798 = vst [vmem:[#allocation70_spill] sm:$0xff] %v3028_v50 }
 0x187   : >> { %v3022_v51 = vpop.permute.xlu0 %942  ;;  %v3032_v62 = vpop.permute.xlu1 %944 }
 0x188   : >> { %4795 = vst [vmem:[#allocation67_spill] sm:$0xff] %v3022_v51  ;;  %4800 = vst [vmem:[#allocation72_spill] sm:$0xff] %v3032_v62 }
 0x18b   : >> { %v3026_v58 = vpop.permute.xlu0 %946  ;;  %v3036_v7 = vpop.permute.xlu1 %948 }
 0x18c   : >> { %4797 = vst [vmem:[#allocation69_spill] sm:$0xff] %v3026_v58  ;;  %4802 = vst [vmem:[#allocation74_spill] sm:$0xff] %v3036_v7 }
 0x18f   : >> { %v3030_v40 = vpop.permute.xlu0 %950  ;;  %v3046_v58 = vpop.permute.xlu1 %952 }
 0x190   : >> { %4799 = vst [vmem:[#allocation71_spill] sm:$0xff] %v3030_v40  ;;  %4803 = vst [vmem:[#allocation75_spill] sm:$0xff] %v3046_v58 }
 0x193   : >> { %v3034_v59 = vpop.permute.xlu0 %954  ;;  %v3058_v62 = vpop.permute.xlu1 %956 }
 0x194   : >> { %4801 = vst [vmem:[#allocation73_spill] sm:$0xff] %v3034_v59  ;;  %4804 = vst [vmem:[#allocation76_spill] sm:$0xff] %v3058_v62 }
 0x1a4   : >> { %v3038_v8 = vpop.permute.xlu0 %1011  ;;  %v3066_v58 = vpop.permute.xlu1 %1016 }
 0x1a5   : >> { %v1020_v63 = vmul.f32 %v3038_v8, %v2754_v25  ;;  %v1019_v51 = vmul.f32 %v3038_v8, %v2757_v26  ;;  %v1022_v40 = vmul.f32 %v3038_v8, %v2766_v35  ;;  %v1021_v59 = vmul.f32 %v3038_v8, %v2769_v36 }
 0x1a6   : >> { %v1024_v7 = vmul.f32 %v3038_v8, %v2778_v42  ;;  %v1029_v62 = vmul.f32 %v3066_v58, %v2754_v25 }
 0x1a7   : >> { %1057 = vrot.lane.b32.xlu1 %v1020_v63, %s2502_s27  ;;  %1055 = vrot.lane.b32.xlu0 %v1019_v51, %s2502_s27  ;;  %v1023_v63 = vmul.f32 %v3038_v8, %v2781_v43  ;;  %v1026_v51 = vmul.f32 %v3038_v8, %v2792_v48 }
 0x1ab   : >> { %1061 = vrot.lane.b32.xlu1 %v1022_v40, %s2502_s27  ;;  %1059 = vrot.lane.b32.xlu0 %v1021_v59, %s2502_s27  ;;  %v1025_v40 = vmul.f32 %v3038_v8, %v2795_v49  ;;  %v1028_v59 = vmul.f32 %v3066_v58, %v2757_v26 }
 0x1af   : >> { %1065 = vrot.lane.b32.xlu1 %v1024_v7, %s2502_s27  ;;  %1063 = vrot.lane.b32.xlu0 %v1023_v63, %s2502_s27  ;;  %v1027_v7 = vmul.f32 %v2806_v54, %v3038_v8  ;;  %v1030_v63 = vmul.f32 %v3066_v58, %v2769_v36 }
 0x1b3   : >> { %1069 = vrot.lane.b32.xlu1 %v1026_v51, %s2502_s27  ;;  %1067 = vrot.lane.b32.xlu0 %v1025_v40, %s2502_s27  ;;  %v1032_v51 = vmul.f32 %v3066_v58, %v2781_v43  ;;  %v1031_v40 = vmul.f32 %v3066_v58, %v2766_v35 }
 0x1b7   : >> { %1073 = vrot.lane.b32.xlu1 %v1028_v59, %s2502_s27  ;;  %1071 = vrot.lane.b32.xlu0 %v1027_v7, %s2502_s27  ;;  %v1034_v59 = vmul.f32 %v3066_v58, %v2795_v49  ;;  %v1033_v7 = vmul.f32 %v3066_v58, %v2778_v42 }
 0x1bb   : >> { %1077 = vrot.lane.b32.xlu1 %v1030_v63, %s2502_s27  ;;  %1075 = vrot.lane.b32.xlu0 %v1029_v62, %s2502_s27  ;;  %v1036_v62 = vmul.f32 %v2806_v54, %v3066_v58  ;;  %v1035_v63 = vmul.f32 %v3066_v58, %v2792_v48 }
 0x1bf   : >> { %1081 = vrot.lane.b32.xlu1 %v1032_v51, %s2502_s27  ;;  %1079 = vrot.lane.b32.xlu0 %v1031_v40, %s2502_s27  ;;  %v1140_v51 = vmul.f32 %v2754_v25, %v2692_v55  ;;  %v1139_v40 = vmul.f32 %v2757_v26, %v2692_v55 }
 0x1c3   : >> { %1085 = vrot.lane.b32.xlu1 %v1034_v59, %s2502_s27  ;;  %1083 = vrot.lane.b32.xlu0 %v1033_v7, %s2502_s27  ;;  %v1142_v59 = vmul.f32 %v2766_v35, %v2692_v55  ;;  %v1141_v7 = vmul.f32 %v2769_v36, %v2692_v55 }
 0x1c7   : >> { %1089 = vrot.lane.b32.xlu1 %v1036_v62, %s2502_s27  ;;  %1087 = vrot.lane.b32.xlu0 %v1035_v63, %s2502_s27  ;;  %v1144_v62 = vmul.f32 %v2778_v42, %v2692_v55  ;;  %v1143_v63 = vmul.f32 %v2781_v43, %v2692_v55 }
 0x1cb   : >> { %1177 = vrot.lane.b32.xlu1 %v1140_v51, %s2502_s27  ;;  %1175 = vrot.lane.b32.xlu0 %v1139_v40, %s2502_s27  ;;  %v1146_v51 = vmul.f32 %v2792_v48, %v2692_v55  ;;  %v1145_v40 = vmul.f32 %v2795_v49, %v2692_v55 }
 0x1cf   : >> { %1181 = vrot.lane.b32.xlu1 %v1142_v59, %s2502_s27  ;;  %1179 = vrot.lane.b32.xlu0 %v1141_v7, %s2502_s27  ;;  %v1148_v59 = vmul.f32 %v2757_v26, %v2716_v2  ;;  %v1147_v7 = vmul.f32 %v2806_v54, %v2692_v55  ;;  %v1151_v55 = vmul.f32 %v2766_v35, %v2716_v2 }
 0x1d3   : >> { %1185 = vrot.lane.b32.xlu1 %v1144_v62, %s2502_s27  ;;  %1183 = vrot.lane.b32.xlu0 %v1143_v63, %s2502_s27  ;;  %v1150_v62 = vmul.f32 %v2769_v36, %v2716_v2  ;;  %v1149_v63 = vmul.f32 %v2754_v25, %v2716_v2 }
 0x1d7   : >> { %1189 = vrot.lane.b32.xlu1 %v1146_v51, %s2502_s27  ;;  %1187 = vrot.lane.b32.xlu0 %v1145_v40, %s2502_s27  ;;  %v1152_v51 = vmul.f32 %v2781_v43, %v2716_v2  ;;  %v1154_v40 = vmul.f32 %v2795_v49, %v2716_v2 }
 0x1db   : >> { %1193 = vrot.lane.b32.xlu1 %v1148_v59, %s2502_s27  ;;  %1191 = vrot.lane.b32.xlu0 %v1147_v7, %s2502_s27  ;;  %v1153_v59 = vmul.f32 %v2778_v42, %v2716_v2  ;;  %v1156_v7 = vmul.f32 %v2806_v54, %v2716_v2  ;;  %v2447_v54 = vld [vmem:[%s4604_s1 + $0x78] sm:$0xff] }
 0x1df   : >> { %1197 = vrot.lane.b32.xlu1 %v1150_v62, %s2502_s27  ;;  %1195 = vrot.lane.b32.xlu0 %v1149_v63, %s2502_s27  ;;  %v1155_v62 = vmul.f32 %v2792_v48, %v2716_v2  ;;  %v2443_v63 = vld [vmem:[%s4604_s1 + $0x68] sm:$0xff]  ;;  %v2446_v2 = vld [vmem:[%s4604_s1 + $0x70] sm:$0xff] }
 0x1e3   : >> { %1201 = vrot.lane.b32.xlu1 %v1152_v51, %s2502_s27  ;;  %1199 = vrot.lane.b32.xlu0 %v1151_v55, %s2502_s27  ;;  %v2442_v51 = vld [vmem:[%s4604_s1 + $0x60] sm:$0xff] }
 0x1e7   : >> { %1205 = vrot.lane.b32.xlu1 %v1154_v40, %s2502_s27  ;;  %1203 = vrot.lane.b32.xlu0 %v1153_v59, %s2502_s27 }
 0x1eb   : >> { %1209 = vrot.lane.b32.xlu1 %v1156_v7, %s2502_s27  ;;  %1207 = vrot.lane.b32.xlu0 %v1155_v62, %s2502_s27 }
 0x1ef   : >> { %1273 = vperm.xlu1 %2483, %v2443_v63   ;;  %1268 = vperm.xlu0 %2482, %v2442_v51  }
 0x1f3   : >> { %1393 = vperm.xlu1 %2483, %v2447_v54   ;;  %1388 = vperm.xlu0 %2482, %v2446_v2  }
 0x219   : >> { %v3166_v55 = vpop.permute.xlu1 %1057  ;;  %v3168_v40 = vpop.permute.xlu0 %1055 }
 0x21a   : >> { %4805 = vst [vmem:[#allocation77_spill] sm:$0xff] %v3166_v55  ;;  %4806 = vst [vmem:[#allocation78_spill] sm:$0xff] %v3168_v40 }
 0x21d   : >> { %v3170_v59 = vpop.permute.xlu1 %1061  ;;  %v3172_v7 = vpop.permute.xlu0 %1059 }
 0x21e   : >> { %4807 = vst [vmem:[#allocation79_spill] sm:$0xff] %v3170_v59  ;;  %4808 = vst [vmem:[#allocation80_spill] sm:$0xff] %v3172_v7 }
 0x221   : >> { %v3174_v62 = vpop.permute.xlu1 %1065  ;;  %v3176_v63 = vpop.permute.xlu0 %1063 }
 0x222   : >> { %4809 = vst [vmem:[#allocation81_spill] sm:$0xff] %v3174_v62  ;;  %4810 = vst [vmem:[#allocation82_spill] sm:$0xff] %v3176_v63 }
 0x225   : >> { %v3178_v51 = vpop.permute.xlu1 %1069  ;;  %v3180_v50 = vpop.permute.xlu0 %1067 }
 0x226   : >> { %4811 = vst [vmem:[#allocation83_spill] sm:$0xff] %v3178_v51  ;;  %4812 = vst [vmem:[#allocation84_spill] sm:$0xff] %v3180_v50 }
 0x229   : >> { %v3182_v56 = vpop.permute.xlu1 %1073  ;;  %v3184_v54 = vpop.permute.xlu0 %1071 }
 0x22a   : >> { %4813 = vst [vmem:[#allocation85_spill] sm:$0xff] %v3182_v56  ;;  %4814 = vst [vmem:[#allocation86_spill] sm:$0xff] %v3184_v54 }
 0x22d   : >> { %v3186_v2 = vpop.permute.xlu0 %1075  ;;  %v3188_v22 = vpop.permute.xlu1 %1077 }
 0x22e   : >> { %4815 = vst [vmem:[#allocation87_spill] sm:$0xff] %v3186_v2  ;;  %4816 = vst [vmem:[#allocation88_spill] sm:$0xff] %v3188_v22 }
 0x231   : >> { %v3190_v40 = vpop.permute.xlu0 %1079  ;;  %v3192_v59 = vpop.permute.xlu1 %1081 }
 0x232   : >> { %4817 = vst [vmem:[#allocation89_spill] sm:$0xff] %v3190_v40  ;;  %4818 = vst [vmem:[#allocation90_spill] sm:$0xff] %v3192_v59 }
 0x235   : >> { %v3194_v7 = vpop.permute.xlu0 %1083  ;;  %v3198_v63 = vpop.permute.xlu1 %1085 }
 0x239   : >> { %v3196_v62 = vpop.permute.xlu0 %1087  ;;  %v3202_v50 = vpop.permute.xlu1 %1089 }
 0x23d   : >> { %v3200_v51 = vpop.permute.xlu0 %1175  ;;  %v3206_v2 = vpop.permute.xlu1 %1177 }
 0x23e   : >> { %4819 = vst [vmem:[#allocation91_spill] sm:$0xff] %v3200_v51  ;;  %4821 = vst [vmem:[#allocation93_spill] sm:$0xff] %v3206_v2 }
 0x241   : >> { %v3204_v56 = vpop.permute.xlu0 %1179  ;;  %v3210_v40 = vpop.permute.xlu1 %1181 }
 0x242   : >> { %4820 = vst [vmem:[#allocation92_spill] sm:$0xff] %v3204_v56  ;;  %4823 = vst [vmem:[#allocation95_spill] sm:$0xff] %v3210_v40 }
 0x245   : >> { %v3208_v22 = vpop.permute.xlu0 %1183  ;;  %v3214_v55 = vpop.permute.xlu1 %1185 }
 0x246   : >> { %4822 = vst [vmem:[#allocation94_spill] sm:$0xff] %v3208_v22  ;;  %4825 = vst [vmem:[#allocation97_spill] sm:$0xff] %v3214_v55  ;;  %v2444_v55 = vld [vmem:[%s2588_s23 + $0x12] sm:$0xff] }
 0x249   : >> { %v3212_v54 = vpop.permute.xlu0 %1187  ;;  %v3218_v14 = vpop.permute.xlu1 %1189 }
 0x24a   : >> { %4824 = vst [vmem:[#allocation96_spill] sm:$0xff] %v3212_v54  ;;  %4827 = vst [vmem:[#allocation99_spill] sm:$0xff] %v3218_v14  ;;  %v3240_v14 = vrot.slane %v2444_v55, %v2590_v15 }
 0x24d   : >> { %v3216_v45 = vpop.permute.xlu0 %1191  ;;  %v3222_v31 = vpop.permute.xlu1 %1193 }
 0x24e   : >> { %4826 = vst [vmem:[#allocation98_spill] sm:$0xff] %v3216_v45  ;;  %4829 = vst [vmem:[#allocation101_spill] sm:$0xff] %v3222_v31  ;;  %v3243_v31 = vrot.slane %v2444_v55, %v2592_v16 }
 0x251   : >> { %v3220_v51 = vpop.permute.xlu0 %1195  ;;  %v3226_v11 = vpop.permute.xlu1 %1197 }
 0x252   : >> { %4828 = vst [vmem:[#allocation100_spill] sm:$0xff] %v3220_v51  ;;  %4831 = vst [vmem:[#allocation103_spill] sm:$0xff] %v3226_v11 }
 0x255   : >> { %v3224_v56 = vpop.permute.xlu0 %1199  ;;  %v3230_v22 = vpop.permute.xlu1 %1201 }
 0x256   : >> { %4830 = vst [vmem:[#allocation102_spill] sm:$0xff] %v3224_v56  ;;  %4833 = vst [vmem:[#allocation105_spill] sm:$0xff] %v3230_v22 }
 0x259   : >> { %v3228_v2 = vpop.permute.xlu0 %1203  ;;  %v3237_v45 = vpop.permute.xlu1 %1205 }
 0x25a   : >> { %4832 = vst [vmem:[#allocation104_spill] sm:$0xff] %v3228_v2  ;;  %4836 = vst [vmem:[#allocation108_spill] sm:$0xff] %v3237_v45  ;;  %v3257_v45 = vrot.slane %v2444_v55, %v2603_v21 }
 0x25d   : >> { %v3232_v40 = vpop.permute.xlu0 %1207  ;;  %v3259_v11 = vpop.permute.xlu1 %1209 }
 0x25e   : >> { %4834 = vst [vmem:[#allocation106_spill] sm:$0xff] %v3232_v40  ;;  %v3254_v40 = vrot.slane %v2444_v55, %v2601_v20  ;;  %4837 = vst [vmem:[#allocation109_spill] sm:$0xff] %v3259_v11 }
 0x26e   : >> { %v3234_v54 = vpop.permute.xlu0 %1268  ;;  %v3273_v10 = vpop.permute.xlu1 %1273 }
 0x26f   : >> { %4835 = vst [vmem:[#allocation107_spill] sm:$0xff] %v3234_v54  ;;  %4838 = vst [vmem:[#allocation110_spill] sm:$0xff] %v3273_v10 }
 0x272   : >> { %v3245_v56 = vpop.permute.xlu0 %1388  ;;  %v3291_v26 = vpop.permute.xlu1 %1393 }
 0x273   : >> { %v1444_v2 = vmul.f32 %v3240_v14, %v3245_v56  ;;  %v1443_v22 = vmul.f32 %v3243_v31, %v3245_v56  ;;  %v1446_v51 = vmul.f32 %v3254_v40, %v3245_v56  ;;  %v1445_v54 = vmul.f32 %v3257_v45, %v3245_v56  ;;  %4841 = vst [vmem:[#allocation113_spill] sm:$0xff] %v3291_v26 }
 0x275   : >> { %1481 = vrot.lane.b32.xlu1 %v1444_v2, %s2501_s24  ;;  %1479 = vrot.lane.b32.xlu0 %v1443_v22, %s2501_s24  ;;  %v3268_v22 = vrot.slane %v2444_v55, %v2607_v23  ;;  %v3271_v2 = vrot.slane %v2444_v55, %v2609_v24 }
 0x277   : >> { %v1448_v11 = vmul.f32 %v3268_v22, %v3245_v56  ;;  %v1447_v35 = vmul.f32 %v3271_v2, %v3245_v56 }
 0x279   : >> { %1485 = vrot.lane.b32.xlu1 %v1446_v51, %s2501_s24  ;;  %1483 = vrot.lane.b32.xlu0 %v1445_v54, %s2501_s24  ;;  %v3282_v51 = vrot.slane %v2444_v55, %v2623_v29  ;;  %v3285_v54 = vrot.slane %v2444_v55, %v2625_v30  ;;  %v1454_v30 = vmul.f32 %v3257_v45, %v3291_v26 }
 0x27a   : >> { %v1455_v29 = vmul.f32 %v3254_v40, %v3291_v26 }
 0x27b   : >> { %4839 = vst [vmem:[#allocation111_spill] sm:$0xff] %v3282_v51  ;;  %4840 = vst [vmem:[#allocation112_spill] sm:$0xff] %v3285_v54  ;;  %v1450_v36 = vmul.f32 %v3282_v51, %v3245_v56  ;;  %v1449_v25 = vmul.f32 %v3285_v54, %v3245_v56 }
 0x27d   : >> { %1489 = vrot.lane.b32.xlu1 %v1448_v11, %s2501_s24  ;;  %1487 = vrot.lane.b32.xlu0 %v1447_v35, %s2501_s24  ;;  %v3296_v11 = vld [vmem:[%s2588_s23 + $0x1a] ss:$0 sm:$0xff]  ;;  %v1452_v35 = vmul.f32 %v3243_v31, %v3291_v26 }
 0x27e   : >> { %v1451_v55 = vmul.f32 %v3296_v11, %v3245_v56 }
 0x281   : >> { %1493 = vrot.lane.b32.xlu1 %v1450_v36, %s2501_s24  ;;  %1491 = vrot.lane.b32.xlu0 %v1449_v25, %s2501_s24  ;;  %v1453_v36 = vmul.f32 %v3240_v14, %v3291_v26  ;;  %v1456_v25 = vmul.f32 %v3271_v2, %v3291_v26 }
 0x285   : >> { %1497 = vrot.lane.b32.xlu1 %v1452_v35, %s2501_s24  ;;  %1495 = vrot.lane.b32.xlu0 %v1451_v55, %s2501_s24  ;;  %v1458_v35 = vmul.f32 %v3285_v54, %v3291_v26  ;;  %v1457_v55 = vmul.f32 %v3268_v22, %v3291_v26 }
 0x289   : >> { %1501 = vrot.lane.b32.xlu1 %v1454_v30, %s2501_s24  ;;  %1499 = vrot.lane.b32.xlu0 %v1453_v36, %s2501_s24  ;;  %v1460_v30 = vmul.f32 %v3296_v11, %v3291_v26  ;;  %v1459_v36 = vmul.f32 %v3282_v51, %v3291_v26  ;;  %v412_v26 = vsel %vm399_vm0, %v2910_v5, %v2928_v39 }
 0x28d   : >> { %1505 = vrot.lane.b32.xlu1 %v1456_v25, %s2501_s24  ;;  %1503 = vrot.lane.b32.xlu0 %v1455_v29, %s2501_s24  ;;  %v1564_v29 = vmul.f32 %v3240_v14, %v2749_v17  ;;  %v1563_v25 = vmul.f32 %v3243_v31, %v2749_v17 }
 0x291   : >> { %1509 = vrot.lane.b32.xlu1 %v1458_v35, %s2501_s24  ;;  %1507 = vrot.lane.b32.xlu0 %v1457_v55, %s2501_s24  ;;  %v1566_v35 = vmul.f32 %v3254_v40, %v2749_v17  ;;  %v1565_v55 = vmul.f32 %v3257_v45, %v2749_v17 }
 0x295   : >> { %1513 = vrot.lane.b32.xlu1 %v1460_v30, %s2501_s24  ;;  %1511 = vrot.lane.b32.xlu0 %v1459_v36, %s2501_s24  ;;  %v1568_v30 = vmul.f32 %v3268_v22, %v2749_v17  ;;  %v1567_v36 = vmul.f32 %v3271_v2, %v2749_v17 }
 0x299   : >> { %1601 = vrot.lane.b32.xlu1 %v1564_v29, %s2501_s24  ;;  %1599 = vrot.lane.b32.xlu0 %v1563_v25, %s2501_s24  ;;  %v1570_v29 = vmul.f32 %v3282_v51, %v2749_v17  ;;  %v1569_v25 = vmul.f32 %v3285_v54, %v2749_v17 }
 0x29d   : >> { %1605 = vrot.lane.b32.xlu1 %v1566_v35, %s2501_s24  ;;  %1603 = vrot.lane.b32.xlu0 %v1565_v55, %s2501_s24  ;;  %v1572_v35 = vmul.f32 %v3243_v31, %v2801_v53  ;;  %v1571_v55 = vmul.f32 %v3296_v11, %v2749_v17  ;;  %v1575_v17 = vmul.f32 %v3254_v40, %v2801_v53 }
 0x2a1   : >> { %1609 = vrot.lane.b32.xlu1 %v1568_v30, %s2501_s24  ;;  %1607 = vrot.lane.b32.xlu0 %v1567_v36, %s2501_s24  ;;  %v1574_v30 = vmul.f32 %v3257_v45, %v2801_v53  ;;  %v1573_v36 = vmul.f32 %v3240_v14, %v2801_v53 }
 0x2a5   : >> { %1613 = vrot.lane.b32.xlu1 %v1570_v29, %s2501_s24  ;;  %1611 = vrot.lane.b32.xlu0 %v1569_v25, %s2501_s24  ;;  %v1576_v29 = vmul.f32 %v3271_v2, %v2801_v53  ;;  %v1578_v25 = vmul.f32 %v3285_v54, %v2801_v53 }
 0x2a9   : >> { %1617 = vrot.lane.b32.xlu1 %v1572_v35, %s2501_s24  ;;  %1615 = vrot.lane.b32.xlu0 %v1571_v55, %s2501_s24  ;;  %v1577_v35 = vmul.f32 %v3268_v22, %v2801_v53  ;;  %v1580_v55 = vmul.f32 %v3296_v11, %v2801_v53 }
 0x2ad   : >> { %1621 = vrot.lane.b32.xlu1 %v1574_v30, %s2501_s24  ;;  %1619 = vrot.lane.b32.xlu0 %v1573_v36, %s2501_s24  ;;  %v1579_v30 = vmul.f32 %v3282_v51, %v2801_v53  ;;  %v2450_v36 = vld [vmem:[%s4604_s1 + $0x88] sm:$0xff] }
 0x2b1   : >> { %1625 = vrot.lane.b32.xlu1 %v1576_v29, %s2501_s24  ;;  %1623 = vrot.lane.b32.xlu0 %v1575_v17, %s2501_s24  ;;  %v2449_v29 = vld [vmem:[%s4604_s1 + $0x80] sm:$0xff] }
 0x2b5   : >> { %1629 = vrot.lane.b32.xlu1 %v1578_v25, %s2501_s24  ;;  %1627 = vrot.lane.b32.xlu0 %v1577_v35, %s2501_s24 }
 0x2b9   : >> { %1633 = vrot.lane.b32.xlu1 %v1580_v55, %s2501_s24  ;;  %1631 = vrot.lane.b32.xlu0 %v1579_v30, %s2501_s24 }
 0x2bd   : >> { %1693 = vperm.xlu1 %2483, %v2450_v36   ;;  %1688 = vperm.xlu0 %2482, %v2449_v29   ;;  %v413_v36 = vsel %vm399_vm0, %v2928_v39, %v2926_v32 }
 0x2e7   : >> { %v3388_v17 = vpop.permute.xlu1 %1481  ;;  %v3390_v25 = vpop.permute.xlu0 %1479 }
 0x2e8   : >> { %4842 = vst [vmem:[#allocation114_spill] sm:$0xff] %v3388_v17  ;;  %4843 = vst [vmem:[#allocation115_spill] sm:$0xff] %v3390_v25 }
 0x2eb   : >> { %v3392_v35 = vpop.permute.xlu1 %1485  ;;  %v3394_v53 = vpop.permute.xlu0 %1483 }
 0x2ec   : >> { %4844 = vst [vmem:[#allocation116_spill] sm:$0xff] %v3392_v35  ;;  %4845 = vst [vmem:[#allocation117_spill] sm:$0xff] %v3394_v53  ;;  %v245_v35 = vmul.f32 %v2635_v34, %v2683_v52  ;;  %v547_v53 = vsel %vm533_vm1, %v2964_v61, %v2962_v60 }
 0x2ee   : >> { %v444_v39 = vadd.f32 %v412_v26, %v245_v35 }
 0x2ef   : >> { %v3396_v55 = vpop.permute.xlu1 %1489  ;;  %v3398_v30 = vpop.permute.xlu0 %1487 }
 0x2f0   : >> { %4846 = vst [vmem:[#allocation118_spill] sm:$0xff] %v3396_v55  ;;  %4847 = vst [vmem:[#allocation119_spill] sm:$0xff] %v3398_v30  ;;  %v246_v55 = vmul.f32 %v2632_v33, %v2683_v52  ;;  %v546_v30 = vsel %vm533_vm1, %v2958_v1, %v2964_v61  ;;  %v247_v1 = vmul.f32 %v2647_v38, %v2683_v52 }
 0x2f1   : >> { %v248_v61 = vmul.f32 %v2644_v37, %v2683_v52  ;;  %v578_v26 = vadd.f32 %v546_v30, %v444_v39  ;;  %v655_v39 = vmul.f32 %v2792_v48, %v2783_v44 }
 0x2f2   : >> { %v445_v17 = vadd.f32 %v413_v36, %v246_v55  ;;  %v652_v36 = vmul.f32 %v2781_v43, %v2783_v44 }
 0x2f3   : >> { %v3406_v29 = vpop.permute.xlu1 %1493  ;;  %v3408_v25 = vpop.permute.xlu0 %1491 }
 0x2f4   : >> { %4848 = vst [vmem:[#allocation120_spill] sm:$0xff] %v3406_v29  ;;  %4849 = vst [vmem:[#allocation121_spill] sm:$0xff] %v3408_v25  ;;  %v414_v29 = vsel %vm399_vm0, %v2926_v32, %v2932_v41  ;;  %v415_v25 = vsel %vm399_vm0, %v2932_v41, %v2930_v46  ;;  %v579_v35 = vadd.f32 %v547_v53, %v445_v17 }
 0x2f5   : >> { %v548_v32 = vsel %vm533_vm1, %v2962_v60, %v2968_v4  ;;  %v549_v46 = vsel %vm533_vm1, %v2968_v4, %v2966_v3  ;;  %v446_v41 = vadd.f32 %v414_v29, %v247_v1  ;;  %v447_v55 = vadd.f32 %v415_v25, %v248_v61 }
 0x2f6   : >> { %v850_v17 = vsel %vm399_vm0, %v2998_v13, %v2996_v12  ;;  %v851_v60 = vsel %vm399_vm0, %v2996_v12, %v3002_v57  ;;  %v668_v4 = vadd.f32 %v652_v36, %v578_v26  ;;  %v654_v29 = vmul.f32 %v2795_v49, %v2783_v44 }
 0x2f7   : >> { %v3426_v5 = vpop.permute.xlu1 %1497  ;;  %v3428_v9 = vpop.permute.xlu0 %1495  ;;  %v580_v1 = vadd.f32 %v548_v32, %v446_v41  ;;  %v581_v3 = vadd.f32 %v549_v46, %v447_v55  ;;  %v1103_v12 = vsel %vm533_vm1, %v3192_v59, %v3194_v7  ;;  %v853_v26 = vsel %vm399_vm0, %v3000_v0, %v3008_v6 }
 0x2f8   : >> { %4850 = vst [vmem:[#allocation122_spill] sm:$0xff] %v3426_v5  ;;  %4851 = vst [vmem:[#allocation123_spill] sm:$0xff] %v3428_v9  ;;  %v653_v5 = vmul.f32 %v2778_v42, %v2783_v44  ;;  %v882_v61 = vadd.f32 %v850_v17, %v668_v4  ;;  %v1329_v46 = vmul.f32 %v3271_v2, %v3273_v10 }
 0x2f9   : >> { %v1330_v41 = vmul.f32 %v3268_v22, %v3273_v10  ;;  %v670_v55 = vadd.f32 %v654_v29, %v580_v1  ;;  %v1106_v6 = vsel %vm533_vm1, %v3196_v62, %v3202_v50  ;;  %v1331_v1 = vmul.f32 %v3285_v54, %v3273_v10 }
 0x2fa   : >> { %v669_v25 = vadd.f32 %v653_v5, %v579_v35  ;;  %v852_v5 = vsel %vm399_vm0, %v3002_v57, %v3000_v0  ;;  %v1135_v36 = vadd.f32 %v1103_v12, %v882_v61  ;;  %v1105_v0 = vsel %vm533_vm1, %v3198_v63, %v3196_v62 }
 0x2fb   : >> { %v3450_v53 = vpop.permute.xlu1 %1501  ;;  %v3452_v30 = vpop.permute.xlu0 %1499 }
 0x2fc   : >> { %4852 = vst [vmem:[#allocation124_spill] sm:$0xff] %v3450_v53  ;;  %4853 = vst [vmem:[#allocation125_spill] sm:$0xff] %v3452_v30  ;;  %v883_v9 = vadd.f32 %v851_v60, %v669_v25  ;;  %v1104_v53 = vsel %vm533_vm1, %v3194_v7, %v3198_v63  ;;  %v671_v7 = vadd.f32 %v655_v39, %v581_v3 }
 0x2fd   : >> { %v884_v60 = vadd.f32 %v852_v5, %v670_v55 }
 0x2fe   : >> { %v1136_v17 = vadd.f32 %v1104_v53, %v883_v9  ;;  %v885_v57 = vadd.f32 %v853_v26, %v671_v7  ;;  %v1332_v9 = vmul.f32 %v3282_v51, %v3273_v10  ;;  %v4894_v10 = vld [vmem:[#allocation27_spill] sm:$0xff] }
 0x2ff   : >> { %v3470_v35 = vpop.permute.xlu1 %1505  ;;  %v3472_v32 = vpop.permute.xlu0 %1503  ;;  %v1137_v63 = vadd.f32 %v1105_v0, %v884_v60 }
 0x300   : >> { %4854 = vst [vmem:[#allocation126_spill] sm:$0xff] %v3470_v35  ;;  %4855 = vst [vmem:[#allocation127_spill] sm:$0xff] %v3472_v32  ;;  %v1345_v32 = vadd.f32 %v1329_v46, %v1135_v36  ;;  %v1346_v30 = vadd.f32 %v1330_v41, %v1136_v17  ;;  %v1138_v29 = vadd.f32 %v1106_v6, %v885_v57 }
 0x301   : >> { %v1347_v12 = vadd.f32 %v1331_v1, %v1137_v63 }
 0x302   : >> { %v1348_v5 = vadd.f32 %v1332_v9, %v1138_v29 }
 0x303   : >> { %v1510_v4 = vpop.permute.xlu1 %1509  ;;  %v1508_v25 = vpop.permute.xlu0 %1507 }
 0x304   : >> { %v1527_v53 = vsel %vm399_vm0, %v3470_v35, %v1508_v25  ;;  %v1528_v3 = vsel %vm399_vm0, %v1508_v25, %v1510_v4  ;;  %v4890_v35 = vld [vmem:[#allocation22_spill] sm:$0xff] }
 0x305   : >> { %v3491_v39 = vadd.f32 %v1527_v53, %v1345_v32  ;;  %v3493_v50 = vadd.f32 %v1528_v3, %v1346_v30 }
 0x307   : >> { %4856 = vst [vmem:[#allocation128_spill] sm:$0xff] %v3491_v39  ;;  %4857 = vst [vmem:[#allocation129_spill] sm:$0xff] %v3493_v50  ;;  %v1514_v62 = vpop.permute.xlu1 %1513  ;;  %v1512_v61 = vpop.permute.xlu0 %1511  ;;  %v4887_v39 = vld [vmem:[#allocation20_spill] sm:$0xff] }
 0x308   : >> { %v1529_v26 = vsel %vm399_vm0, %v1510_v4, %v1512_v61  ;;  %v1530_v46 = vsel %vm399_vm0, %v1512_v61, %v1514_v62 }
 0x309   : >> { %v3497_v41 = vadd.f32 %v1529_v26, %v1347_v12  ;;  %v3499_v55 = vadd.f32 %v1530_v46, %v1348_v5 }
 0x30b   : >> { %4858 = vst [vmem:[#allocation130_spill] sm:$0xff] %v3497_v41  ;;  %4859 = vst [vmem:[#allocation131_spill] sm:$0xff] %v3499_v55  ;;  %v1602_v7 = vpop.permute.xlu1 %1601  ;;  %v1600_v36 = vpop.permute.xlu0 %1599  ;;  %v4885_v55 = vld [vmem:[#allocation19_spill] sm:$0xff] }
 0x30c   : >> { %v3502_v17 = vsel %vm399_vm0, %v1600_v36, %v1602_v7 }
 0x30d   : >> { %4860 = vst [vmem:[#allocation132_spill] sm:$0xff] %v3502_v17 }
 0x30f   : >> { %v1606_v32 = vpop.permute.xlu1 %1605  ;;  %v1604_v30 = vpop.permute.xlu0 %1603 }
 0x310   : >> { %v3505_v60 = vsel %vm399_vm0, %v1602_v7, %v1604_v30  ;;  %v3508_v57 = vsel %vm399_vm0, %v1604_v30, %v1606_v32 }
 0x311   : >> { %4861 = vst [vmem:[#allocation133_spill] sm:$0xff] %v3505_v60  ;;  %4862 = vst [vmem:[#allocation134_spill] sm:$0xff] %v3508_v57 }
 0x313   : >> { %v1610_v0 = vpop.permute.xlu1 %1609  ;;  %v1608_v6 = vpop.permute.xlu0 %1607 }
 0x314   : >> { %v3511_v4 = vsel %vm399_vm0, %v1606_v32, %v1608_v6  ;;  %v3514_v25 = vsel %vm399_vm0, %v1608_v6, %v1610_v0 }
 0x315   : >> { %4863 = vst [vmem:[#allocation135_spill] sm:$0xff] %v3511_v4  ;;  %4864 = vst [vmem:[#allocation136_spill] sm:$0xff] %v3514_v25  ;;  %v4883_v4 = vld [vmem:[#allocation5_spill] sm:$0xff] }
 0x317   : >> { %v1614_v1 = vpop.permute.xlu1 %1613  ;;  %v1612_v9 = vpop.permute.xlu0 %1611 }
 0x318   : >> { %v3517_v53 = vsel %vm399_vm0, %v1610_v0, %v1612_v9  ;;  %v3520_v3 = vsel %vm399_vm0, %v1612_v9, %v1614_v1 }
 0x319   : >> { %4865 = vst [vmem:[#allocation137_spill] sm:$0xff] %v3517_v53  ;;  %4866 = vst [vmem:[#allocation138_spill] sm:$0xff] %v3520_v3  ;;  %v4882_v53 = vld [vmem:[#allocation4_spill] sm:$0xff] }
 0x31b   : >> { %v1618_v63 = vpop.permute.xlu1 %1617  ;;  %v1616_v29 = vpop.permute.xlu0 %1615 }
 0x31c   : >> { %v3523_v62 = vsel %vm399_vm0, %v1614_v1, %v1616_v29 }
 0x31d   : >> { %4867 = vst [vmem:[#allocation139_spill] sm:$0xff] %v3523_v62 }
 0x31f   : >> { %v1622_v61 = vpop.permute.xlu1 %1621  ;;  %v1620_v12 = vpop.permute.xlu0 %1619 }
 0x320   : >> { %v3526_v5 = vsel %vm399_vm0, %v1618_v63, %v1620_v12  ;;  %v3529_v26 = vsel %vm399_vm0, %v1620_v12, %v1622_v61 }
 0x321   : >> { %4868 = vst [vmem:[#allocation140_spill] sm:$0xff] %v3526_v5  ;;  %4869 = vst [vmem:[#allocation141_spill] sm:$0xff] %v3529_v26 }
 0x323   : >> { %v1626_v46 = vpop.permute.xlu1 %1625  ;;  %v1624_v7 = vpop.permute.xlu0 %1623 }
 0x324   : >> { %v3532_v36 = vsel %vm399_vm0, %v1622_v61, %v1624_v7  ;;  %v3535_v32 = vsel %vm399_vm0, %v1624_v7, %v1626_v46 }
 0x325   : >> { %4870 = vst [vmem:[#allocation142_spill] sm:$0xff] %v3532_v36  ;;  %4871 = vst [vmem:[#allocation143_spill] sm:$0xff] %v3535_v32  ;;  %v240_v32 = vmul.f32 %v2644_v37, %v2671_v47  ;;  %v4879_v36 = vld [vmem:[#allocation9_spill] sm:$0xff] }
 0x327   : >> { %v1630_v30 = vpop.permute.xlu1 %1629  ;;  %v1628_v0 = vpop.permute.xlu0 %1627 }
 0x328   : >> { %v3538_v6 = vsel %vm399_vm0, %v1626_v46, %v1628_v0  ;;  %v3541_v1 = vsel %vm399_vm0, %v1628_v0, %v1630_v30 }
 0x329   : >> { %4872 = vst [vmem:[#allocation144_spill] sm:$0xff] %v3538_v6  ;;  %4873 = vst [vmem:[#allocation145_spill] sm:$0xff] %v3541_v1 }
 0x32b   : >> { %v1634_v9 = vpop.permute.xlu1 %1633  ;;  %v1632_v63 = vpop.permute.xlu0 %1631 }
 0x32c   : >> { %v3544_v29 = vsel %vm399_vm0, %v1630_v30, %v1632_v63  ;;  %v3547_v12 = vsel %vm399_vm0, %v1632_v63, %v1634_v9 }
 0x32d   : >> { %4874 = vst [vmem:[#allocation146_spill] sm:$0xff] %v3544_v29  ;;  %4875 = vst [vmem:[#allocation147_spill] sm:$0xff] %v3547_v12  ;;  %v239_v29 = vmul.f32 %v2647_v38, %v2671_v47  ;;  %v243_v38 = vmul.f32 %v2619_v28, %v2683_v52 }
 0x33c   : >> { %v3549_v61 = vpop.permute.xlu0 %1688  ;;  %v3573_v12 = vpop.permute.xlu1 %1693 }
 0x33d   : >> { %v1697_v7 = vmul.f32 %v3549_v61, %v3240_v14  ;;  %v1696_v46 = vmul.f32 %v3549_v61, %v3243_v31  ;;  %v1699_v0 = vmul.f32 %v3549_v61, %v3254_v40  ;;  %v1698_v30 = vmul.f32 %v3549_v61, %v3257_v45  ;;  %4876 = vst [vmem:[#allocation148_spill] sm:$0xff] %v3573_v12 }
 0x33e   : >> { %v1701_v9 = vmul.f32 %v3549_v61, %v3268_v22  ;;  %v1700_v63 = vmul.f32 %v3549_v61, %v3271_v2 }
 0x33f   : >> { %1734 = vrot.lane.b32.xlu1 %v1697_v7, %s2502_s27  ;;  %1732 = vrot.lane.b32.xlu0 %v1696_v46, %s2502_s27  ;;  %v1703_v7 = vmul.f32 %v3549_v61, %v3282_v51  ;;  %v1702_v46 = vmul.f32 %v3549_v61, %v3285_v54 }
 0x343   : >> { %1738 = vrot.lane.b32.xlu1 %v1699_v0, %s2502_s27  ;;  %1736 = vrot.lane.b32.xlu0 %v1698_v30, %s2502_s27  ;;  %v1705_v0 = vmul.f32 %v3573_v12, %v3243_v31  ;;  %v1704_v30 = vmul.f32 %v3296_v11, %v3549_v61 }
 0x347   : >> { %1742 = vrot.lane.b32.xlu1 %v1701_v9, %s2502_s27  ;;  %1740 = vrot.lane.b32.xlu0 %v1700_v63, %s2502_s27  ;;  %v1707_v9 = vmul.f32 %v3573_v12, %v3257_v45  ;;  %v1706_v63 = vmul.f32 %v3573_v12, %v3240_v14 }
 0x34b   : >> { %1746 = vrot.lane.b32.xlu1 %v1703_v7, %s2502_s27  ;;  %1744 = vrot.lane.b32.xlu0 %v1702_v46, %s2502_s27  ;;  %v1709_v7 = vmul.f32 %v3573_v12, %v3271_v2  ;;  %v1708_v46 = vmul.f32 %v3573_v12, %v3254_v40 }
 0x34f   : >> { %1750 = vrot.lane.b32.xlu1 %v1705_v0, %s2502_s27  ;;  %1748 = vrot.lane.b32.xlu0 %v1704_v30, %s2502_s27  ;;  %v1711_v0 = vmul.f32 %v3573_v12, %v3285_v54  ;;  %v1710_v30 = vmul.f32 %v3573_v12, %v3268_v22 }
 0x353   : >> { %1754 = vrot.lane.b32.xlu1 %v1707_v9, %s2502_s27  ;;  %1752 = vrot.lane.b32.xlu0 %v1706_v63, %s2502_s27  ;;  %v1713_v9 = vmul.f32 %v3296_v11, %v3573_v12  ;;  %v1712_v63 = vmul.f32 %v3573_v12, %v3282_v51  ;;  %v4895_v12 = vld [vmem:[#allocation29_spill] sm:$0xff] }
 0x357   : >> { %1758 = vrot.lane.b32.xlu1 %v1709_v7, %s2502_s27  ;;  %1756 = vrot.lane.b32.xlu0 %v1708_v46, %s2502_s27  ;;  %v1817_v7 = vmul.f32 %v3240_v14, %v3038_v8  ;;  %v1816_v46 = vmul.f32 %v3243_v31, %v3038_v8 }
 0x35b   : >> { %1762 = vrot.lane.b32.xlu1 %v1711_v0, %s2502_s27  ;;  %1760 = vrot.lane.b32.xlu0 %v1710_v30, %s2502_s27  ;;  %v1819_v0 = vmul.f32 %v3254_v40, %v3038_v8  ;;  %v1818_v30 = vmul.f32 %v3257_v45, %v3038_v8 }
 0x35f   : >> { %1766 = vrot.lane.b32.xlu1 %v1713_v9, %s2502_s27  ;;  %1764 = vrot.lane.b32.xlu0 %v1712_v63, %s2502_s27  ;;  %v1821_v9 = vmul.f32 %v3268_v22, %v3038_v8  ;;  %v1820_v63 = vmul.f32 %v3271_v2, %v3038_v8 }
 0x363   : >> { %1854 = vrot.lane.b32.xlu1 %v1817_v7, %s2502_s27  ;;  %1852 = vrot.lane.b32.xlu0 %v1816_v46, %s2502_s27  ;;  %v1823_v7 = vmul.f32 %v3282_v51, %v3038_v8  ;;  %v1822_v46 = vmul.f32 %v3285_v54, %v3038_v8 }
 0x367   : >> { %1858 = vrot.lane.b32.xlu1 %v1819_v0, %s2502_s27  ;;  %1856 = vrot.lane.b32.xlu0 %v1818_v30, %s2502_s27  ;;  %v1825_v0 = vmul.f32 %v3243_v31, %v3066_v58  ;;  %v1824_v30 = vmul.f32 %v3296_v11, %v3038_v8  ;;  %v1828_v8 = vmul.f32 %v3254_v40, %v3066_v58 }
 0x36b   : >> { %1862 = vrot.lane.b32.xlu1 %v1821_v9, %s2502_s27  ;;  %1860 = vrot.lane.b32.xlu0 %v1820_v63, %s2502_s27  ;;  %v1827_v9 = vmul.f32 %v3257_v45, %v3066_v58  ;;  %v1826_v63 = vmul.f32 %v3240_v14, %v3066_v58 }
 0x36f   : >> { %1866 = vrot.lane.b32.xlu1 %v1823_v7, %s2502_s27  ;;  %1864 = vrot.lane.b32.xlu0 %v1822_v46, %s2502_s27  ;;  %v1829_v7 = vmul.f32 %v3271_v2, %v3066_v58  ;;  %v1831_v46 = vmul.f32 %v3285_v54, %v3066_v58 }
 0x373   : >> { %1870 = vrot.lane.b32.xlu1 %v1825_v0, %s2502_s27  ;;  %1868 = vrot.lane.b32.xlu0 %v1824_v30, %s2502_s27  ;;  %v1830_v0 = vmul.f32 %v3268_v22, %v3066_v58  ;;  %v2453_v30 = vld [vmem:[%s2588_s23 + $0x1b] sm:$0xff] }
 0x374   : >> { %v3701_v1 = vrot.slane %v2453_v30, %v2607_v23  ;;  %v3704_v6 = vrot.slane %v2453_v30, %v2609_v24  ;;  %v4877_v23 = vld [vmem:[#allocation8_spill] sm:$0xff]  ;;  %v3749_v25 = vrot.slane %v2453_v30, %v4882_v53  ;;  %v3752_v57 = vrot.slane %v2453_v30, %v4883_v4  ;;  %v4884_v53 = vld [vmem:[#allocation18_spill] sm:$0xff] }
 0x375   : >> { %v3740_v62 = vmul.f32 %v2781_v43, %v4877_v23  ;;  %v3744_v3 = vmul.f32 %v2778_v42, %v4877_v23  ;;  %v3756_v60 = vmul.f32 %v2795_v49, %v4877_v23  ;;  %v3760_v17 = vmul.f32 %v2792_v48, %v4877_v23  ;;  %v3796_v49 = vld [vmem:[%s2588_s23 + $0x23] ss:$0 sm:$0xff]  ;;  %v4889_v42 = vld [vmem:[#allocation23_spill] sm:$0xff] }
 0x376   : >> { %v2025_v37 = vmul.f32 %v3701_v1, %v3245_v56  ;;  %v400_v4 = vsel %vm399_vm0, %v4885_v55, %v4884_v53  ;;  %v2026_v50 = vmul.f32 %v3752_v57, %v3245_v56  ;;  %v403_v43 = vsel %vm399_vm0, %v4887_v39, %v4889_v42 }
 0x377   : >> { %1874 = vrot.lane.b32.xlu1 %v1827_v9, %s2502_s27  ;;  %1872 = vrot.lane.b32.xlu0 %v1826_v63, %s2502_s27  ;;  %v1833_v9 = vmul.f32 %v3296_v11, %v3066_v58  ;;  %v1832_v63 = vmul.f32 %v3282_v51, %v3066_v58  ;;  %v3675_v58 = vrot.slane %v2453_v30, %v2601_v20  ;;  %v4897_v51 = vld [vmem:[#allocation113_spill] sm:$0xff] }
 0x378   : >> { %v3678_v11 = vrot.slane %v2453_v30, %v2603_v21  ;;  %v236_v20 = vmul.f32 %v2616_v27, %v2671_v47  ;;  %v237_v21 = vmul.f32 %v2635_v34, %v2671_v47  ;;  %v241_v34 = vmul.f32 %v2599_v19, %v2683_v52 }
 0x37b   : >> { %1878 = vrot.lane.b32.xlu1 %v1829_v7, %s2502_s27  ;;  %1876 = vrot.lane.b32.xlu0 %v1828_v8, %s2502_s27  ;;  %v3663_v7 = vrot.slane %v2453_v30, %v2590_v15  ;;  %v3666_v8 = vrot.slane %v2453_v30, %v2592_v16  ;;  %v233_v15 = vmul.f32 %v2599_v19, %v2671_v47  ;;  %v4886_v30 = vld [vmem:[#allocation21_spill] sm:$0xff] }
 0x37c   : >> { %v234_v16 = vmul.f32 %v2596_v18, %v2671_v47  ;;  %v2024_v19 = vmul.f32 %v3704_v6, %v3245_v56  ;;  %v401_v41 = vsel %vm399_vm0, %v4884_v53, %v4886_v30 }
 0x37f   : >> { %1882 = vrot.lane.b32.xlu1 %v1831_v46, %s2502_s27  ;;  %1880 = vrot.lane.b32.xlu0 %v1830_v0, %s2502_s27  ;;  %v2021_v46 = vmul.f32 %v3663_v7, %v3245_v56  ;;  %v2020_v0 = vmul.f32 %v3666_v8, %v3245_v56 }
 0x383   : >> { %1886 = vrot.lane.b32.xlu1 %v1833_v9, %s2502_s27  ;;  %1884 = vrot.lane.b32.xlu0 %v1832_v63, %s2502_s27  ;;  %v2023_v9 = vmul.f32 %v3675_v58, %v3245_v56  ;;  %v2022_v63 = vmul.f32 %v3678_v11, %v3245_v56 }
 0x387   : >> { %2058 = vrot.lane.b32.xlu1 %v2021_v46, %s2501_s24  ;;  %2056 = vrot.lane.b32.xlu0 %v2020_v0, %s2501_s24  ;;  %v235_v46 = vmul.f32 %v2619_v28, %v2671_v47  ;;  %v238_v0 = vmul.f32 %v2632_v33, %v2671_v47  ;;  %v242_v33 = vmul.f32 %v2596_v18, %v2683_v52  ;;  %v4880_v28 = vld [vmem:[#allocation12_spill] sm:$0xff] }
 0x388   : >> { %v3728_v18 = vmul.f32 %v4879_v36, %v4877_v23  ;;  %v3732_v26 = vmul.f32 %v4880_v28, %v4877_v23  ;;  %v3785_v48 = vmul.f32 %v4880_v28, %v2783_v44  ;;  %v4891_v28 = vld [vmem:[#allocation25_spill] sm:$0xff] }
 0x389   : >> { %v405_v59 = vsel %vm399_vm0, %v4890_v35, %v4891_v28 }
 0x38b   : >> { %2062 = vrot.lane.b32.xlu1 %v2023_v9, %s2501_s24  ;;  %2060 = vrot.lane.b32.xlu0 %v2022_v63, %s2501_s24  ;;  %v3716_v9 = vmul.f32 %v2616_v27, %v2683_v52  ;;  %v4878_v63 = vld [vmem:[#allocation10_spill] sm:$0xff]  ;;  %v4881_v27 = vld [vmem:[#allocation11_spill] sm:$0xff]  ;;  %v402_v52 = vsel %vm399_vm0, %v4886_v30, %v4887_v39  ;;  %v404_v30 = vsel %vm399_vm0, %v4889_v42, %v4890_v35 }
 0x38c   : >> { %v3720_v24 = vmul.f32 %v4878_v63, %v4877_v23  ;;  %v3736_v5 = vmul.f32 %v4881_v27, %v4877_v23  ;;  %v2027_v23 = vmul.f32 %v3749_v25, %v3245_v56  ;;  %v3789_v55 = vmul.f32 %v4881_v27, %v2783_v44  ;;  %v4896_v35 = vld [vmem:[#allocation26_spill] sm:$0xff] }
 0x38d   : >> { %v3793_v53 = vmul.f32 %v4878_v63, %v2671_v47  ;;  %v3814_v39 = vmul.f32 %v4879_v36, %v2671_v47  ;;  %v4899_v47 = vld [vmem:[#allocation31_spill] sm:$0xff] }
 0x38f   : >> { %2066 = vrot.lane.b32.xlu1 %v2025_v37, %s2501_s24  ;;  %2064 = vrot.lane.b32.xlu0 %v2024_v19, %s2501_s24  ;;  %v3764_v37 = vmul.f32 %v4878_v63, %v2783_v44  ;;  %v3768_v19 = vmul.f32 %v4879_v36, %v2783_v44  ;;  %4888 = vst [vmem:[#allocation4_spill] sm:$0xff] %v3793_v53  ;;  %v4892_v63 = vld [vmem:[#allocation24_spill] sm:$0xff]  ;;  %4893 = vst [vmem:[#allocation5_spill] sm:$0xff] %v3814_v39 }
 0x390   : >> { %v432_v44 = vadd.f32 %v400_v4, %v233_v15  ;;  %v433_v53 = vadd.f32 %v401_v41, %v234_v16  ;;  %v406_v27 = vsel %vm399_vm0, %v4891_v28, %v4892_v63  ;;  %v407_v42 = vsel %vm399_vm0, %v4892_v63, %v4894_v10  ;;  %v4898_v36 = vld [vmem:[#allocation28_spill] sm:$0xff] }
 0x391   : >> { %v2028_v41 = vmul.f32 %v3796_v49, %v3245_v56  ;;  %v434_v15 = vadd.f32 %v402_v52, %v235_v46  ;;  %v435_v16 = vadd.f32 %v403_v43, %v236_v20  ;;  %v436_v28 = vadd.f32 %v404_v30, %v237_v21  ;;  %v4900_v63 = vld [vmem:[#allocation32_spill] sm:$0xff] }
 0x392   : >> { %v437_v4 = vadd.f32 %v405_v59, %v238_v0  ;;  %v409_v39 = vsel %vm399_vm0, %v4895_v12, %v4898_v36  ;;  %v410_v10 = vsel %vm399_vm0, %v4898_v36, %v4899_v47  ;;  %v438_v52 = vadd.f32 %v406_v27, %v239_v29  ;;  %v4902_v59 = vld [vmem:[#allocation35_spill] sm:$0xff]  ;;  %v4904_v36 = vld [vmem:[#allocation37_spill] sm:$0xff] }
 0x393   : >> { %2070 = vrot.lane.b32.xlu1 %v2027_v23, %s2501_s24  ;;  %2068 = vrot.lane.b32.xlu0 %v2026_v50, %s2501_s24  ;;  %v408_v23 = vsel %vm399_vm0, %v4896_v35, %v4895_v12  ;;  %v2029_v50 = vmul.f32 %v3666_v8, %v4897_v51  ;;  %v4901_v35 = vld [vmem:[#allocation33_spill] sm:$0xff]  ;;  %v439_v43 = vadd.f32 %v407_v42, %v240_v32  ;;  %v4903_v12 = vld [vmem:[#allocation34_spill] sm:$0xff] }
 0x394   : >> { %v534_v54 = vsel %vm533_vm1, %v4901_v35, %v4900_v63  ;;  %v440_v56 = vadd.f32 %v408_v23, %v241_v34  ;;  %v535_v46 = vsel %vm533_vm1, %v4900_v63, %v4902_v59  ;;  %v536_v20 = vsel %vm533_vm1, %v4902_v59, %v4903_v12  ;;  %v4905_v34 = vld [vmem:[#allocation30_spill] sm:$0xff]  ;;  %v4906_v23 = vld [vmem:[#allocation36_spill] sm:$0xff] }
 0x395   : >> { %v537_v21 = vsel %vm533_vm1, %v4903_v12, %v4904_v36  ;;  %v2031_v0 = vmul.f32 %v3678_v11, %v4897_v51  ;;  %v2030_v29 = vmul.f32 %v3663_v7, %v4897_v51  ;;  %v441_v32 = vadd.f32 %v409_v39, %v242_v33  ;;  %v4908_v35 = vld [vmem:[#allocation38_spill] sm:$0xff]  ;;  %v4910_v39 = vld [vmem:[#allocation43_spill] sm:$0xff] }
 0x396   : >> { %v411_v27 = vsel %vm399_vm0, %v4899_v47, %v4905_v34  ;;  %v442_v30 = vadd.f32 %v410_v10, %v243_v38  ;;  %v566_v42 = vadd.f32 %v534_v54, %v432_v44  ;;  %v567_v33 = vadd.f32 %v535_v46, %v433_v53  ;;  %v4909_v44 = vld [vmem:[#allocation41_spill] sm:$0xff]  ;;  %v4911_v10 = vld [vmem:[#allocation40_spill] sm:$0xff] }
 0x397   : >> { %2074 = vrot.lane.b32.xlu1 %v2029_v50, %s2501_s24  ;;  %2072 = vrot.lane.b32.xlu0 %v2028_v41, %s2501_s24  ;;  %v538_v50 = vsel %vm533_vm1, %v4904_v36, %v4906_v23  ;;  %v4907_v41 = vld [vmem:[#allocation39_spill] sm:$0xff]  ;;  %v568_v47 = vadd.f32 %v536_v20, %v434_v15  ;;  %v569_v38 = vadd.f32 %v537_v21, %v435_v16  ;;  %v4912_v36 = vld [vmem:[#allocation42_spill] sm:$0xff] }
 0x398   : >> { %v539_v63 = vsel %vm533_vm1, %v4906_v23, %v4907_v41  ;;  %v540_v59 = vsel %vm533_vm1, %v4907_v41, %v4908_v35  ;;  %v541_v54 = vsel %vm533_vm1, %v4908_v35, %v4909_v44  ;;  %v542_v12 = vsel %vm533_vm1, %v4911_v10, %v4910_v39  ;;  %v4914_v41 = vld [vmem:[#allocation44_spill] sm:$0xff] }
 0x399   : >> { %v543_v34 = vsel %vm533_vm1, %v4910_v39, %v4912_v36  ;;  %v2032_v53 = vmul.f32 %v3675_v58, %v4897_v51  ;;  %v443_v15 = vadd.f32 %v411_v27, %v3716_v9  ;;  %v570_v16 = vadd.f32 %v538_v50, %v436_v28 }
 0x39a   : >> { %v571_v46 = vadd.f32 %v539_v63, %v437_v4  ;;  %v572_v20 = vadd.f32 %v540_v59, %v438_v52  ;;  %v573_v21 = vadd.f32 %v541_v54, %v439_v43  ;;  %v574_v44 = vadd.f32 %v542_v12, %v440_v56 }
 0x39b   : >> { %2078 = vrot.lane.b32.xlu1 %v2031_v0, %s2501_s24  ;;  %2076 = vrot.lane.b32.xlu0 %v2030_v29, %s2501_s24  ;;  %v2033_v0 = vmul.f32 %v3704_v6, %v4897_v51  ;;  %v4913_v29 = vld [vmem:[#allocation45_spill] sm:$0xff]  ;;  %v575_v39 = vadd.f32 %v543_v34, %v441_v32  ;;  %v656_v9 = vadd.f32 %v3720_v24, %v566_v42  ;;  %v4915_v32 = vld [vmem:[#allocation46_spill] sm:$0xff]  ;;  %v4916_v24 = vld [vmem:[#allocation47_spill] sm:$0xff] }
 0x39c   : >> { %v544_v23 = vsel %vm533_vm1, %v4912_v36, %v4913_v29  ;;  %v545_v35 = vsel %vm533_vm1, %v4913_v29, %v4914_v41  ;;  %v657_v28 = vadd.f32 %v3728_v18, %v567_v33  ;;  %v658_v4 = vadd.f32 %v3732_v26, %v568_v47  ;;  %v4917_v42 = vld [vmem:[#allocation49_spill] sm:$0xff]  ;;  %v4918_v33 = vld [vmem:[#allocation48_spill] sm:$0xff] }
 0x39d   : >> { %v659_v52 = vadd.f32 %v3736_v5, %v569_v38  ;;  %v2035_v43 = vmul.f32 %v3752_v57, %v4897_v51  ;;  %v2034_v27 = vmul.f32 %v3701_v1, %v4897_v51  ;;  %v576_v50 = vadd.f32 %v544_v23, %v442_v30  ;;  %v4919_v38 = vld [vmem:[#allocation51_spill] sm:$0xff]  ;;  %v4921_v34 = vld [vmem:[#allocation53_spill] sm:$0xff] }
 0x39e   : >> { %v577_v63 = vadd.f32 %v545_v35, %v443_v15  ;;  %v660_v59 = vadd.f32 %v3740_v62, %v570_v16  ;;  %v661_v56 = vadd.f32 %v3744_v3, %v571_v46  ;;  %v838_v18 = vsel %vm399_vm0, %v4916_v24, %v4915_v32  ;;  %v4923_v16 = vld [vmem:[#allocation54_spill] sm:$0xff]  ;;  %v4926_v41 = vld [vmem:[#allocation57_spill] sm:$0xff]  ;;  %v4931_v24 = vld [vmem:[#allocation79_spill] sm:$0xff] }
 0x39f   : >> { %2082 = vrot.lane.b32.xlu1 %v2033_v0, %s2501_s24  ;;  %2080 = vrot.lane.b32.xlu0 %v2032_v53, %s2501_s24  ;;  %v662_v26 = vadd.f32 %v3756_v60, %v572_v20  ;;  %v663_v5 = vadd.f32 %v3760_v17, %v573_v21  ;;  %v839_v30 = vsel %vm399_vm0, %v4915_v32, %v4917_v42  ;;  %v4920_v60 = vld [vmem:[#allocation50_spill] sm:$0xff]  ;;  %v4922_v53 = vld [vmem:[#allocation52_spill] sm:$0xff]  ;;  %v4925_v21 = vld [vmem:[#allocation55_spill] sm:$0xff] }
 0x3a0   : >> { %v840_v3 = vsel %vm399_vm0, %v4917_v42, %v4918_v33  ;;  %v664_v62 = vadd.f32 %v3764_v37, %v574_v44  ;;  %v665_v47 = vadd.f32 %v3768_v19, %v575_v39  ;;  %v841_v17 = vsel %vm399_vm0, %v4918_v33, %v4919_v38  ;;  %v4924_v20 = vld [vmem:[#allocation56_spill] sm:$0xff]  ;;  %v4927_v44 = vld [vmem:[#allocation58_spill] sm:$0xff] }
 0x3a1   : >> { %v842_v54 = vsel %vm399_vm0, %v4919_v38, %v4920_v60  ;;  %v2037_v10 = vmul.f32 %v3796_v49, %v4897_v51  ;;  %v2036_v12 = vmul.f32 %v3749_v25, %v4897_v51  ;;  %v870_v36 = vadd.f32 %v838_v18, %v656_v9 }
 0x3a2   : >> { %v843_v37 = vsel %vm399_vm0, %v4920_v60, %v4921_v34  ;;  %v666_v19 = vadd.f32 %v3785_v48, %v576_v50  ;;  %v667_v0 = vadd.f32 %v3789_v55, %v577_v63  ;;  %v844_v15 = vsel %vm399_vm0, %v4921_v34, %v4922_v53  ;;  %v4937_v34 = vld [vmem:[#allocation84_spill] sm:$0xff] }
 0x3a3   : >> { %2086 = vrot.lane.b32.xlu1 %v2035_v43, %s2501_s24  ;;  %2084 = vrot.lane.b32.xlu0 %v2034_v27, %s2501_s24  ;;  %v845_v46 = vsel %vm399_vm0, %v4922_v53, %v4923_v16  ;;  %v846_v51 = vsel %vm399_vm0, %v4925_v21, %v4924_v20  ;;  %v871_v29 = vadd.f32 %v839_v30, %v657_v28  ;;  %v4928_v43 = vld [vmem:[#allocation77_spill] sm:$0xff]  ;;  %v4929_v27 = vld [vmem:[#allocation78_spill] sm:$0xff]  ;;  %v4933_v30 = vld [vmem:[#allocation3_spill] sm:$0xff] }
 0x3a4   : >> { %v872_v48 = vadd.f32 %v840_v3, %v658_v4  ;;  %v873_v23 = vadd.f32 %v841_v17, %v659_v52  ;;  %v874_v55 = vadd.f32 %v842_v54, %v660_v59  ;;  %v847_v35 = vsel %vm399_vm0, %v4924_v20, %v4926_v41  ;;  %v4930_v59 = vld [vmem:[#allocation80_spill] sm:$0xff]  ;;  %v4936_v17 = vld [vmem:[#allocation81_spill] sm:$0xff]  ;;  %v4940_v21 = vld [vmem:[#allocation83_spill] sm:$0xff] }
 0x3a5   : >> { %v848_v39 = vsel %vm399_vm0, %v4926_v41, %v4927_v44  ;;  %v849_v9 = vsel %vm399_vm0, %v4927_v44, %v2998_v13  ;;  %v1091_v50 = vsel %vm533_vm1, %v4929_v27, %v4928_v43  ;;  %v875_v28 = vadd.f32 %v843_v37, %v661_v56  ;;  %v4932_v13 = vld [vmem:[#allocation107_spill] sm:$0xff]  ;;  %v4934_v56 = vld [vmem:[#allocation2_spill] sm:$0xff] }
 0x3a6   : >> { %v3949_v4 = vadd.f32 %v844_v15, %v662_v26  ;;  %v3951_v52 = vadd.f32 %v845_v46, %v663_v5  ;;  %v3953_v63 = vadd.f32 %v846_v51, %v664_v62  ;;  %v1092_v32 = vsel %vm533_vm1, %v4928_v43, %v4930_v59  ;;  %v4935_v62 = vld [vmem:[#allocation82_spill] sm:$0xff]  ;;  %v4941_v43 = vld [vmem:[#allocation117_spill] sm:$0xff] }
 0x3a7   : >> { %2090 = vrot.lane.b32.xlu1 %v2037_v10, %s2501_s24  ;;  %2088 = vrot.lane.b32.xlu0 %v2036_v12, %s2501_s24  ;;  %v1093_v18 = vsel %vm533_vm1, %v4930_v59, %v4931_v24  ;;  %v1317_v42 = vmul.f32 %v3243_v31, %v4932_v13  ;;  %v3965_v26 = vadd.f32 %v847_v35, %v665_v47  ;;  %v4938_v37 = vld [vmem:[#allocation114_spill] sm:$0xff] }
 0x3a8   : >> { %v3967_v5 = vadd.f32 %v848_v39, %v666_v19  ;;  %v3969_v33 = vadd.f32 %v849_v9, %v667_v0  ;;  %v1123_v3 = vadd.f32 %v1091_v50, %v870_v36  ;;  %v1094_v38 = vsel %vm533_vm1, %v4931_v24, %v4935_v62  ;;  %v4939_v19 = vld [vmem:[#allocation115_spill] sm:$0xff] }
 0x3a9   : >> { %v1095_v60 = vsel %vm533_vm1, %v4935_v62, %v4936_v17  ;;  %v2141_v54 = vmul.f32 %v3663_v7, %v3549_v61  ;;  %v2140_v47 = vmul.f32 %v3666_v8, %v3549_v61  ;;  %v1124_v10 = vadd.f32 %v1092_v32, %v871_v29 }
 0x3aa   : >> { %v1125_v12 = vadd.f32 %v1093_v18, %v872_v48  ;;  %v1096_v36 = vsel %vm533_vm1, %v4936_v17, %v4937_v34  ;;  %v1515_v0 = vsel %vm399_vm0, %v4939_v19, %v4938_v37  ;;  %v1333_v53 = vadd.f32 %v1317_v42, %v1123_v3  ;;  %v4943_v18 = vld [vmem:[#allocation86_spill] sm:$0xff]  ;;  %v4944_v3 = vld [vmem:[#allocation112_spill] sm:$0xff] }
 0x3ab   : >> { %2283 = vperm.xlu1 %2483, %v4933_v30   ;;  %2278 = vperm.xlu0 %2482, %v4934_v56   ;;  %v1318_v15 = vmul.f32 %v3240_v14, %v4932_v13  ;;  %v1319_v16 = vmul.f32 %v3257_v45, %v4932_v13  ;;  %v1126_v46 = vadd.f32 %v1094_v38, %v873_v23 }
 0x3ac   : >> { %v1127_v20 = vadd.f32 %v1095_v60, %v874_v55  ;;  %v1097_v51 = vsel %vm533_vm1, %v4937_v34, %v4940_v21  ;;  %v1320_v29 = vmul.f32 %v3254_v40, %v4932_v13  ;;  %v1128_v48 = vadd.f32 %v1096_v36, %v875_v28  ;;  %v4942_v55 = vld [vmem:[#allocation116_spill] sm:$0xff]  ;;  %v4946_v36 = vld [vmem:[#allocation118_spill] sm:$0xff] }
 0x3ad   : >> { %v1547_v41 = vadd.f32 %v1515_v0, %v1333_v53  ;;  %v2143_v39 = vmul.f32 %v3675_v58, %v3549_v61  ;;  %v2142_v9 = vmul.f32 %v3678_v11, %v3549_v61  ;;  %v1516_v23 = vsel %vm399_vm0, %v4938_v37, %v4941_v43 }
 0x3ae   : >> { %v1517_v27 = vsel %vm399_vm0, %v4941_v43, %v4942_v55  ;;  %v1321_v50 = vmul.f32 %v3271_v2, %v4932_v13  ;;  %v1334_v59 = vadd.f32 %v1318_v15, %v1124_v10  ;;  %v1335_v32 = vadd.f32 %v1319_v16, %v1125_v12  ;;  %v4945_v12 = vld [vmem:[#allocation119_spill] sm:$0xff] }
 0x3af   : >> { %2178 = vrot.lane.b32.xlu1 %v2141_v54, %s2502_s27  ;;  %2176 = vrot.lane.b32.xlu0 %v2140_v47, %s2502_s27  ;;  %v1098_v42 = vsel %vm533_vm1, %v4940_v21, %v4943_v18  ;;  %v1336_v30 = vadd.f32 %v1320_v29, %v1126_v46  ;;  %v1322_v56 = vmul.f32 %v3268_v22, %v4932_v13  ;;  %v4953_v18 = vld [vmem:[#allocation85_spill] sm:$0xff] }
 0x3b0   : >> { %v1323_v62 = vmul.f32 %v4944_v3, %v4932_v13  ;;  %v1548_v38 = vadd.f32 %v1516_v23, %v1334_v59  ;;  %v1549_v17 = vadd.f32 %v1517_v27, %v1335_v32  ;;  %v2145_v47 = vmul.f32 %v3701_v1, %v3549_v61  ;;  %v4952_v32 = vld [vmem:[#allocation87_spill] sm:$0xff] }
 0x3b1   : >> { %v1735_v35 = vpop.permute.xlu1 %1734  ;;  %v1733_v44 = vpop.permute.xlu0 %1732  ;;  %v2144_v10 = vmul.f32 %v3704_v6, %v3549_v61  ;;  %v1518_v34 = vsel %vm399_vm0, %v4942_v55, %v4945_v12  ;;  %v1519_v37 = vsel %vm399_vm0, %v4945_v12, %v4946_v36  ;;  %v1337_v53 = vadd.f32 %v1321_v50, %v1127_v20  ;;  %v4948_v55 = vld [vmem:[#allocation121_spill] sm:$0xff]  ;;  %v4956_v12 = vld [vmem:[#allocation148_spill] sm:$0xff] }
 0x3b2   : >> { %v1768_v28 = vsel %vm533_vm1, %v1733_v44, %v1735_v35  ;;  %v1129_v46 = vadd.f32 %v1097_v51, %v3949_v4  ;;  %v1130_v21 = vadd.f32 %v1098_v42, %v3951_v52  ;;  %v1338_v29 = vadd.f32 %v1322_v56, %v1128_v48  ;;  %v4949_v51 = vld [vmem:[#allocation120_spill] sm:$0xff] }
 0x3b3   : >> { %v4011_v24 = vadd.f32 %v1768_v28, %v1547_v41  ;;  %2182 = vrot.lane.b32.xlu1 %v2143_v39, %s2502_s27  ;;  %2180 = vrot.lane.b32.xlu0 %v2142_v9, %s2502_s27  ;;  %v4947_v41 = vld [vmem:[#allocation111_spill] sm:$0xff]  ;;  %v1551_v39 = vadd.f32 %v1519_v37, %v1337_v53  ;;  %v2147_v43 = vmul.f32 %v3749_v25, %v3549_v61 }
 0x3b4   : >> { %v1324_v44 = vmul.f32 %v4947_v41, %v4932_v13  ;;  %v2146_v23 = vmul.f32 %v3752_v57, %v3549_v61  ;;  %v1520_v4 = vsel %vm399_vm0, %v4946_v36, %v4948_v55  ;;  %v1521_v52 = vsel %vm399_vm0, %v4948_v55, %v4949_v51  ;;  %v4957_v37 = vld [vmem:[#allocation123_spill] sm:$0xff] }
 0x3b5   : >> { %v1739_v60 = vpop.permute.xlu1 %1738  ;;  %v1737_v54 = vpop.permute.xlu0 %1736  ;;  %v1339_v50 = vadd.f32 %v1323_v62, %v1129_v46  ;;  %v1099_v42 = vsel %vm533_vm1, %v4953_v18, %v4952_v32  ;;  %v2148_v36 = vmul.f32 %v3796_v49, %v3549_v61 }
 0x3b6   : >> { %v1769_v19 = vsel %vm533_vm1, %v1735_v35, %v1737_v54  ;;  %v1770_v0 = vsel %vm533_vm1, %v1737_v54, %v1739_v60  ;;  %v1550_v35 = vadd.f32 %v1518_v34, %v1336_v30  ;;  %v4954_v30 = vld [vmem:[#allocation88_spill] sm:$0xff]  ;;  %v2149_v34 = vmul.f32 %v3666_v8, %v4956_v12 }
 0x3b7   : >> { %v4034_v15 = vadd.f32 %v1769_v19, %v1548_v38  ;;  %v4036_v16 = vadd.f32 %v1770_v0, %v1549_v17  ;;  %2186 = vrot.lane.b32.xlu1 %v2145_v47, %s2502_s27  ;;  %2184 = vrot.lane.b32.xlu0 %v2144_v10, %s2502_s27  ;;  %v1100_v56 = vsel %vm533_vm1, %v4952_v32, %v4954_v30  ;;  %v4955_v38 = vld [vmem:[#allocation89_spill] sm:$0xff]  ;;  %v4958_v0 = vld [vmem:[#allocation110_spill] sm:$0xff] }
 0x3b8   : >> { %v1101_v62 = vsel %vm533_vm1, %v4954_v30, %v4955_v38  ;;  %v1340_v17 = vadd.f32 %v1324_v44, %v1130_v21  ;;  %v1553_v54 = vadd.f32 %v1521_v52, %v1339_v50  ;;  %v1522_v19 = vsel %vm399_vm0, %v4949_v51, %v4957_v37  ;;  %v4964_v50 = vld [vmem:[#allocation124_spill] sm:$0xff] }
 0x3b9   : >> { %v1743_v9 = vpop.permute.xlu1 %1742  ;;  %v1741_v20 = vpop.permute.xlu0 %1740  ;;  %v1325_v53 = vmul.f32 %v3243_v31, %v4958_v0  ;;  %v1131_v61 = vadd.f32 %v1099_v42, %v3953_v63  ;;  %v2151_v52 = vmul.f32 %v3678_v11, %v4956_v12  ;;  %v2150_v63 = vmul.f32 %v3663_v7, %v4956_v12 }
 0x3ba   : >> { %v1771_v48 = vsel %vm533_vm1, %v1739_v60, %v1741_v20  ;;  %v1772_v27 = vsel %vm533_vm1, %v1741_v20, %v1743_v9  ;;  %v1552_v60 = vadd.f32 %v1520_v4, %v1338_v29  ;;  %v1326_v29 = vmul.f32 %v3240_v14, %v4958_v0  ;;  %v4961_v20 = vld [vmem:[#allocation90_spill] sm:$0xff] }
 0x3bb   : >> { %v4056_v28 = vadd.f32 %v1771_v48, %v1550_v35  ;;  %v4058_v59 = vadd.f32 %v1772_v27, %v1551_v39  ;;  %2190 = vrot.lane.b32.xlu1 %v2147_v43, %s2502_s27  ;;  %2188 = vrot.lane.b32.xlu0 %v2146_v23, %s2502_s27  ;;  %v1132_v39 = vadd.f32 %v1100_v56, %v3965_v26  ;;  %v4962_v48 = vld [vmem:[#allocation125_spill] sm:$0xff]  ;;  %v4963_v26 = vld [vmem:[#allocation122_spill] sm:$0xff] }
 0x3bc   : >> { %v1327_v43 = vmul.f32 %v3257_v45, %v4958_v0  ;;  %v1133_v23 = vadd.f32 %v1101_v62, %v3967_v5  ;;  %v1554_v55 = vadd.f32 %v1522_v19, %v1340_v17  ;;  %v1523_v27 = vsel %vm399_vm0, %v4963_v26, %v4962_v48  ;;  %v4967_v62 = vld [vmem:[#allocation12_spill] sm:$0xff] }
 0x3bd   : >> { %4950 = vst [vmem:[#allocation18_spill] sm:$0xff] %v4056_v28  ;;  %4951 = vst [vmem:[#allocation19_spill] sm:$0xff] %v4058_v59  ;;  %v1747_v47 = vpop.permute.xlu1 %1746  ;;  %v1745_v10 = vpop.permute.xlu0 %1744  ;;  %v1524_v32 = vsel %vm399_vm0, %v4962_v48, %v4964_v50  ;;  %v1328_v5 = vmul.f32 %v3254_v40, %v4958_v0  ;;  %v1341_v42 = vadd.f32 %v1325_v53, %v1131_v61  ;;  %v4970_v61 = vld [vmem:[#allocation126_spill] sm:$0xff]  ;;  %v5005_v59 = vld [vmem:[#allocation97_spill] sm:$0xff] }
 0x3be   : >> { %v1773_v46 = vsel %vm533_vm1, %v1743_v9, %v1745_v10  ;;  %v1774_v21 = vsel %vm533_vm1, %v1745_v10, %v1747_v47  ;;  %v1102_v9 = vsel %vm533_vm1, %v4955_v38, %v4961_v20  ;;  %v1342_v30 = vadd.f32 %v1326_v29, %v1132_v39  ;;  %v4966_v38 = vld [vmem:[#allocation6_spill] sm:$0xff] }
 0x3bf   : >> { %v4084_v44 = vadd.f32 %v1773_v46, %v1552_v60  ;;  %v4086_v35 = vadd.f32 %v1774_v21, %v1553_v54  ;;  %2194 = vrot.lane.b32.xlu1 %v2149_v34, %s2502_s27  ;;  %2192 = vrot.lane.b32.xlu0 %v2148_v36, %s2502_s27  ;;  %v674_v17 = vmul.f32 %v4967_v62, %v4966_v38  ;;  %v4968_v60 = vld [vmem:[#allocation11_spill] sm:$0xff] }
 0x3c0   : >> { %v4119_v54 = vmul.f32 %v4968_v60, %v4966_v38  ;;  %v1134_v10 = vadd.f32 %v1102_v9, %v3969_v33  ;;  %v1343_v34 = vadd.f32 %v1327_v43, %v1133_v23  ;;  %v1555_v36 = vadd.f32 %v1523_v27, %v1341_v42  ;;  %v4969_v21 = vld [vmem:[#allocation127_spill] sm:$0xff]  ;;  %v4977_v27 = vld [vmem:[#allocation17_spill] sm:$0xff] }
 0x3c1   : >> { %4959 = vst [vmem:[#allocation21_spill] sm:$0xff] %v4084_v44  ;;  %4960 = vst [vmem:[#allocation20_spill] sm:$0xff] %v4086_v35  ;;  %v1751_v4 = vpop.permute.xlu1 %1750  ;;  %v1749_v51 = vpop.permute.xlu0 %1748  ;;  %v2153_v53 = vmul.f32 %v3704_v6, %v4956_v12  ;;  %v2152_v46 = vmul.f32 %v3675_v58, %v4956_v12  ;;  %v1525_v29 = vsel %vm399_vm0, %v4964_v50, %v4969_v21 }
 0x3c2   : >> { %v1775_v18 = vsel %vm533_vm1, %v1747_v47, %v1749_v51  ;;  %v1556_v47 = vadd.f32 %v1524_v32, %v1342_v30  ;;  %v1526_v39 = vsel %vm399_vm0, %v4969_v21, %v4970_v61  ;;  %v1344_v9 = vadd.f32 %v1328_v5, %v1134_v10  ;;  %v4974_v51 = vld [vmem:[#allocation59_spill] sm:$0xff] }
 0x3c3   : >> { %v4111_v56 = vadd.f32 %v1775_v18, %v1554_v55  ;;  %2198 = vrot.lane.b32.xlu1 %v2151_v52, %s2502_s27  ;;  %2196 = vrot.lane.b32.xlu0 %v2150_v63, %s2502_s27  ;;  %v4973_v55 = vld [vmem:[#allocation62_spill] sm:$0xff]  ;;  %v4149_v50 = vmul.f32 %v4977_v27, %v4966_v38  ;;  %v1557_v32 = vadd.f32 %v1525_v29, %v1343_v34  ;;  %v4981_v29 = vld [vmem:[#allocation93_spill] sm:$0xff]  ;;  %v4982_v61 = vld [vmem:[#allocation91_spill] sm:$0xff] }
 0x3c4   : >> { %v958_v52 = vsel %vm399_vm0, %v4974_v51, %v4973_v55  ;;  %v4975_v63 = vld [vmem:[#allocation14_spill] sm:$0xff]  ;;  %v1558_v5 = vadd.f32 %v1526_v39, %v1344_v9  ;;  %v2155_v30 = vmul.f32 %v3752_v57, %v4956_v12  ;;  %v2154_v10 = vmul.f32 %v3701_v1, %v4956_v12  ;;  %v4986_v51 = vld [vmem:[#allocation9_spill] sm:$0xff] }
 0x3c5   : >> { %4965 = vst [vmem:[#allocation23_spill] sm:$0xff] %v4111_v56  ;;  %v1755_v37 = vpop.permute.xlu1 %1754  ;;  %v1753_v19 = vpop.permute.xlu0 %1752  ;;  %v676_v48 = vmul.f32 %v4975_v63, %v4966_v38  ;;  %v1211_v39 = vsel %vm533_vm1, %v4982_v61, %v4981_v29  ;;  %v5001_v56 = vld [vmem:[#allocation130_spill] sm:$0xff] }
 0x3c6   : >> { %v1776_v33 = vsel %vm533_vm1, %v1751_v4, %v1753_v19  ;;  %v1777_v20 = vsel %vm533_vm1, %v1753_v19, %v1755_v37  ;;  %v4976_v4 = vld [vmem:[#allocation13_spill] sm:$0xff]  ;;  %v4979_v19 = vld [vmem:[#allocation7_spill] sm:$0xff] }
 0x3c7   : >> { %v4134_v43 = vadd.f32 %v1776_v33, %v1555_v36  ;;  %v4136_v23 = vadd.f32 %v1777_v20, %v1556_v47  ;;  %2202 = vrot.lane.b32.xlu1 %v2153_v53, %s2502_s27  ;;  %2200 = vrot.lane.b32.xlu0 %v2152_v46, %s2502_s27  ;;  %v677_v26 = vmul.f32 %v4976_v4, %v4966_v38  ;;  %v4978_v36 = vld [vmem:[#allocation16_spill] sm:$0xff]  ;;  %v4980_v53 = vld [vmem:[#allocation10_spill] sm:$0xff] }
 0x3c8   : >> { %v4157_v47 = vmul.f32 %v4978_v36, %v4966_v38  ;;  %v4161_v46 = vmul.f32 %v4980_v53, %v4979_v19  ;;  %v4985_v38 = vld [vmem:[#allocation4_spill] sm:$0xff]  ;;  %v4177_v53 = vmul.f32 %v4986_v51, %v4979_v19 }
 0x3c9   : >> { %4971 = vst [vmem:[#allocation22_spill] sm:$0xff] %v4134_v43  ;;  %4972 = vst [vmem:[#allocation25_spill] sm:$0xff] %v4136_v23  ;;  %v1759_v18 = vpop.permute.xlu1 %1758  ;;  %v1757_v42 = vpop.permute.xlu0 %1756  ;;  %v990_v9 = vadd.f32 %v958_v52, %v4985_v38  ;;  %v4989_v51 = vld [vmem:[#allocation92_spill] sm:$0xff]  ;;  %v5000_v43 = vld [vmem:[#allocation94_spill] sm:$0xff] }
 0x3ca   : >> { %v1778_v21 = vsel %vm533_vm1, %v1755_v37, %v1757_v42  ;;  %v1779_v34 = vsel %vm533_vm1, %v1757_v42, %v1759_v18  ;;  %v4181_v37 = vmul.f32 %v4967_v62, %v4979_v19  ;;  %v2156_v62 = vmul.f32 %v3749_v25, %v4956_v12 }
 0x3cb   : >> { %v4168_v33 = vadd.f32 %v1778_v21, %v1557_v32  ;;  %v4170_v20 = vadd.f32 %v1779_v34, %v1558_v5  ;;  %2206 = vrot.lane.b32.xlu1 %v2155_v30, %s2502_s27  ;;  %2204 = vrot.lane.b32.xlu0 %v2154_v10, %s2502_s27  ;;  %v4185_v32 = vmul.f32 %v4968_v60, %v4979_v19  ;;  %v4987_v5 = vld [vmem:[#allocation60_spill] sm:$0xff] }
 0x3cc   : >> { %v959_v42 = vsel %vm399_vm0, %v4973_v55, %v4987_v5  ;;  %v4192_v30 = vmul.f32 %v4975_v63, %v4979_v19  ;;  %v2157_v21 = vmul.f32 %v3796_v49, %v4956_v12  ;;  %v4988_v34 = vld [vmem:[#allocation64_spill] sm:$0xff]  ;;  %v1243_v61 = vadd.f32 %v1211_v39, %v990_v9  ;;  %v4992_v49 = vld [vmem:[#allocation129_spill] sm:$0xff]  ;;  %v4995_v9 = vld [vmem:[#allocation95_spill] sm:$0xff] }
 0x3cd   : >> { %4983 = vst [vmem:[#allocation24_spill] sm:$0xff] %v4168_v33  ;;  %4984 = vst [vmem:[#allocation27_spill] sm:$0xff] %v4170_v20  ;;  %v1763_v52 = vpop.permute.xlu1 %1762  ;;  %v1761_v10 = vpop.permute.xlu0 %1760  ;;  %v960_v60 = vsel %vm399_vm0, %v4987_v5, %v4988_v34  ;;  %v1212_v63 = vsel %vm533_vm1, %v4981_v29, %v4989_v51  ;;  %v4990_v20 = vld [vmem:[#allocation128_spill] sm:$0xff]  ;;  %v4994_v12 = vld [vmem:[#allocation5_spill] sm:$0xff]  ;;  %v1213_v29 = vsel %vm533_vm1, %v4989_v51, %v4995_v9 }
 0x3ce   : >> { %v1780_v38 = vsel %vm533_vm1, %v1759_v18, %v1761_v10  ;;  %v1781_v55 = vsel %vm533_vm1, %v1761_v10, %v1763_v52  ;;  %v991_v39 = vadd.f32 %v959_v42, %v4994_v12  ;;  %v4217_v18 = vmul.f32 %v4976_v4, %v4979_v19  ;;  %v4996_v5 = vld [vmem:[#allocation8_spill] sm:$0xff] }
 0x3cf   : >> { %v4207_v33 = vadd.f32 %v1780_v38, %v4990_v20  ;;  %v4210_v23 = vadd.f32 %v1781_v55, %v4992_v49  ;;  %2210 = vrot.lane.b32.xlu1 %v2157_v21, %s2502_s27  ;;  %2208 = vrot.lane.b32.xlu0 %v2156_v62, %s2502_s27  ;;  %v1349_v20 = vmul.f32 %v3243_v31, %v4996_v5  ;;  %v4997_v38 = vld [vmem:[#allocation61_spill] sm:$0xff]  ;;  %v4998_v55 = vld [vmem:[#allocation66_spill] sm:$0xff]  ;;  %v4999_v62 = vld [vmem:[#allocation63_spill] sm:$0xff] }
 0x3d0   : >> { %v992_v10 = vadd.f32 %v960_v60, %v674_v17  ;;  %v961_v21 = vsel %vm399_vm0, %v4988_v34, %v4997_v38  ;;  %v962_v42 = vsel %vm399_vm0, %v4997_v38, %v4998_v55  ;;  %v963_v4 = vsel %vm399_vm0, %v4998_v55, %v4999_v62  ;;  %v5003_v38 = vld [vmem:[#allocation131_spill] sm:$0xff] }
 0x3d1   : >> { %4991 = vst [vmem:[#allocation29_spill] sm:$0xff] %v4207_v33  ;;  %4993 = vst [vmem:[#allocation26_spill] sm:$0xff] %v4210_v23  ;;  %v1767_v49 = vpop.permute.xlu1 %1766  ;;  %v1765_v12 = vpop.permute.xlu0 %1764  ;;  %v1244_v23 = vadd.f32 %v1212_v63, %v991_v39  ;;  %v1365_v51 = vadd.f32 %v1349_v20, %v1243_v61  ;;  %v1214_v34 = vsel %vm533_vm1, %v4995_v9, %v5000_v43  ;;  %v5006_v9 = vld [vmem:[#allocation68_spill] sm:$0xff] }
 0x3d2   : >> { %v1782_v33 = vsel %vm533_vm1, %v1763_v52, %v1765_v12  ;;  %v1783_v17 = vsel %vm533_vm1, %v1765_v12, %v1767_v49  ;;  %v1245_v60 = vadd.f32 %v1213_v29, %v992_v10  ;;  %v993_v55 = vadd.f32 %v961_v21, %v4119_v54  ;;  %v5007_v29 = vld [vmem:[#allocation132_spill] sm:$0xff] }
 0x3d3   : >> { %v4239_v35 = vadd.f32 %v1782_v33, %v5001_v56  ;;  %v4242_v44 = vadd.f32 %v1783_v17, %v5003_v38  ;;  %v1215_v61 = vsel %vm533_vm1, %v5000_v43, %v5005_v59  ;;  %v1350_v52 = vmul.f32 %v3240_v14, %v4996_v5  ;;  %v5008_v49 = vld [vmem:[#allocation96_spill] sm:$0xff] }
 0x3d4   : >> { %v1351_v63 = vmul.f32 %v3257_v45, %v4996_v5  ;;  %v994_v39 = vadd.f32 %v962_v42, %v676_v48  ;;  %v964_v56 = vsel %vm399_vm0, %v4999_v62, %v5006_v9  ;;  %v995_v33 = vadd.f32 %v963_v4, %v677_v26 }
 0x3d5   : >> { %5002 = vst [vmem:[#allocation113_spill] sm:$0xff] %v4239_v35  ;;  %5004 = vst [vmem:[#allocation28_spill] sm:$0xff] %v4242_v44  ;;  %v1667_v20 = vadd.f32 %v5007_v29, %v1365_v51  ;;  %v1855_v10 = vpop.permute.xlu1 %1854  ;;  %v1853_v54 = vpop.permute.xlu0 %1852  ;;  %v1246_v21 = vadd.f32 %v1214_v34, %v993_v55  ;;  %v1216_v43 = vsel %vm533_vm1, %v5005_v59, %v5008_v49  ;;  %v5009_v44 = vld [vmem:[#allocation99_spill] sm:$0xff] }
 0x3d6   : >> { %v1366_v12 = vadd.f32 %v1350_v52, %v1244_v23  ;;  %v1888_v17 = vsel %vm533_vm1, %v1853_v54, %v1855_v10  ;;  %v1247_v38 = vadd.f32 %v1215_v61, %v994_v39  ;;  %v1217_v48 = vsel %vm533_vm1, %v5008_v49, %v5009_v44  ;;  %v5010_v23 = vld [vmem:[#allocation65_spill] sm:$0xff]  ;;  %v5012_v52 = vld [vmem:[#allocation134_spill] sm:$0xff] }
 0x3d7   : >> { %v1367_v42 = vadd.f32 %v1351_v63, %v1245_v60  ;;  %v4263_v62 = vadd.f32 %v1888_v17, %v1667_v20  ;;  %v996_v26 = vadd.f32 %v964_v56, %v4149_v50  ;;  %v1352_v4 = vmul.f32 %v3254_v40, %v4996_v5  ;;  %v5011_v61 = vld [vmem:[#allocation133_spill] sm:$0xff]  ;;  %v5013_v49 = vld [vmem:[#allocation98_spill] sm:$0xff] }
 0x3d8   : >> { %v1353_v51 = vmul.f32 %v3271_v2, %v4996_v5  ;;  %v1354_v59 = vmul.f32 %v3268_v22, %v4996_v5  ;;  %v965_v34 = vsel %vm399_vm0, %v5006_v9, %v5010_v23  ;;  %v1248_v55 = vadd.f32 %v1216_v43, %v995_v33  ;;  %v5014_v43 = vld [vmem:[#allocation67_spill] sm:$0xff] }
 0x3d9   : >> { %v1668_v60 = vadd.f32 %v5011_v61, %v1366_v12  ;;  %v1669_v63 = vadd.f32 %v5012_v52, %v1367_v42  ;;  %v1859_v39 = vpop.permute.xlu1 %1858  ;;  %v1857_v50 = vpop.permute.xlu0 %1856  ;;  %v1249_v56 = vadd.f32 %v1217_v48, %v996_v26  ;;  %v1368_v29 = vadd.f32 %v1352_v4, %v1246_v21  ;;  %v5015_v12 = vld [vmem:[#allocation70_spill] sm:$0xff]  ;;  %v5016_v42 = vld [vmem:[#allocation72_spill] sm:$0xff] }
 0x3da   : >> { %v1889_v20 = vsel %vm533_vm1, %v1855_v10, %v1857_v50  ;;  %v1890_v54 = vsel %vm533_vm1, %v1857_v50, %v1859_v39  ;;  %v1218_v17 = vsel %vm533_vm1, %v5009_v44, %v5013_v49  ;;  %v1369_v35 = vadd.f32 %v1353_v51, %v1247_v38  ;;  %v5017_v38 = vld [vmem:[#allocation135_spill] sm:$0xff]  ;;  %v5018_v4 = vld [vmem:[#allocation136_spill] sm:$0xff]  ;;  %v5020_v50 = vld [vmem:[#allocation101_spill] sm:$0xff] }
 0x3db   : >> { %v4282_v28 = vadd.f32 %v1889_v20, %v1668_v60  ;;  %v4284_v9 = vadd.f32 %v1890_v54, %v1669_v63  ;;  %v997_v33 = vadd.f32 %v965_v34, %v4157_v47  ;;  %v966_v48 = vsel %vm399_vm0, %v5015_v12, %v5014_v43  ;;  %v5019_v63 = vld [vmem:[#allocation100_spill] sm:$0xff]  ;;  %v5021_v54 = vld [vmem:[#allocation103_spill] sm:$0xff] }
 0x3dc   : >> { %v4292_v10 = vmul.f32 %v4977_v27, %v4979_v19  ;;  %v1355_v21 = vmul.f32 %v4944_v3, %v4996_v5  ;;  %v967_v44 = vsel %vm399_vm0, %v5014_v43, %v5016_v42  ;;  %v1670_v26 = vadd.f32 %v5017_v38, %v1368_v29  ;;  %v5023_v43 = vld [vmem:[#allocation74_spill] sm:$0xff] }
 0x3dd   : >> { %v1671_v51 = vadd.f32 %v5018_v4, %v1369_v35  ;;  %v1370_v47 = vadd.f32 %v1354_v59, %v1248_v55  ;;  %v1863_v23 = vpop.permute.xlu1 %1862  ;;  %v1861_v34 = vpop.permute.xlu0 %1860  ;;  %v1250_v61 = vadd.f32 %v1218_v17, %v997_v33  ;;  %v1219_v20 = vsel %vm533_vm1, %v5020_v50, %v5019_v63  ;;  %v5022_v17 = vld [vmem:[#allocation69_spill] sm:$0xff] }
 0x3de   : >> { %v1371_v60 = vadd.f32 %v1355_v21, %v1249_v56  ;;  %v1891_v52 = vsel %vm533_vm1, %v1859_v39, %v1861_v34  ;;  %v1892_v27 = vsel %vm533_vm1, %v1861_v34, %v1863_v23  ;;  %v1220_v49 = vsel %vm533_vm1, %v5019_v63, %v5021_v54  ;;  %v5024_v21 = vld [vmem:[#allocation137_spill] sm:$0xff]  ;;  %v5028_v63 = vld [vmem:[#allocation15_spill] sm:$0xff] }
 0x3df   : >> { %v4309_v29 = vadd.f32 %v1891_v52, %v1670_v26  ;;  %v4311_v35 = vadd.f32 %v1892_v27, %v1671_v51  ;;  %v998_v59 = vadd.f32 %v966_v48, %v4161_v46  ;;  %v999_v55 = vadd.f32 %v967_v44, %v4177_v53  ;;  %v5025_v26 = vld [vmem:[#allocation138_spill] sm:$0xff] }
 0x3e0   : >> { %v687_v39 = vmul.f32 %v4978_v36, %v4979_v19  ;;  %v1356_v56 = vmul.f32 %v4947_v41, %v4996_v5  ;;  %v968_v33 = vsel %vm399_vm0, %v5016_v42, %v5022_v17  ;;  %v969_v12 = vsel %vm399_vm0, %v5022_v17, %v5023_v43  ;;  %v5026_v5 = vld [vmem:[#allocation102_spill] sm:$0xff] }
 0x3e1   : >> { %v1672_v38 = vadd.f32 %v5024_v21, %v1370_v47  ;;  %v1673_v46 = vadd.f32 %v5025_v26, %v1371_v60  ;;  %v1867_v48 = vpop.permute.xlu1 %1866  ;;  %v1865_v53 = vpop.permute.xlu0 %1864  ;;  %v1251_v44 = vadd.f32 %v1219_v20, %v998_v59  ;;  %v1252_v4 = vadd.f32 %v1220_v49, %v999_v55  ;;  %v5027_v60 = vld [vmem:[#allocation105_spill] sm:$0xff]  ;;  %v5030_v49 = vld [vmem:[#allocation75_spill] sm:$0xff]  ;;  %v5032_v26 = vld [vmem:[#allocation104_spill] sm:$0xff] }
 0x3e2   : >> { %v1893_v36 = vsel %vm533_vm1, %v1863_v23, %v1865_v53  ;;  %v1894_v19 = vsel %vm533_vm1, %v1865_v53, %v1867_v48  ;;  %v1221_v42 = vsel %vm533_vm1, %v5021_v54, %v5026_v5  ;;  %v1372_v51 = vadd.f32 %v1356_v56, %v1250_v61  ;;  %v5029_v54 = vld [vmem:[#allocation71_spill] sm:$0xff] }
 0x3e3   : >> { %v4332_v34 = vadd.f32 %v1893_v36, %v1672_v38  ;;  %v4334_v52 = vadd.f32 %v1894_v19, %v1673_v46  ;;  %v1000_v47 = vadd.f32 %v968_v33, %v4181_v37  ;;  %v1222_v27 = vsel %vm533_vm1, %v5026_v5, %v5027_v60  ;;  %v5031_v59 = vld [vmem:[#allocation139_spill] sm:$0xff]  ;;  %v5035_v5 = vld [vmem:[#allocation76_spill] sm:$0xff] }
 0x3e4   : >> { %v1357_v23 = vmul.f32 %v3243_v31, %v5028_v63  ;;  %v1358_v50 = vmul.f32 %v3240_v14, %v5028_v63  ;;  %v1001_v20 = vadd.f32 %v969_v12, %v4185_v32  ;;  %v970_v61 = vsel %vm399_vm0, %v5023_v43, %v5029_v54  ;;  %v5033_v12 = vld [vmem:[#allocation108_spill] sm:$0xff] }
 0x3e5   : >> { %v971_v37 = vsel %vm399_vm0, %v5029_v54, %v5030_v49  ;;  %v1674_v55 = vadd.f32 %v5031_v59, %v1372_v51  ;;  %v1871_v56 = vpop.permute.xlu1 %1870  ;;  %v1869_v17 = vpop.permute.xlu0 %1868  ;;  %v1253_v33 = vadd.f32 %v1221_v42, %v1000_v47  ;;  %v1223_v32 = vsel %vm533_vm1, %v5027_v60, %v5032_v26  ;;  %v5036_v51 = vld [vmem:[#allocation140_spill] sm:$0xff]  ;;  %v5037_v60 = vld [vmem:[#allocation141_spill] sm:$0xff] }
 0x3e6   : >> { %v1373_v21 = vadd.f32 %v1357_v23, %v1251_v44  ;;  %v1374_v31 = vadd.f32 %v1358_v50, %v1252_v4  ;;  %v1895_v38 = vsel %vm533_vm1, %v1867_v48, %v1869_v17  ;;  %v1254_v14 = vadd.f32 %v1222_v27, %v1001_v20  ;;  %v5034_v4 = vld [vmem:[#allocation73_spill] sm:$0xff] }
 0x3e7   : >> { %v1224_v43 = vsel %vm533_vm1, %v5032_v26, %v5033_v12  ;;  %v4359_v46 = vadd.f32 %v1895_v38, %v1674_v55  ;;  %v1002_v53 = vadd.f32 %v970_v61, %v4192_v30  ;;  %v1003_v36 = vadd.f32 %v971_v37, %v4217_v18  ;;  %v5038_v37 = vld [vmem:[#allocation106_spill] sm:$0xff]  ;;  %v5039_v55 = vld [vmem:[#allocation109_spill] sm:$0xff]  ;;  %v5041_v26 = vld [vmem:[#allocation143_spill] sm:$0xff] }
 0x3e8   : >> { %v1359_v44 = vmul.f32 %v3257_v45, %v5028_v63  ;;  %v1360_v48 = vmul.f32 %v3254_v40, %v5028_v63  ;;  %v972_v19 = vsel %vm399_vm0, %v5030_v49, %v5034_v4  ;;  %v973_v42 = vsel %vm399_vm0, %v5034_v4, %v5035_v5  ;;  %v5040_v38 = vld [vmem:[#allocation142_spill] sm:$0xff] }
 0x3e9   : >> { %v1675_v47 = vadd.f32 %v5036_v51, %v1373_v21  ;;  %v1676_v30 = vadd.f32 %v5037_v60, %v1374_v31  ;;  %v1875_v27 = vpop.permute.xlu1 %1874  ;;  %v1873_v18 = vpop.permute.xlu0 %1872  ;;  %v1255_v23 = vadd.f32 %v1223_v32, %v1002_v53  ;;  %v1256_v50 = vadd.f32 %v1224_v43, %v1003_v36 }
 0x3ea   : >> { %v1896_v45 = vsel %vm533_vm1, %v1871_v56, %v1873_v18  ;;  %v1897_v40 = vsel %vm533_vm1, %v1873_v18, %v1875_v27  ;;  %v1375_v20 = vadd.f32 %v1359_v44, %v1253_v33  ;;  %v1376_v54 = vadd.f32 %v1360_v48, %v1254_v14 }
 0x3eb   : >> { %v4377_v61 = vadd.f32 %v1896_v45, %v1675_v47  ;;  %v4379_v49 = vadd.f32 %v1897_v40, %v1676_v30  ;;  %v1225_v59 = vsel %vm533_vm1, %v5033_v12, %v5038_v37  ;;  %v1226_v17 = vsel %vm533_vm1, %v5038_v37, %v5039_v55  ;;  %v5045_v37 = vld [vmem:[#allocation147_spill] sm:$0xff] }
 0x3ec   : >> { %v1361_v21 = vmul.f32 %v3271_v2, %v5028_v63  ;;  %v1362_v56 = vmul.f32 %v3268_v22, %v5028_v63  ;;  %v1004_v33 = vadd.f32 %v972_v19, %v4292_v10  ;;  %v1005_v31 = vadd.f32 %v973_v42, %v687_v39  ;;  %v5042_v10 = vld [vmem:[#allocation144_spill] sm:$0xff]  ;;  %v5043_v19 = vld [vmem:[#allocation145_spill] sm:$0xff] }
 0x3ed   : >> { %v1677_v14 = vadd.f32 %v5040_v38, %v1375_v20  ;;  %v1678_v32 = vadd.f32 %v5041_v26, %v1376_v54  ;;  %v1879_v43 = vpop.permute.xlu1 %1878  ;;  %v1877_v53 = vpop.permute.xlu0 %1876  ;;  %v1363_v51 = vmul.f32 %v4944_v3, %v5028_v63  ;;  %v1364_v47 = vmul.f32 %v4947_v41, %v5028_v63  ;;  %v5044_v20 = vld [vmem:[#allocation146_spill] sm:$0xff] }
 0x3ee   : >> { %v1377_v12 = vadd.f32 %v1361_v21, %v1255_v23  ;;  %v1378_v36 = vadd.f32 %v1362_v56, %v1256_v50  ;;  %v1898_v44 = vsel %vm533_vm1, %v1875_v27, %v1877_v53  ;;  %v1899_v48 = vsel %vm533_vm1, %v1877_v53, %v1879_v43 }
 0x3ef   : >> { %v1257_v4 = vadd.f32 %v1225_v59, %v1004_v33  ;;  %v1258_v2 = vadd.f32 %v1226_v17, %v1005_v31  ;;  %v4396_v5 = vadd.f32 %v1898_v44, %v1677_v14  ;;  %v4398_v22 = vadd.f32 %v1899_v48, %v1678_v32 }
 0x3f0   : >> { %v1679_v39 = vadd.f32 %v5042_v10, %v1377_v12  ;;  %v1680_v42 = vadd.f32 %v5043_v19, %v1378_v36 }
 0x3f1   : >> { %v1883_v60 = vpop.permute.xlu1 %1882  ;;  %v1881_v30 = vpop.permute.xlu0 %1880  ;;  %v1379_v23 = vadd.f32 %v1363_v51, %v1257_v4  ;;  %v1380_v50 = vadd.f32 %v1364_v47, %v1258_v2 }
 0x3f2   : >> { %v1900_v27 = vsel %vm533_vm1, %v1879_v43, %v1881_v30  ;;  %v1901_v18 = vsel %vm533_vm1, %v1881_v30, %v1883_v60 }
 0x3f3   : >> { %v4408_v45 = vadd.f32 %v1900_v27, %v1679_v39  ;;  %v4410_v40 = vadd.f32 %v1901_v18, %v1680_v42  ;;  %v1681_v54 = vadd.f32 %v5044_v20, %v1379_v23  ;;  %v1682_v59 = vadd.f32 %v5045_v37, %v1380_v50 }
 0x3f4   : >> { %v1981_v42 = vmul.f32 %v3666_v8, %v4932_v13  ;;  %v1982_v27 = vmul.f32 %v3663_v7, %v4932_v13  ;;  %v1983_v23 = vmul.f32 %v3678_v11, %v4932_v13 }
 0x3f5   : >> { %v1887_v3 = vpop.permute.xlu1 %1886  ;;  %v1885_v55 = vpop.permute.xlu0 %1884 }
 0x3f6   : >> { %v1902_v41 = vsel %vm533_vm1, %v1883_v60, %v1885_v55  ;;  %v1903_v63 = vsel %vm533_vm1, %v1885_v55, %v1887_v3  ;;  %v1997_v30 = vadd.f32 %v1981_v42, %v4263_v62  ;;  %v1998_v37 = vadd.f32 %v1982_v27, %v4282_v28 }
 0x3f7   : >> { %v4416_v17 = vadd.f32 %v1902_v41, %v1681_v54  ;;  %v4418_v21 = vadd.f32 %v1903_v63, %v1682_v59  ;;  %v1999_v62 = vadd.f32 %v1983_v23, %v4284_v9  ;;  %v1984_v63 = vmul.f32 %v3675_v58, %v4932_v13 }
 0x3f9   : >> { %v2059_v56 = vpop.permute.xlu1 %2058  ;;  %v2057_v33 = vpop.permute.xlu0 %2056  ;;  %v2000_v27 = vadd.f32 %v1984_v63, %v4309_v29 }
 0x3fa   : >> { %v2092_v60 = vsel %vm399_vm0, %v2057_v33, %v2059_v56  ;;  %v1985_v33 = vmul.f32 %v3704_v6, %v4932_v13 }
 0x3fb   : >> { %v2124_v18 = vadd.f32 %v2092_v60, %v1997_v30 }
 0x3fd   : >> { %v2063_v31 = vpop.permute.xlu1 %2062  ;;  %v2061_v38 = vpop.permute.xlu0 %2060 }
 0x3fe   : >> { %v2093_v50 = vsel %vm399_vm0, %v2059_v56, %v2061_v38  ;;  %v2094_v59 = vsel %vm399_vm0, %v2061_v38, %v2063_v31  ;;  %v1986_v56 = vmul.f32 %v3701_v1, %v4932_v13 }
 0x3ff   : >> { %v2125_v41 = vadd.f32 %v2093_v50, %v1998_v37  ;;  %v2126_v28 = vadd.f32 %v2094_v59, %v1999_v62 }
 0x401   : >> { %v2067_v14 = vpop.permute.xlu1 %2066  ;;  %v2065_v26 = vpop.permute.xlu0 %2064 }
 0x402   : >> { %v2095_v38 = vsel %vm399_vm0, %v2063_v31, %v2065_v26  ;;  %v2096_v42 = vsel %vm399_vm0, %v2065_v26, %v2067_v14 }
 0x405   : >> { %v4420_v32 = vpop.permute.xlu1 %2070  ;;  %v2069_v43 = vpop.permute.xlu0 %2068 }
 0x406   : >> { %v2097_v29 = vsel %vm399_vm0, %v2067_v14, %v2069_v43 }
 0x409   : >> { %v4422_v53 = vpop.permute.xlu1 %2074  ;;  %v4424_v12 = vpop.permute.xlu0 %2072 }
 0x40d   : >> { %v4426_v36 = vpop.permute.xlu1 %2078  ;;  %v4428_v44 = vpop.permute.xlu0 %2076 }
 0x411   : >> { %v4430_v48 = vpop.permute.xlu1 %2082  ;;  %v4432_v4 = vpop.permute.xlu0 %2080 }
 0x415   : >> { %v4434_v2 = vpop.permute.xlu1 %2086  ;;  %v4436_v10 = vpop.permute.xlu0 %2084 }
 0x419   : >> { %v4438_v39 = vpop.permute.xlu1 %2090  ;;  %v4440_v19 = vpop.permute.xlu0 %2088 }
 0x42a   : >> { %v4444_v51 = vpop.permute.xlu1 %2283  ;;  %v4446_v47 = vpop.permute.xlu0 %2278 }
 0x42e   : >> { %v2179_v20 = vpop.permute.xlu1 %2178  ;;  %v2177_v54 = vpop.permute.xlu0 %2176 }
 0x42f   : >> { %v2212_v3 = vsel %vm533_vm1, %v2177_v54, %v2179_v20  ;;  %v1987_v54 = vmul.f32 %v3752_v57, %v4932_v13 }
 0x430   : >> { %v2244_v55 = vadd.f32 %v2212_v3, %v2124_v18  ;;  %v2001_v18 = vadd.f32 %v1985_v33, %v4311_v35  ;;  %v1988_v35 = vmul.f32 %v3749_v25, %v4932_v13  ;;  %v2002_v33 = vadd.f32 %v1986_v56, %v4332_v34 }
 0x431   : >> { %v2099_v34 = vsel %vm399_vm0, %v4420_v32, %v4424_v12 }
 0x432   : >> { %v2260_v9 = vmax.f32 %v4011_v24, %v2244_v55  ;;  %v2183_v60 = vpop.permute.xlu1 %2182  ;;  %v2181_v30 = vpop.permute.xlu0 %2180  ;;  %v2127_v24 = vadd.f32 %v2095_v38, %v2000_v27  ;;  %v2128_v26 = vadd.f32 %v2096_v42, %v2001_v18  ;;  %v5047_v18 = vld [vmem:[#allocation19_spill] sm:$0xff] }
 0x433   : >> { %v2213_v23 = vsel %vm533_vm1, %v2179_v20, %v2181_v30  ;;  %v2214_v50 = vsel %vm533_vm1, %v2181_v30, %v2183_v60  ;;  %v2098_v20 = vsel %vm399_vm0, %v2069_v43, %v4420_v32  ;;  %v5046_v30 = vld [vmem:[#allocation18_spill] sm:$0xff] }
 0x434   : >> { %v2286_v37 = vadd.f32 %v4446_v47, %v2260_v9  ;;  %v2245_v31 = vadd.f32 %v2213_v23, %v2125_v41  ;;  %v2246_v59 = vadd.f32 %v2214_v50, %v2126_v28  ;;  %v2003_v28 = vadd.f32 %v1987_v54, %v4334_v52 }
 0x435   : >> { %v1989_v52 = vmul.f32 %v3666_v8, %v4958_v0 }
 0x436   : >> { %v2302_v3 = vmax.f32 %v2286_v37, 0.0  ;;  %v2261_v62 = vmax.f32 %v4034_v15, %v2245_v31  ;;  %v2262_v55 = vmax.f32 %v4036_v16, %v2246_v59  ;;  %v2187_v41 = vpop.permute.xlu1 %2186  ;;  %v2185_v63 = vpop.permute.xlu0 %2184  ;;  %v2129_v16 = vadd.f32 %v2097_v29, %v2002_v33 }
 0x437   : >> { %v2215_v38 = vsel %vm533_vm1, %v2183_v60, %v2185_v63  ;;  %v2216_v14 = vsel %vm533_vm1, %v2185_v63, %v2187_v41  ;;  %v2130_v9 = vadd.f32 %v2098_v20, %v2003_v28  ;;  %v2004_v37 = vadd.f32 %v1988_v35, %v4359_v46 }
 0x438   : >> { %2321 = vst [vmem:[%s4477_s19] sm:$0xff] %v2302_v3  ;;  %v2287_v13 = vadd.f32 %v4446_v47, %v2261_v62  ;;  %v2288_v43 = vadd.f32 %v4446_v47, %v2262_v55  ;;  %v2247_v42 = vadd.f32 %v2215_v38, %v2127_v24  ;;  %v2248_v15 = vadd.f32 %v2216_v14, %v2128_v26  ;;  %v5048_v62 = vld [vmem:[#allocation21_spill] sm:$0xff] }
 0x439   : >> { %v1990_v31 = vmul.f32 %v3663_v7, %v4958_v0  ;;  %v2131_v29 = vadd.f32 %v2099_v34, %v2004_v37  ;;  %v2100_v46 = vsel %vm399_vm0, %v4422_v53, %v4428_v44  ;;  %v2101_v7 = vsel %vm399_vm0, %v4428_v44, %v4426_v36  ;;  %v5050_v34 = vld [vmem:[#allocation23_spill] sm:$0xff] }
 0x43a   : >> { %v2303_v56 = vmax.f32 %v2287_v13, 0.0  ;;  %v2304_v60 = vmax.f32 %v2288_v43, 0.0  ;;  %v2263_v27 = vmax.f32 %v5046_v30, %v2247_v42  ;;  %v2264_v23 = vmax.f32 %v5047_v18, %v2248_v15  ;;  %v2191_v50 = vpop.permute.xlu1 %2190  ;;  %v2189_v54 = vpop.permute.xlu0 %2188 }
 0x43b   : >> { %v2217_v59 = vsel %vm533_vm1, %v2187_v41, %v2189_v54  ;;  %v2218_v32 = vsel %vm533_vm1, %v2189_v54, %v2191_v50  ;;  %v1991_v35 = vmul.f32 %v3678_v11, %v4958_v0  ;;  %v5049_v41 = vld [vmem:[#allocation20_spill] sm:$0xff]  ;;  %v2005_v38 = vadd.f32 %v1989_v52, %v4377_v61 }
 0x43c   : >> { %2322 = vst [vmem:[%s4477_s19 + $0x8] sm:$0xff] %v2303_v56  ;;  %2323 = vst [vmem:[%s4477_s19 + $0x10] sm:$0xff] %v2304_v60  ;;  %v2289_v8 = vadd.f32 %v4446_v47, %v2263_v27  ;;  %v2290_v12 = vadd.f32 %v4446_v47, %v2264_v23  ;;  %v2249_v24 = vadd.f32 %v2217_v59, %v2129_v16  ;;  %v5051_v59 = vld [vmem:[#allocation22_spill] sm:$0xff] }
 0x43d   : >> { %v2250_v26 = vadd.f32 %v2218_v32, %v2130_v9  ;;  %v2006_v14 = vadd.f32 %v1990_v31, %v4379_v49  ;;  %v1992_v53 = vmul.f32 %v3675_v58, %v4958_v0  ;;  %v1993_v11 = vmul.f32 %v3704_v6, %v4958_v0 }
 0x43e   : >> { %v2305_v20 = vmax.f32 %v2289_v8, 0.0  ;;  %v2306_v3 = vmax.f32 %v2290_v12, 0.0  ;;  %v2265_v55 = vmax.f32 %v5048_v62, %v2249_v24  ;;  %v2195_v33 = vpop.permute.xlu1 %2194  ;;  %v2193_v28 = vpop.permute.xlu0 %2192  ;;  %v2132_v15 = vadd.f32 %v2100_v46, %v2005_v38 }
 0x43f   : >> { %v2266_v63 = vmax.f32 %v5049_v41, %v2250_v26  ;;  %v2219_v44 = vsel %vm533_vm1, %v2191_v50, %v2193_v28  ;;  %v2133_v61 = vadd.f32 %v2101_v7, %v2006_v14  ;;  %v2102_v58 = vsel %vm399_vm0, %v4426_v36, %v4432_v4 }
 0x440   : >> { %2324 = vst [vmem:[%s4477_s19 + $0x18] sm:$0xff] %v2305_v20  ;;  %2325 = vst [vmem:[%s4477_s19 + $0x20] sm:$0xff] %v2306_v3  ;;  %v2291_v13 = vadd.f32 %v4446_v47, %v2265_v55  ;;  %v2251_v42 = vadd.f32 %v2219_v44, %v2131_v29  ;;  %v1994_v49 = vmul.f32 %v3701_v1, %v4958_v0  ;;  %v5053_v55 = vld [vmem:[#allocation24_spill] sm:$0xff] }
 0x441   : >> { %v2292_v43 = vadd.f32 %v4446_v47, %v2266_v63  ;;  %v2103_v6 = vsel %vm399_vm0, %v4432_v4, %v4430_v48  ;;  %v2007_v30 = vadd.f32 %v1991_v35, %v4396_v5  ;;  %v2008_v27 = vadd.f32 %v1992_v53, %v4398_v22  ;;  %v5054_v63 = vld [vmem:[#allocation27_spill] sm:$0xff] }
 0x442   : >> { %v2307_v16 = vmax.f32 %v2291_v13, 0.0  ;;  %v2267_v52 = vmax.f32 %v5050_v34, %v2251_v42  ;;  %v2199_v56 = vpop.permute.xlu1 %2198  ;;  %v2197_v60 = vpop.permute.xlu0 %2196  ;;  %v1995_v1 = vmul.f32 %v3752_v57, %v4958_v0  ;;  %v2104_v5 = vsel %vm399_vm0, %v4430_v48, %v4436_v10 }
 0x443   : >> { %v2308_v9 = vmax.f32 %v2292_v43, 0.0  ;;  %v2220_v18 = vsel %vm533_vm1, %v2195_v33, %v2197_v60  ;;  %v2221_v36 = vsel %vm533_vm1, %v2197_v60, %v2199_v56  ;;  %v2134_v54 = vadd.f32 %v2102_v58, %v2007_v30  ;;  %v5056_v58 = vld [vmem:[#allocation26_spill] sm:$0xff] }
 0x444   : >> { %2326 = vst [vmem:[%s4477_s19 + $0x28] sm:$0xff] %v2307_v16  ;;  %v2293_v4 = vadd.f32 %v4446_v47, %v2267_v52  ;;  %v2252_v23 = vadd.f32 %v2220_v18, %v2132_v15  ;;  %v2253_v50 = vadd.f32 %v2221_v36, %v2133_v61  ;;  %v2135_v37 = vadd.f32 %v2103_v6, %v2008_v27  ;;  %v5052_v47 = vld [vmem:[#allocation25_spill] sm:$0xff] }
 0x445   : >> { %2327 = vst [vmem:[%s4477_s19 + $0x30] sm:$0xff] %v2308_v9  ;;  %v1996_v22 = vmul.f32 %v3749_v25, %v4958_v0  ;;  %v2105_v57 = vsel %vm399_vm0, %v4436_v10, %v4434_v2  ;;  %v2009_v26 = vadd.f32 %v1993_v11, %v4408_v45  ;;  %v2010_v29 = vadd.f32 %v1994_v49, %v4410_v40  ;;  %v5055_v61 = vld [vmem:[#allocation29_spill] sm:$0xff] }
 0x446   : >> { %v2309_v31 = vmax.f32 %v2293_v4, 0.0  ;;  %v2268_v32 = vmax.f32 %v5051_v59, %v2252_v23  ;;  %v2269_v8 = vmax.f32 %v5052_v47, %v2253_v50  ;;  %v2203_v12 = vpop.permute.xlu1 %2202  ;;  %v2201_v24 = vpop.permute.xlu0 %2200  ;;  %v2106_v45 = vsel %vm399_vm0, %v4434_v2, %v4440_v19  ;;  %v5057_v36 = vld [vmem:[#allocation113_spill] sm:$0xff]  ;;  %v5058_v4 = vld [vmem:[#allocation28_spill] sm:$0xff] }
 0x447   : >> { %v2222_v48 = vsel %vm533_vm1, %v2199_v56, %v2201_v24  ;;  %v2223_v46 = vsel %vm533_vm1, %v2201_v24, %v2203_v12  ;;  %v2136_v35 = vadd.f32 %v2104_v5, %v2009_v26  ;;  %v2137_v20 = vadd.f32 %v2105_v57, %v2010_v29 }
 0x448   : >> { %2328 = vst [vmem:[%s4477_s19 + $0x38] sm:$0xff] %v2309_v31  ;;  %v2294_v25 = vadd.f32 %v4444_v51, %v2268_v32  ;;  %v2295_v0 = vadd.f32 %v4444_v51, %v2269_v8  ;;  %v2254_v10 = vadd.f32 %v2222_v48, %v2134_v54  ;;  %v2255_v7 = vadd.f32 %v2223_v46, %v2135_v37 }
 0x449   : >> { %v2107_v40 = vsel %vm399_vm0, %v4440_v19, %v4438_v39  ;;  %v2011_v14 = vadd.f32 %v1995_v1, %v4416_v17  ;;  %v2012_v53 = vadd.f32 %v1996_v22, %v4418_v21 }
 0x44a   : >> { %v2310_v3 = vmax.f32 %v2294_v25, 0.0  ;;  %v2311_v62 = vmax.f32 %v2295_v0, 0.0  ;;  %v2270_v41 = vmax.f32 %v5053_v55, %v2254_v10  ;;  %v2271_v33 = vmax.f32 %v5054_v63, %v2255_v7  ;;  %v2207_v28 = vpop.permute.xlu1 %2206  ;;  %v2205_v38 = vpop.permute.xlu0 %2204 }
 0x44b   : >> { %v2224_v44 = vsel %vm533_vm1, %v2203_v12, %v2205_v38  ;;  %v2225_v2 = vsel %vm533_vm1, %v2205_v38, %v2207_v28  ;;  %v2138_v43 = vadd.f32 %v2106_v45, %v2011_v14  ;;  %v2139_v42 = vadd.f32 %v2107_v40, %v2012_v53 }
 0x44c   : >> { %2329 = vst [vmem:[%s4477_s19 + $0x40] sm:$0xff] %v2310_v3  ;;  %2330 = vst [vmem:[%s4477_s19 + $0x48] sm:$0xff] %v2311_v62  ;;  %v2296_v39 = vadd.f32 %v4444_v51, %v2270_v41  ;;  %v2297_v19 = vadd.f32 %v4444_v51, %v2271_v33  ;;  %v2256_v11 = vadd.f32 %v2224_v44, %v2136_v35 }
 0x44d   : >> { %v2257_v13 = vadd.f32 %v2225_v2, %v2137_v20 }
 0x44e   : >> { %v2312_v15 = vmax.f32 %v2296_v39, 0.0  ;;  %v2313_v17 = vmax.f32 %v2297_v19, 0.0  ;;  %v2272_v21 = vmax.f32 %v5055_v61, %v2256_v11  ;;  %v2211_v6 = vpop.permute.xlu1 %2210  ;;  %v2209_v16 = vpop.permute.xlu0 %2208 }
 0x44f   : >> { %v2273_v49 = vmax.f32 %v5056_v58, %v2257_v13  ;;  %v2226_v9 = vsel %vm533_vm1, %v2207_v28, %v2209_v16  ;;  %v2227_v34 = vsel %vm533_vm1, %v2209_v16, %v2211_v6 }
 0x450   : >> { %2331 = vst [vmem:[%s4477_s19 + $0x50] sm:$0xff] %v2312_v15  ;;  %2332 = vst [vmem:[%s4477_s19 + $0x58] sm:$0xff] %v2313_v17  ;;  %v2298_v52 = vadd.f32 %v4444_v51, %v2272_v21  ;;  %v2258_v60 = vadd.f32 %v2226_v9, %v2138_v43  ;;  %v2259_v30 = vadd.f32 %v2227_v34, %v2139_v42 }
 0x451   : >> { %v2299_v56 = vadd.f32 %v4444_v51, %v2273_v49 }
 0x452   : >> { %v2314_v27 = vmax.f32 %v2298_v52, 0.0  ;;  %v2274_v1 = vmax.f32 %v5057_v36, %v2258_v60  ;;  %v2275_v23 = vmax.f32 %v5058_v4, %v2259_v30  ;;  %174 = sbr.rel (!%p172_p4) target bundleno = 17 (0x11), region = 82 }
 0x453   : >> { %v2315_v18 = vmax.f32 %v2299_v56, 0.0 }
 0x454   : >> { %2333 = vst [vmem:[%s4477_s19 + $0x60] sm:$0xff] %v2314_v27  ;;  %v2300_v50 = vadd.f32 %v4444_v51, %v2274_v1  ;;  %v2301_v54 = vadd.f32 %v4444_v51, %v2275_v23 }
 0x455   : >> { %2334 = vst [vmem:[%s4477_s19 + $0x68] sm:$0xff] %v2315_v18 }
 0x456   : >> { %v2316_v37 = vmax.f32 %v2300_v50, 0.0  ;;  %v2317_v5 = vmax.f32 %v2301_v54, 0.0 }
 0x458   : >> { %2335 = vst [vmem:[%s4477_s19 + $0x70] sm:$0xff] %v2316_v37  ;;  %2336 = vst [vmem:[%s4477_s19 + $0x78] sm:$0xff] %v2317_v5 }
 0x459 PF: > { %s13_s12 = sadd.s32 1, %s2494_s12  }
 0x45a   : > { %p10_p5 = scmp.ge.s32.totalorder %s13_s12, 4  }
 0x45c   :  { %12 = sbr.rel (!%p10_p5) target bundleno = 1 (0x1), region = 93 }

// kernel: audio_cnn_forward.6
= control target key start
LH: loop header
LB: loop body
LE: loop exit
PB: predicated region body
PF: predicated region fallthrough
CT: control target
= control target key end

     0   :  { %s2021_s12 = smov 0   ;;  %s2742_s0 = inlined_call_operand.vmem [shape: f32[2,1056,514], index: 0, kind: input, shape index: {}]   ;;  %s2743_s1 = inlined_call_operand.vmem [shape: f32[3,64,64], index: 1, kind: input, shape index: {}]   ;;  %s2744_s2 = inlined_call_operand.vmem [shape: f32[32,1], index: 2, kind: input, shape index: {}]   ;;  %s2745_s3 = inlined_call_operand.vmem [shape: f32[2,32,32,512], index: 3, kind: output, shape index: {}]  }
   0x1 LB: > { %s1517_s13 = sadd.s32 4294967295, %s1991_s12   ;;  %p1521_p0 = scmp.ge.s32.totalorder %s1991_s12, 1  ;;  %s1991_s12 = sphi %s2021_s12, %s13_s12  }
   0x2   : > { %p137_p1 = scmp.lt.s32.totalorder %s1991_s12, 3 }
   0x4   : > { %p138_p2 = pnand %p1521_p0, %p137_p1 }
   0x5   : > { %p161_p3 = scmp.lt.s32.totalorder (!%p138_p2), %s1517_s13, 1  ;;  %v2032_v0 = vld [vmem:[%s2744_s2] sm:$0xff] (!%p138_p2)  ;;  %v2037_v1 = vld [vmem:[%s2744_s2 + $0x8] sm:$0xff] (!%p138_p2)  ;;  %v2042_v2 = vld [vmem:[%s2744_s2 + $0x10] sm:$0xff] (!%p138_p2)  ;;  %s2059_s30 = smov (!%p138_p2), 0  }
   0x6   : > { %141 = sbr.rel (%p138_p2) target bundleno = 498 (0x1f2), region = 32  ;;  %v2047_v3 = vld [vmem:[%s2744_s2 + $0x18] sm:$0xff] (!%p138_p2) }
   0xd   : > { %s2760_s13 = smov (!%p161_p3, %s1517_s13), 1 }
   0xe   : > { %s1758_s22 = smul.u32 5280, %s2760_s13  ;;  %s1595_s23 = sshll.u32 %s2760_s13, 12 }
   0xf   : > { %s2052_s26 = scalar_lea.vmem %s2745_s3, %s1595_s23 }
  0x10   : > { %s2057_s29 = scalar_lea.vmem %s2742_s0, %s1758_s22 }
  0x11 LB: >> { %s1525_s4 = sshll.u32 %s1995_s30, 5  ;;  %s1997_s8 = smov 127   ;;  %v1998_v63 = vmov 0.0   ;;  %vm364_vm0 = vcmask 1039360   ;;  %vm429_vm1 = vcmask 523264   ;;  %vm1019_vm2 = vcmask 1031168   ;;  %s1995_s30 = sphi %s2059_s30, %s180_s30  }
  0x12   : >> { %s182_s5 = sshra.s32 %s1525_s4, 3  ;;  %518 = vmatprep.mubr.f32.mxu0 %v1998_v63  ;;  %631 = vmatprep.mubr.f32.mxu1 %v1998_v63  ;;  %s1999_s9 = smov 126  }
  0x13   : >> { %s1596_s6 = smul.u32 40, %s182_s5  ;;  %s1597_s13 = sshll.u32 %s1995_s30, 7 }
  0x14   : >> { %s2713_s14 = scalar_lea.vmem %s2052_s26, %s1597_s13  ;;  %s180_s30 = sadd.s32 1, %s1995_s30  }
  0x15   : >> { %s2066_s7 = scalar_lea.vmem %s2057_s29, %s1596_s6  ;;  %p177_p4 = scmp.ge.s32.totalorder %s180_s30, 32  }
  0x16   : >> { %v2069_v4 = vld [vmem:[%s2066_s7 + $0x30] sm:$0xff]  ;;  %v2072_v5 = vld [vmem:[%s2066_s7 + $0x38] sm:$0xff]  ;;  %v2075_v6 = vld [vmem:[%s2066_s7 + $0x8] sm:$0xff] }
  0x17   : >> { %v2079_v7 = vpack.i.bf16 %v2072_v5, %v2069_v4  ;;  %v2082_v8 = vld [vmem:[%s2066_s7 + $0x10] sm:$0xff]  ;;  %v2085_v9 = vld [vmem:[%s2066_s7 + $0x40] sm:$0xff]  ;;  %v228_v10 = vld [vmem:[%s2066_s7 + $0x48] sm:$0xff] }
  0x18   : >> { %v2092_v12 = vpack.i.bf16 %v2082_v8, %v2075_v6  ;;  %v2095_v13 = vld [vmem:[%s2066_s7 + $0x18] sm:$0xff]  ;;  %v227_v14 = vld [vmem:[%s2066_s7 + $0x20] sm:$0xff]  ;;  %v2101_v15 = vpack.i.bf16 %v228_v10, %v2085_v9  ;;  %v2118_v20 = vld [vmem:[%s2066_s7 + $0x28] sm:$0xff] }
  0x19   : >> { %1790 = vrot.lane.b32.xlu1 %v2079_v7, %s1997_s8  ;;  %v2106_v16 = vpack.i.bf16 %v227_v14, %v2095_v13  ;;  %v2109_v17 = vld [vmem:[%s2066_s7 + $0x58] sm:$0xff]  ;;  %v2112_v18 = vld [vmem:[%s2066_s7 + $0x60] sm:$0xff]  ;;  %v2136_v24 = vld [vmem:[%s2066_s7 + $0x88] sm:$0xff] }
  0x1a   : >> { %1780 = vrot.lane.b32.xlu0 %v2092_v12, %s1997_s8  ;;  %v2115_v19 = vld [vmem:[%s2066_s7] sm:$0xff]  ;;  %v2124_v21 = vpack.i.bf16 %v2112_v18, %v2109_v17  ;;  %v2139_v25 = vld [vmem:[%s2066_s7 + $0x68] sm:$0xff]  ;;  %v229_v26 = vld [vmem:[%s2066_s7 + $0x70] sm:$0xff] }
  0x1b   : >> { %v2130_v22 = vpack.i.bf16 %v2118_v20, %v2115_v19  ;;  %v2133_v23 = vld [vmem:[%s2066_s7 + $0x80] sm:$0xff]  ;;  %v2151_v28 = vpack.i.bf16 %v229_v26, %v2139_v25  ;;  %v2154_v29 = vld [vmem:[%s2066_s7 + $0x50] sm:$0xff]  ;;  %v2157_v30 = vld [vmem:[%s2066_s7 + $0x78] sm:$0xff]  ;;  %v1630_v26 = vpack.c.bf16 %v2069_v4, %v2075_v6 }
  0x1c   : >> { %v2146_v27 = vpack.i.bf16 %v2136_v24, %v2133_v23  ;;  %v2160_v31 = vld [vmem:[%s2066_s7 + $0x90] sm:$0xff]  ;;  %v230_v32 = vld [vmem:[%s2066_s7 + $0x98] sm:$0xff]  ;;  %v2167_v33 = vpack.i.bf16 %v2157_v30, %v2154_v29  ;;  %v231_v36 = vld [vmem:[%s2066_s7 + $0xc0] sm:$0xff]  ;;  %v2746_v6 = vpack.c.bf16 %v2133_v23, %v2109_v17 }
  0x1d   : >> { %1795 = vrot.lane.b32.xlu1 %v2101_v15, %s1997_s8  ;;  %v2172_v34 = vpack.i.bf16 %v230_v32, %v2160_v31  ;;  %v2175_v35 = vld [vmem:[%s2066_s7 + $0xb8] sm:$0xff]  ;;  %v2179_v37 = vld [vmem:[%s2066_s7 + $0xa8] sm:$0xff]  ;;  %v2182_v38 = vld [vmem:[%s2066_s7 + $0xb0] sm:$0xff]  ;;  %v1646_v32 = vpack.c.bf16 %v2085_v9, %v2095_v13  ;;  %v2747_v9 = vpack.c.bf16 %v2072_v5, %v2082_v8  ;;  %v2748_v17 = vpack.c.bf16 %v2160_v31, %v2139_v25 }
  0x1e   : >> { %1785 = vrot.lane.b32.xlu0 %v2106_v16, %s1997_s8  ;;  %v2187_v39 = vpack.i.bf16 %v231_v36, %v2175_v35  ;;  %v2193_v40 = vpack.i.bf16 %v2182_v38, %v2179_v37  ;;  %v2196_v41 = vld [vmem:[%s2066_s7 + $0xe0] sm:$0xff]  ;;  %v232_v42 = vld [vmem:[%s2066_s7 + $0xe8] sm:$0xff]  ;;  %v2200_v43 = vld [vmem:[%s2066_s7 + $0xd0] sm:$0xff]  ;;  %v1632_v36 = vpack.c.bf16 %v2118_v20, %v2115_v19 }
  0x1f   : >> { %v2203_v44 = vld [vmem:[%s2066_s7 + $0xd8] sm:$0xff]  ;;  %v1844_v45 = vpack.i.bf16 %v232_v42, %v2196_v41  ;;  %v2216_v48 = vld [vmem:[%s2066_s7 + $0x100] sm:$0xff]  ;;  %v2222_v50 = vld [vmem:[%s2066_s7 + $0xc8] sm:$0xff]  ;;  %v2750_v31 = vpack.c.bf16 %v2200_v43, %v2179_v37 }
  0x20   : >> { %v1839_v46 = vpack.i.bf16 %v2203_v44, %v2200_v43  ;;  %v2213_v47 = vld [vmem:[%s2066_s7 + $0xf8] sm:$0xff]  ;;  %v2219_v49 = vld [vmem:[%s2066_s7 + $0xa0] sm:$0xff]  ;;  %v2234_v54 = vld [vmem:[%s2066_s7 + $0x128] sm:$0xff] }
  0x21   : >> { %1805 = vrot.lane.b32.xlu1 %v2124_v21, %s1997_s8  ;;  %v1854_v51 = vpack.i.bf16 %v2216_v48, %v2213_v47  ;;  %v1849_v52 = vpack.i.bf16 %v2222_v50, %v2219_v49  ;;  %v2231_v53 = vld [vmem:[%s2066_s7 + $0x120] sm:$0xff]  ;;  %v2237_v55 = vld [vmem:[%s2066_s7 + $0x108] sm:$0xff]  ;;  %v233_v56 = vld [vmem:[%s2066_s7 + $0x110] sm:$0xff]  ;;  %v2753_v43 = vpack.c.bf16 %v2222_v50, %v2219_v49 }
  0x22   : >> { %1800 = vrot.lane.b32.xlu0 %v2130_v22, %s1997_s8  ;;  %v1864_v57 = vpack.i.bf16 %v2234_v54, %v2231_v53  ;;  %v1859_v58 = vpack.i.bf16 %v233_v56, %v2237_v55  ;;  %v2246_v59 = vld [vmem:[%s2066_s7 + $0xf0] sm:$0xff]  ;;  %v2249_v60 = vld [vmem:[%s2066_s7 + $0x118] sm:$0xff]  ;;  %v1528_v4 = vld [vmem:[%s2743_s1 + $0x48] sm:$0xff] }
  0x23   : >> { %v2252_v61 = vld [vmem:[%s2066_s7 + $0x130] sm:$0xff]  ;;  %v234_v62 = vld [vmem:[%s2066_s7 + $0x138] sm:$0xff]  ;;  %v1874_v10 = vpack.i.bf16 %v2249_v60, %v2246_v59 }
  0x24   : >> { %v1869_v14 = vpack.i.bf16 %v234_v62, %v2252_v61  ;;  %v1530_v37 = vld [vmem:[%s2743_s1 + $0x58] sm:$0xff]  ;;  %v2756_v49 = vpack.c.bf16 %v2252_v61, %v2237_v55 }
  0x25   : >> { %1815 = vrot.lane.b32.xlu1 %v2146_v27, %s1997_s8 }
  0x26   : >> { %1810 = vrot.lane.b32.xlu0 %v2151_v28, %s1997_s8 }
  0x29   : >> { %1825 = vrot.lane.b32.xlu1 %v2167_v33, %s1997_s8 }
  0x2a   : >> { %1820 = vrot.lane.b32.xlu0 %v2172_v34, %s1997_s8 }
  0x2d   : >> { %1835 = vrot.lane.b32.xlu1 %v2187_v39, %s1997_s8 }
  0x2e   : >> { %1830 = vrot.lane.b32.xlu0 %v2193_v40, %s1997_s8 }
  0x31   : >> { %1845 = vrot.lane.b32.xlu1 %v1844_v45, %s1997_s8 }
  0x32   : >> { %1840 = vrot.lane.b32.xlu0 %v1839_v46, %s1997_s8 }
  0x35   : >> { %1855 = vrot.lane.b32.xlu1 %v1854_v51, %s1997_s8 }
  0x36   : >> { %1850 = vrot.lane.b32.xlu0 %v1849_v52, %s1997_s8 }
  0x39   : >> { %1865 = vrot.lane.b32.xlu1 %v1864_v57, %s1997_s8 }
  0x3a   : >> { %1860 = vrot.lane.b32.xlu0 %v1859_v58, %s1997_s8 }
  0x3d   : >> { %1875 = vrot.lane.b32.xlu1 %v1874_v10, %s1997_s8 }
  0x3e   : >> { %1870 = vrot.lane.b32.xlu0 %v1869_v14, %s1997_s8 }
  0x41   : >> { %1885 = vrot.lane.b32.xlu1 %v2106_v16, %s1999_s9 }
  0x42   : >> { %1880 = vrot.lane.b32.xlu0 %v2092_v12, %s1999_s9 }
  0x45   : >> { %1895 = vrot.lane.b32.xlu1 %v2101_v15, %s1999_s9 }
  0x46   : >> { %1890 = vrot.lane.b32.xlu0 %v2079_v7, %s1999_s9 }
  0x49   : >> { %1905 = vrot.lane.b32.xlu1 %v2124_v21, %s1999_s9 }
  0x4a   : >> { %1900 = vrot.lane.b32.xlu0 %v2130_v22, %s1999_s9 }
  0x4d   : >> { %1915 = vrot.lane.b32.xlu1 %v2146_v27, %s1999_s9 }
  0x4e   : >> { %1910 = vrot.lane.b32.xlu0 %v2151_v28, %s1999_s9 }
  0x51   : >> { %1925 = vrot.lane.b32.xlu1 %v2167_v33, %s1999_s9 }
  0x52   : >> { %1920 = vrot.lane.b32.xlu0 %v2172_v34, %s1999_s9 }
  0x55   : >> { %1935 = vrot.lane.b32.xlu1 %v2187_v39, %s1999_s9 }
  0x56   : >> { %1930 = vrot.lane.b32.xlu0 %v2193_v40, %s1999_s9 }
  0x59   : >> { %1945 = vrot.lane.b32.xlu1 %v1844_v45, %s1999_s9 }
  0x5a   : >> { %1940 = vrot.lane.b32.xlu0 %v1839_v46, %s1999_s9 }
  0x5d   : >> { %1955 = vrot.lane.b32.xlu1 %v1854_v51, %s1999_s9 }
  0x5e   : >> { %1950 = vrot.lane.b32.xlu0 %v1849_v52, %s1999_s9 }
  0x61   : >> { %1965 = vrot.lane.b32.xlu1 %v1864_v57, %s1999_s9 }
  0x62   : >> { %1960 = vrot.lane.b32.xlu0 %v1859_v58, %s1999_s9 }
  0x65   : >> { %1975 = vrot.lane.b32.xlu1 %v1874_v10, %s1999_s9 }
  0x66   : >> { %1970 = vrot.lane.b32.xlu0 %v1869_v14, %s1999_s9 }
  0x8b   : >> { %v1791_v22 = vpop.permute.xlu1 %1790 }
  0x8c   : >> { %v1793_v27 = vunpack.i.h.bf16 %v1791_v22  ;;  %v1792_v28 = vunpack.i.l.bf16 %v1791_v22  ;;  %v1781_v33 = vpop.permute.xlu0 %1780 }
  0x8d   : >> { %v1783_v34 = vunpack.i.h.bf16 %v1781_v33  ;;  %v1782_v39 = vunpack.i.l.bf16 %v1781_v33 }
  0x8e   : >> { %v370_v40 = vsel %vm364_vm0, %v1792_v28, %v1793_v27 }
  0x8f   : >> { %v1796_v45 = vpop.permute.xlu1 %1795  ;;  %v366_v46 = vsel %vm364_vm0, %v1782_v39, %v1783_v34 }
  0x90   : >> { %v1798_v51 = vunpack.i.h.bf16 %v1796_v45  ;;  %v1797_v52 = vunpack.i.l.bf16 %v1796_v45  ;;  %v1786_v57 = vpop.permute.xlu0 %1785  ;;  %v1598_v58 = vpack.c.bf16 %v370_v40, %v366_v46 }
  0x91   : >> { %v1788_v21 = vunpack.i.h.bf16 %v1786_v57  ;;  %v1787_v10 = vunpack.i.l.bf16 %v1786_v57 }
  0x92   : >> { %1599 = vmatprep.subr.bf16.mxu0 %v1598_v58  ;;  %v372_v14 = vsel %vm364_vm0, %v1797_v52, %v1798_v51  ;;  %v371_v11 = vsel %vm364_vm0, %v1793_v27, %v1797_v52  ;;  %v2000_v27 = vmov 0  }
  0x93   : >> { %v1806_v22 = vpop.permute.xlu1 %1805  ;;  %v368_v16 = vsel %vm364_vm0, %v1787_v10, %v1788_v21  ;;  %v367_v33 = vsel %vm364_vm0, %v1783_v34, %v1787_v10  ;;  %1979 = vset.pattern.permute.xlu0 %v2000_v27  ;;  %1980 = vset.pattern.permute.xlu1 %v2000_v27 }
  0x94   : >> { %v1801_v15 = vpop.permute.xlu0 %1800  ;;  %v1614_v7 = vpack.c.bf16 %v372_v14, %v368_v16  ;;  %v1616_v56 = vpack.c.bf16 %v371_v11, %v367_v33  ;;  %v1808_v45 = vunpack.i.h.bf16 %v1806_v22  ;;  %v1807_v42 = vunpack.i.l.bf16 %v1806_v22  ;;  %1384 = vperm.xlu0 %1979, %v2032_v0   ;;  %1389 = vperm.xlu1 %1980, %v2037_v1  }
  0x95   : >> { %v1803_v12 = vunpack.i.h.bf16 %v1801_v15  ;;  %v1802_v62 = vunpack.i.l.bf16 %v1801_v15 }
  0x96   : >> { %1615 = vmatprep.subr.bf16.mxu1 %v1614_v7 }
  0x97   : >> { %1617 = vmatpush1.bf16.msra.mxu1 %v1616_v56  ;;  %v1816_v40 = vpop.permute.xlu1 %1815  ;;  %v365_v46 = vsel %vm364_vm0, %v1802_v62, %v1782_v39  ;;  %v369_v51 = vsel %vm364_vm0, %v1803_v12, %v1792_v28  ;;  %v374_v56 = vsel %vm364_vm0, %v1807_v42, %v1808_v45 }
  0x98   : >> { %v1818_v52 = vunpack.i.h.bf16 %v1816_v40  ;;  %v1817_v21 = vunpack.i.l.bf16 %v1816_v40  ;;  %v1811_v57 = vpop.permute.xlu0 %1810  ;;  %v1600_v34 = vpack.c.bf16 %v369_v51, %v365_v46  ;;  %1399 = vperm.xlu0 %1979, %v2047_v3   ;;  %1394 = vperm.xlu1 %1980, %v2042_v2  }
  0x99   : >> { %v1813_v11 = vunpack.i.h.bf16 %v1811_v57  ;;  %v1812_v16 = vunpack.i.l.bf16 %v1811_v57 }
  0x9a   : >> { %1601 = vmatpush1.bf16.msra.mxu0 %v1600_v34  ;;  %v378_v62 = vsel %vm364_vm0, %v1817_v21, %v1818_v52 }
  0x9b   : >> { %v1826_v15 = vpop.permute.xlu1 %1825  ;;  %v1602_v12 = vpack.c.bf16 %v378_v62, %v374_v56  ;;  %v376_v33 = vsel %vm364_vm0, %v1812_v16, %v1813_v11  ;;  %v375_v27 = vsel %vm364_vm0, %v1808_v45, %v1812_v16 }
  0x9c   : >> { %v1828_v7 = vunpack.i.h.bf16 %v1826_v15  ;;  %v1827_v28 = vunpack.i.l.bf16 %v1826_v15  ;;  %v1821_v39 = vpop.permute.xlu0 %1820 }
  0x9d   : >> { %v1823_v58 = vunpack.i.h.bf16 %v1821_v39  ;;  %v1822_v10 = vunpack.i.l.bf16 %v1821_v39  ;;  %1603 = vmatprep.subr.bf16.mxu0 %v1602_v12 }
  0x9e   : >> { %v373_v14 = vsel %vm364_vm0, %v1827_v28, %v1807_v42  ;;  %v377_v22 = vsel %vm364_vm0, %v1828_v7, %v1817_v21 }
  0x9f   : >> { %v1836_v40 = vpop.permute.xlu1 %1835  ;;  %v1604_v46 = vpack.c.bf16 %v377_v22, %v373_v14  ;;  %v380_v51 = vsel %vm364_vm0, %v1822_v10, %v1823_v58  ;;  %v379_v57 = vsel %vm364_vm0, %v1818_v52, %v1822_v10 }
  0xa0   : >> { %v1831_v34 = vpop.permute.xlu0 %1830  ;;  %v1618_v56 = vpack.c.bf16 %v380_v51, %v376_v33  ;;  %v1620_v62 = vpack.c.bf16 %v379_v57, %v375_v27  ;;  %v1838_v15 = vunpack.i.h.bf16 %v1836_v40  ;;  %v1837_v12 = vunpack.i.l.bf16 %v1836_v40 }
  0xa1   : >> { %1605 = vmatpush1.bf16.msra.mxu0 %v1604_v46  ;;  %v1833_v39 = vunpack.i.h.bf16 %v1831_v34  ;;  %v1832_v42 = vunpack.i.l.bf16 %v1831_v34 }
  0xa2   : >> { %1619 = vmatprep.subr.bf16.mxu1 %v1618_v56  ;;  %v384_v52 = vsel %vm364_vm0, %v1837_v12, %v1838_v15 }
  0xa3   : >> { %1621 = vmatpush1.bf16.msra.mxu1 %v1620_v62  ;;  %v1846_v21 = vpop.permute.xlu1 %1845  ;;  %v382_v45 = vsel %vm364_vm0, %v1832_v42, %v1833_v39  ;;  %v383_v40 = vsel %vm364_vm0, %v1833_v39, %v1837_v12 }
  0xa4   : >> { %v1848_v11 = vunpack.i.h.bf16 %v1846_v21  ;;  %v1847_v7 = vunpack.i.l.bf16 %v1846_v21  ;;  %v1841_v28 = vpop.permute.xlu0 %1840 }
  0xa5   : >> { %v1843_v14 = vunpack.i.h.bf16 %v1841_v28  ;;  %v1842_v58 = vunpack.i.l.bf16 %v1841_v28 }
  0xa6   : >> { %v388_v16 = vsel %vm364_vm0, %v1847_v7, %v1848_v11 }
  0xa7   : >> { %v1856_v10 = vpop.permute.xlu1 %1855  ;;  %v386_v22 = vsel %vm364_vm0, %v1842_v58, %v1843_v14  ;;  %v1622_v33 = vpack.c.bf16 %v388_v16, %v384_v52  ;;  %v387_v46 = vsel %vm364_vm0, %v1843_v14, %v1847_v7 }
  0xa8   : >> { %v1851_v51 = vpop.permute.xlu0 %1850  ;;  %v1606_v27 = vpack.c.bf16 %v386_v22, %v382_v45  ;;  %v1624_v57 = vpack.c.bf16 %v387_v46, %v383_v40  ;;  %v1858_v62 = vunpack.i.h.bf16 %v1856_v10  ;;  %v1857_v21 = vunpack.i.l.bf16 %v1856_v10 }
  0xa9   : >> { %v1853_v34 = vunpack.i.h.bf16 %v1851_v51  ;;  %v1852_v56 = vunpack.i.l.bf16 %v1851_v51  ;;  %1623 = vmatprep.subr.bf16.mxu1 %v1622_v33 }
  0xaa   : >> { %1607 = vmatprep.subr.bf16.mxu0 %v1606_v27  ;;  %1625 = vmatpush1.bf16.msra.mxu1 %v1624_v57  ;;  %v390_v45 = vsel %vm364_vm0, %v1857_v21, %v1858_v62 }
  0xab   : >> { %v1866_v15 = vpop.permute.xlu1 %1865  ;;  %v381_v11 = vsel %vm364_vm0, %v1852_v56, %v1832_v42  ;;  %v385_v28 = vsel %vm364_vm0, %v1853_v34, %v1842_v58 }
  0xac   : >> { %v1868_v52 = vunpack.i.h.bf16 %v1866_v15  ;;  %v1867_v16 = vunpack.i.l.bf16 %v1866_v15  ;;  %v1861_v12 = vpop.permute.xlu0 %1860  ;;  %v1608_v39 = vpack.c.bf16 %v385_v28, %v381_v11 }
  0xad   : >> { %v1863_v7 = vunpack.i.h.bf16 %v1861_v12  ;;  %v1862_v14 = vunpack.i.l.bf16 %v1861_v12 }
  0xae   : >> { %1609 = vmatpush1.bf16.msra.mxu0 %v1608_v39  ;;  %v394_v22 = vsel %vm364_vm0, %v1867_v16, %v1868_v52 }
  0xaf   : >> { %v1876_v33 = vpop.permute.xlu1 %1875  ;;  %v1610_v10 = vpack.c.bf16 %v394_v22, %v390_v45  ;;  %v392_v34 = vsel %vm364_vm0, %v1862_v14, %v1863_v7  ;;  %v391_v11 = vsel %vm364_vm0, %v1858_v62, %v1862_v14  ;;  %v2751_v14 = vpack.c.bf16 %v2136_v24, %v2112_v18 }
  0xb0   : >> { %v1878_v40 = vunpack.i.h.bf16 %v1876_v33  ;;  %v1877_v46 = vunpack.i.l.bf16 %v1876_v33  ;;  %v1871_v51 = vpop.permute.xlu0 %1870  ;;  %v2752_v18 = vpack.c.bf16 %v2196_v41, %v2175_v35  ;;  %v2754_v35 = vpack.c.bf16 %v2231_v53, %v2213_v47  ;;  %v1531_v47 = vld [vmem:[%s2743_s1 + $0x60] sm:$0xff] }
  0xb1   : >> { %v1873_v27 = vunpack.i.h.bf16 %v1871_v51  ;;  %v1872_v42 = vunpack.i.l.bf16 %v1871_v51  ;;  %1611 = vmatprep.subr.bf16.mxu0 %v1610_v10 }
  0xb2   : >> { %v389_v58 = vsel %vm364_vm0, %v1877_v46, %v1857_v21  ;;  %v393_v57 = vsel %vm364_vm0, %v1878_v40, %v1867_v16  ;;  %v1527_v21 = vld [vmem:[%s2743_s1 + $0x40] sm:$0xff]  ;;  %v2749_v16 = vpack.c.bf16 %v2157_v30, %v2154_v29  ;;  %v2755_v46 = vpack.c.bf16 %v2203_v44, %v2182_v38 }
  0xb3   : >> { %v1612_v56 = vpack.c.bf16 %v393_v57, %v389_v58  ;;  %v396_v15 = vsel %vm364_vm0, %v1872_v42, %v1873_v27  ;;  %v395_v28 = vsel %vm364_vm0, %v1868_v52, %v1872_v42  ;;  %v2362_v12 = vpop.permute.xlu1 %1885  ;;  %v2757_v38 = vpack.c.bf16 %v2249_v60, %v2246_v59  ;;  %v1532_v59 = vld [vmem:[%s2743_s1 + $0x68] sm:$0xff] }
  0xb4   : >> { %v1626_v39 = vpack.c.bf16 %v396_v15, %v392_v34  ;;  %v1628_v45 = vpack.c.bf16 %v395_v28, %v391_v11  ;;  %v2364_v22 = vpop.permute.xlu0 %1880  ;;  %v1888_v8 = vunpack.i.h.bf16 %v2362_v12  ;;  %v1887_v23 = vunpack.i.l.bf16 %v2362_v12 }
  0xb5   : >> { %1613 = vmatpush1.bf16.msra.mxu0 %v1612_v56  ;;  %v1883_v13 = vunpack.i.h.bf16 %v2364_v22  ;;  %v1882_v19 = vunpack.i.l.bf16 %v2364_v22  ;;  %v2758_v44 = vpack.c.bf16 %v2234_v54, %v2216_v48  ;;  %v1533_v56 = vld [vmem:[%s2743_s1 + $0x70] sm:$0xff] }
  0xb6   : >> { %1627 = vmatprep.subr.bf16.mxu1 %v1626_v39  ;;  %1631 = vmatprep.subr.bf16.mxu0 %v1630_v26  ;;  %v1023_v10 = vsel %vm1019_vm2, %v1887_v23, %v1888_v8 }
  0xb7   : >> { %1629 = vmatpush1.bf16.msra.mxu1 %v1628_v45  ;;  %v2372_v62 = vpop.permute.xlu1 %1895  ;;  %v1021_v29 = vsel %vm1019_vm2, %v1882_v19, %v1883_v13  ;;  %v2508_v15 = vsel %vm1019_vm2, %v1883_v13, %v1887_v23 }
  0xb8   : >> { %1535 = vmatmul.mubr.msk.f32.vlgmr.msra.gmra.mrb[0].mxu0 %vm429_vm1, %v1527_v21  ;;  %1647 = vmatprep.subr.bf16.mxu1 %v1646_v32  ;;  %v2378_v52 = vpop.permute.xlu0 %1890  ;;  %v1898_v7 = vunpack.i.h.bf16 %v2372_v62  ;;  %v1897_v25 = vunpack.i.l.bf16 %v2372_v62 }
  0xb9   : >> { %1633 = vmatpush1.bf16.msra.mxu0 %v1632_v36  ;;  %524 = vmatprep.mubr.f32.mxu0 %v1998_v63  ;;  %v1893_v20 = vunpack.i.h.bf16 %v2378_v52  ;;  %v1892_v26 = vunpack.i.l.bf16 %v2378_v52  ;;  %v1529_v36 = vld [vmem:[%s2743_s1 + $0x50] sm:$0xff] }
  0xba   : >> { %1543 = vmatmul.mubr.msk.f32.vlgmr.msra.gmra.mrb[0].mxu1 %vm429_vm1, %v1527_v21  ;;  %1635 = vmatprep.subr.bf16.mxu0 %v2746_v6  ;;  %v1027_v40 = vsel %vm1019_vm2, %v1897_v25, %v1898_v7 }
  0xbb   : >> { %1649 = vmatpush1.bf16.msra.mxu1 %v2747_v9  ;;  %637 = vmatprep.mubr.f32.mxu1 %v1998_v63  ;;  %v2399_v32 = vpop.permute.xlu1 %1905  ;;  %v1025_v30 = vsel %vm1019_vm2, %v1892_v26, %v1893_v20  ;;  %v1678_v50 = vpack.c.bf16 %v1027_v40, %v1023_v10  ;;  %v2513_v11 = vsel %vm1019_vm2, %v1893_v20, %v1897_v25  ;;  %v1534_v20 = vld [vmem:[%s2743_s1 + $0x78] sm:$0xff] }
  0xbc   : >> { %1536 = vmatmul.mubr.msk.f32.gmra.mrb[2].mxu0 %vm429_vm1, %v1528_v4  ;;  %1651 = vmatprep.subr.bf16.mxu1 %v2748_v17  ;;  %v2405_v5 = vpop.permute.xlu0 %1900  ;;  %v1662_v41 = vpack.c.bf16 %v1025_v30, %v1021_v29  ;;  %v1908_v61 = vunpack.i.h.bf16 %v2399_v32  ;;  %v1907_v42 = vunpack.i.l.bf16 %v2399_v32  ;;  %v1680_v17 = vpack.c.bf16 %v2513_v11, %v2508_v15 }
  0xbd   : >> { %530 = vmatprep.mubr.f32.mxu0 %v1998_v63  ;;  %1637 = vmatpush1.bf16.msra.mxu0 %v2749_v16  ;;  %v1902_v60 = vunpack.i.l.bf16 %v2405_v5  ;;  %v1903_v48 = vunpack.i.h.bf16 %v2405_v5 }
  0xbe   : >> { %1544 = vmatmul.mubr.msk.f32.gmra.mrb[2].mxu1 %vm429_vm1, %v1528_v4  ;;  %1639 = vmatprep.subr.bf16.mxu0 %v2750_v31  ;;  %v1029_v6 = vsel %vm1019_vm2, %v1907_v42, %v1908_v61 }
  0xbf   : >> { %643 = vmatprep.mubr.f32.mxu1 %v1998_v63  ;;  %1653 = vmatpush1.bf16.msra.mxu1 %v2751_v14  ;;  %v2426_v33 = vpop.permute.xlu1 %1915  ;;  %v1020_v28 = vsel %vm1019_vm2, %v1902_v60, %v1882_v19  ;;  %v1024_v12 = vsel %vm1019_vm2, %v1903_v48, %v1892_v26  ;;  %v220_v48 = vld [vmem:[%s2743_s1 + $0x8] sm:$0xff] }
  0xc0   : >> { %1537 = vmatmul.mubr.msk.f32.gmra.mrb[4].mxu0 %vm429_vm1, %v1529_v36  ;;  %1655 = vmatprep.subr.bf16.mxu1 %v2752_v18  ;;  %v2442_v24 = vpop.permute.xlu0 %1910  ;;  %v1918_v58 = vunpack.i.h.bf16 %v2426_v33  ;;  %v1917_v57 = vunpack.i.l.bf16 %v2426_v33  ;;  %v1664_v5 = vpack.c.bf16 %v1024_v12, %v1020_v28  ;;  %v219_v18 = vld [vmem:[%s2743_s1] sm:$0xff] }
  0xc1   : >> { %536 = vmatprep.mubr.f32.mxu0 %v1998_v63  ;;  %1641 = vmatpush1.bf16.msra.mxu0 %v2753_v43  ;;  %v1912_v39 = vunpack.i.l.bf16 %v2442_v24  ;;  %v1913_v4 = vunpack.i.h.bf16 %v2442_v24 }
  0xc2   : >> { %1545 = vmatmul.mubr.msk.f32.gmra.mrb[4].mxu1 %vm429_vm1, %v1529_v36  ;;  %1643 = vmatprep.subr.bf16.mxu0 %v2754_v35  ;;  %v1033_v52 = vsel %vm1019_vm2, %v1917_v57, %v1918_v58 }
  0xc3   : >> { %649 = vmatprep.mubr.f32.mxu1 %v1998_v63  ;;  %1657 = vmatpush1.bf16.msra.mxu1 %v2755_v46  ;;  %v1926_v51 = vpop.permute.xlu1 %1925  ;;  %v2544_v23 = vsel %vm1019_vm2, %v1908_v61, %v1912_v39  ;;  %v1666_v7 = vpack.c.bf16 %v1033_v52, %v1029_v6  ;;  %v1031_v24 = vsel %vm1019_vm2, %v1912_v39, %v1913_v4  ;;  %v221_v4 = vld [vmem:[%s2743_s1 + $0x10] sm:$0xff] }
  0xc4   : >> { %1538 = vmatmul.mubr.msk.f32.gmra.mrb[6].mxu0 %vm429_vm1, %v1530_v37  ;;  %1659 = vmatprep.subr.bf16.mxu1 %v2756_v49  ;;  %v2465_v27 = vpop.permute.xlu0 %1920  ;;  %v1928_v45 = vunpack.i.h.bf16 %v1926_v51  ;;  %v1927_v21 = vunpack.i.l.bf16 %v1926_v51 }
  0xc5   : >> { %542 = vmatprep.mubr.f32.mxu0 %v1998_v63  ;;  %1645 = vmatpush1.bf16.msra.mxu0 %v2757_v38  ;;  %v1923_v22 = vunpack.i.h.bf16 %v2465_v27  ;;  %v1922_v8 = vunpack.i.l.bf16 %v2465_v27 }
  0xc6   : >> { %1546 = vmatmul.mubr.msk.f32.gmra.mrb[6].mxu1 %vm429_vm1, %v1530_v37  ;;  %1663 = vmatprep.subr.bf16.mxu0 %v1662_v41  ;;  %v1028_v36 = vsel %vm1019_vm2, %v1927_v21, %v1907_v42  ;;  %v1032_v16 = vsel %vm1019_vm2, %v1928_v45, %v1917_v57 }
  0xc7   : >> { %655 = vmatprep.mubr.f32.mxu1 %v1998_v63  ;;  %1661 = vmatpush1.bf16.msra.mxu1 %v2758_v44  ;;  %v2479_v53 = vpop.permute.xlu1 %1935  ;;  %v1035_v37 = vsel %vm1019_vm2, %v1922_v8, %v1923_v22  ;;  %v1034_v40 = vsel %vm1019_vm2, %v1918_v58, %v1922_v8  ;;  %v1668_v35 = vpack.c.bf16 %v1032_v16, %v1028_v36  ;;  %v223_v8 = vld [vmem:[%s2743_s1 + $0x20] sm:$0xff]  ;;  %v225_v36 = vld [vmem:[%s2743_s1 + $0x30] sm:$0xff]  ;;  %v226_v16 = vld [vmem:[%s2743_s1 + $0x38] sm:$0xff] }
  0xc8   : >> { %1539 = vmatmul.mubr.msk.f32.gmra.mrb[8].mxu0 %vm429_vm1, %v1531_v47  ;;  %1679 = vmatprep.subr.bf16.mxu1 %v1678_v50  ;;  %v2482_v55 = vpop.permute.xlu0 %1930  ;;  %v1938_v31 = vunpack.i.h.bf16 %v2479_v53  ;;  %v1937_v14 = vunpack.i.l.bf16 %v2479_v53  ;;  %v1682_v38 = vpack.c.bf16 %v1035_v37, %v1031_v24  ;;  %v1684_v11 = vpack.c.bf16 %v1034_v40, %v2544_v23  ;;  %v224_v23 = vld [vmem:[%s2743_s1 + $0x28] sm:$0xff] }
  0xc9   : >> { %548 = vmatprep.mubr.f32.mxu0 %v1998_v63  ;;  %v1933_v13 = vunpack.i.h.bf16 %v2482_v55  ;;  %v1932_v19 = vunpack.i.l.bf16 %v2482_v55 }
  0xca   : >> { %1547 = vmatmul.mubr.msk.f32.gmra.mrb[8].mxu1 %vm429_vm1, %v1531_v47  ;;  %v1039_v53 = vsel %vm1019_vm2, %v1937_v14, %v1938_v31  ;;  %v1569_v31 = vld [vmem:[%s2743_s1 + $0x90] sm:$0xff] }
  0xcb   : >> { %661 = vmatprep.mubr.f32.mxu1 %v1998_v63  ;;  %v2492_v54 = vpop.permute.xlu1 %1945  ;;  %v1037_v43 = vsel %vm1019_vm2, %v1932_v19, %v1933_v13  ;;  %v1038_v39 = vsel %vm1019_vm2, %v1933_v13, %v1937_v14  ;;  %v1570_v14 = vld [vmem:[%s2743_s1 + $0x98] sm:$0xff] }
  0xcc   : >> { %1540 = vmatmul.mubr.msk.f32.gmra.mrb[10].mxu0 %vm429_vm1, %v1532_v59  ;;  %v2499_v34 = vpop.permute.xlu0 %1940  ;;  %v1948_v33 = vunpack.i.h.bf16 %v2492_v54  ;;  %v1947_v29 = vunpack.i.l.bf16 %v2492_v54 }
  0xcd   : >> { %554 = vmatprep.mubr.f32.mxu0 %v1998_v63  ;;  %v1943_v26 = vunpack.i.h.bf16 %v2499_v34  ;;  %v1942_v32 = vunpack.i.l.bf16 %v2499_v34 }
  0xce   : >> { %1548 = vmatmul.mubr.msk.f32.gmra.mrb[10].mxu1 %vm429_vm1, %v1532_v59  ;;  %v1043_v59 = vsel %vm1019_vm2, %v1947_v29, %v1948_v33  ;;  %v1571_v33 = vld [vmem:[%s2743_s1 + $0xa0] sm:$0xff] }
  0xcf   : >> { %667 = vmatprep.mubr.f32.mxu1 %v1998_v63  ;;  %v2524_v62 = vpop.permute.xlu1 %1955  ;;  %v1041_v10 = vsel %vm1019_vm2, %v1942_v32, %v1943_v26  ;;  %v1042_v45 = vsel %vm1019_vm2, %v1943_v26, %v1947_v29  ;;  %v1686_v21 = vpack.c.bf16 %v1043_v59, %v1039_v53  ;;  %v1572_v29 = vld [vmem:[%s2743_s1 + $0xa8] sm:$0xff] }
  0xd0   : >> { %1541 = vmatmul.mubr.msk.f32.gmra.mrb[12].mxu0 %vm429_vm1, %v1533_v56  ;;  %v1951_v9 = vpop.permute.xlu0 %1950  ;;  %v1958_v51 = vunpack.i.h.bf16 %v2524_v62  ;;  %v1957_v49 = vunpack.i.l.bf16 %v2524_v62  ;;  %v1670_v44 = vpack.c.bf16 %v1041_v10, %v1037_v43  ;;  %v1688_v13 = vpack.c.bf16 %v1042_v45, %v1038_v39 }
  0xd1   : >> { %560 = vmatprep.mubr.f32.mxu0 %v1998_v63  ;;  %v1953_v41 = vunpack.i.h.bf16 %v1951_v9  ;;  %v1952_v46 = vunpack.i.l.bf16 %v1951_v9 }
  0xd2   : >> { %1549 = vmatmul.mubr.msk.f32.gmra.mrb[12].mxu1 %vm429_vm1, %v1533_v56  ;;  %v1045_v28 = vsel %vm1019_vm2, %v1957_v49, %v1958_v51 }
  0xd3   : >> { %673 = vmatprep.mubr.f32.mxu1 %v1998_v63  ;;  %v2549_v25 = vpop.permute.xlu1 %1965  ;;  %v1036_v57 = vsel %vm1019_vm2, %v1952_v46, %v1932_v19  ;;  %v1040_v34 = vsel %vm1019_vm2, %v1953_v41, %v1942_v32 }
  0xd4   : >> { %1542 = vmatmul.mubr.msk.f32.gmra.mrb[14].mxu0 %vm429_vm1, %v1534_v20  ;;  %v2556_v30 = vpop.permute.xlu0 %1960  ;;  %v1968_v50 = vunpack.i.h.bf16 %v2549_v25  ;;  %v1967_v27 = vunpack.i.l.bf16 %v2549_v25  ;;  %v1672_v62 = vpack.c.bf16 %v1040_v34, %v1036_v57  ;;  %v1568_v25 = vld [vmem:[%s2743_s1 + $0x88] sm:$0xff] }
  0xd5   : >> { %768 = vmatprep.mubr.f32.mxu0 %v1998_v63  ;;  %v1963_v54 = vunpack.i.h.bf16 %v2556_v30  ;;  %v1962_v61 = vunpack.i.l.bf16 %v2556_v30  ;;  %v1573_v30 = vld [vmem:[%s2743_s1 + $0xb0] sm:$0xff] }
  0xd6   : >> { %1550 = vmatmul.mubr.msk.f32.gmra.mrb[14].mxu1 %vm429_vm1, %v1534_v20  ;;  %v1049_v12 = vsel %vm1019_vm2, %v1967_v27, %v1968_v50 }
  0xd7   : >> { %881 = vmatprep.mubr.f32.mxu1 %v1998_v63  ;;  %v1976_v47 = vpop.permute.xlu1 %1975  ;;  %v1047_v22 = vsel %vm1019_vm2, %v1962_v61, %v1963_v54  ;;  %v1674_v9 = vpack.c.bf16 %v1049_v12, %v1045_v28  ;;  %v1046_v19 = vsel %vm1019_vm2, %v1958_v51, %v1962_v61 }
  0xd8   : >> { %1551 = vmatmul.mubr.msk.f32.vlgmr.msra.gmra.mrb[0].mxu0 %vm429_vm1, %v219_v18  ;;  %v1971_v60 = vpop.permute.xlu0 %1970  ;;  %v1978_v56 = vunpack.i.h.bf16 %v1976_v47  ;;  %v1977_v15 = vunpack.i.l.bf16 %v1976_v47 }
  0xd9   : >> { %1665 = vmatpush1.bf16.msra.mxu0 %v1664_v5  ;;  %774 = vmatprep.mubr.f32.mxu0 %v1998_v63  ;;  %v1973_v42 = vunpack.i.h.bf16 %v1971_v60  ;;  %v1972_v58 = vunpack.i.l.bf16 %v1971_v60 }
  0xda   : >> { %1559 = vmatmul.mubr.msk.f32.vlgmr.msra.gmra.mrb[0].mxu1 %vm429_vm1, %v219_v18  ;;  %1667 = vmatprep.subr.bf16.mxu0 %v1666_v7  ;;  %v1044_v6 = vsel %vm1019_vm2, %v1977_v15, %v1957_v49  ;;  %v1048_v52 = vsel %vm1019_vm2, %v1978_v56, %v1967_v27  ;;  %v1567_v7 = vld [vmem:[%s2743_s1 + $0x80] sm:$0xff]  ;;  %v1574_v18 = vld [vmem:[%s2743_s1 + $0xb8] sm:$0xff] }
  0xdb   : >> { %1681 = vmatpush1.bf16.msra.mxu1 %v1680_v17  ;;  %887 = vmatprep.mubr.f32.mxu1 %v1998_v63  ;;  %v1051_v55 = vsel %vm1019_vm2, %v1972_v58, %v1973_v42  ;;  %v1050_v20 = vsel %vm1019_vm2, %v1968_v50, %v1972_v58  ;;  %v1676_v32 = vpack.c.bf16 %v1048_v52, %v1044_v6  ;;  %v222_v17 = vld [vmem:[%s2743_s1 + $0x18] sm:$0xff] }
  0xdc   : >> { %1683 = vmatprep.subr.bf16.mxu1 %v1682_v38  ;;  %1552 = vmatmul.mubr.msk.f32.gmra.mrb[2].mxu0 %vm429_vm1, %v220_v48  ;;  %v1690_v26 = vpack.c.bf16 %v1051_v55, %v1047_v22  ;;  %v1692_v5 = vpack.c.bf16 %v1050_v20, %v1046_v19 }
  0xdd   : >> { %1669 = vmatpush1.bf16.msra.mxu0 %v1668_v35  ;;  %780 = vmatprep.mubr.f32.mxu0 %v1998_v63 }
  0xde   : >> { %1560 = vmatmul.mubr.msk.f32.gmra.mrb[2].mxu1 %vm429_vm1, %v220_v48  ;;  %1671 = vmatprep.subr.bf16.mxu0 %v1670_v44 }
  0xdf   : >> { %1685 = vmatpush1.bf16.msra.mxu1 %v1684_v11  ;;  %893 = vmatprep.mubr.f32.mxu1 %v1998_v63 }
  0xe0   : >> { %1553 = vmatmul.mubr.msk.f32.gmra.mrb[4].mxu0 %vm429_vm1, %v221_v4  ;;  %1687 = vmatprep.subr.bf16.mxu1 %v1686_v21 }
  0xe1   : >> { %1673 = vmatpush1.bf16.msra.mxu0 %v1672_v62  ;;  %786 = vmatprep.mubr.f32.mxu0 %v1998_v63 }
  0xe2   : >> { %1561 = vmatmul.mubr.msk.f32.gmra.mrb[4].mxu1 %vm429_vm1, %v221_v4  ;;  %1675 = vmatprep.subr.bf16.mxu0 %v1674_v9 }
  0xe3   : >> { %1689 = vmatpush1.bf16.msra.mxu1 %v1688_v13  ;;  %899 = vmatprep.mubr.f32.mxu1 %v1998_v63 }
  0xe4   : >> { %1554 = vmatmul.mubr.msk.f32.gmra.mrb[6].mxu0 %vm429_vm1, %v222_v17  ;;  %1691 = vmatprep.subr.bf16.mxu1 %v1690_v26 }
  0xe5   : >> { %792 = vmatprep.mubr.f32.mxu0 %v1998_v63  ;;  %1677 = vmatpush1.bf16.msra.mxu0 %v1676_v32 }
  0xe6   : >> { %1562 = vmatmul.mubr.msk.f32.gmra.mrb[6].mxu1 %vm429_vm1, %v222_v17 }
  0xe7   : >> { %905 = vmatprep.mubr.f32.mxu1 %v1998_v63  ;;  %1693 = vmatpush1.bf16.msra.mxu1 %v1692_v5 }
  0xe8   : >> { %1555 = vmatmul.mubr.msk.f32.gmra.mrb[8].mxu0 %vm429_vm1, %v223_v8 }
  0xe9   : >> { %798 = vmatprep.mubr.f32.mxu0 %v1998_v63 }
  0xea   : >> { %1563 = vmatmul.mubr.msk.f32.gmra.mrb[8].mxu1 %vm429_vm1, %v223_v8 }
  0xeb   : >> { %911 = vmatprep.mubr.f32.mxu1 %v1998_v63 }
  0xec   : >> { %1556 = vmatmul.mubr.msk.f32.gmra.mrb[10].mxu0 %vm429_vm1, %v224_v23 }
  0xed   : >> { %804 = vmatprep.mubr.f32.mxu0 %v1998_v63 }
  0xee   : >> { %1564 = vmatmul.mubr.msk.f32.gmra.mrb[10].mxu1 %vm429_vm1, %v224_v23 }
  0xef   : >> { %917 = vmatprep.mubr.f32.mxu1 %v1998_v63 }
  0xf0   : >> { %1557 = vmatmul.mubr.msk.f32.gmra.mrb[12].mxu0 %vm429_vm1, %v225_v36 }
  0xf1   : >> { %810 = vmatprep.mubr.f32.mxu0 %v1998_v63 }
  0xf2   : >> { %1565 = vmatmul.mubr.msk.f32.gmra.mrb[12].mxu1 %vm429_vm1, %v225_v36 }
  0xf3   : >> { %923 = vmatprep.mubr.f32.mxu1 %v1998_v63 }
  0xf4   : >> { %1558 = vmatmul.mubr.msk.f32.gmra.mrb[14].mxu0 %vm429_vm1, %v226_v16 }
  0xf5   : >> { %1172 = vmatprep.mubr.f32.mxu0 %v1998_v63 }
  0xf6   : >> { %1566 = vmatmul.mubr.msk.f32.gmra.mrb[14].mxu1 %vm429_vm1, %v226_v16 }
  0xf7   : >> { %1285 = vmatprep.mubr.f32.mxu1 %v1998_v63 }
  0xf8   : >> { %1575 = vmatmul.mubr.msk.f32.vlgmr.msra.gmra.mrb[0].mxu0 %vm429_vm1, %v1567_v7 }
  0xf9   : >> { %1178 = vmatprep.mubr.f32.mxu0 %v1998_v63 }
  0xfa   : >> { %1583 = vmatmul.mubr.msk.f32.vlgmr.msra.gmra.mrb[0].mxu1 %vm429_vm1, %v1567_v7 }
  0xfb   : >> { %1291 = vmatprep.mubr.f32.mxu1 %v1998_v63 }
  0xfc   : >> { %1576 = vmatmul.mubr.msk.f32.gmra.mrb[2].mxu0 %vm429_vm1, %v1568_v25 }
  0xfd   : >> { %1184 = vmatprep.mubr.f32.mxu0 %v1998_v63 }
  0xfe   : >> { %1584 = vmatmul.mubr.msk.f32.gmra.mrb[2].mxu1 %vm429_vm1, %v1568_v25 }
  0xff   : >> { %1297 = vmatprep.mubr.f32.mxu1 %v1998_v63 }
 0x100   : >> { %1577 = vmatmul.mubr.msk.f32.gmra.mrb[4].mxu0 %vm429_vm1, %v1569_v31 }
 0x101   : >> { %1190 = vmatprep.mubr.f32.mxu0 %v1998_v63 }
 0x102   : >> { %1585 = vmatmul.mubr.msk.f32.gmra.mrb[4].mxu1 %vm429_vm1, %v1569_v31 }
 0x103   : >> { %1303 = vmatprep.mubr.f32.mxu1 %v1998_v63 }
 0x104   : >> { %1578 = vmatmul.mubr.msk.f32.gmra.mrb[6].mxu0 %vm429_vm1, %v1570_v14 }
 0x105   : >> { %1196 = vmatprep.mubr.f32.mxu0 %v1998_v63 }
 0x106   : >> { %1586 = vmatmul.mubr.msk.f32.gmra.mrb[6].mxu1 %vm429_vm1, %v1570_v14 }
 0x107   : >> { %1309 = vmatprep.mubr.f32.mxu1 %v1998_v63 }
 0x108   : >> { %1579 = vmatmul.mubr.msk.f32.gmra.mrb[8].mxu0 %vm429_vm1, %v1571_v33 }
 0x109   : >> { %1202 = vmatprep.mubr.f32.mxu0 %v1998_v63 }
 0x10a   : >> { %1587 = vmatmul.mubr.msk.f32.gmra.mrb[8].mxu1 %vm429_vm1, %v1571_v33 }
 0x10b   : >> { %1315 = vmatprep.mubr.f32.mxu1 %v1998_v63 }
 0x10c   : >> { %1580 = vmatmul.mubr.msk.f32.gmra.mrb[10].mxu0 %vm429_vm1, %v1572_v29 }
 0x10d   : >> { %1208 = vmatprep.mubr.f32.mxu0 %v1998_v63 }
 0x10e   : >> { %1588 = vmatmul.mubr.msk.f32.gmra.mrb[10].mxu1 %vm429_vm1, %v1572_v29 }
 0x10f   : >> { %1321 = vmatprep.mubr.f32.mxu1 %v1998_v63 }
 0x110   : >> { %1581 = vmatmul.mubr.msk.f32.gmra.mrb[12].mxu0 %vm429_vm1, %v1573_v30 }
 0x111   : >> { %1214 = vmatprep.mubr.f32.mxu0 %v1998_v63 }
 0x112   : >> { %1589 = vmatmul.mubr.msk.f32.gmra.mrb[12].mxu1 %vm429_vm1, %v1573_v30 }
 0x113   : >> { %1327 = vmatprep.mubr.f32.mxu1 %v1998_v63  ;;  %v1385_v59 = vpop.permute.xlu0 %1384  ;;  %v1390_v42 = vpop.permute.xlu1 %1389 }
 0x114   : >> { %1582 = vmatmul.mubr.msk.f32.gmra.mrb[14].mxu0 %vm429_vm1, %v1574_v18 }
 0x116   : >> { %1590 = vmatmul.mubr.msk.f32.gmra.mrb[14].mxu1 %vm429_vm1, %v1574_v18 }
 0x117   : >> { %v1395_v32 = vpop.permute.xlu1 %1394 }
 0x1cb   : >> { %v1174_v24 = vpop.f32.mrb[0].mxu0 }
 0x1cc   : >> { %v1176_v37 = vpop.f32.mrb[1].mxu0 }
 0x1cd   : >> { %v1287_v43 = vpop.f32.mrb[0].mxu1 }
 0x1ce   : >> { %v1289_v10 = vpop.f32.mrb[1].mxu1 }
 0x1cf   : >> { %v1180_v40 = vpop.f32.mrb[2].mxu0 }
 0x1d0   : >> { %v1182_v35 = vpop.f32.mrb[3].mxu0 }
 0x1d1   : >> { %v1293_v41 = vpop.f32.mrb[2].mxu1 }
 0x1d2   : >> { %v1295_v46 = vpop.f32.mrb[3].mxu1 }
 0x1d3   : >> { %v1186_v51 = vpop.f32.mrb[4].mxu0 }
 0x1d4   : >> { %v1188_v49 = vpop.f32.mrb[5].mxu0 }
 0x1d5   : >> { %v1299_v50 = vpop.f32.mrb[4].mxu1 }
 0x1d6   : >> { %v2701_v27 = vpop.f32.mrb[5].mxu1 }
 0x1d7   : >> { %v2703_v63 = vpop.f32.mrb[6].mxu0 }
 0x1d8   : >> { %v2705_v47 = vpop.f32.mrb[7].mxu0 }
 0x1d9   : >> { %v2707_v38 = vpop.f32.mrb[6].mxu1 }
 0x1da   : >> { %v2709_v44 = vpop.f32.mrb[7].mxu1 }
 0x1db   : >> { %v1198_v53 = vpop.f32.mrb[8].mxu0 }
 0x1dc   : >> { %v1366_v60 = vmax.f32 %v1174_v24, %v1198_v53  ;;  %v1200_v48 = vpop.f32.mrb[9].mxu0 }
 0x1dd   : >> { %v1367_v54 = vmax.f32 %v1176_v37, %v1200_v48  ;;  %v1311_v61 = vpop.f32.mrb[8].mxu1 }
 0x1de   : >> { %v1368_v58 = vmax.f32 %v1287_v43, %v1311_v61  ;;  %v1402_v57 = vadd.f32 %v1385_v59, %v1366_v60  ;;  %v1313_v34 = vpop.f32.mrb[9].mxu1 }
 0x1df   : >> { %v1403_v56 = vadd.f32 %v1385_v59, %v1367_v54  ;;  %v1369_v15 = vmax.f32 %v1289_v10, %v1313_v34  ;;  %v1204_v11 = vpop.f32.mrb[10].mxu0 }
 0x1e0   : >> { %v1404_v28 = vadd.f32 %v1385_v59, %v1368_v58  ;;  %v1418_v12 = vmax.f32 %v1402_v57, 0.0  ;;  %v1370_v39 = vmax.f32 %v1180_v40, %v1204_v11  ;;  %v1206_v45 = vpop.f32.mrb[11].mxu0 }
 0x1e1   : >> { %v1419_v21 = vmax.f32 %v1403_v56, 0.0  ;;  %v1405_v62 = vadd.f32 %v1385_v59, %v1369_v15  ;;  %v1371_v4 = vmax.f32 %v1182_v35, %v1206_v45  ;;  %v1317_v22 = vpop.f32.mrb[10].mxu1 }
 0x1e2   : >> { %v1420_v55 = vmax.f32 %v1404_v28, 0.0  ;;  %1437 = vst [vmem:[%s2713_s14] sm:$0xff] %v1418_v12  ;;  %v1372_v6 = vmax.f32 %v1293_v41, %v1317_v22  ;;  %v1406_v52 = vadd.f32 %v1390_v42, %v1370_v39  ;;  %v1319_v9 = vpop.f32.mrb[11].mxu1 }
 0x1e3   : >> { %1438 = vst [vmem:[%s2713_s14 + $0x8] sm:$0xff] %v1419_v21  ;;  %v1421_v13 = vmax.f32 %v1405_v62, 0.0  ;;  %v1407_v19 = vadd.f32 %v1390_v42, %v1371_v4  ;;  %v1373_v20 = vmax.f32 %v1295_v46, %v1319_v9  ;;  %v1210_v26 = vpop.f32.mrb[12].mxu0 }
 0x1e4   : >> { %1439 = vst [vmem:[%s2713_s14 + $0x10] sm:$0xff] %v1420_v55  ;;  %v1408_v17 = vadd.f32 %v1390_v42, %v1372_v6  ;;  %v1422_v5 = vmax.f32 %v1406_v52, 0.0  ;;  %v1374_v8 = vmax.f32 %v1186_v51, %v1210_v26  ;;  %v1212_v23 = vpop.f32.mrb[13].mxu0  ;;  %v1400_v51 = vpop.permute.xlu0 %1399 }
 0x1e5   : >> { %1440 = vst [vmem:[%s2713_s14 + $0x18] sm:$0xff] %v1421_v13  ;;  %v1423_v36 = vmax.f32 %v1407_v19, 0.0  ;;  %v1409_v16 = vadd.f32 %v1390_v42, %v1373_v20  ;;  %v1375_v7 = vmax.f32 %v1188_v49, %v1212_v23  ;;  %v1323_v25 = vpop.f32.mrb[12].mxu1 }
 0x1e6   : >> { %v1424_v31 = vmax.f32 %v1408_v17, 0.0  ;;  %1441 = vst [vmem:[%s2713_s14 + $0x20] sm:$0xff] %v1422_v5  ;;  %v1376_v14 = vmax.f32 %v1299_v50, %v1323_v25  ;;  %v1410_v33 = vadd.f32 %v1395_v32, %v1374_v8  ;;  %v1325_v29 = vpop.f32.mrb[13].mxu1 }
 0x1e7   : >> { %1442 = vst [vmem:[%s2713_s14 + $0x28] sm:$0xff] %v1423_v36  ;;  %v1425_v30 = vmax.f32 %v1409_v16, 0.0  ;;  %v1411_v18 = vadd.f32 %v1395_v32, %v1375_v7  ;;  %v1377_v24 = vmax.f32 %v2701_v27, %v1325_v29  ;;  %v1216_v37 = vpop.f32.mrb[14].mxu0 }
 0x1e8   : >> { %1443 = vst [vmem:[%s2713_s14 + $0x30] sm:$0xff] %v1424_v31  ;;  %v1412_v43 = vadd.f32 %v1395_v32, %v1376_v14  ;;  %v1426_v10 = vmax.f32 %v1410_v33, 0.0  ;;  %v1378_v40 = vmax.f32 %v2703_v63, %v1216_v37  ;;  %v1218_v35 = vpop.f32.mrb[15].mxu0 }
 0x1e9   : >> { %1444 = vst [vmem:[%s2713_s14 + $0x38] sm:$0xff] %v1425_v30  ;;  %v1427_v41 = vmax.f32 %v1411_v18, 0.0  ;;  %v1413_v46 = vadd.f32 %v1395_v32, %v1377_v24  ;;  %v1379_v49 = vmax.f32 %v2705_v47, %v1218_v35  ;;  %v1329_v50 = vpop.f32.mrb[14].mxu1 }
 0x1ea   : >> { %v1428_v53 = vmax.f32 %v1412_v43, 0.0  ;;  %1445 = vst [vmem:[%s2713_s14 + $0x40] sm:$0xff] %v1426_v10  ;;  %v1414_v27 = vadd.f32 %v1400_v51, %v1378_v40  ;;  %v1380_v59 = vmax.f32 %v2707_v38, %v1329_v50  ;;  %v1331_v60 = vpop.f32.mrb[15].mxu1 }
 0x1eb   : >> { %1446 = vst [vmem:[%s2713_s14 + $0x48] sm:$0xff] %v1427_v41  ;;  %v1429_v63 = vmax.f32 %v1413_v46, 0.0  ;;  %v1415_v48 = vadd.f32 %v1400_v51, %v1379_v49  ;;  %v1381_v54 = vmax.f32 %v2709_v44, %v1331_v60  ;;  %179 = sbr.rel (!%p177_p4) target bundleno = 17 (0x11), region = 73 }
 0x1ec   : >> { %1447 = vst [vmem:[%s2713_s14 + $0x50] sm:$0xff] %v1428_v53  ;;  %v1430_v61 = vmax.f32 %v1414_v27, 0.0  ;;  %v1416_v42 = vadd.f32 %v1400_v51, %v1380_v59 }
 0x1ed   : >> { %1448 = vst [vmem:[%s2713_s14 + $0x58] sm:$0xff] %v1429_v63  ;;  %v1431_v47 = vmax.f32 %v1415_v48, 0.0  ;;  %v1417_v58 = vadd.f32 %v1400_v51, %v1381_v54 }
 0x1ee   : >> { %1449 = vst [vmem:[%s2713_s14 + $0x60] sm:$0xff] %v1430_v61  ;;  %v1432_v57 = vmax.f32 %v1416_v42, 0.0 }
 0x1ef   : >> { %1450 = vst [vmem:[%s2713_s14 + $0x68] sm:$0xff] %v1431_v47  ;;  %v1433_v34 = vmax.f32 %v1417_v58, 0.0 }
 0x1f0   : >> { %1451 = vst [vmem:[%s2713_s14 + $0x70] sm:$0xff] %v1432_v57 }
 0x1f1   : >> { %1452 = vst [vmem:[%s2713_s14 + $0x78] sm:$0xff] %v1433_v34 }
 0x1f2 PF: > { %s13_s12 = sadd.s32 1, %s1991_s12  }
 0x1f3   : > { %p10_p5 = scmp.ge.s32.totalorder %s13_s12, 4  }
 0x1f5   :  { %12 = sbr.rel (!%p10_p5) target bundleno = 1 (0x1), region = 84 }

// kernel: audio_cnn_forward.7
= control target key start
LH: loop header
LB: loop body
LE: loop exit
PB: predicated region body
PF: predicated region fallthrough
CT: control target
= control target key end

     0   :  { %8 = vsyncpa [#allocation3], 0  ;;  %s2726_s0 = inlined_call_operand.vmem [shape: f32[2,1088,258], index: 0, kind: input, shape index: {}]   ;;  %s2727_s1 = inlined_call_operand.vmem [shape: f32[3,128,128], index: 1, kind: input, shape index: {}]   ;;  %s2728_s2 = inlined_call_operand.vmem [shape: f32[64,1], index: 2, kind: input, shape index: {}]   ;;  %s2729_s3 = inlined_call_operand.hbm [shape: f32[2,16,64,256], index: 3, kind: output, shape index: {}]  }
   0x1   :  { %10 = vsyncpa [#allocation3 + $0x1], 0  ;;  %s1985_s12 = smov 0   ;;  %s1987_s13 = smov 0  }
   0x2   :  { %s1989_s14 = smov 0   ;;  %s1991_s15 = smov 0  }
   0x3 LB: > { %s2006_s16 = sadd.s32 4294967295, %s1952_s15   ;;  %s1364_s17 = sadd.s32 4294967294, %s1952_s15   ;;  %s1952_s15 = sphi %s1991_s15, %s2735_s15   ;;  %s1948_s14 = sphi %s1989_s14, %s2734_s14   ;;  %s1944_s13 = sphi %s1987_s13, %s2733_s13   ;;  %s1940_s12 = sphi %s1985_s12, %s2732_s12  }
   0x4   : > { %s2010_s18 = sadd.s32 1, %s1952_s15   ;;  %s91_s19 = sadd.s32 1, %s1948_s14 }
   0x5   : > { %s88_s20 = ssub.s32 %s1952_s15, %s2010_s18  ;;  %p101_p0 = scmp.ne.s32.totalorder %s1948_s14, %s1944_s13 }
   0x6   : > { %p89_p1 = scmp.eq.s32.totalorder %s88_s20, 0  ;;  %p102_p2 = scmp.eq.s32.totalorder %s2006_s16, 1 }
   0x7   : > { %p107_p3 = scmp.ne.s32.totalorder %s1944_s13, %s1940_s12  ;;  %p108_p4 = scmp.eq.s32.totalorder %s1364_s17, 1 }
   0x8   : > { %s2021_s21 = scalar_select %p89_p1, %s1948_s14, %s91_s19  }
   0x9   : > { %p2023_p5 = por %p102_p2, %p101_p0  ;;  %p2027_p6 = por %p108_p4, %p107_p3 }
   0xa   : > { %p1367_p7 = scmp.ge.s32.totalorder %s1952_s15, 1  ;;  %p140_p8 = scmp.lt.s32.totalorder %s1952_s15, 3 }
   0xc   : > { %p141_p9 = pnand %p1367_p7, %p140_p8 }
   0xd   : > { %s161_s24 = sand.u32 (!%p141_p9), 1, %s1944_s13   ;;  %p164_p10 = scmp.lt.s32.totalorder (!%p141_p9), %s2006_s16, 1  ;;  %v2038_v0 = vld [vmem:[%s2728_s2] sm:$0xff] (!%p141_p9)  ;;  %v2043_v1 = vld [vmem:[%s2728_s2 + $0x8] sm:$0xff] (!%p141_p9)  ;;  %v2048_v2 = vld [vmem:[%s2728_s2 + $0x10] sm:$0xff] (!%p141_p9) }
   0xe   : > { %144 = sbr.rel (%p141_p9) target bundleno = 546 (0x222), region = 32  ;;  %s2052_s4 = sshll.u32 (!%p141_p9), %s161_s24, 11  ;;  %v2057_v3 = vld [vmem:[%s2728_s2 + $0x18] sm:$0xff] (!%p141_p9)  ;;  %v2062_v4 = vld [vmem:[%s2728_s2 + $0x20] sm:$0xff] (!%p141_p9)  ;;  %v2067_v5 = vld [vmem:[%s2728_s2 + $0x28] sm:$0xff] (!%p141_p9) }
   0xf   : > { %v2072_v6 = vld [vmem:[%s2728_s2 + $0x30] sm:$0xff] (!%p141_p9)  ;;  %v2077_v7 = vld [vmem:[%s2728_s2 + $0x38] sm:$0xff] (!%p141_p9)  ;;  %s163_s30 = scalar_lea.vmem (!%p141_p9), [#allocation2], %s2052_s4  ;;  %s2086_s5 = smov (!%p141_p9), 0  }
  0x15   : > { %s165_s25 = scalar_select %p164_p10, %s2006_s16, 1 }
  0x17   : > { %s1590_s26 = smul.u32 3264, %s165_s25 }
  0x19   : > { %s2083_s29 = scalar_lea.vmem %s2726_s0, %s1590_s26 }
  0x1a LB: >> { %s1370_s6 = sshll.u32 %s1956_s5, 6  ;;  %s1958_s10 = smov 127   ;;  %vm414_vm0 = vcmask 1039360   ;;  %vm914_vm1 = vcmask 1031168   ;;  %s1956_s5 = sphi %s2086_s5, %s182_s5  }
  0x1b   : >> { %s184_s7 = sshra.s32 %s1370_s6, 3  ;;  %s1960_s19 = smov 126  }
  0x1c   : >> { %s1411_s8 = smul.u32 24, %s184_s7  ;;  %s1412_s27 = sshll.u32 %s1956_s5, 7 }
  0x1d   : >> { %s2638_s28 = scalar_lea.vmem %s163_s30, %s1412_s27 [#allocation2]  ;;  %s182_s5 = sadd.s32 1, %s1956_s5  }
  0x1e   : >> { %s2093_s9 = scalar_lea.vmem %s2083_s29, %s1411_s8  ;;  %p179_p11 = scmp.ge.s32.totalorder %s182_s5, 16  }
  0x1f   : >> { %v190_v8 = vld [vmem:[%s2093_s9 + $0x8] sm:$0xff]  ;;  %v237_v9 = vld [vmem:[%s2093_s9 + $0x10] sm:$0xff]  ;;  %v189_v10 = vld [vmem:[%s2093_s9] sm:$0xff]  ;;  %s1413_s6 = sshll.u32 (%p179_p11), %s2006_s16, 15  ;;  %s2685_s5 = scalar_lea.sflag (%p179_p11), [#allocation3], %s161_s24 }
  0x20   : >> { %v2098_v11 = vpack.i.bf16 %v237_v9, %v190_v8  ;;  %v191_v12 = vld [vmem:[%s2093_s9 + $0x18] sm:$0xff]  ;;  %v192_v13 = vld [vmem:[%s2093_s9 + $0x20] sm:$0xff]  ;;  %v238_v14 = vld [vmem:[%s2093_s9 + $0x28] sm:$0xff]  ;;  %s1962_s16 = smov (%p179_p11), [#allocation2]  }
  0x21   : >> { %v2103_v15 = vpack.i.bf16 %v191_v12, %v189_v10  ;;  %v194_v16 = vld [vmem:[%s2093_s9 + $0x38] sm:$0xff]  ;;  %v239_v17 = vld [vmem:[%s2093_s9 + $0x40] sm:$0xff]  ;;  %v2109_v18 = vpack.i.bf16 %v238_v14, %v192_v13  ;;  %v196_v20 = vld [vmem:[%s2093_s9 + $0x50] sm:$0xff]  ;;  %v2143_v36 = vpack.c.bf16 %v192_v13, %v190_v8  ;;  %v2145_v37 = vpack.c.bf16 %v191_v12, %v189_v10  ;;  %s1890_s11 = sshll.u32 (%p179_p11), %s1962_s16, 4  ;;  %s1891_s11 = int_to_ptr.vmem [resolvable:$false] %s1890_s11 }
  0x22   : >> { %1645 = vrot.lane.b32.xlu0 %v2098_v11, %s1958_s10  ;;  %v2113_v19 = vpack.i.bf16 %v239_v17, %v194_v16  ;;  %v240_v21 = vld [vmem:[%s2093_s9 + $0x58] sm:$0xff]  ;;  %v193_v22 = vld [vmem:[%s2093_s9 + $0x30] sm:$0xff]  ;;  %v195_v23 = vld [vmem:[%s2093_s9 + $0x48] sm:$0xff]  ;;  %v2161_v44 = vpack.c.bf16 %v196_v20, %v194_v16  ;;  %s1892_s17 = scalar_lea.vmem (%p179_p11), %s1891_s11, 65536 }
  0x23   : >> { %1655 = vrot.lane.b32.xlu1 %v2103_v15, %s1958_s10  ;;  %v2121_v24 = vpack.i.bf16 %v240_v21, %v196_v20  ;;  %v2125_v25 = vpack.i.bf16 %v195_v23, %v193_v22  ;;  %v198_v26 = vld [vmem:[%s2093_s9 + $0x68] sm:$0xff]  ;;  %v241_v27 = vld [vmem:[%s2093_s9 + $0x70] sm:$0xff]  ;;  %v200_v28 = vld [vmem:[%s2093_s9 + $0x80] sm:$0xff]  ;;  %1447 = vmatprep.subr.bf16.mxu0 %v2143_v36  ;;  %v2163_v45 = vpack.c.bf16 %v195_v23, %v193_v22 }
  0x24   : >> { %v242_v29 = vld [vmem:[%s2093_s9 + $0x88] sm:$0xff]  ;;  %v2133_v30 = vpack.i.bf16 %v241_v27, %v198_v26  ;;  %v197_v32 = vld [vmem:[%s2093_s9 + $0x60] sm:$0xff]  ;;  %v199_v33 = vld [vmem:[%s2093_s9 + $0x78] sm:$0xff]  ;;  %1449 = vmatpush1.bf16.msra.mxu0 %v2145_v37  ;;  %v2176_v50 = vpack.c.bf16 %v200_v28, %v198_v26 }
  0x25   : >> { %v2137_v31 = vpack.i.bf16 %v242_v29, %v200_v28  ;;  %v202_v34 = vld [vmem:[%s2093_s9 + $0x98] sm:$0xff]  ;;  %v243_v35 = vld [vmem:[%s2093_s9 + $0xa0] sm:$0xff]  ;;  %v2149_v38 = vpack.i.bf16 %v199_v33, %v197_v32  ;;  %v204_v40 = vld [vmem:[%s2093_s9 + $0xb0] sm:$0xff]  ;;  %1451 = vmatprep.subr.bf16.mxu0 %v2161_v44  ;;  %v2181_v53 = vpack.c.bf16 %v199_v33, %v197_v32 }
  0x26   : >> { %1650 = vrot.lane.b32.xlu0 %v2109_v18, %s1958_s10  ;;  %v2154_v39 = vpack.i.bf16 %v243_v35, %v202_v34  ;;  %v244_v41 = vld [vmem:[%s2093_s9 + $0xb8] sm:$0xff]  ;;  %v201_v42 = vld [vmem:[%s2093_s9 + $0x90] sm:$0xff]  ;;  %v203_v43 = vld [vmem:[%s2093_s9 + $0xa8] sm:$0xff]  ;;  %v2194_v58 = vpack.c.bf16 %v204_v40, %v202_v34 }
  0x27   : >> { %1660 = vrot.lane.b32.xlu1 %v2113_v19, %s1958_s10  ;;  %v2167_v46 = vpack.i.bf16 %v244_v41, %v204_v40  ;;  %v2172_v47 = vpack.i.bf16 %v203_v43, %v201_v42  ;;  %v206_v48 = vld [vmem:[%s2093_s9 + $0xc8] sm:$0xff]  ;;  %v245_v49 = vld [vmem:[%s2093_s9 + $0xd0] sm:$0xff]  ;;  %v208_v51 = vld [vmem:[%s2093_s9 + $0xe0] sm:$0xff]  ;;  %v2199_v61 = vpack.c.bf16 %v203_v43, %v201_v42 }
  0x28   : >> { %v246_v52 = vld [vmem:[%s2093_s9 + $0xe8] sm:$0xff]  ;;  %1453 = vmatpush1.bf16.msra.mxu0 %v2163_v45  ;;  %v2186_v54 = vpack.i.bf16 %v245_v49, %v206_v48  ;;  %v205_v56 = vld [vmem:[%s2093_s9 + $0xc0] sm:$0xff]  ;;  %v207_v57 = vld [vmem:[%s2093_s9 + $0xd8] sm:$0xff]  ;;  %v2212_v10 = vpack.c.bf16 %v208_v51, %v206_v48 }
  0x29   : >> { %1455 = vmatprep.subr.bf16.mxu0 %v2176_v50  ;;  %v2190_v55 = vpack.i.bf16 %v246_v52, %v208_v51  ;;  %v210_v59 = vld [vmem:[%s2093_s9 + $0xf8] sm:$0xff]  ;;  %v247_v60 = vld [vmem:[%s2093_s9 + $0x100] sm:$0xff]  ;;  %v2204_v62 = vpack.i.bf16 %v207_v57, %v205_v56  ;;  %v212_v8 = vld [vmem:[%s2093_s9 + $0x110] sm:$0xff]  ;;  %v2217_v14 = vpack.c.bf16 %v207_v57, %v205_v56 }
  0x2a   : >> { %1665 = vrot.lane.b32.xlu0 %v2121_v24, %s1958_s10  ;;  %v2208_v63 = vpack.i.bf16 %v247_v60, %v210_v59  ;;  %v248_v9 = vld [vmem:[%s2093_s9 + $0x118] sm:$0xff]  ;;  %v209_v12 = vld [vmem:[%s2093_s9 + $0xf0] sm:$0xff]  ;;  %v211_v13 = vld [vmem:[%s2093_s9 + $0x108] sm:$0xff]  ;;  %v2230_v22 = vpack.c.bf16 %v212_v8, %v210_v59  ;;  %v1959_v60 = vmov 0.0  }
  0x2b   : >> { %1670 = vrot.lane.b32.xlu1 %v2125_v25, %s1958_s10  ;;  %v2222_v16 = vpack.i.bf16 %v248_v9, %v212_v8  ;;  %v2226_v17 = vpack.i.bf16 %v211_v13, %v209_v12  ;;  %v214_v20 = vld [vmem:[%s2093_s9 + $0x128] sm:$0xff]  ;;  %v249_v21 = vld [vmem:[%s2093_s9 + $0x130] sm:$0xff]  ;;  %v216_v23 = vld [vmem:[%s2093_s9 + $0x140] sm:$0xff]  ;;  %v2235_v27 = vpack.c.bf16 %v211_v13, %v209_v12  ;;  %543 = vmatprep.mubr.f32.mxu1 %v1959_v60 }
  0x2c   : >> { %1457 = vmatpush1.bf16.msra.mxu0 %v2181_v53  ;;  %v250_v26 = vld [vmem:[%s2093_s9 + $0x148] sm:$0xff]  ;;  %v2240_v28 = vpack.i.bf16 %v249_v21, %v214_v20  ;;  %v213_v32 = vld [vmem:[%s2093_s9 + $0x120] sm:$0xff]  ;;  %v215_v33 = vld [vmem:[%s2093_s9 + $0x138] sm:$0xff]  ;;  %v2248_v34 = vpack.c.bf16 %v216_v23, %v214_v20  ;;  %704 = vmatprep.mubr.f32.mxu0 %v1959_v60 }
  0x2d   : >> { %1459 = vmatprep.subr.bf16.mxu0 %v2194_v58  ;;  %v2244_v29 = vpack.i.bf16 %v250_v26, %v216_v23  ;;  %v218_v35 = vld [vmem:[%s2093_s9 + $0x158] sm:$0xff]  ;;  %v251_v40 = vld [vmem:[%s2093_s9 + $0x160] sm:$0xff]  ;;  %v2253_v41 = vpack.c.bf16 %v215_v33, %v213_v32  ;;  %v2258_v42 = vpack.i.bf16 %v215_v33, %v213_v32  ;;  %v220_v43 = vld [vmem:[%s2093_s9 + $0x170] sm:$0xff] }
  0x2e   : >> { %1675 = vrot.lane.b32.xlu0 %v2133_v30, %s1958_s10  ;;  %v2263_v48 = vpack.i.bf16 %v251_v40, %v218_v35  ;;  %v252_v49 = vld [vmem:[%s2093_s9 + $0x178] sm:$0xff]  ;;  %v217_v51 = vld [vmem:[%s2093_s9 + $0x150] sm:$0xff]  ;;  %v219_v52 = vld [vmem:[%s2093_s9 + $0x168] sm:$0xff]  ;;  %v2268_v56 = vpack.c.bf16 %v220_v43, %v218_v35  ;;  %s2677_s9 = scalar_lea.hbm (%p179_p11), %s2729_s3, %s1413_s6 }
  0x2f   : >> { %1680 = vrot.lane.b32.xlu1 %v2137_v31, %s1958_s10  ;;  %v2271_v57 = vpack.c.bf16 %v219_v52, %v217_v51  ;;  %v1754_v59 = vpack.i.bf16 %v252_v49, %v220_v43  ;;  %v1759_v8 = vpack.i.bf16 %v219_v52, %v217_v51  ;;  %v221_v9 = vld [vmem:[%s2727_s1] sm:$0xff] }
  0x30   : >> { %1461 = vmatpush1.bf16.msra.mxu0 %v2199_v61 }
  0x31   : >> { %1463 = vmatprep.subr.bf16.mxu0 %v2212_v10 }
  0x32   : >> { %1685 = vrot.lane.b32.xlu0 %v2149_v38, %s1958_s10 }
  0x33   : >> { %1690 = vrot.lane.b32.xlu1 %v2154_v39, %s1958_s10 }
  0x34   : >> { %1465 = vmatpush1.bf16.msra.mxu0 %v2217_v14 }
  0x35   : >> { %1467 = vmatprep.subr.bf16.mxu0 %v2230_v22 }
  0x36   : >> { %1695 = vrot.lane.b32.xlu0 %v2167_v46, %s1958_s10 }
  0x37   : >> { %1700 = vrot.lane.b32.xlu1 %v2172_v47, %s1958_s10 }
  0x38   : >> { %1469 = vmatpush1.bf16.msra.mxu0 %v2235_v27 }
  0x39   : >> { %1471 = vmatprep.subr.bf16.mxu0 %v2248_v34 }
  0x3a   : >> { %1705 = vrot.lane.b32.xlu0 %v2186_v54, %s1958_s10 }
  0x3b   : >> { %1710 = vrot.lane.b32.xlu1 %v2190_v55, %s1958_s10 }
  0x3c   : >> { %1473 = vmatpush1.bf16.msra.mxu0 %v2253_v41 }
  0x3d   : >> { %1475 = vmatprep.subr.bf16.mxu0 %v2268_v56 }
  0x3e   : >> { %1715 = vrot.lane.b32.xlu0 %v2204_v62, %s1958_s10 }
  0x3f   : >> { %1720 = vrot.lane.b32.xlu1 %v2208_v63, %s1958_s10 }
  0x40   : >> { %1477 = vmatpush1.bf16.msra.mxu0 %v2271_v57 }
  0x42   : >> { %1725 = vrot.lane.b32.xlu0 %v2222_v16, %s1958_s10 }
  0x43   : >> { %1730 = vrot.lane.b32.xlu1 %v2226_v17, %s1958_s10  ;;  %705 = vmatmul.mubr.f32.vlgmr.msra.gmra.mrb[0].mxu0 %v221_v9 }
  0x44   : >> { %710 = vmatprep.mubr.f32.mxu0 %v1959_v60 }
  0x46   : >> { %1735 = vrot.lane.b32.xlu0 %v2240_v28, %s1958_s10 }
  0x47   : >> { %1740 = vrot.lane.b32.xlu1 %v2244_v29, %s1958_s10 }
  0x4a   : >> { %1745 = vrot.lane.b32.xlu0 %v2258_v42, %s1958_s10 }
  0x4b   : >> { %1750 = vrot.lane.b32.xlu1 %v2263_v48, %s1958_s10 }
  0x4e   : >> { %1755 = vrot.lane.b32.xlu0 %v1754_v59, %s1958_s10 }
  0x4f   : >> { %1760 = vrot.lane.b32.xlu1 %v1759_v8, %s1958_s10  ;;  %s1293_s10 = sshll.u32 (%p179_p11), %s163_s30, 4  ;;  %s2681_s10 = int_to_ptr.vmem [resolvable:$true] %s1293_s10 }
  0x50   : > { %s1886_s29 = scalar_lea.vmem (%p179_p11), %s2681_s10, 32768  ;;  %p1893_p1 = scmp.lt.s32.totalorder (%p179_p11), %s2681_s10, %s1891_s11 }
  0x51   : > { %p1887_p12 = scmp.ne.s32.totalorder (%p179_p11), %s2681_s10, %s1886_s29  ;;  %p1894_p2 = scmp.lt.s32.totalorder (%p179_p11), %s1892_s17, %s1886_s29 }
  0x52   : >> { %1765 = vrot.lane.b32.xlu0 %v2098_v11, %s1960_s19  ;;  %v222_v11 = vld [vmem:[%s2727_s1 + $0x8] sm:$0xff] }
  0x53   : >> { %1770 = vrot.lane.b32.xlu1 %v2109_v18, %s1960_s19  ;;  %711 = vmatmul.mubr.f32.gmra.mrb[2].mxu0 %v222_v11  ;;  %v224_v18 = vld [vmem:[%s2727_s1 + $0x18] sm:$0xff]  ;;  %p1888_p13 = pnand (%p179_p11), %p1887_p12, %p2023_p5  ;;  %p1895_p3 = por (%p179_p11), %p1894_p2, %p1893_p1 }
  0x54   : >> { %716 = vmatprep.mubr.f32.mxu0 %v1959_v60 }
  0x55   : > { %p1889_p0 = pneg (%p179_p11), %p1888_p13 }
  0x56   : >> { %1775 = vrot.lane.b32.xlu0 %v2103_v15, %s1960_s19  ;;  %v223_v15 = vld [vmem:[%s2727_s1 + $0x10] sm:$0xff] }
  0x57   : >> { %1780 = vrot.lane.b32.xlu1 %v2113_v19, %s1960_s19  ;;  %717 = vmatmul.mubr.f32.gmra.mrb[4].mxu0 %v223_v15  ;;  %v225_v19 = vld [vmem:[%s2727_s1 + $0x20] sm:$0xff]  ;;  %p1896_p4 = pnand (%p179_p11), %p1895_p3, %p1889_p0 }
  0x58   : >> { %722 = vmatprep.mubr.f32.mxu0 %v1959_v60 }
  0x5a   : >> { %1785 = vrot.lane.b32.xlu0 %v2121_v24, %s1960_s19  ;;  %v226_v24 = vld [vmem:[%s2727_s1 + $0x28] sm:$0xff] }
  0x5b   : >> { %1790 = vrot.lane.b32.xlu1 %v2125_v25, %s1960_s19  ;;  %723 = vmatmul.mubr.f32.gmra.mrb[6].mxu0 %v224_v18  ;;  %v227_v25 = vld [vmem:[%s2727_s1 + $0x30] sm:$0xff] }
  0x5c   : >> { %728 = vmatprep.mubr.f32.mxu0 %v1959_v60 }
  0x5e   : >> { %1795 = vrot.lane.b32.xlu0 %v2133_v30, %s1960_s19  ;;  %v228_v30 = vld [vmem:[%s2727_s1 + $0x38] sm:$0xff] }
  0x5f   : >> { %1800 = vrot.lane.b32.xlu1 %v2137_v31, %s1960_s19  ;;  %729 = vmatmul.mubr.f32.gmra.mrb[8].mxu0 %v225_v19 }
  0x60   : >> { %734 = vmatprep.mubr.f32.mxu0 %v1959_v60 }
  0x62   : >> { %1805 = vrot.lane.b32.xlu0 %v2149_v38, %s1960_s19 }
  0x63   : >> { %1810 = vrot.lane.b32.xlu1 %v2154_v39, %s1960_s19  ;;  %735 = vmatmul.mubr.f32.gmra.mrb[10].mxu0 %v226_v24 }
  0x64   : >> { %740 = vmatprep.mubr.f32.mxu0 %v1959_v60 }
  0x66   : >> { %1815 = vrot.lane.b32.xlu0 %v2167_v46, %s1960_s19 }
  0x67   : >> { %1820 = vrot.lane.b32.xlu1 %v2172_v47, %s1960_s19  ;;  %741 = vmatmul.mubr.f32.gmra.mrb[12].mxu0 %v227_v25 }
  0x68   : >> { %746 = vmatprep.mubr.f32.mxu0 %v1959_v60 }
  0x6a   : >> { %1825 = vrot.lane.b32.xlu0 %v2186_v54, %s1960_s19 }
  0x6b   : >> { %1830 = vrot.lane.b32.xlu1 %v2190_v55, %s1960_s19  ;;  %747 = vmatmul.mubr.f32.gmra.mrb[14].mxu0 %v228_v30 }
  0x6c   : >> { %1043 = vmatprep.mubr.f32.mxu0 %v1959_v60 }
  0x6e   : >> { %1835 = vrot.lane.b32.xlu0 %v2204_v62, %s1960_s19 }
  0x6f   : >> { %1840 = vrot.lane.b32.xlu1 %v2208_v63, %s1960_s19 }
  0x72   : >> { %1845 = vrot.lane.b32.xlu0 %v2222_v16, %s1960_s19 }
  0x73   : >> { %1850 = vrot.lane.b32.xlu1 %v2226_v17, %s1960_s19 }
  0x76   : >> { %1855 = vrot.lane.b32.xlu0 %v2240_v28, %s1960_s19 }
  0x77   : >> { %1860 = vrot.lane.b32.xlu1 %v2244_v29, %s1960_s19 }
  0x7a   : >> { %1865 = vrot.lane.b32.xlu0 %v2258_v42, %s1960_s19 }
  0x7b   : >> { %1870 = vrot.lane.b32.xlu1 %v2263_v48, %s1960_s19 }
  0x7e   : >> { %1875 = vrot.lane.b32.xlu0 %v1754_v59, %s1960_s19 }
  0x7f   : >> { %1880 = vrot.lane.b32.xlu1 %v1759_v8, %s1960_s19 }
  0x94   : >> { %v1646_v31 = vpop.permute.xlu0 %1645 }
  0x95   : >> { %v1656_v38 = vpop.permute.xlu1 %1655  ;;  %v1648_v39 = vunpack.i.h.bf16 %v1646_v31  ;;  %v1647_v46 = vunpack.i.l.bf16 %v1646_v31 }
  0x96   : >> { %v1657_v47 = vunpack.i.l.bf16 %v1656_v38  ;;  %v1658_v55 = vunpack.i.h.bf16 %v1656_v38 }
  0x97   : >> { %v416_v13 = vsel %vm414_vm0, %v1647_v46, %v1648_v39 }
  0x98   : >> { %v1651_v54 = vpop.permute.xlu0 %1650  ;;  %v415_v16 = vsel %vm414_vm0, %v1657_v47, %v1647_v46 }
  0x99   : >> { %v1653_v62 = vunpack.i.h.bf16 %v1651_v54  ;;  %v1652_v63 = vunpack.i.l.bf16 %v1651_v54  ;;  %v1661_v12 = vpop.permute.xlu1 %1660 }
  0x9a   : >> { %v1663_v17 = vunpack.i.h.bf16 %v1661_v12  ;;  %v1662_v20 = vunpack.i.l.bf16 %v1661_v12 }
  0x9b   : >> { %v418_v21 = vsel %vm414_vm0, %v1652_v63, %v1653_v62  ;;  %v417_v23 = vsel %vm414_vm0, %v1658_v55, %v1652_v63 }
  0x9c   : >> { %v1666_v26 = vpop.permute.xlu0 %1665  ;;  %v1414_v28 = vpack.c.bf16 %v418_v21, %v416_v13  ;;  %v1416_v29 = vpack.c.bf16 %v417_v23, %v415_v16  ;;  %v420_v43 = vsel %vm414_vm0, %v1662_v20, %v1663_v17 }
  0x9d   : >> { %v1668_v32 = vunpack.i.h.bf16 %v1666_v26  ;;  %v1667_v33 = vunpack.i.l.bf16 %v1666_v26  ;;  %v1671_v35 = vpop.permute.xlu1 %1670 }
  0x9e   : >> { %v1673_v40 = vunpack.i.h.bf16 %v1671_v35  ;;  %v1672_v42 = vunpack.i.l.bf16 %v1671_v35  ;;  %1415 = vmatprep.subr.bf16.mxu1 %v1414_v28 }
  0x9f   : >> { %1417 = vmatpush1.bf16.msra.mxu1 %v1416_v29  ;;  %v422_v48 = vsel %vm414_vm0, %v1667_v33, %v1668_v32 }
  0xa0   : >> { %v1676_v49 = vpop.permute.xlu0 %1675  ;;  %v1418_v51 = vpack.c.bf16 %v422_v48, %v420_v43  ;;  %v419_v52 = vsel %vm414_vm0, %v1672_v42, %v1662_v20  ;;  %v421_v59 = vsel %vm414_vm0, %v1673_v40, %v1667_v33 }
  0xa1   : >> { %v1678_v8 = vunpack.i.h.bf16 %v1676_v49  ;;  %v1677_v9 = vunpack.i.l.bf16 %v1676_v49  ;;  %v1681_v11 = vpop.permute.xlu1 %1680  ;;  %v1420_v15 = vpack.c.bf16 %v421_v59, %v419_v52 }
  0xa2   : >> { %v1683_v18 = vunpack.i.h.bf16 %v1681_v11  ;;  %v1682_v19 = vunpack.i.l.bf16 %v1681_v11  ;;  %1419 = vmatprep.subr.bf16.mxu1 %v1418_v51 }
  0xa3   : >> { %1421 = vmatpush1.bf16.msra.mxu1 %v1420_v15  ;;  %v424_v24 = vsel %vm414_vm0, %v1677_v9, %v1678_v8 }
  0xa4   : >> { %v1686_v25 = vpop.permute.xlu0 %1685  ;;  %v426_v30 = vsel %vm414_vm0, %v1682_v19, %v1683_v18 }
  0xa5   : >> { %v1688_v31 = vunpack.i.h.bf16 %v1686_v25  ;;  %v1687_v38 = vunpack.i.l.bf16 %v1686_v25  ;;  %v1691_v39 = vpop.permute.xlu1 %1690  ;;  %v1422_v46 = vpack.c.bf16 %v426_v30, %v424_v24 }
  0xa6   : >> { %v1693_v47 = vunpack.i.h.bf16 %v1691_v39  ;;  %v1692_v54 = vunpack.i.l.bf16 %v1691_v39 }
  0xa7   : >> { %1423 = vmatprep.subr.bf16.mxu1 %v1422_v46  ;;  %v423_v55 = vsel %vm414_vm0, %v1687_v38, %v1677_v9  ;;  %v425_v62 = vsel %vm414_vm0, %v1688_v31, %v1682_v19 }
  0xa8   : >> { %v1696_v63 = vpop.permute.xlu0 %1695  ;;  %v1424_v12 = vpack.c.bf16 %v425_v62, %v423_v55  ;;  %v428_v23 = vsel %vm414_vm0, %v1692_v54, %v1693_v47 }
  0xa9   : >> { %v1698_v13 = vunpack.i.h.bf16 %v1696_v63  ;;  %v1697_v16 = vunpack.i.l.bf16 %v1696_v63  ;;  %v1701_v17 = vpop.permute.xlu1 %1700  ;;  %v1961_v63 = vmov 0  }
  0xaa   : >> { %v1703_v20 = vunpack.i.h.bf16 %v1701_v17  ;;  %v1702_v21 = vunpack.i.l.bf16 %v1701_v17  ;;  %1425 = vmatpush1.bf16.msra.mxu1 %v1424_v12  ;;  %1884 = vset.pattern.permute.xlu0 %v1961_v63 }
  0xab   : >> { %v430_v26 = vsel %vm414_vm0, %v1697_v16, %v1698_v13  ;;  %1885 = vset.pattern.permute.xlu1 %v1961_v63  ;;  %1190 = vperm.xlu0 %1884, %v2038_v0  }
  0xac   : >> { %v1706_v28 = vpop.permute.xlu0 %1705  ;;  %v1426_v29 = vpack.c.bf16 %v430_v26, %v428_v23  ;;  %v427_v32 = vsel %vm414_vm0, %v1702_v21, %v1692_v54  ;;  %v429_v33 = vsel %vm414_vm0, %v1703_v20, %v1697_v16  ;;  %1195 = vperm.xlu1 %1885, %v2043_v1  }
  0xad   : >> { %v1708_v35 = vunpack.i.h.bf16 %v1706_v28  ;;  %v1707_v40 = vunpack.i.l.bf16 %v1706_v28  ;;  %v1711_v42 = vpop.permute.xlu1 %1710  ;;  %v1428_v43 = vpack.c.bf16 %v429_v33, %v427_v32 }
  0xae   : >> { %v1713_v48 = vunpack.i.h.bf16 %v1711_v42  ;;  %v1712_v49 = vunpack.i.l.bf16 %v1711_v42  ;;  %1427 = vmatprep.subr.bf16.mxu1 %v1426_v29 }
  0xaf   : >> { %1429 = vmatpush1.bf16.msra.mxu1 %v1428_v43  ;;  %v432_v51 = vsel %vm414_vm0, %v1707_v40, %v1708_v35  ;;  %1205 = vperm.xlu0 %1884, %v2057_v3  }
  0xb0   : >> { %v1716_v52 = vpop.permute.xlu0 %1715  ;;  %v434_v59 = vsel %vm414_vm0, %v1712_v49, %v1713_v48  ;;  %1200 = vperm.xlu1 %1885, %v2048_v2  }
  0xb1   : >> { %v1718_v8 = vunpack.i.h.bf16 %v1716_v52  ;;  %v1717_v9 = vunpack.i.l.bf16 %v1716_v52  ;;  %v1721_v11 = vpop.permute.xlu1 %1720  ;;  %v1430_v15 = vpack.c.bf16 %v434_v59, %v432_v51 }
  0xb2   : >> { %v1723_v18 = vunpack.i.h.bf16 %v1721_v11  ;;  %v1722_v19 = vunpack.i.l.bf16 %v1721_v11 }
  0xb3   : >> { %1431 = vmatprep.subr.bf16.mxu1 %v1430_v15  ;;  %v431_v24 = vsel %vm414_vm0, %v1717_v9, %v1707_v40  ;;  %v433_v25 = vsel %vm414_vm0, %v1718_v8, %v1712_v49  ;;  %1215 = vperm.xlu0 %1884, %v2067_v5  }
  0xb4   : >> { %v1726_v30 = vpop.permute.xlu0 %1725  ;;  %v1432_v31 = vpack.c.bf16 %v433_v25, %v431_v24  ;;  %v436_v55 = vsel %vm414_vm0, %v1722_v19, %v1723_v18  ;;  %1210 = vperm.xlu1 %1885, %v2062_v4  }
  0xb5   : >> { %v1728_v38 = vunpack.i.h.bf16 %v1726_v30  ;;  %v1727_v39 = vunpack.i.l.bf16 %v1726_v30  ;;  %v1731_v46 = vpop.permute.xlu1 %1730 }
  0xb6   : >> { %v1733_v47 = vunpack.i.h.bf16 %v1731_v46  ;;  %v1732_v54 = vunpack.i.l.bf16 %v1731_v46  ;;  %1433 = vmatpush1.bf16.msra.mxu1 %v1432_v31 }
  0xb7   : >> { %v438_v62 = vsel %vm414_vm0, %v1727_v39, %v1728_v38  ;;  %1225 = vperm.xlu0 %1884, %v2077_v7  }
  0xb8   : >> { %v1736_v12 = vpop.permute.xlu0 %1735  ;;  %v1434_v13 = vpack.c.bf16 %v438_v62, %v436_v55  ;;  %v435_v16 = vsel %vm414_vm0, %v1732_v54, %v1722_v19  ;;  %v437_v17 = vsel %vm414_vm0, %v1733_v47, %v1727_v39  ;;  %1220 = vperm.xlu1 %1885, %v2072_v6  }
  0xb9   : >> { %v1738_v20 = vunpack.i.h.bf16 %v1736_v12  ;;  %v1737_v21 = vunpack.i.l.bf16 %v1736_v12  ;;  %v1741_v23 = vpop.permute.xlu1 %1740  ;;  %v1436_v26 = vpack.c.bf16 %v437_v17, %v435_v16 }
  0xba   : >> { %v1743_v28 = vunpack.i.h.bf16 %v1741_v23  ;;  %v1742_v29 = vunpack.i.l.bf16 %v1741_v23  ;;  %1435 = vmatprep.subr.bf16.mxu1 %v1434_v13  ;;  %v1372_v13 = vld [vmem:[%s2727_s1 + $0x80] sm:$0xff] }
  0xbb   : >> { %1437 = vmatpush1.bf16.msra.mxu1 %v1436_v26  ;;  %v440_v32 = vsel %vm414_vm0, %v1737_v21, %v1738_v20 }
  0xbc   : >> { %v1746_v33 = vpop.permute.xlu0 %1745  ;;  %v442_v35 = vsel %vm414_vm0, %v1742_v29, %v1743_v28 }
  0xbd   : >> { %v1748_v40 = vunpack.i.h.bf16 %v1746_v33  ;;  %v1747_v42 = vunpack.i.l.bf16 %v1746_v33  ;;  %v1751_v43 = vpop.permute.xlu1 %1750  ;;  %v1438_v48 = vpack.c.bf16 %v442_v35, %v440_v32 }
  0xbe   : >> { %v1753_v49 = vunpack.i.h.bf16 %v1751_v43  ;;  %v1752_v51 = vunpack.i.l.bf16 %v1751_v43 }
  0xbf   : >> { %1439 = vmatprep.subr.bf16.mxu1 %v1438_v48  ;;  %v439_v52 = vsel %vm414_vm0, %v1747_v42, %v1737_v21  ;;  %v441_v59 = vsel %vm414_vm0, %v1748_v40, %v1742_v29  ;;  %v1373_v40 = vld [vmem:[%s2727_s1 + $0x88] sm:$0xff] }
  0xc0   : >> { %v1756_v8 = vpop.permute.xlu0 %1755  ;;  %v1440_v9 = vpack.c.bf16 %v441_v59, %v439_v52  ;;  %v444_v25 = vsel %vm414_vm0, %v1752_v51, %v1753_v49  ;;  %v1374_v59 = vld [vmem:[%s2727_s1 + $0x90] sm:$0xff] }
  0xc1   : >> { %v1758_v11 = vunpack.i.h.bf16 %v1756_v8  ;;  %v1757_v15 = vunpack.i.l.bf16 %v1756_v8  ;;  %v1761_v18 = vpop.permute.xlu1 %1760 }
  0xc2   : >> { %v1763_v19 = vunpack.i.h.bf16 %v1761_v18  ;;  %v1762_v24 = vunpack.i.l.bf16 %v1761_v18  ;;  %1441 = vmatpush1.bf16.msra.mxu1 %v1440_v9 }
  0xc3   : >> { %v446_v30 = vsel %vm414_vm0, %v1757_v15, %v1758_v11 }
  0xc4   : >> { %v1766_v31 = vpop.permute.xlu0 %1765  ;;  %v1442_v38 = vpack.c.bf16 %v446_v30, %v444_v25  ;;  %v443_v39 = vsel %vm414_vm0, %v1762_v24, %v1752_v51  ;;  %v445_v46 = vsel %vm414_vm0, %v1763_v19, %v1757_v15 }
  0xc5   : >> { %v1768_v47 = vunpack.i.h.bf16 %v1766_v31  ;;  %v1767_v54 = vunpack.i.l.bf16 %v1766_v31  ;;  %v1771_v55 = vpop.permute.xlu1 %1770  ;;  %v1444_v62 = vpack.c.bf16 %v445_v46, %v443_v39 }
  0xc6   : >> { %v1773_v63 = vunpack.i.h.bf16 %v1771_v55  ;;  %v1772_v12 = vunpack.i.l.bf16 %v1771_v55  ;;  %1443 = vmatprep.subr.bf16.mxu1 %v1442_v38  ;;  %v1375_v38 = vld [vmem:[%s2727_s1 + $0x98] sm:$0xff] }
  0xc7   : >> { %1445 = vmatpush1.bf16.msra.mxu1 %v1444_v62  ;;  %v916_v16 = vsel %vm914_vm1, %v1767_v54, %v1768_v47 }
  0xc8   : >> { %v1776_v17 = vpop.permute.xlu0 %1775  ;;  %v918_v20 = vsel %vm914_vm1, %v1772_v12, %v1773_v63  ;;  %1510 = vmatprep.subr.bf16.mxu1 %v2143_v36 }
  0xc9   : >> { %v1778_v21 = vunpack.i.h.bf16 %v1776_v17  ;;  %v1777_v23 = vunpack.i.l.bf16 %v1776_v17  ;;  %v1781_v26 = vpop.permute.xlu1 %1780  ;;  %v1478_v28 = vpack.c.bf16 %v918_v20, %v916_v16 }
  0xca   : >> { %544 = vmatmul.mubr.f32.vlgmr.msra.gmra.mrb[0].mxu1 %v1372_v13  ;;  %v1783_v33 = vunpack.i.h.bf16 %v1781_v26  ;;  %v1782_v35 = vunpack.i.l.bf16 %v1781_v26 }
  0xcb   : >> { %v915_v29 = vsel %vm914_vm1, %v1777_v23, %v1767_v54  ;;  %v917_v32 = vsel %vm914_vm1, %v1778_v21, %v1772_v12  ;;  %1479 = vmatprep.subr.bf16.mxu0 %v1478_v28  ;;  %549 = vmatprep.mubr.f32.mxu1 %v1959_v60  ;;  %v1377_v28 = vld [vmem:[%s2727_s1 + $0xa8] sm:$0xff] }
  0xcc   : >> { %v1480_v42 = vpack.c.bf16 %v917_v32, %v915_v29  ;;  %v1786_v36 = vpop.permute.xlu0 %1785  ;;  %1518 = vmatpush1.bf16.msra.mxu1 %v2145_v37  ;;  %v920_v8 = vsel %vm914_vm1, %v1782_v35, %v1783_v33 }
  0xcd   : >> { %v1788_v43 = vunpack.i.h.bf16 %v1786_v36  ;;  %v1787_v48 = vunpack.i.l.bf16 %v1786_v36  ;;  %v1791_v49 = vpop.permute.xlu1 %1790  ;;  %1511 = vmatprep.subr.bf16.mxu1 %v2161_v44 }
  0xce   : >> { %v1793_v51 = vunpack.i.h.bf16 %v1791_v49  ;;  %v1792_v52 = vunpack.i.l.bf16 %v1791_v49  ;;  %550 = vmatmul.mubr.f32.gmra.mrb[2].mxu1 %v1373_v40  ;;  %1481 = vmatpush1.bf16.msra.mxu0 %v1480_v42 }
  0xcf   : >> { %555 = vmatprep.mubr.f32.mxu1 %v1959_v60  ;;  %v922_v9 = vsel %vm914_vm1, %v1787_v48, %v1788_v43 }
  0xd0   : >> { %v921_v37 = vsel %vm914_vm1, %v1793_v51, %v1787_v48  ;;  %v919_v11 = vsel %vm914_vm1, %v1792_v52, %v1782_v35  ;;  %v1796_v15 = vpop.permute.xlu0 %1795  ;;  %v1482_v44 = vpack.c.bf16 %v922_v9, %v920_v8  ;;  %1519 = vmatpush1.bf16.msra.mxu1 %v2163_v45  ;;  %v1378_v51 = vld [vmem:[%s2727_s1 + $0xb0] sm:$0xff] }
  0xd1   : >> { %v1484_v18 = vpack.c.bf16 %v921_v37, %v919_v11  ;;  %v1798_v19 = vunpack.i.h.bf16 %v1796_v15  ;;  %v1797_v24 = vunpack.i.l.bf16 %v1796_v15  ;;  %v1801_v25 = vpop.permute.xlu1 %1800  ;;  %1512 = vmatprep.subr.bf16.mxu1 %v2176_v50 }
  0xd2   : >> { %v1803_v30 = vunpack.i.h.bf16 %v1801_v25  ;;  %v1802_v31 = vunpack.i.l.bf16 %v1801_v25  ;;  %556 = vmatmul.mubr.f32.gmra.mrb[4].mxu1 %v1374_v59  ;;  %1483 = vmatprep.subr.bf16.mxu0 %v1482_v44 }
  0xd3   : >> { %1485 = vmatpush1.bf16.msra.mxu0 %v1484_v18  ;;  %561 = vmatprep.mubr.f32.mxu1 %v1959_v60  ;;  %v924_v39 = vsel %vm914_vm1, %v1797_v24, %v1798_v19 }
  0xd4   : >> { %v1806_v45 = vpop.permute.xlu0 %1805  ;;  %v926_v46 = vsel %vm914_vm1, %v1802_v31, %v1803_v30  ;;  %1520 = vmatpush1.bf16.msra.mxu1 %v2181_v53  ;;  %v1376_v53 = vld [vmem:[%s2727_s1 + $0xa0] sm:$0xff] }
  0xd5   : >> { %v1808_v47 = vunpack.i.h.bf16 %v1806_v45  ;;  %v1807_v50 = vunpack.i.l.bf16 %v1806_v45  ;;  %v1811_v54 = vpop.permute.xlu1 %1810  ;;  %v1486_v55 = vpack.c.bf16 %v926_v46, %v924_v39  ;;  %1513 = vmatprep.subr.bf16.mxu1 %v2194_v58  ;;  %v1380_v39 = vld [vmem:[%s2727_s1 + $0xc0] sm:$0xff] }
  0xd6   : >> { %562 = vmatmul.mubr.f32.gmra.mrb[6].mxu1 %v1375_v38  ;;  %v1813_v12 = vunpack.i.h.bf16 %v1811_v54  ;;  %v1812_v13 = vunpack.i.l.bf16 %v1811_v54 }
  0xd7   : >> { %v923_v62 = vsel %vm914_vm1, %v1807_v50, %v1797_v24  ;;  %v925_v63 = vsel %vm914_vm1, %v1808_v47, %v1802_v31  ;;  %1487 = vmatprep.subr.bf16.mxu0 %v1486_v55  ;;  %567 = vmatprep.mubr.f32.mxu1 %v1959_v60 }
  0xd8   : >> { %v1488_v16 = vpack.c.bf16 %v925_v63, %v923_v62  ;;  %v1816_v17 = vpop.permute.xlu0 %1815  ;;  %1521 = vmatpush1.bf16.msra.mxu1 %v2199_v61  ;;  %v928_v29 = vsel %vm914_vm1, %v1812_v13, %v1813_v12 }
  0xd9   : >> { %v1818_v20 = vunpack.i.h.bf16 %v1816_v17  ;;  %v1817_v58 = vunpack.i.l.bf16 %v1816_v17  ;;  %v1821_v21 = vpop.permute.xlu1 %1820  ;;  %1514 = vmatprep.subr.bf16.mxu1 %v2212_v10 }
  0xda   : >> { %v1823_v23 = vunpack.i.h.bf16 %v1821_v21  ;;  %v1822_v26 = vunpack.i.l.bf16 %v1821_v21  ;;  %568 = vmatmul.mubr.f32.gmra.mrb[8].mxu1 %v1376_v53  ;;  %1489 = vmatpush1.bf16.msra.mxu0 %v1488_v16  ;;  %v1381_v53 = vld [vmem:[%s2727_s1 + $0xc8] sm:$0xff] }
  0xdb   : >> { %573 = vmatprep.mubr.f32.mxu1 %v1959_v60  ;;  %v930_v32 = vsel %vm914_vm1, %v1817_v58, %v1818_v20 }
  0xdc   : >> { %v929_v61 = vsel %vm914_vm1, %v1823_v23, %v1817_v58  ;;  %v927_v33 = vsel %vm914_vm1, %v1822_v26, %v1812_v13  ;;  %v1826_v35 = vpop.permute.xlu0 %1825  ;;  %v1490_v10 = vpack.c.bf16 %v930_v32, %v928_v29  ;;  %1522 = vmatpush1.bf16.msra.mxu1 %v2217_v14 }
  0xdd   : >> { %v1492_v40 = vpack.c.bf16 %v929_v61, %v927_v33  ;;  %v1828_v42 = vunpack.i.h.bf16 %v1826_v35  ;;  %v1827_v36 = vunpack.i.l.bf16 %v1826_v35  ;;  %v1831_v43 = vpop.permute.xlu1 %1830  ;;  %1515 = vmatprep.subr.bf16.mxu1 %v2230_v22  ;;  %v1382_v61 = vld [vmem:[%s2727_s1 + $0xd0] sm:$0xff] }
  0xde   : >> { %v1833_v48 = vunpack.i.h.bf16 %v1831_v43  ;;  %v1832_v49 = vunpack.i.l.bf16 %v1831_v43  ;;  %574 = vmatmul.mubr.f32.gmra.mrb[10].mxu1 %v1377_v28  ;;  %1491 = vmatprep.subr.bf16.mxu0 %v1490_v10 }
  0xdf   : >> { %1493 = vmatpush1.bf16.msra.mxu0 %v1492_v40  ;;  %579 = vmatprep.mubr.f32.mxu1 %v1959_v60  ;;  %v932_v52 = vsel %vm914_vm1, %v1827_v36, %v1828_v42 }
  0xe0   : >> { %v1836_v14 = vpop.permute.xlu0 %1835  ;;  %v934_v59 = vsel %vm914_vm1, %v1832_v49, %v1833_v48  ;;  %1523 = vmatpush1.bf16.msra.mxu1 %v2235_v27  ;;  %v1379_v27 = vld [vmem:[%s2727_s1 + $0xb8] sm:$0xff] }
  0xe1   : >> { %v1838_v8 = vunpack.i.h.bf16 %v1836_v14  ;;  %v1837_v22 = vunpack.i.l.bf16 %v1836_v14  ;;  %v1841_v9 = vpop.permute.xlu1 %1840  ;;  %v1494_v37 = vpack.c.bf16 %v934_v59, %v932_v52  ;;  %1516 = vmatprep.subr.bf16.mxu1 %v2248_v34  ;;  %v1383_v48 = vld [vmem:[%s2727_s1 + $0xd8] sm:$0xff] }
  0xe2   : >> { %580 = vmatmul.mubr.f32.gmra.mrb[12].mxu1 %v1378_v51  ;;  %v1843_v44 = vunpack.i.h.bf16 %v1841_v9  ;;  %v1842_v18 = vunpack.i.l.bf16 %v1841_v9  ;;  %v1388_v9 = vld [vmem:[%s2727_s1 + $0x100] sm:$0xff] }
  0xe3   : >> { %v931_v11 = vsel %vm914_vm1, %v1837_v22, %v1827_v36  ;;  %v933_v15 = vsel %vm914_vm1, %v1838_v8, %v1832_v49  ;;  %1495 = vmatprep.subr.bf16.mxu0 %v1494_v37  ;;  %585 = vmatprep.mubr.f32.mxu1 %v1959_v60  ;;  %v1384_v22 = vld [vmem:[%s2727_s1 + $0xe0] sm:$0xff]  ;;  %v1385_v37 = vld [vmem:[%s2727_s1 + $0xe8] sm:$0xff] }
  0xe4   : >> { %v1496_v19 = vpack.c.bf16 %v933_v15, %v931_v11  ;;  %v1846_v24 = vpop.permute.xlu0 %1845  ;;  %1524 = vmatpush1.bf16.msra.mxu1 %v2253_v41  ;;  %v936_v45 = vsel %vm914_vm1, %v1842_v18, %v1843_v44  ;;  %v1389_v11 = vld [vmem:[%s2727_s1 + $0x108] sm:$0xff]  ;;  %v1386_v15 = vld [vmem:[%s2727_s1 + $0xf0] sm:$0xff] }
  0xe5   : >> { %v1848_v25 = vunpack.i.h.bf16 %v1846_v24  ;;  %v1847_v34 = vunpack.i.l.bf16 %v1846_v24  ;;  %v1851_v30 = vpop.permute.xlu1 %1850  ;;  %1517 = vmatprep.subr.bf16.mxu1 %v2268_v56  ;;  %v1390_v44 = vld [vmem:[%s2727_s1 + $0x110] sm:$0xff]  ;;  %v1392_v24 = vld [vmem:[%s2727_s1 + $0x120] sm:$0xff] }
  0xe6   : >> { %v1853_v31 = vunpack.i.h.bf16 %v1851_v30  ;;  %v1852_v38 = vunpack.i.l.bf16 %v1851_v30  ;;  %586 = vmatmul.mubr.f32.gmra.mrb[14].mxu1 %v1379_v27  ;;  %1497 = vmatpush1.bf16.msra.mxu0 %v1496_v19  ;;  %v1391_v27 = vld [vmem:[%s2727_s1 + $0x118] sm:$0xff]  ;;  %v229_v19 = vld [vmem:[%s2727_s1 + $0x40] sm:$0xff]  ;;  %v231_v30 = vld [vmem:[%s2727_s1 + $0x50] sm:$0xff] }
  0xe7   : >> { %591 = vmatprep.mubr.f32.mxu1 %v1959_v60  ;;  %v938_v46 = vsel %vm914_vm1, %v1847_v34, %v1848_v25  ;;  %v230_v25 = vld [vmem:[%s2727_s1 + $0x48] sm:$0xff] }
  0xe8   : >> { %v937_v41 = vsel %vm914_vm1, %v1853_v31, %v1847_v34  ;;  %v935_v47 = vsel %vm914_vm1, %v1852_v38, %v1842_v18  ;;  %v1856_v50 = vpop.permute.xlu0 %1855  ;;  %v1498_v56 = vpack.c.bf16 %v938_v46, %v936_v45  ;;  %1525 = vmatpush1.bf16.msra.mxu1 %v2271_v57  ;;  %v1387_v18 = vld [vmem:[%s2727_s1 + $0xf8] sm:$0xff]  ;;  %v1393_v34 = vld [vmem:[%s2727_s1 + $0x128] sm:$0xff]  ;;  %v1394_v31 = vld [vmem:[%s2727_s1 + $0x130] sm:$0xff] }
  0xe9   : >> { %v1500_v54 = vpack.c.bf16 %v937_v41, %v935_v47  ;;  %v1858_v55 = vunpack.i.h.bf16 %v1856_v50  ;;  %v1857_v62 = vunpack.i.l.bf16 %v1856_v50  ;;  %v1861_v63 = vpop.permute.xlu1 %1860  ;;  %v232_v38 = vld [vmem:[%s2727_s1 + $0x58] sm:$0xff]  ;;  %v233_v45 = vld [vmem:[%s2727_s1 + $0x60] sm:$0xff]  ;;  %v234_v41 = vld [vmem:[%s2727_s1 + $0x68] sm:$0xff] }
  0xea   : >> { %v1863_v12 = vunpack.i.h.bf16 %v1861_v63  ;;  %v1862_v13 = vunpack.i.l.bf16 %v1861_v63  ;;  %592 = vmatmul.mubr.f32.gmra.mrb[16].mxu1 %v1380_v39  ;;  %1499 = vmatprep.subr.bf16.mxu0 %v1498_v56  ;;  %v1395_v39 = vld [vmem:[%s2727_s1 + $0x138] sm:$0xff]  ;;  %v1396_v46 = vld [vmem:[%s2727_s1 + $0x140] sm:$0xff]  ;;  %v1397_v47 = vld [vmem:[%s2727_s1 + $0x148] sm:$0xff] }
  0xeb   : >> { %1501 = vmatpush1.bf16.msra.mxu0 %v1500_v54  ;;  %597 = vmatprep.mubr.f32.mxu1 %v1959_v60  ;;  %v940_v16 = vsel %vm914_vm1, %v1857_v62, %v1858_v55  ;;  %v235_v50 = vld [vmem:[%s2727_s1 + $0x70] sm:$0xff]  ;;  %v236_v54 = vld [vmem:[%s2727_s1 + $0x78] sm:$0xff]  ;;  %v1401_v63 = vld [vmem:[%s2727_s1 + $0x168] sm:$0xff] }
  0xec   : >> { %v1866_v17 = vpop.permute.xlu0 %1865  ;;  %v942_v57 = vsel %vm914_vm1, %v1862_v13, %v1863_v12  ;;  %v1398_v56 = vld [vmem:[%s2727_s1 + $0x150] sm:$0xff]  ;;  %v1399_v55 = vld [vmem:[%s2727_s1 + $0x158] sm:$0xff] }
  0xed   : >> { %v1868_v20 = vunpack.i.h.bf16 %v1866_v17  ;;  %v1867_v58 = vunpack.i.l.bf16 %v1866_v17  ;;  %v1871_v21 = vpop.permute.xlu1 %1870  ;;  %v1502_v23 = vpack.c.bf16 %v942_v57, %v940_v16  ;;  %v1402_v12 = vld [vmem:[%s2727_s1 + $0x170] sm:$0xff] }
  0xee   : >> { %598 = vmatmul.mubr.f32.gmra.mrb[18].mxu1 %v1381_v53  ;;  %v1873_v29 = vunpack.i.h.bf16 %v1871_v21  ;;  %v1872_v32 = vunpack.i.l.bf16 %v1871_v21 }
  0xef   : >> { %v939_v26 = vsel %vm914_vm1, %v1867_v58, %v1857_v62  ;;  %v941_v28 = vsel %vm914_vm1, %v1868_v20, %v1862_v13  ;;  %1503 = vmatprep.subr.bf16.mxu0 %v1502_v23  ;;  %603 = vmatprep.mubr.f32.mxu1 %v1959_v60  ;;  %v1400_v62 = vld [vmem:[%s2727_s1 + $0x160] sm:$0xff]  ;;  %v1403_v13 = vld [vmem:[%s2727_s1 + $0x178] sm:$0xff] }
  0xf0   : >> { %v1504_v33 = vpack.c.bf16 %v941_v28, %v939_v26  ;;  %v1876_v35 = vpop.permute.xlu0 %1875  ;;  %v944_v49 = vsel %vm914_vm1, %v1872_v32, %v1873_v29 }
  0xf1   : >> { %v1878_v10 = vunpack.i.h.bf16 %v1876_v35  ;;  %v1877_v40 = vunpack.i.l.bf16 %v1876_v35  ;;  %v1881_v42 = vpop.permute.xlu1 %1880 }
  0xf2   : >> { %v1883_v36 = vunpack.i.h.bf16 %v1881_v42  ;;  %v1882_v43 = vunpack.i.l.bf16 %v1881_v42  ;;  %604 = vmatmul.mubr.f32.gmra.mrb[20].mxu1 %v1382_v61  ;;  %1505 = vmatpush1.bf16.msra.mxu0 %v1504_v33 }
  0xf3   : >> { %609 = vmatprep.mubr.f32.mxu1 %v1959_v60  ;;  %v946_v51 = vsel %vm914_vm1, %v1877_v40, %v1878_v10 }
  0xf4   : >> { %v945_v52 = vsel %vm914_vm1, %v1883_v36, %v1877_v40  ;;  %v943_v14 = vsel %vm914_vm1, %v1882_v43, %v1872_v32  ;;  %v1506_v59 = vpack.c.bf16 %v946_v51, %v944_v49 }
  0xf5   : >> { %v1508_v8 = vpack.c.bf16 %v945_v52, %v943_v14 }
  0xf6   : >> { %610 = vmatmul.mubr.f32.gmra.mrb[22].mxu1 %v1383_v48  ;;  %1507 = vmatprep.subr.bf16.mxu0 %v1506_v59 }
  0xf7   : >> { %1509 = vmatpush1.bf16.msra.mxu0 %v1508_v8  ;;  %615 = vmatprep.mubr.f32.mxu1 %v1959_v60 }
  0xfa   : >> { %616 = vmatmul.mubr.f32.gmra.mrb[24].mxu1 %v1384_v22  ;;  %1044 = vmatmul.mubr.f32.vlgmr.msra.gmra.mrb[0].mxu0 %v1388_v9 }
  0xfb   : >> { %621 = vmatprep.mubr.f32.mxu1 %v1959_v60  ;;  %1049 = vmatprep.mubr.f32.mxu0 %v1959_v60 }
  0xfe   : >> { %622 = vmatmul.mubr.f32.gmra.mrb[26].mxu1 %v1385_v37  ;;  %1050 = vmatmul.mubr.f32.gmra.mrb[2].mxu0 %v1389_v11 }
  0xff   : >> { %627 = vmatprep.mubr.f32.mxu1 %v1959_v60  ;;  %1055 = vmatprep.mubr.f32.mxu0 %v1959_v60 }
 0x102   : >> { %628 = vmatmul.mubr.f32.gmra.mrb[28].mxu1 %v1386_v15  ;;  %1056 = vmatmul.mubr.f32.gmra.mrb[4].mxu0 %v1390_v44 }
 0x103   : >> { %633 = vmatprep.mubr.f32.mxu1 %v1959_v60  ;;  %1061 = vmatprep.mubr.f32.mxu0 %v1959_v60 }
 0x106   : >> { %634 = vmatmul.mubr.f32.gmra.mrb[30].mxu1 %v1387_v18  ;;  %1062 = vmatmul.mubr.f32.gmra.mrb[6].mxu0 %v1391_v27 }
 0x107   : >> { %752 = vmatprep.mubr.f32.mxu1 %v1959_v60  ;;  %1067 = vmatprep.mubr.f32.mxu0 %v1959_v60 }
 0x10a   : >> { %753 = vmatmul.mubr.f32.vlgmr.msra.gmra.mrb[16].mxu1 %v229_v19  ;;  %1068 = vmatmul.mubr.f32.gmra.mrb[8].mxu0 %v1392_v24 }
 0x10b   : >> { %758 = vmatprep.mubr.f32.mxu1 %v1959_v60  ;;  %1073 = vmatprep.mubr.f32.mxu0 %v1959_v60 }
 0x10e   : >> { %759 = vmatmul.mubr.f32.gmra.mrb[18].mxu1 %v230_v25  ;;  %1074 = vmatmul.mubr.f32.gmra.mrb[10].mxu0 %v1393_v34 }
 0x10f   : >> { %764 = vmatprep.mubr.f32.mxu1 %v1959_v60  ;;  %1079 = vmatprep.mubr.f32.mxu0 %v1959_v60 }
 0x112   : >> { %765 = vmatmul.mubr.f32.gmra.mrb[20].mxu1 %v231_v30  ;;  %1080 = vmatmul.mubr.f32.gmra.mrb[12].mxu0 %v1394_v31 }
 0x113   : >> { %770 = vmatprep.mubr.f32.mxu1 %v1959_v60  ;;  %1085 = vmatprep.mubr.f32.mxu0 %v1959_v60 }
 0x116   : >> { %771 = vmatmul.mubr.f32.gmra.mrb[22].mxu1 %v232_v38  ;;  %1086 = vmatmul.mubr.f32.gmra.mrb[14].mxu0 %v1395_v39 }
 0x117   : >> { %776 = vmatprep.mubr.f32.mxu1 %v1959_v60  ;;  %1091 = vmatprep.mubr.f32.mxu0 %v1959_v60 }
 0x11a   : >> { %777 = vmatmul.mubr.f32.gmra.mrb[24].mxu1 %v233_v45  ;;  %1092 = vmatmul.mubr.f32.gmra.mrb[16].mxu0 %v1396_v46 }
 0x11b   : >> { %782 = vmatprep.mubr.f32.mxu1 %v1959_v60  ;;  %1097 = vmatprep.mubr.f32.mxu0 %v1959_v60 }
 0x11e   : >> { %783 = vmatmul.mubr.f32.gmra.mrb[26].mxu1 %v234_v41  ;;  %1098 = vmatmul.mubr.f32.gmra.mrb[18].mxu0 %v1397_v47 }
 0x11f   : >> { %788 = vmatprep.mubr.f32.mxu1 %v1959_v60  ;;  %1103 = vmatprep.mubr.f32.mxu0 %v1959_v60 }
 0x122   : >> { %789 = vmatmul.mubr.f32.gmra.mrb[28].mxu1 %v235_v50  ;;  %1104 = vmatmul.mubr.f32.gmra.mrb[20].mxu0 %v1398_v56 }
 0x123   : >> { %794 = vmatprep.mubr.f32.mxu1 %v1959_v60  ;;  %1109 = vmatprep.mubr.f32.mxu0 %v1959_v60 }
 0x126   : >> { %795 = vmatmul.mubr.f32.gmra.mrb[30].mxu1 %v236_v54  ;;  %1110 = vmatmul.mubr.f32.gmra.mrb[22].mxu0 %v1399_v55 }
 0x127   : >> { %1115 = vmatprep.mubr.f32.mxu0 %v1959_v60 }
 0x12a   : >> { %1116 = vmatmul.mubr.f32.gmra.mrb[24].mxu0 %v1400_v62 }
 0x12b   : >> { %1121 = vmatprep.mubr.f32.mxu0 %v1959_v60 }
 0x12e   : >> { %1122 = vmatmul.mubr.f32.gmra.mrb[26].mxu0 %v1401_v63 }
 0x12f   : >> { %1127 = vmatprep.mubr.f32.mxu0 %v1959_v60 }
 0x132   : >> { %1128 = vmatmul.mubr.f32.gmra.mrb[28].mxu0 %v1402_v12 }
 0x133   : >> { %1133 = vmatprep.mubr.f32.mxu0 %v1959_v60 }
 0x136   : >> { %1134 = vmatmul.mubr.f32.gmra.mrb[30].mxu0 %v1403_v13 }
 0x19d   : >> { %v545_v53 = vpop.f32.mrb[0].mxu1 }
 0x19e   : >> { %v547_v16 = vpop.f32.mrb[1].mxu1 }
 0x1a1   : >> { %v551_v17 = vpop.f32.mrb[2].mxu1 }
 0x1a2   : >> { %v553_v57 = vpop.f32.mrb[3].mxu1 }
 0x1a5   : >> { %v557_v20 = vpop.f32.mrb[4].mxu1 }
 0x1a6   : >> { %v559_v58 = vpop.f32.mrb[5].mxu1 }
 0x1a9   : >> { %v563_v21 = vpop.f32.mrb[6].mxu1 }
 0x1aa   : >> { %v565_v23 = vpop.f32.mrb[7].mxu1 }
 0x1ad   : >> { %v569_v26 = vpop.f32.mrb[8].mxu1 }
 0x1ae   : >> { %v571_v28 = vpop.f32.mrb[9].mxu1 }
 0x1b1   : >> { %v575_v29 = vpop.f32.mrb[10].mxu1 }
 0x1b2   : >> { %v577_v32 = vpop.f32.mrb[11].mxu1 }
 0x1b5   : >> { %v581_v61 = vpop.f32.mrb[12].mxu1 }
 0x1b6   : >> { %v583_v33 = vpop.f32.mrb[13].mxu1 }
 0x1b9   : >> { %v587_v60 = vpop.f32.mrb[14].mxu1 }
 0x1ba   : >> { %v589_v35 = vpop.f32.mrb[15].mxu1 }
 0x1cd   : >> { %v1045_v10 = vpop.f32.mrb[0].mxu0 }
 0x1ce   : >> { %v1526_v40 = vadd.f32 %v1045_v10, %v545_v53  ;;  %v1047_v42 = vpop.f32.mrb[1].mxu0 }
 0x1cf   : >> { %v1527_v36 = vadd.f32 %v1047_v42, %v547_v16 }
 0x1d1   : >> { %v1051_v43 = vpop.f32.mrb[2].mxu0 }
 0x1d2   : >> { %v2607_v48 = vadd.f32 %v1051_v43, %v551_v17  ;;  %v1053_v49 = vpop.f32.mrb[3].mxu0 }
 0x1d3   : >> { %v2609_v51 = vadd.f32 %v1053_v49, %v553_v57 }
 0x1d5   : >> { %v1057_v52 = vpop.f32.mrb[4].mxu0 }
 0x1d6   : >> { %v2611_v14 = vadd.f32 %v1057_v52, %v557_v20  ;;  %v1059_v59 = vpop.f32.mrb[5].mxu0 }
 0x1d7   : >> { %v2613_v8 = vadd.f32 %v1059_v59, %v559_v58 }
 0x1d9   : >> { %v1063_v22 = vpop.f32.mrb[6].mxu0 }
 0x1da   : >> { %v2615_v9 = vadd.f32 %v1063_v22, %v563_v21  ;;  %v1065_v37 = vpop.f32.mrb[7].mxu0  ;;  %v1191_v21 = vpop.permute.xlu0 %1190 }
 0x1db   : >> { %v2617_v11 = vadd.f32 %v1065_v37, %v565_v23 }
 0x1dd   : >> { %v754_v15 = vpop.f32.mrb[16].mxu1  ;;  %v1069_v44 = vpop.f32.mrb[8].mxu0 }
 0x1de   : >> { %v2619_v18 = vadd.f32 %v1069_v44, %v569_v26  ;;  %v756_v27 = vpop.f32.mrb[17].mxu1  ;;  %v1071_v19 = vpop.f32.mrb[9].mxu0 }
 0x1df   : >> { %v2621_v24 = vadd.f32 %v1071_v19, %v571_v28  ;;  %v1196_v26 = vpop.permute.xlu1 %1195 }
 0x1e1   : >> { %v760_v25 = vpop.f32.mrb[18].mxu1  ;;  %v1075_v34 = vpop.f32.mrb[10].mxu0 }
 0x1e2   : >> { %v2623_v30 = vadd.f32 %v1075_v34, %v575_v29  ;;  %v762_v31 = vpop.f32.mrb[19].mxu1  ;;  %v1077_v38 = vpop.f32.mrb[11].mxu0 }
 0x1e3   : >> { %v2625_v39 = vadd.f32 %v1077_v38, %v577_v32 }
 0x1e5   : >> { %v766_v45 = vpop.f32.mrb[20].mxu1  ;;  %v1081_v46 = vpop.f32.mrb[12].mxu0 }
 0x1e6   : >> { %v2627_v41 = vadd.f32 %v1081_v46, %v581_v61  ;;  %v768_v47 = vpop.f32.mrb[21].mxu1  ;;  %v1083_v50 = vpop.f32.mrb[13].mxu0 }
 0x1e7   : >> { %v2629_v56 = vadd.f32 %v1083_v50, %v583_v33 }
 0x1e9   : >> { %v772_v54 = vpop.f32.mrb[22].mxu1  ;;  %v1087_v55 = vpop.f32.mrb[14].mxu0 }
 0x1ea   : >> { %v2631_v62 = vadd.f32 %v1087_v55, %v587_v60  ;;  %v774_v63 = vpop.f32.mrb[23].mxu1  ;;  %v1089_v12 = vpop.f32.mrb[15].mxu0 }
 0x1eb   : >> { %v2633_v13 = vadd.f32 %v1089_v12, %v589_v35 }
 0x1ed   : >> { %v778_v53 = vpop.f32.mrb[24].mxu1  ;;  %v1093_v16 = vpop.f32.mrb[16].mxu0 }
 0x1ee   : >> { %v1542_v17 = vadd.f32 %v1093_v16, %v754_v15  ;;  %v780_v57 = vpop.f32.mrb[25].mxu1  ;;  %v1095_v20 = vpop.f32.mrb[17].mxu0 }
 0x1ef   : >> { %v1543_v58 = vadd.f32 %v1095_v20, %v756_v27 }
 0x1f0   : >> { %v1172_v23 = vmax.f32 %v1526_v40, %v1542_v17 }
 0x1f1   : >> { %v1173_v28 = vmax.f32 %v1527_v36, %v1543_v58  ;;  %v784_v29 = vpop.f32.mrb[26].mxu1  ;;  %v1099_v32 = vpop.f32.mrb[18].mxu0 }
 0x1f2   : >> { %v1228_v61 = vadd.f32 %v1191_v21, %v1172_v23  ;;  %v1544_v33 = vadd.f32 %v1099_v32, %v760_v25  ;;  %v786_v60 = vpop.f32.mrb[27].mxu1  ;;  %v1101_v10 = vpop.f32.mrb[19].mxu0 }
 0x1f3   : >> { %v1229_v35 = vadd.f32 %v1191_v21, %v1173_v28  ;;  %v1545_v42 = vadd.f32 %v1101_v10, %v762_v31  ;;  %v1201_v25 = vpop.permute.xlu1 %1200 }
 0x1f4   : >> { %v1244_v43 = vmax.f32 %v1228_v61, 0.0  ;;  %v1174_v49 = vmax.f32 %v2607_v48, %v1544_v33 }
 0x1f5   : >> { %v1245_v40 = vmax.f32 %v1229_v35, 0.0  ;;  %v1175_v52 = vmax.f32 %v2609_v51, %v1545_v42  ;;  %v790_v36 = vpop.f32.mrb[28].mxu1  ;;  %v1105_v59 = vpop.f32.mrb[20].mxu0 }
 0x1f6   : >> { %1263 = vst [vmem:[%s2638_s28] sm:$0xff] %v1244_v43  ;;  %v1230_v22 = vadd.f32 %v1196_v26, %v1174_v49  ;;  %v1546_v37 = vadd.f32 %v1105_v59, %v766_v45  ;;  %v792_v15 = vpop.f32.mrb[29].mxu1  ;;  %v1107_v44 = vpop.f32.mrb[21].mxu0 }
 0x1f7   : >> { %1264 = vst [vmem:[%s2638_s28 + $0x8] sm:$0xff] %v1245_v40  ;;  %v1231_v27 = vadd.f32 %v1196_v26, %v1175_v52  ;;  %v1547_v19 = vadd.f32 %v1107_v44, %v768_v47  ;;  %v1211_v10 = vpop.permute.xlu1 %1210 }
 0x1f8   : >> { %v1246_v34 = vmax.f32 %v1230_v22, 0.0  ;;  %v1176_v31 = vmax.f32 %v2611_v14, %v1546_v37 }
 0x1f9   : >> { %v1247_v48 = vmax.f32 %v1231_v27, 0.0  ;;  %v1177_v38 = vmax.f32 %v2613_v8, %v1547_v19  ;;  %v796_v51 = vpop.f32.mrb[30].mxu1  ;;  %v1111_v46 = vpop.f32.mrb[22].mxu0 }
 0x1fa   : >> { %1265 = vst [vmem:[%s2638_s28 + $0x10] sm:$0xff] %v1246_v34  ;;  %v1232_v50 = vadd.f32 %v1201_v25, %v1176_v31  ;;  %v1548_v55 = vadd.f32 %v1111_v46, %v772_v54  ;;  %v798_v45 = vpop.f32.mrb[31].mxu1  ;;  %v1113_v12 = vpop.f32.mrb[23].mxu0 }
 0x1fb   : >> { %1266 = vst [vmem:[%s2638_s28 + $0x18] sm:$0xff] %v1247_v48  ;;  %v1233_v16 = vadd.f32 %v1201_v25, %v1177_v38  ;;  %v1549_v17 = vadd.f32 %v1113_v12, %v774_v63  ;;  %v1206_v8 = vpop.permute.xlu0 %1205 }
 0x1fc   : >> { %v1248_v47 = vmax.f32 %v1232_v50, 0.0  ;;  %v1178_v20 = vmax.f32 %v2615_v9, %v1548_v55 }
 0x1fd   : >> { %v1249_v58 = vmax.f32 %v1233_v16, 0.0  ;;  %v1179_v14 = vmax.f32 %v2617_v11, %v1549_v17  ;;  %v1117_v21 = vpop.f32.mrb[24].mxu0 }
 0x1fe   : >> { %1267 = vst [vmem:[%s2638_s28 + $0x20] sm:$0xff] %v1248_v47  ;;  %v1234_v23 = vadd.f32 %v1206_v8, %v1178_v20  ;;  %v1550_v26 = vadd.f32 %v1117_v21, %v778_v53  ;;  %v1119_v54 = vpop.f32.mrb[25].mxu0 }
 0x1ff   : >> { %1268 = vst [vmem:[%s2638_s28 + $0x28] sm:$0xff] %v1249_v58  ;;  %v1235_v28 = vadd.f32 %v1206_v8, %v1179_v14  ;;  %v1551_v32 = vadd.f32 %v1119_v54, %v780_v57  ;;  %v1216_v52 = vpop.permute.xlu0 %1215 }
 0x200   : >> { %v1250_v61 = vmax.f32 %v1234_v23, 0.0  ;;  %v1180_v63 = vmax.f32 %v2619_v18, %v1550_v26 }
 0x201   : >> { %v1251_v33 = vmax.f32 %v1235_v28, 0.0  ;;  %v1181_v9 = vmax.f32 %v2621_v24, %v1551_v32  ;;  %v1123_v11 = vpop.f32.mrb[26].mxu0 }
 0x202   : >> { %1269 = vst [vmem:[%s2638_s28 + $0x30] sm:$0xff] %v1250_v61  ;;  %v1236_v35 = vadd.f32 %v1211_v10, %v1180_v63  ;;  %v1552_v42 = vadd.f32 %v1123_v11, %v784_v29  ;;  %v1125_v43 = vpop.f32.mrb[27].mxu0 }
 0x203   : >> { %1270 = vst [vmem:[%s2638_s28 + $0x38] sm:$0xff] %v1251_v33  ;;  %v1237_v53 = vadd.f32 %v1211_v10, %v1181_v9  ;;  %v1553_v49 = vadd.f32 %v1125_v43, %v786_v60 }
 0x204   : >> { %v1252_v40 = vmax.f32 %v1236_v35, 0.0  ;;  %v1182_v57 = vmax.f32 %v2623_v30, %v1552_v42  ;;  %v1221_v30 = vpop.permute.xlu1 %1220 }
 0x205   : >> { %v1253_v59 = vmax.f32 %v1237_v53, 0.0  ;;  %v1183_v18 = vmax.f32 %v2625_v39, %v1553_v49  ;;  %v1129_v24 = vpop.f32.mrb[28].mxu0 }
 0x206   : >> { %1271 = vst [vmem:[%s2638_s28 + $0x40] sm:$0xff] %v1252_v40  ;;  %v1238_v22 = vadd.f32 %v1216_v52, %v1182_v57  ;;  %v1554_v37 = vadd.f32 %v1129_v24, %v790_v36  ;;  %v1131_v44 = vpop.f32.mrb[29].mxu0 }
 0x207   : >> { %1272 = vst [vmem:[%s2638_s28 + $0x48] sm:$0xff] %v1253_v59  ;;  %v1239_v29 = vadd.f32 %v1216_v52, %v1183_v18  ;;  %v1555_v27 = vadd.f32 %v1131_v44, %v792_v15 }
 0x208   : >> { %v1254_v19 = vmax.f32 %v1238_v22, 0.0  ;;  %v1184_v60 = vmax.f32 %v2627_v41, %v1554_v37  ;;  %v1226_v41 = vpop.permute.xlu0 %1225 }
 0x209   : >> { %v1255_v25 = vmax.f32 %v1239_v29, 0.0  ;;  %v1185_v34 = vmax.f32 %v2629_v56, %v1555_v27  ;;  %v1135_v31 = vpop.f32.mrb[30].mxu0 }
 0x20a   : >> { %1273 = vst [vmem:[%s2638_s28 + $0x50] sm:$0xff] %v1254_v19  ;;  %v1240_v39 = vadd.f32 %v1221_v30, %v1184_v60  ;;  %v1556_v48 = vadd.f32 %v1135_v31, %v796_v51  ;;  %v1137_v38 = vpop.f32.mrb[31].mxu0 }
 0x20b   : >> { %1274 = vst [vmem:[%s2638_s28 + $0x58] sm:$0xff] %v1255_v25  ;;  %v1241_v36 = vadd.f32 %v1221_v30, %v1185_v34  ;;  %v1557_v46 = vadd.f32 %v1137_v38, %v798_v45 }
 0x20c   : >> { %v1256_v15 = vmax.f32 %v1240_v39, 0.0  ;;  %v1186_v50 = vmax.f32 %v2631_v62, %v1556_v48 }
 0x20d   : >> { %v1257_v55 = vmax.f32 %v1241_v36, 0.0  ;;  %v1187_v12 = vmax.f32 %v2633_v13, %v1557_v46  ;;  %181 = sbr.rel (!%p179_p11) target bundleno = 26 (0x1a), region = 78 }
 0x20e   : >> { %1275 = vst [vmem:[%s2638_s28 + $0x60] sm:$0xff] %v1256_v15  ;;  %v1242_v56 = vadd.f32 %v1226_v41, %v1186_v50 }
 0x20f   : >> { %1276 = vst [vmem:[%s2638_s28 + $0x68] sm:$0xff] %v1257_v55  ;;  %v1243_v16 = vadd.f32 %v1226_v41, %v1187_v12 }
 0x210   : >> { %v1258_v17 = vmax.f32 %v1242_v56, 0.0 }
 0x211   : >> { %v1259_v47 = vmax.f32 %v1243_v16, 0.0 }
 0x212   : >> { %1277 = vst [vmem:[%s2638_s28 + $0x70] sm:$0xff] %v1258_v17 }
 0x213   : >> { %1278 = vst [vmem:[%s2638_s28 + $0x78] sm:$0xff] %v1259_v47 }
 0x214   : > { %1899 = shalt.err (!%p1896_p4)
}
 0x215   : > { %s1900_s24 = scalar_lea.hbm %s2677_s9, 32768  ;;  %s1904_s20 = scalar_lea.hbm %s2729_s3, 65536 }
 0x216   : > { %p1901_p7 = scmp.ne.s32.totalorder %s2677_s9, %s1900_s24  ;;  %p1905_p10 = scmp.lt.u32.totalorder %s2677_s9, %s2729_s3 }
 0x217   : > { %p1906_p11 = scmp.lt.u32.totalorder %s1904_s20, %s1900_s24  ;;  %p1908_p13 = scmp.lt.u32.totalorder %s1900_s24, %s2677_s9 }
 0x218   : > { %p1902_p8 = pnand %p1901_p7, %p2023_p5 }
 0x219   : > { %p1907_p12 = por %p1906_p11, %p1905_p10 }
 0x21a   : > { %p1903_p9 = pneg %p1902_p8 }
 0x21b   : > { %p1909_p0 = por %p1908_p13, %p1907_p12 }
 0x21d   : > { %p1910_p1 = pnand %p1909_p0, %p1903_p9 }
 0x21f   : > { %1913 = shalt.err (!%p1910_p1)
}
 0x220   : > { %s1963_s26 = smov 256   ;;  %s1964_s27 = smov 16  }
 0x221   : > { %1591 = dma.vmem_to_hbm [thread:$0]  (%p2023_p5), %s2681_s10, 32768, %s2677_s9, %s2685_s5, %s1963_s26, %s1963_s26, %s1964_s27  }
 0x222 PF: > { %p1597_p2 = scmp.ge.s32.totalorder %s1952_s15, 2  ;;  %s1308_s28 = sand.u32 1, %s1940_s12  }
 0x223   : > { %s1309_s6 = scalar_lea.sflag [#allocation3], %s1308_s28 }
 0x224   : > { %p1594_p3 = pnand %p1597_p2, %p2027_p6 }
 0x226   : > { %1935 = dma.done.wait (!%p1594_p3), %s1309_s6, 32768  }
 0x227   : > { %1937 = vsyncadd (!%p1594_p3), %s1309_s6, 4294934528  ;;  %p13_p4 = scmp.ge.s32.totalorder %s2010_s18, 4   ;;  %s2732_s12 = smov %s1944_s13 }
 0x228   : > { %s2733_s13 = smov %s1948_s14  ;;  %s2734_s14 = smov %s2021_s21 }
 0x229   : > { %s2735_s15 = smov %s2010_s18  ;;  %15 = sbr.rel (!%p13_p4) target bundleno = 3 (0x3), region = 89 }
 0x230   :  { %1314 = vsyncpa [#allocation3], 1 }
 0x231   :  { %1316 = vsyncpa [#allocation3 + $0x1], 1 }

// kernel: audio_cnn_forward.9
= control target key start
LH: loop header
LB: loop body
LE: loop exit
PB: predicated region body
PF: predicated region fallthrough
CT: control target
= control target key end

     0   :  { %11 = vsyncpa [#allocation3], 0  ;;  %s569_s0 = inlined_call_operand.hbm [shape: f32[2,2,128], index: 0, kind: input, shape index: {}]   ;;  %s570_s1 = inlined_call_operand.hbm [shape: f32[1,128], index: 1, kind: input, shape index: {}]   ;;  %s571_s2 = inlined_call_operand.vmem [shape: f32[128,2], index: 2, kind: input, shape index: {}]   ;;  %s572_s3 = inlined_call_operand.hbm [shape: f32[1,2], index: 3, kind: input, shape index: {}]   ;;  %s573_s4 = inlined_call_operand.hbm [shape: f32[2,128], index: 4, kind: output, shape index: {0}]   ;;  %s574_s5 = inlined_call_operand.hbm [shape: f32[2,2], index: 5, kind: output, shape index: {1}]  }
   0x1   :  { %12 = vsyncpa [#allocation6], 0 }
   0x2   :  { %13 = vsyncpa [#allocation4], 0 }
   0x3   :  { %14 = vsyncpa [#allocation10], 0  ;;  %s414_s18 = smov [#allocation5]   ;;  %s415_s20 = smov [#allocation2]  }
   0x4   :  { %s33_s19 = sshll.u32 %s414_s18, 4  ;;  %s20_s21 = sshll.u32 %s415_s20, 4  ;;  %s34_s19 = int_to_ptr.vmem [resolvable:$true] %s33_s19  ;;  %s454_s21 = int_to_ptr.vmem [resolvable:$true] %s20_s21 }
   0x5   :  { %s296_s24 = scalar_lea.hbm %s570_s1, 16 }
   0x6   :  { %p297_p0 = scmp.ne.s32.totalorder %s570_s1, %s296_s24  ;;  %p300_p1 = scmp.lt.u32.totalorder %s296_s24, %s570_s1 }
   0x8   :  { %p302_p2 = pnand %p300_p1, %p297_p0 }
   0xa   :  { %305 = shalt.err (!%p302_p2)
}
   0xb   :  { %s306_s29 = scalar_lea.vmem %s34_s19, 16  ;;  %s310_s30 = scalar_lea.vmem %s34_s19, 32 }
   0xc   :  { %p307_p3 = scmp.ne.s32.totalorder %s34_s19, %s306_s29  ;;  %p311_p4 = scmp.lt.s32.totalorder %s34_s19, %s34_s19 }
   0xd   :  { %p312_p5 = scmp.lt.s32.totalorder %s310_s30, %s306_s29 }
   0xf   :  { %p313_p6 = por %p312_p5, %p311_p4 }
  0x11   :  { %p314_p7 = pnand %p313_p6, %p307_p3 }
  0x13   :  { %317 = shalt.err (!%p314_p7)
}
  0x14   :  { %36 = dma.hbm_to_vmem [thread:$0]  %s570_s1, 16, %s34_s19, [#allocation6]  }
  0x15   :  { %s318_s10 = scalar_lea.hbm %s569_s0, 64 }
  0x16   :  { %p319_p8 = scmp.ne.s32.totalorder %s569_s0, %s318_s10  ;;  %p322_p9 = scmp.lt.u32.totalorder %s318_s10, %s569_s0 }
  0x18   :  { %p324_p10 = pnand %p322_p9, %p319_p8 }
  0x1a   :  { %327 = shalt.err (!%p324_p10)
}
  0x1b   :  { %s328_s15 = scalar_lea.vmem %s454_s21, 64  ;;  %p333_p12 = scmp.lt.s32.totalorder %s454_s21, %s454_s21 }
  0x1c   :  { %p329_p11 = scmp.ne.s32.totalorder %s454_s21, %s328_s15  ;;  %p334_p13 = scmp.lt.s32.totalorder %s328_s15, %s328_s15 }
  0x1e   :  { %p335_p0 = por %p334_p13, %p333_p12 }
  0x20   :  { %p336_p1 = pnand %p335_p0, %p329_p11 }
  0x22   :  { %339 = shalt.err (!%p336_p1)
}
  0x23   :  { %s416_s1 = smov 32   ;;  %s417_s16 = smov 2  }
  0x24   :  { %26 = dma.hbm_to_vmem [thread:$0]  %s569_s0, 64, %s454_s21, [#allocation3], %s416_s1, %s416_s1, %s417_s16  }
  0x25   :  { %s418_s19 = smov [#allocation7]   ;;  %s340_s24 = scalar_lea.hbm %s572_s3, 16 }
  0x26   :  { %s45_s20 = sshll.u32 %s418_s19, 4  ;;  %p341_p2 = scmp.ne.s32.totalorder %s572_s3, %s340_s24  ;;  %s46_s20 = int_to_ptr.vmem [resolvable:$true] %s45_s20 }
  0x27   :  { %p344_p3 = scmp.lt.u32.totalorder %s340_s24, %s572_s3 }
  0x29   :  { %p346_p4 = pnand %p344_p3, %p341_p2 }
  0x2b   :  { %349 = shalt.err (!%p346_p4)
}
  0x2c   :  { %s350_s29 = scalar_lea.vmem %s46_s20, 16  ;;  %s354_s0 = scalar_lea.vmem %s46_s20, 32 }
  0x2d   :  { %p351_p5 = scmp.ne.s32.totalorder %s46_s20, %s350_s29  ;;  %p355_p6 = scmp.lt.s32.totalorder %s46_s20, %s46_s20 }
  0x2e   :  { %p356_p7 = scmp.lt.s32.totalorder %s354_s0, %s350_s29 }
  0x30   :  { %p357_p8 = por %p356_p7, %p355_p6 }
  0x32   :  { %p358_p9 = pnand %p357_p8, %p351_p5 }
  0x34   :  { %361 = shalt.err (!%p358_p9)
}
  0x35   :  { %48 = dma.hbm_to_vmem [thread:$0]  %s572_s3, 16, %s46_s20, [#allocation6]  }
  0x36   :  { %406 = dma.done.wait [#allocation3], 64  }
  0x37   :  { %407 = vsyncadd [#allocation3], 4294967232 }
  0x38   :  { %408 = dma.done.wait [#allocation6], 32  }
  0x39   :  { %409 = vsyncadd [#allocation6], 4294967264  ;;  %v419_v0 = vmov 0.0|0.0   ;;  %vm420_vm0 = vmmov 0   ;;  %v421_v1 = vmov 0.0   ;;  %v72_v2 = vld [vmem:[%s571_s2] sm:$0xff] }
  0x3a   :  { %258 = vmatprep.subr.bf16.mxu0 %v419_v0  ;;  %255 = vmatprep.mubr.msk.f32.mxu0 %vm420_vm0, %v421_v1  ;;  %v73_v3 = vld [vmem:[%s571_s2 + $0x8] sm:$0xff]  ;;  %v74_v4 = vld [vmem:[%s571_s2 + $0x10] sm:$0xff]  ;;  %v75_v6 = vld [vmem:[%s571_s2 + $0x18] sm:$0xff]  ;;  %s422_s10 = smov [#allocation8]  }
  0x3b   :  { %v259_v5 = vpack.c.bf16 %v73_v3, %v72_v2  ;;  %v262_v7 = vpack.c.bf16 %v75_v6, %v74_v4  ;;  %v76_v8 = vld [vmem:[%s571_s2 + $0x20] sm:$0xff]  ;;  %v77_v9 = vld [vmem:[%s571_s2 + $0x28] sm:$0xff]  ;;  %v78_v15 = vld [vmem:[%s571_s2 + $0x30] sm:$0xff]  ;;  %s179_s11 = sshll.u32 %s422_s10, 4  ;;  %s180_s11 = int_to_ptr.vmem [resolvable:$true] %s179_s11 }
  0x3c   :  { %v203_v10 = vld [vmem:[#allocation5] ss:$0 sm:$0xff]  ;;  %v59_v11 = vld [vmem:[#allocation2] sm:$0x3]  ;;  %v68_v13 = vld [vmem:[#allocation2 + $0x2] sm:$0x3]  ;;  %v265_v14 = vpack.c.bf16 %v77_v9, %v76_v8  ;;  %p367_p11 = scmp.lt.s32.totalorder %s180_s11, %s180_s11 }
  0x3d   :  { %260 = vmatpush3.bf16.msra.mxu0 %v259_v5  ;;  %v66_v12 = vadd.f32 %v203_v10, %v59_v11  ;;  %v79_v16 = vld [vmem:[%s571_s2 + $0x38] sm:$0xff]  ;;  %v80_v19 = vld [vmem:[%s571_s2 + $0x40] sm:$0xff]  ;;  %v81_v20 = vld [vmem:[%s571_s2 + $0x48] sm:$0xff]  ;;  %s362_s3 = scalar_lea.vmem %s180_s11, 32 }
  0x3e   :  { %261 = vmatprep.subr.bf16.mxu0 %v419_v0  ;;  %v268_v18 = vpack.c.bf16 %v79_v16, %v78_v15  ;;  %v271_v21 = vpack.c.bf16 %v81_v20, %v80_v19  ;;  %v82_v22 = vld [vmem:[%s571_s2 + $0x50] sm:$0xff]  ;;  %v83_v23 = vld [vmem:[%s571_s2 + $0x58] sm:$0xff]  ;;  %v84_v25 = vld [vmem:[%s571_s2 + $0x60] sm:$0xff]  ;;  %p363_p10 = scmp.ne.s32.totalorder %s180_s11, %s362_s3  ;;  %p368_p12 = scmp.lt.s32.totalorder %s362_s3, %s362_s3 }
  0x3f   :  { %v69_v17 = vadd.f32 %v68_v13, %v66_v12  ;;  %v274_v24 = vpack.c.bf16 %v83_v23, %v82_v22  ;;  %v85_v26 = vld [vmem:[%s571_s2 + $0x68] sm:$0xff]  ;;  %v86_v28 = vld [vmem:[%s571_s2 + $0x70] sm:$0xff]  ;;  %v87_v29 = vld [vmem:[%s571_s2 + $0x78] sm:$0xff] }
  0x40   :  { %v277_v27 = vpack.c.bf16 %v85_v26, %v84_v25  ;;  %v280_v30 = vpack.c.bf16 %v87_v29, %v86_v28  ;;  %p369_p13 = por %p368_p12, %p367_p11 }
  0x41   :  { %263 = vmatpush3.bf16.msra.mxu0 %v262_v7  ;;  %70 = vst [vmem:[#allocation8] sm:$0x3] %v69_v17  ;;  %v71_v31 = vmax.f32 %v69_v17, 0.0 }
  0x42   :  { %264 = vmatprep.subr.bf16.mxu0 %v419_v0  ;;  %p370_p0 = pnand %p369_p13, %p363_p10 }
  0x45   :  { %266 = vmatpush3.bf16.msra.mxu0 %v265_v14 }
  0x46   :  { %267 = vmatprep.subr.bf16.mxu0 %v419_v0 }
  0x49   :  { %269 = vmatpush3.bf16.msra.mxu0 %v268_v18 }
  0x4a   :  { %270 = vmatprep.subr.bf16.mxu0 %v419_v0 }
  0x4d   :  { %272 = vmatpush3.bf16.msra.mxu0 %v271_v21 }
  0x4e   :  { %273 = vmatprep.subr.bf16.mxu0 %v419_v0 }
  0x51   :  { %275 = vmatpush3.bf16.msra.mxu0 %v274_v24 }
  0x52   :  { %276 = vmatprep.subr.bf16.mxu0 %v419_v0 }
  0x55   :  { %278 = vmatpush3.bf16.msra.mxu0 %v277_v27 }
  0x56   :  { %279 = vmatprep.subr.bf16.mxu0 %v419_v0 }
  0x59   :  { %281 = vmatpush3.bf16.msra.mxu0 %v280_v30 }
  0x5c   :  { %256 = vmatmul.mubr.f32.vlgmr.msra.gmra.mrb[0].mxu0 %v71_v31 }
  0x5d   :  { %373 = shalt.err (!%p370_p0)
}
  0x5e   :  { %s374_s2 = scalar_lea.hbm %s573_s4, 32 }
  0x5f   :  { %p375_p1 = scmp.ne.s32.totalorder %s573_s4, %s374_s2  ;;  %p378_p2 = scmp.lt.u32.totalorder %s374_s2, %s573_s4 }
  0x61   :  { %p380_p3 = pnand %p378_p2, %p375_p1 }
  0x63   :  { %383 = shalt.err (!%p380_p3)
}
  0x64   :  { %182 = dma.vmem_to_hbm [thread:$0]  %s180_s11, 32, %s573_s4, [#allocation4]   ;;  %v204_v32 = vld [vmem:[#allocation7] ss:$0 sm:$0xff]  ;;  %vm171_vm1 = vcmask 9216  }
  0x65   :  { %s423_s19 = smov [#allocation9]  }
  0x66   :  { %s189_s20 = sshll.u32 %s423_s19, 4  ;;  %s190_s20 = int_to_ptr.vmem [resolvable:$true] %s189_s20 }
  0x67   :  { %s384_s22 = scalar_lea.vmem %s190_s20, 32  ;;  %p389_p5 = scmp.lt.s32.totalorder %s190_s20, %s190_s20 }
  0x68   :  { %p385_p4 = scmp.ne.s32.totalorder %s190_s20, %s384_s22  ;;  %p390_p6 = scmp.lt.s32.totalorder %s384_s22, %s384_s22 }
  0x6a   :  { %p391_p7 = por %p390_p6, %p389_p5 }
  0x6c   :  { %p392_p8 = pnand %p391_p7, %p385_p4 }
 0x12f   :  { %v161_v33 = vpop.f32.mrb[0].mxu0 }
 0x130   :  { %v162_v34 = vadd.f32 %v204_v32, %v161_v33  ;;  %v257_v35 = vpop.f32.mrb[1].mxu0 }
 0x132   :  { %v205_v36 = vmul.f32 -1.442695, %v162_v34 }
 0x134   :  { %292 = vpow2.f32 %v205_v36 }
 0x13e   :  { %v293_v37 = vpop.eup %292 }
 0x13f   :  { %v168_v38 = vadd.f32 1.0, %v293_v37 }
 0x141   :  { %294 = vrcp.f32 %v168_v38 }
 0x14b   :  { %v295_v39 = vpop.eup %294 }
 0x14c   :  { %172 = vst.msk [vmem:[#allocation9] sm:$0x3] %vm171_vm1, %v295_v39 }
 0x14d   :  { %395 = shalt.err (!%p392_p8)
}
 0x14e   :  { %s396_s24 = scalar_lea.hbm %s574_s5, 32 }
 0x14f   :  { %p397_p9 = scmp.ne.s32.totalorder %s574_s5, %s396_s24  ;;  %p400_p10 = scmp.lt.u32.totalorder %s396_s24, %s574_s5 }
 0x151   :  { %p402_p11 = pnand %p400_p10, %p397_p9 }
 0x153   :  { %405 = shalt.err (!%p402_p11)
}
 0x154   :  { %192 = dma.vmem_to_hbm [thread:$0]  %s190_s20, 32, %s574_s5, [#allocation10]  }
 0x155   :  { %410 = dma.done.wait [#allocation4], 32  }
 0x156   :  { %411 = vsyncadd [#allocation4], 4294967264 }
 0x157   :  { %412 = dma.done.wait [#allocation10], 32  }
 0x158   :  { %413 = vsyncadd [#allocation10], 4294967264 }
 0x159   :  { %199 = vsyncpa [#allocation3], 1 }
 0x15a   :  { %200 = vsyncpa [#allocation6], 1 }
 0x15b   :  { %201 = vsyncpa [#allocation4], 1 }
 0x15c   :  { %202 = vsyncpa [#allocation10], 1 }

// kernel: audio_cnn_forward.8
= control target key start
LH: loop header
LB: loop body
LE: loop exit
PB: predicated region body
PF: predicated region fallthrough
CT: control target
= control target key end

     0   :  { %7 = vsyncpa [#allocation4], 0  ;;  %s16970_s0 = inlined_call_operand.vmem [shape: f32[2,131072], index: 0, kind: input, shape index: {}]   ;;  %s16971_s1 = inlined_call_operand.vmem [shape: bf16[131072,128], index: 1, kind: input, shape index: {}]   ;;  %s16972_s2 = inlined_call_operand.hbm [shape: f32[2,2,128], index: 2, kind: output, shape index: {}]  }
   0x1   :  { %9 = vsyncpa [#allocation4 + $0x1], 0  ;;  %s15630_s9 = smov 0   ;;  %s15632_s10 = smov 0  }
   0x2   :  { %s15634_s11 = smov 0   ;;  %s15636_s12 = smov 0  }
   0x3   :  { %s15638_s13 = smov 0   ;;  %s15640_s14 = smov 0  }
   0x4   :  { %s15642_s15 = smov 0   ;;  %s15644_s16 = smov 0  }
   0x5 LB: > { %s11933_s17 = sadd.s32 4294967295, %s15610_s16   ;;  %s11934_s18 = sadd.s32 4294967294, %s15610_s16   ;;  %s15610_s16 = sphi %s15644_s16, %s15_s16   ;;  %s15606_s15 = sphi %s15642_s15, %s16981_s15   ;;  %s15602_s14 = sphi %s15640_s14, %s16980_s14   ;;  %s15598_s13 = sphi %s15638_s13, %s16979_s13   ;;  %s15594_s12 = sphi %s15636_s12, %s16978_s12   ;;  %s15590_s11 = sphi %s15634_s11, %s16977_s11   ;;  %s15586_s10 = sphi %s15632_s10, %s16976_s10   ;;  %s15582_s9 = sphi %s15630_s9, %s16975_s9  }
   0x6   : > { %s24_s19 = sadd.s32 1, %s15602_s14  ;;  %s27_s20 = sadd.s32 1, %s15606_s15 }
   0x7   : > { %p25_p0 = scmp.ge.s32.totalorder %s24_s19, 4  ;;  %p104_p1 = scmp.ne.s32.totalorder %s15590_s11, %s15586_s10 }
   0x8   : > { %p105_p2 = scmp.eq.s32.totalorder %s11933_s17, 7  ;;  %p110_p4 = scmp.ne.s32.totalorder %s15586_s10, %s15582_s9 }
   0x9   : > { %s16983_s19 = smov (%p25_p0, %s24_s19), 0  ;;  %s16985_s20 = smov (!%p25_p0, %s27_s20), %s15606_s15 }
   0xa   : > { %p15679_p3 = por %p105_p2, %p104_p1  ;;  %p29_p5 = scmp.ge.s32.totalorder %s16985_s20, 2 }
   0xb   : > { %p111_p6 = scmp.eq.s32.totalorder %s11934_s18, 7  ;;  %p11941_p7 = scmp.ge.s32.totalorder %s15610_s16, 1 }
   0xc   : > { %p155_p8 = scmp.lt.s32.totalorder %s15610_s16, 9  ;;  %s16987_s20 = smov (%p29_p5, %s16985_s20), 0 }
   0xd   : > { %p15689_p9 = por %p111_p6, %p110_p4  ;;  %s91_s23 = ssub.s32 %s15606_s15, %s16987_s20 }
   0xe   : > { %p156_p10 = pnand %p11941_p7, %p155_p8  ;;  %s94_s24 = sadd.s32 1, %s15590_s11 }
   0xf   : > { %p92_p11 = scmp.eq.s32.totalorder %s91_s23, 0  ;;  %s183_s26 = sand.u32 (!%p156_p10), 1, %s15586_s10  }
  0x10   : > { %159 = sbr.rel (%p156_p10) target bundleno = 1313 (0x521), region = 28  ;;  %s11943_s27 = sshll.u32 (!%p156_p10), %s15598_s13, 2 }
  0x11   : > { %s15697_s25 = scalar_select %p92_p11, %s15590_s11, %s94_s24  }
  0x12   : > { %s15703_s28 = sshll.u32 (!%p156_p10), %s183_s26, 1  ;;  %s187_s29 = sadd.s32 (!%p156_p10), %s15594_s12, %s11943_s27 }
  0x13   : > { %s11944_s30 = sshll.u32 (!%p156_p10), %s187_s29, 7  ;;  %s11947_s3 = sshll.u32 (!%p156_p10), %s187_s29, 11 }
  0x14   : > { %p189_p12 = scmp.lt.s32.totalorder (!%p156_p10), %s11944_s30, 1023  ;;  %p199_p13 = scmp.lt.s32.totalorder (!%p156_p10), %s11947_s3, 16383 }
  0x15   : > { %s185_s24 = scalar_lea.vmem (!%p156_p10), [#allocation3], %s15703_s28  ;;  %p11949_p0 = scmp.ne.s32.totalorder (!%p156_p10), %s15594_s12, 0 }
  0x17   : > { %s16989_s30 = smov (!%p189_p12, %s11944_s30), 1023  ;;  %s16991_s3 = smov (!%p199_p13, %s11947_s3), 16383 }
  0x18   : > { %s11945_s4 = sshll.u32 %s16989_s30, 1  ;;  %s11948_s8 = sshll.u32 %s16991_s3, 2  ;;  %v15612_v0 = vmov (!%p11949_p0), 0.0  }
  0x19   : > { %s15709_s7 = scalar_lea.vmem %s16970_s0, %s11945_s4  ;;  %s15714_s23 = scalar_lea.vmem %s16971_s1, %s11948_s8  ;;  %211 = vst [vmem:[#allocation2] sm:$0x3] (!%p11949_p0), %v15612_v0 }
  0x1a   : > { %210 = sbr.rel (%p11949_p0) target bundleno = 33 (0x21), region = 32 }
  0x21 PF: > { %v14460_v1 = vld [vmem:[%s15714_s23 + $0x40] sm:$0xff]   ;;  %v14464_v5 = vld [vmem:[%s15714_s23 + $0x48] sm:$0xff]   ;;  %v14468_v9 = vld [vmem:[%s15714_s23 + $0x50] sm:$0xff]   ;;  %v281_v29 = vlaneseq  ;;  %v15613_v37 = vmov 1983009808   ;;  %p12974_p1 = scmp.ne.s32.totalorder %s15594_s12, 3 }
  0x22   : > { %v14461_v2 = vld [vmem:[%s15714_s23 + $0xc0] sm:$0xff]   ;;  %12979 = vmatprep.subr.bf16.mxu0 %v14460_v1  ;;  %v14465_v6 = vld [vmem:[%s15714_s23 + $0xc8] sm:$0xff]   ;;  %v14469_v10 = vld [vmem:[%s15714_s23 + $0xd0] sm:$0xff]   ;;  %v279_v38 = vunpack.c.l.s4 %v15613_v37 }
  0x23   : > { %v14462_v3 = vld [vmem:[%s15714_s23] sm:$0xff]   ;;  %13001 = vmatprep.subr.bf16.mxu1 %v14461_v2  ;;  %v14466_v7 = vld [vmem:[%s15714_s23 + $0x8] sm:$0xff]   ;;  %v14470_v11 = vld [vmem:[%s15714_s23 + $0x10] sm:$0xff]   ;;  %v282_v34 = vshrl.u32 %v281_v29, 7 }
  0x24   : > { %v14463_v4 = vld [vmem:[%s15714_s23 + $0x80] sm:$0xff]   ;;  %12980 = vmatpush3.bf16.msra.mxu0 %v14462_v3  ;;  %v14467_v8 = vld [vmem:[%s15714_s23 + $0x88] sm:$0xff]   ;;  %v14471_v12 = vld [vmem:[%s15714_s23 + $0x90] sm:$0xff]   ;;  %v280_v40 = vunpack.c.0.s8 %v279_v38 }
  0x25   : > { %13002 = vmatpush3.bf16.msra.mxu1 %v14463_v4  ;;  %12981 = vmatprep.subr.bf16.mxu0 %v14464_v5  ;;  %v14472_v13 = vld [vmem:[%s15714_s23 + $0x58] sm:$0xff]   ;;  %v14476_v17 = vld [vmem:[%s15714_s23 + $0x60] sm:$0xff]   ;;  %v14480_v21 = vld [vmem:[%s15714_s23 + $0x68] sm:$0xff]  }
  0x26   : > { %13003 = vmatprep.subr.bf16.mxu1 %v14465_v6  ;;  %v14473_v14 = vld [vmem:[%s15714_s23 + $0xd8] sm:$0xff]   ;;  %v14477_v18 = vld [vmem:[%s15714_s23 + $0xe0] sm:$0xff]   ;;  %v14481_v22 = vld [vmem:[%s15714_s23 + $0xe8] sm:$0xff]   ;;  %v15753_v42 = vsub.s32 %v280_v40, %v282_v34 }
  0x27   : > { %v14474_v15 = vld [vmem:[%s15714_s23 + $0x18] sm:$0xff]   ;;  %v14478_v19 = vld [vmem:[%s15714_s23 + $0x20] sm:$0xff]   ;;  %v14482_v23 = vld [vmem:[%s15714_s23 + $0x28] sm:$0xff]  }
  0x28   : > { %12982 = vmatpush3.bf16.msra.mxu0 %v14466_v7  ;;  %v14475_v16 = vld [vmem:[%s15714_s23 + $0x98] sm:$0xff]   ;;  %v14479_v20 = vld [vmem:[%s15714_s23 + $0xa0] sm:$0xff]   ;;  %v14483_v24 = vld [vmem:[%s15714_s23 + $0xa8] sm:$0xff]  }
  0x29   : > { %13004 = vmatpush3.bf16.msra.mxu1 %v14467_v8  ;;  %12983 = vmatprep.subr.bf16.mxu0 %v14468_v9  ;;  %v14484_v25 = vld [vmem:[%s15714_s23 + $0x70] sm:$0xff]   ;;  %v14488_v30 = vld [vmem:[%s15714_s23 + $0x78] sm:$0xff]   ;;  %v213_v35 = vld [vmem:[%s15709_s7] sm:$0xff] }
  0x2a   : > { %13005 = vmatprep.subr.bf16.mxu1 %v14469_v10  ;;  %v14485_v26 = vld [vmem:[%s15714_s23 + $0xf0] sm:$0xff]   ;;  %v14489_v31 = vld [vmem:[%s15714_s23 + $0xf8] sm:$0xff]   ;;  %v14493_v36 = vld [vmem:[%s15714_s23 + $0x140] sm:$0xff]   ;;  %v277_v41 = vcombine.high %v213_v35, %v213_v35  ;;  %v284_v43 = vrot.slane %v213_v35, %v15753_v42 }
  0x2b   : > { %v14486_v27 = vld [vmem:[%s15714_s23 + $0x30] sm:$0xff]   ;;  %v14490_v32 = vld [vmem:[%s15714_s23 + $0x38] sm:$0xff]   ;;  %v14494_v39 = vld [vmem:[%s15714_s23 + $0x1c0] sm:$0xff]  }
  0x2c   : > { %12984 = vmatpush3.bf16.msra.mxu0 %v14470_v11  ;;  %v14487_v28 = vld [vmem:[%s15714_s23 + $0xb0] sm:$0xff]   ;;  %v14491_v33 = vld [vmem:[%s15714_s23 + $0xb8] sm:$0xff]   ;;  %v291_v44 = vrot.slane %v277_v41, %v15753_v42  ;;  %v292_v45 = vcombine.high %v284_v43, %v284_v43  ;;  %v14495_v47 = vld [vmem:[%s15714_s23 + $0x100] sm:$0xff]   ;;  %v949_v48 = vpack.c.bf16 %v284_v43, %v284_v43 }
  0x2d   : > { %13006 = vmatpush3.bf16.msra.mxu1 %v14471_v12  ;;  %12985 = vmatprep.subr.bf16.mxu0 %v14472_v13  ;;  %v14496_v50 = vld [vmem:[%s15714_s23 + $0x180] sm:$0xff]   ;;  %v14497_v53 = vld [vmem:[%s15714_s23 + $0x148] sm:$0xff]   ;;  %v14501_v57 = vld [vmem:[%s15714_s23 + $0x150] sm:$0xff]  }
  0x2e   : > { %13007 = vmatprep.subr.bf16.mxu1 %v14473_v14  ;;  %v293_v46 = vcombine.high %v291_v44, %v291_v44  ;;  %v951_v49 = vpack.c.bf16 %v291_v44, %v291_v44  ;;  %v950_v51 = vpack.c.bf16 %v292_v45, %v292_v45  ;;  %v14498_v54 = vld [vmem:[%s15714_s23 + $0x1c8] sm:$0xff]   ;;  %v14502_v58 = vld [vmem:[%s15714_s23 + $0x1d0] sm:$0xff]   ;;  %v14505_v61 = vld [vmem:[%s15714_s23 + $0x158] sm:$0xff]  }
  0x2f   : > { %v14499_v55 = vld [vmem:[%s15714_s23 + $0x108] sm:$0xff]   ;;  %v14503_v59 = vld [vmem:[%s15714_s23 + $0x110] sm:$0xff]   ;;  %v14506_v62 = vld [vmem:[%s15714_s23 + $0x1d8] sm:$0xff]  }
  0x30   : > { %12986 = vmatpush3.bf16.msra.mxu0 %v14474_v15  ;;  %v952_v52 = vpack.c.bf16 %v293_v46, %v293_v46  ;;  %9301 = vmatprep.mubr.bf16.mxu0 %v950_v51  ;;  %v14500_v56 = vld [vmem:[%s15714_s23 + $0x188] sm:$0xff]   ;;  %v14504_v60 = vld [vmem:[%s15714_s23 + $0x190] sm:$0xff]   ;;  %v14507_v63 = vld [vmem:[%s15714_s23 + $0x118] sm:$0xff]  }
  0x31   : > { %13008 = vmatpush3.bf16.msra.mxu1 %v14475_v16  ;;  %12987 = vmatprep.subr.bf16.mxu0 %v14476_v17  ;;  %v14508_v0 = vld [vmem:[%s15714_s23 + $0x198] sm:$0xff]   ;;  %v14509_v1 = vld [vmem:[%s15714_s23 + $0x160] sm:$0xff]   ;;  %v14513_v5 = vld [vmem:[%s15714_s23 + $0x168] sm:$0xff]  }
  0x32   : > { %13009 = vmatprep.subr.bf16.mxu1 %v14477_v18  ;;  %9341 = vmatprep.mubr.bf16.mxu1 %v952_v52  ;;  %v14510_v2 = vld [vmem:[%s15714_s23 + $0x1e0] sm:$0xff]   ;;  %v14514_v6 = vld [vmem:[%s15714_s23 + $0x1e8] sm:$0xff]   ;;  %v14517_v9 = vld [vmem:[%s15714_s23 + $0x170] sm:$0xff]  }
  0x33   : > { %v14511_v3 = vld [vmem:[%s15714_s23 + $0x120] sm:$0xff]   ;;  %v14515_v7 = vld [vmem:[%s15714_s23 + $0x128] sm:$0xff]   ;;  %v14518_v10 = vld [vmem:[%s15714_s23 + $0x1f0] sm:$0xff]  }
  0x34   : > { %12988 = vmatpush3.bf16.msra.mxu0 %v14478_v19  ;;  %v14512_v4 = vld [vmem:[%s15714_s23 + $0x1a0] sm:$0xff]   ;;  %v14516_v8 = vld [vmem:[%s15714_s23 + $0x1a8] sm:$0xff]   ;;  %v14519_v12 = vld [vmem:[%s15714_s23 + $0x130] sm:$0xff]  }
  0x35   : > { %13010 = vmatpush3.bf16.msra.mxu1 %v14479_v20  ;;  %12989 = vmatprep.subr.bf16.mxu0 %v14480_v21  ;;  %v214_v11 = vld [vmem:[%s15709_s7 + $0x8] sm:$0xff]  ;;  %v14520_v15 = vld [vmem:[%s15714_s23 + $0x1b0] sm:$0xff]   ;;  %v14521_v16 = vld [vmem:[%s15714_s23 + $0x178] sm:$0xff]  }
  0x36   : > { %13011 = vmatprep.subr.bf16.mxu1 %v14481_v22  ;;  %v301_v13 = vrot.slane %v214_v11, %v15753_v42  ;;  %v294_v14 = vcombine.high %v214_v11, %v214_v11  ;;  %v14522_v19 = vld [vmem:[%s15714_s23 + $0x1f8] sm:$0xff]   ;;  %v14533_v34 = vld [vmem:[%s15714_s23 + $0x288] sm:$0xff]   ;;  %v14534_v35 = vld [vmem:[%s15714_s23 + $0x250] sm:$0xff]  }
  0x37   : > { %v14523_v20 = vld [vmem:[%s15714_s23 + $0x138] sm:$0xff]   ;;  %v14536_v37 = vld [vmem:[%s15714_s23 + $0x210] sm:$0xff]   ;;  %v14542_v44 = vld [vmem:[%s15714_s23 + $0x260] sm:$0xff]  }
  0x38   : > { %12990 = vmatpush3.bf16.msra.mxu0 %v14482_v23  ;;  %v309_v17 = vcombine.high %v301_v13, %v301_v13  ;;  %v308_v18 = vrot.slane %v294_v14, %v15753_v42  ;;  %v14524_v23 = vld [vmem:[%s15714_s23 + $0x1b8] sm:$0xff]   ;;  %v14537_v38 = vld [vmem:[%s15714_s23 + $0x290] sm:$0xff]   ;;  %v14543_v45 = vld [vmem:[%s15714_s23 + $0x2e0] sm:$0xff]  }
  0x39   : > { %13012 = vmatpush3.bf16.msra.mxu1 %v14483_v24  ;;  %12991 = vmatprep.subr.bf16.mxu0 %v14484_v25  ;;  %v14526_v25 = vld [vmem:[%s15714_s23 + $0x240] sm:$0xff]   ;;  %v14539_v40 = vld [vmem:[%s15714_s23 + $0x2d8] sm:$0xff]   ;;  %v14549_v51 = vld [vmem:[%s15714_s23 + $0x2a8] sm:$0xff]  }
  0x3a   : > { %13013 = vmatprep.subr.bf16.mxu1 %v14485_v26  ;;  %v954_v21 = vpack.c.bf16 %v309_v17, %v309_v17  ;;  %v310_v22 = vcombine.high %v308_v18, %v308_v18  ;;  %v14527_v26 = vld [vmem:[%s15714_s23 + $0x2c0] sm:$0xff]   ;;  %v955_v29 = vpack.c.bf16 %v308_v18, %v308_v18  ;;  %v14540_v41 = vld [vmem:[%s15714_s23 + $0x218] sm:$0xff]   ;;  %v14550_v52 = vld [vmem:[%s15714_s23 + $0x270] sm:$0xff]  }
  0x3b   : > { %v14541_v43 = vld [vmem:[%s15714_s23 + $0x298] sm:$0xff]   ;;  %v14544_v46 = vld [vmem:[%s15714_s23 + $0x220] sm:$0xff]   ;;  %v14564_v11 = vld [vmem:[%s15714_s23 + $0x3c8] sm:$0xff]  }
  0x3c   : > { %12992 = vmatpush3.bf16.msra.mxu0 %v14486_v27  ;;  %v956_v24 = vpack.c.bf16 %v310_v22, %v310_v22  ;;  %v14528_v27 = vld [vmem:[%s15714_s23 + $0x200] sm:$0xff]   ;;  %v14567_v14 = vld [vmem:[%s15714_s23 + $0x350] sm:$0xff]   ;;  %v14571_v18 = vld [vmem:[%s15714_s23 + $0x358] sm:$0xff]  }
  0x3d   : > { %13014 = vmatpush3.bf16.msra.mxu1 %v14487_v28  ;;  %12993 = vmatprep.subr.bf16.mxu0 %v14488_v30  ;;  %v953_v28 = vpack.c.bf16 %v301_v13, %v301_v13  ;;  %v14529_v30 = vld [vmem:[%s15714_s23 + $0x280] sm:$0xff]   ;;  %v14566_v13 = vld [vmem:[%s15714_s23 + $0x388] sm:$0xff]   ;;  %v14570_v17 = vld [vmem:[%s15714_s23 + $0x390] sm:$0xff]  }
  0x3e   : > { %13015 = vmatprep.subr.bf16.mxu1 %v14489_v31  ;;  %v14530_v31 = vld [vmem:[%s15714_s23 + $0x248] sm:$0xff]   ;;  %v14575_v22 = vld [vmem:[%s15714_s23 + $0x360] sm:$0xff]  }
  0x40   : > { %12994 = vmatpush3.bf16.msra.mxu0 %v14490_v32  ;;  %v14531_v32 = vld [vmem:[%s15714_s23 + $0x2c8] sm:$0xff]  }
  0x41   : > { %13016 = vmatpush3.bf16.msra.mxu1 %v14491_v33  ;;  %13023 = vmatprep.subr.bf16.mxu0 %v14493_v36  ;;  %v14532_v33 = vld [vmem:[%s15714_s23 + $0x208] sm:$0xff]   ;;  %v14535_v36 = vld [vmem:[%s15714_s23 + $0x2d0] sm:$0xff]  }
  0x42   : > { %13045 = vmatprep.subr.bf16.mxu1 %v14494_v39  ;;  %v14538_v39 = vld [vmem:[%s15714_s23 + $0x258] sm:$0xff]  }
  0x43   : > { %9302 = vmatmul.mubr.bf16.vlgmr.msra.gmra.mrb[0].mxu0 %v949_v48  ;;  %v14546_v48 = vld [vmem:[%s15714_s23 + $0x268] sm:$0xff]  }
  0x44   : > { %9342 = vmatmul.mubr.bf16.vlgmr.msra.gmra.mrb[0].mxu1 %v951_v49  ;;  %13024 = vmatpush3.bf16.msra.mxu0 %v14495_v47  ;;  %v14545_v47 = vld [vmem:[%s15714_s23 + $0x2a0] sm:$0xff]   ;;  %v14547_v49 = vld [vmem:[%s15714_s23 + $0x2e8] sm:$0xff]  }
  0x45   : > { %13046 = vmatpush3.bf16.msra.mxu1 %v14496_v50  ;;  %13025 = vmatprep.subr.bf16.mxu0 %v14497_v53  ;;  %v14548_v50 = vld [vmem:[%s15714_s23 + $0x228] sm:$0xff]   ;;  %v14551_v53 = vld [vmem:[%s15714_s23 + $0x2f0] sm:$0xff]  }
  0x46   : > { %13047 = vmatprep.subr.bf16.mxu1 %v14498_v54  ;;  %9381 = vmatprep.mubr.bf16.mxu0 %v954_v21  ;;  %v215_v54 = vld [vmem:[%s15709_s7 + $0x10] sm:$0xff]  ;;  %v14574_v21 = vld [vmem:[%s15714_s23 + $0x398] sm:$0xff]  }
  0x47   : > { %9421 = vmatprep.mubr.bf16.mxu1 %v956_v24  ;;  %v14577_v24 = vld [vmem:[%s15714_s23 + $0x320] sm:$0xff]  }
  0x48   : > { %13026 = vmatpush3.bf16.msra.mxu0 %v14499_v55  ;;  %v14552_v55 = vld [vmem:[%s15714_s23 + $0x230] sm:$0xff]  }
  0x49   : > { %13048 = vmatpush3.bf16.msra.mxu1 %v14500_v56  ;;  %13027 = vmatprep.subr.bf16.mxu0 %v14501_v57  ;;  %v318_v56 = vrot.slane %v215_v54, %v15753_v42  ;;  %v311_v57 = vcombine.high %v215_v54, %v215_v54  ;;  %v14597_v54 = vld [vmem:[%s15714_s23 + $0x4c8] sm:$0xff]  }
  0x4a   : > { %13049 = vmatprep.subr.bf16.mxu1 %v14502_v58  ;;  %v14553_v58 = vld [vmem:[%s15714_s23 + $0x2b0] sm:$0xff]  }
  0x4c   : > { %13028 = vmatpush3.bf16.msra.mxu0 %v14503_v59  ;;  %v14554_v59 = vld [vmem:[%s15714_s23 + $0x278] sm:$0xff]  }
  0x4d   : > { %13050 = vmatpush3.bf16.msra.mxu1 %v14504_v60  ;;  %13029 = vmatprep.subr.bf16.mxu0 %v14505_v61  ;;  %v326_v60 = vcombine.high %v318_v56, %v318_v56  ;;  %v325_v61 = vrot.slane %v311_v57, %v15753_v42  ;;  %v14600_v57 = vld [vmem:[%s15714_s23 + $0x450] sm:$0xff]  }
  0x4e   : > { %13051 = vmatprep.subr.bf16.mxu1 %v14506_v62  ;;  %v14555_v62 = vld [vmem:[%s15714_s23 + $0x2f8] sm:$0xff]  }
  0x50   : > { %13030 = vmatpush3.bf16.msra.mxu0 %v14507_v63  ;;  %v14556_v63 = vld [vmem:[%s15714_s23 + $0x238] sm:$0xff]  }
  0x51   : > { %13052 = vmatpush3.bf16.msra.mxu1 %v14508_v0  ;;  %13031 = vmatprep.subr.bf16.mxu0 %v14509_v1  ;;  %v958_v0 = vpack.c.bf16 %v326_v60, %v326_v60  ;;  %v327_v1 = vcombine.high %v325_v61, %v325_v61  ;;  %v14603_v60 = vld [vmem:[%s15714_s23 + $0x490] sm:$0xff]  }
  0x52   : > { %13053 = vmatprep.subr.bf16.mxu1 %v14510_v2  ;;  %v14557_v2 = vld [vmem:[%s15714_s23 + $0x2b8] sm:$0xff]  }
  0x54   : > { %13032 = vmatpush3.bf16.msra.mxu0 %v14511_v3  ;;  %v960_v3 = vpack.c.bf16 %v327_v1, %v327_v1  ;;  %v14608_v1 = vld [vmem:[%s15714_s23 + $0x460] sm:$0xff]  }
  0x55   : > { %13054 = vmatpush3.bf16.msra.mxu1 %v14512_v4  ;;  %13033 = vmatprep.subr.bf16.mxu0 %v14513_v5  ;;  %v14559_v4 = vld [vmem:[%s15714_s23 + $0x340] sm:$0xff]  }
  0x56   : > { %13055 = vmatprep.subr.bf16.mxu1 %v14514_v6  ;;  %v14560_v5 = vld [vmem:[%s15714_s23 + $0x3c0] sm:$0xff]  }
  0x57   : > { %v14561_v6 = vld [vmem:[%s15714_s23 + $0x300] sm:$0xff]  }
  0x58   : > { %13034 = vmatpush3.bf16.msra.mxu0 %v14515_v7  ;;  %v957_v7 = vpack.c.bf16 %v318_v56, %v318_v56  ;;  %v14599_v56 = vld [vmem:[%s15714_s23 + $0x488] sm:$0xff]  }
  0x59   : > { %13056 = vmatpush3.bf16.msra.mxu1 %v14516_v8  ;;  %13035 = vmatprep.subr.bf16.mxu0 %v14517_v9  ;;  %v959_v8 = vpack.c.bf16 %v325_v61, %v325_v61  ;;  %v14562_v9 = vld [vmem:[%s15714_s23 + $0x380] sm:$0xff]   ;;  %v14604_v61 = vld [vmem:[%s15714_s23 + $0x458] sm:$0xff]  }
  0x5a   : > { %13057 = vmatprep.subr.bf16.mxu1 %v14518_v10  ;;  %v14563_v10 = vld [vmem:[%s15714_s23 + $0x348] sm:$0xff]  }
  0x5c   : > { %13036 = vmatpush3.bf16.msra.mxu0 %v14519_v12  ;;  %v14565_v12 = vld [vmem:[%s15714_s23 + $0x308] sm:$0xff]  }
  0x5d   : > { %13058 = vmatpush3.bf16.msra.mxu1 %v14520_v15  ;;  %13037 = vmatprep.subr.bf16.mxu0 %v14521_v16  ;;  %v14568_v15 = vld [vmem:[%s15714_s23 + $0x3d0] sm:$0xff]  }
  0x5e   : > { %13059 = vmatprep.subr.bf16.mxu1 %v14522_v19  ;;  %v14569_v16 = vld [vmem:[%s15714_s23 + $0x310] sm:$0xff]   ;;  %v14572_v19 = vld [vmem:[%s15714_s23 + $0x3d8] sm:$0xff]  }
  0x60   : > { %13038 = vmatpush3.bf16.msra.mxu0 %v14523_v20  ;;  %v14573_v20 = vld [vmem:[%s15714_s23 + $0x318] sm:$0xff]  }
  0x61   : > { %13060 = vmatpush3.bf16.msra.mxu1 %v14524_v23  ;;  %13067 = vmatprep.subr.bf16.mxu0 %v14526_v25  ;;  %v14576_v23 = vld [vmem:[%s15714_s23 + $0x3e0] sm:$0xff]  }
  0x62   : > { %13089 = vmatprep.subr.bf16.mxu1 %v14527_v26  ;;  %v14578_v25 = vld [vmem:[%s15714_s23 + $0x3a0] sm:$0xff]   ;;  %v14579_v26 = vld [vmem:[%s15714_s23 + $0x368] sm:$0xff]  }
  0x63   : > { %9382 = vmatmul.mubr.bf16.vlgmr.msra.gmra.mrb[4].mxu0 %v953_v28  ;;  %v14581_v28 = vld [vmem:[%s15714_s23 + $0x328] sm:$0xff]  }
  0x64   : > { %9422 = vmatmul.mubr.bf16.vlgmr.msra.gmra.mrb[4].mxu1 %v955_v29  ;;  %13068 = vmatpush3.bf16.msra.mxu0 %v14528_v27  ;;  %v14580_v27 = vld [vmem:[%s15714_s23 + $0x3e8] sm:$0xff]  }
  0x65   : > { %13090 = vmatpush3.bf16.msra.mxu1 %v14529_v30  ;;  %13069 = vmatprep.subr.bf16.mxu0 %v14530_v31  ;;  %v14582_v29 = vld [vmem:[%s15714_s23 + $0x3a8] sm:$0xff]   ;;  %v14583_v30 = vld [vmem:[%s15714_s23 + $0x370] sm:$0xff]  }
  0x66   : > { %13091 = vmatprep.subr.bf16.mxu1 %v14531_v32  ;;  %9461 = vmatprep.mubr.bf16.mxu0 %v958_v0  ;;  %v14584_v31 = vld [vmem:[%s15714_s23 + $0x3f0] sm:$0xff]   ;;  %v14607_v0 = vld [vmem:[%s15714_s23 + $0x498] sm:$0xff]  }
  0x67   : > { %9501 = vmatprep.mubr.bf16.mxu1 %v960_v3  ;;  %v14585_v32 = vld [vmem:[%s15714_s23 + $0x330] sm:$0xff]   ;;  %v14610_v3 = vld [vmem:[%s15714_s23 + $0x420] sm:$0xff]  }
  0x68   : > { %13070 = vmatpush3.bf16.msra.mxu0 %v14532_v33  ;;  %v216_v33 = vld [vmem:[%s15709_s7 + $0x18] sm:$0xff] }
  0x69   : > { %13092 = vmatpush3.bf16.msra.mxu1 %v14533_v34  ;;  %13071 = vmatprep.subr.bf16.mxu0 %v14534_v35  ;;  %v14586_v34 = vld [vmem:[%s15714_s23 + $0x3b0] sm:$0xff]   ;;  %v335_v35 = vrot.slane %v216_v33, %v15753_v42 }
  0x6a   : > { %13093 = vmatprep.subr.bf16.mxu1 %v14535_v36  ;;  %v328_v36 = vcombine.high %v216_v33, %v216_v33  ;;  %v14631_v33 = vld [vmem:[%s15714_s23 + $0x508] sm:$0xff]  }
  0x6c   : > { %13072 = vmatpush3.bf16.msra.mxu0 %v14536_v37  ;;  %v14587_v37 = vld [vmem:[%s15714_s23 + $0x378] sm:$0xff]  }
  0x6d   : > { %13094 = vmatpush3.bf16.msra.mxu1 %v14537_v38  ;;  %13073 = vmatprep.subr.bf16.mxu0 %v14538_v39  ;;  %v14588_v38 = vld [vmem:[%s15714_s23 + $0x3f8] sm:$0xff]   ;;  %v343_v39 = vcombine.high %v335_v35, %v335_v35 }
  0x6e   : > { %13095 = vmatprep.subr.bf16.mxu1 %v14539_v40  ;;  %v342_v40 = vrot.slane %v328_v36, %v15753_v42  ;;  %v14634_v36 = vld [vmem:[%s15714_s23 + $0x5d0] sm:$0xff]  }
  0x70   : > { %13074 = vmatpush3.bf16.msra.mxu0 %v14540_v41  ;;  %v14589_v41 = vld [vmem:[%s15714_s23 + $0x338] sm:$0xff]  }
  0x71   : > { %13096 = vmatpush3.bf16.msra.mxu1 %v14541_v43  ;;  %13075 = vmatprep.subr.bf16.mxu0 %v14542_v44  ;;  %v14590_v43 = vld [vmem:[%s15714_s23 + $0x3b8] sm:$0xff]   ;;  %v962_v44 = vpack.c.bf16 %v343_v39, %v343_v39 }
  0x72   : > { %13097 = vmatprep.subr.bf16.mxu1 %v14543_v45  ;;  %v344_v45 = vcombine.high %v342_v40, %v342_v40  ;;  %v14637_v39 = vld [vmem:[%s15714_s23 + $0x558] sm:$0xff]  }
  0x74   : > { %13076 = vmatpush3.bf16.msra.mxu0 %v14544_v46  ;;  %v14592_v46 = vld [vmem:[%s15714_s23 + $0x440] sm:$0xff]  }
  0x75   : > { %13098 = vmatpush3.bf16.msra.mxu1 %v14545_v47  ;;  %13077 = vmatprep.subr.bf16.mxu0 %v14546_v48  ;;  %v964_v47 = vpack.c.bf16 %v344_v45, %v344_v45  ;;  %v14593_v48 = vld [vmem:[%s15714_s23 + $0x4c0] sm:$0xff]  }
  0x76   : > { %13099 = vmatprep.subr.bf16.mxu1 %v14547_v49  ;;  %v14594_v49 = vld [vmem:[%s15714_s23 + $0x400] sm:$0xff]  }
  0x77   : > { %v14642_v45 = vld [vmem:[%s15714_s23 + $0x5e0] sm:$0xff]  }
  0x78   : > { %13078 = vmatpush3.bf16.msra.mxu0 %v14548_v50  ;;  %v961_v50 = vpack.c.bf16 %v335_v35, %v335_v35  ;;  %v14633_v35 = vld [vmem:[%s15714_s23 + $0x550] sm:$0xff]  }
  0x79   : > { %13100 = vmatpush3.bf16.msra.mxu1 %v14549_v51  ;;  %13079 = vmatprep.subr.bf16.mxu0 %v14550_v52  ;;  %v963_v51 = vpack.c.bf16 %v342_v40, %v342_v40  ;;  %v14595_v52 = vld [vmem:[%s15714_s23 + $0x480] sm:$0xff]   ;;  %v14638_v40 = vld [vmem:[%s15714_s23 + $0x5d8] sm:$0xff]  }
  0x7a   : > { %13101 = vmatprep.subr.bf16.mxu1 %v14551_v53  ;;  %v14596_v53 = vld [vmem:[%s15714_s23 + $0x448] sm:$0xff]  }
  0x7c   : > { %13080 = vmatpush3.bf16.msra.mxu0 %v14552_v55  ;;  %v14598_v55 = vld [vmem:[%s15714_s23 + $0x408] sm:$0xff]  }
  0x7d   : > { %13102 = vmatpush3.bf16.msra.mxu1 %v14553_v58  ;;  %13081 = vmatprep.subr.bf16.mxu0 %v14554_v59  ;;  %v14601_v58 = vld [vmem:[%s15714_s23 + $0x4d0] sm:$0xff]  }
  0x7e   : > { %13103 = vmatprep.subr.bf16.mxu1 %v14555_v62  ;;  %v14602_v59 = vld [vmem:[%s15714_s23 + $0x410] sm:$0xff]   ;;  %v14605_v62 = vld [vmem:[%s15714_s23 + $0x4d8] sm:$0xff]  }
  0x80   : > { %13082 = vmatpush3.bf16.msra.mxu0 %v14556_v63  ;;  %v14606_v63 = vld [vmem:[%s15714_s23 + $0x418] sm:$0xff]  }
  0x81   : > { %13104 = vmatpush3.bf16.msra.mxu1 %v14557_v2  ;;  %13111 = vmatprep.subr.bf16.mxu0 %v14559_v4  ;;  %v14609_v2 = vld [vmem:[%s15714_s23 + $0x4e0] sm:$0xff]  }
  0x82   : > { %13133 = vmatprep.subr.bf16.mxu1 %v14560_v5  ;;  %v14611_v4 = vld [vmem:[%s15714_s23 + $0x4a0] sm:$0xff]   ;;  %v14612_v5 = vld [vmem:[%s15714_s23 + $0x468] sm:$0xff]  }
  0x83   : > { %9462 = vmatmul.mubr.bf16.vlgmr.msra.gmra.mrb[8].mxu0 %v957_v7  ;;  %v14614_v7 = vld [vmem:[%s15714_s23 + $0x428] sm:$0xff]  }
  0x84   : > { %9502 = vmatmul.mubr.bf16.vlgmr.msra.gmra.mrb[8].mxu1 %v959_v8  ;;  %13112 = vmatpush3.bf16.msra.mxu0 %v14561_v6  ;;  %v14613_v6 = vld [vmem:[%s15714_s23 + $0x4e8] sm:$0xff]  }
  0x85   : > { %13134 = vmatpush3.bf16.msra.mxu1 %v14562_v9  ;;  %13113 = vmatprep.subr.bf16.mxu0 %v14563_v10  ;;  %v14615_v8 = vld [vmem:[%s15714_s23 + $0x4a8] sm:$0xff]   ;;  %v14616_v9 = vld [vmem:[%s15714_s23 + $0x470] sm:$0xff]  }
  0x86   : > { %13135 = vmatprep.subr.bf16.mxu1 %v14564_v11  ;;  %9541 = vmatprep.mubr.bf16.mxu0 %v962_v44  ;;  %v14617_v10 = vld [vmem:[%s15714_s23 + $0x4f0] sm:$0xff]   ;;  %v14641_v44 = vld [vmem:[%s15714_s23 + $0x560] sm:$0xff]  }
  0x87   : > { %9581 = vmatprep.mubr.bf16.mxu1 %v964_v47  ;;  %v14618_v11 = vld [vmem:[%s15714_s23 + $0x430] sm:$0xff]   ;;  %v14644_v47 = vld [vmem:[%s15714_s23 + $0x5a0] sm:$0xff]  }
  0x88   : > { %13114 = vmatpush3.bf16.msra.mxu0 %v14565_v12  ;;  %v217_v12 = vld [vmem:[%s15709_s7 + $0x20] sm:$0xff] }
  0x89   : > { %13136 = vmatpush3.bf16.msra.mxu1 %v14566_v13  ;;  %13115 = vmatprep.subr.bf16.mxu0 %v14567_v14  ;;  %v14619_v13 = vld [vmem:[%s15714_s23 + $0x4b0] sm:$0xff]   ;;  %v352_v14 = vrot.slane %v217_v12, %v15753_v42 }
  0x8a   : > { %13137 = vmatprep.subr.bf16.mxu1 %v14568_v15  ;;  %v345_v15 = vcombine.high %v217_v12, %v217_v12  ;;  %v14664_v12 = vld [vmem:[%s15714_s23 + $0x608] sm:$0xff]  }
  0x8c   : > { %13116 = vmatpush3.bf16.msra.mxu0 %v14569_v16  ;;  %v14620_v16 = vld [vmem:[%s15714_s23 + $0x478] sm:$0xff]  }
  0x8d   : > { %13138 = vmatpush3.bf16.msra.mxu1 %v14570_v17  ;;  %13117 = vmatprep.subr.bf16.mxu0 %v14571_v18  ;;  %v14621_v17 = vld [vmem:[%s15714_s23 + $0x4f8] sm:$0xff]   ;;  %v360_v18 = vcombine.high %v352_v14, %v352_v14 }
  0x8e   : > { %13139 = vmatprep.subr.bf16.mxu1 %v14572_v19  ;;  %v359_v19 = vrot.slane %v345_v15, %v15753_v42  ;;  %v14667_v15 = vld [vmem:[%s15714_s23 + $0x6d0] sm:$0xff]  }
  0x90   : > { %13118 = vmatpush3.bf16.msra.mxu0 %v14573_v20  ;;  %v14622_v20 = vld [vmem:[%s15714_s23 + $0x438] sm:$0xff]  }
  0x91   : > { %13140 = vmatpush3.bf16.msra.mxu1 %v14574_v21  ;;  %13119 = vmatprep.subr.bf16.mxu0 %v14575_v22  ;;  %v14623_v21 = vld [vmem:[%s15714_s23 + $0x4b8] sm:$0xff]   ;;  %v966_v22 = vpack.c.bf16 %v360_v18, %v360_v18 }
  0x92   : > { %13141 = vmatprep.subr.bf16.mxu1 %v14576_v23  ;;  %v361_v23 = vcombine.high %v359_v19, %v359_v19  ;;  %v14670_v18 = vld [vmem:[%s15714_s23 + $0x658] sm:$0xff]  }
  0x94   : > { %13120 = vmatpush3.bf16.msra.mxu0 %v14577_v24  ;;  %v14625_v24 = vld [vmem:[%s15714_s23 + $0x540] sm:$0xff]  }
  0x95   : > { %13142 = vmatpush3.bf16.msra.mxu1 %v14578_v25  ;;  %13121 = vmatprep.subr.bf16.mxu0 %v14579_v26  ;;  %v968_v25 = vpack.c.bf16 %v361_v23, %v361_v23  ;;  %v14626_v26 = vld [vmem:[%s15714_s23 + $0x5c0] sm:$0xff]  }
  0x96   : > { %13143 = vmatprep.subr.bf16.mxu1 %v14580_v27  ;;  %v14627_v27 = vld [vmem:[%s15714_s23 + $0x500] sm:$0xff]  }
  0x97   : > { %v14675_v23 = vld [vmem:[%s15714_s23 + $0x6e0] sm:$0xff]  }
  0x98   : > { %13122 = vmatpush3.bf16.msra.mxu0 %v14581_v28  ;;  %v965_v28 = vpack.c.bf16 %v352_v14, %v352_v14  ;;  %v14666_v14 = vld [vmem:[%s15714_s23 + $0x650] sm:$0xff]  }
  0x99   : > { %13144 = vmatpush3.bf16.msra.mxu1 %v14582_v29  ;;  %13123 = vmatprep.subr.bf16.mxu0 %v14583_v30  ;;  %v967_v29 = vpack.c.bf16 %v359_v19, %v359_v19  ;;  %v14628_v30 = vld [vmem:[%s15714_s23 + $0x580] sm:$0xff]   ;;  %v14671_v19 = vld [vmem:[%s15714_s23 + $0x6d8] sm:$0xff]  }
  0x9a   : > { %13145 = vmatprep.subr.bf16.mxu1 %v14584_v31  ;;  %v14629_v31 = vld [vmem:[%s15714_s23 + $0x548] sm:$0xff]  }
  0x9c   : > { %13124 = vmatpush3.bf16.msra.mxu0 %v14585_v32  ;;  %v14630_v32 = vld [vmem:[%s15714_s23 + $0x5c8] sm:$0xff]  }
  0x9d   : > { %13146 = vmatpush3.bf16.msra.mxu1 %v14586_v34  ;;  %13125 = vmatprep.subr.bf16.mxu0 %v14587_v37  ;;  %v14632_v34 = vld [vmem:[%s15714_s23 + $0x588] sm:$0xff]   ;;  %v14635_v37 = vld [vmem:[%s15714_s23 + $0x510] sm:$0xff]  }
  0x9e   : > { %13147 = vmatprep.subr.bf16.mxu1 %v14588_v38  ;;  %v14636_v38 = vld [vmem:[%s15714_s23 + $0x590] sm:$0xff]  }
  0xa0   : > { %13126 = vmatpush3.bf16.msra.mxu0 %v14589_v41  ;;  %v14639_v41 = vld [vmem:[%s15714_s23 + $0x518] sm:$0xff]  }
  0xa1   : > { %13148 = vmatpush3.bf16.msra.mxu1 %v14590_v43  ;;  %13155 = vmatprep.subr.bf16.mxu0 %v14592_v46  ;;  %v14640_v43 = vld [vmem:[%s15714_s23 + $0x598] sm:$0xff]   ;;  %v14643_v46 = vld [vmem:[%s15714_s23 + $0x520] sm:$0xff]  }
  0xa2   : > { %13177 = vmatprep.subr.bf16.mxu1 %v14593_v48  ;;  %v14645_v48 = vld [vmem:[%s15714_s23 + $0x568] sm:$0xff]  }
  0xa3   : > { %9542 = vmatmul.mubr.bf16.vlgmr.msra.gmra.mrb[12].mxu0 %v961_v50  ;;  %v14647_v50 = vld [vmem:[%s15714_s23 + $0x528] sm:$0xff]  }
  0xa4   : > { %9582 = vmatmul.mubr.bf16.vlgmr.msra.gmra.mrb[12].mxu1 %v963_v51  ;;  %13156 = vmatpush3.bf16.msra.mxu0 %v14594_v49  ;;  %v14646_v49 = vld [vmem:[%s15714_s23 + $0x5e8] sm:$0xff]  }
  0xa5   : > { %13178 = vmatpush3.bf16.msra.mxu1 %v14595_v52  ;;  %13157 = vmatprep.subr.bf16.mxu0 %v14596_v53  ;;  %v14648_v51 = vld [vmem:[%s15714_s23 + $0x5a8] sm:$0xff]   ;;  %v14649_v52 = vld [vmem:[%s15714_s23 + $0x570] sm:$0xff]  }
  0xa6   : > { %13179 = vmatprep.subr.bf16.mxu1 %v14597_v54  ;;  %9621 = vmatprep.mubr.bf16.mxu0 %v966_v22  ;;  %v14650_v53 = vld [vmem:[%s15714_s23 + $0x5f0] sm:$0xff]   ;;  %v14674_v22 = vld [vmem:[%s15714_s23 + $0x660] sm:$0xff]  }
  0xa7   : > { %9661 = vmatprep.mubr.bf16.mxu1 %v968_v25  ;;  %v14651_v54 = vld [vmem:[%s15714_s23 + $0x530] sm:$0xff]   ;;  %v14677_v25 = vld [vmem:[%s15714_s23 + $0x6a0] sm:$0xff]  }
  0xa8   : > { %13158 = vmatpush3.bf16.msra.mxu0 %v14598_v55  ;;  %v218_v55 = vld [vmem:[%s15709_s7 + $0x28] sm:$0xff] }
  0xa9   : > { %13180 = vmatpush3.bf16.msra.mxu1 %v14599_v56  ;;  %13159 = vmatprep.subr.bf16.mxu0 %v14600_v57  ;;  %v14652_v56 = vld [vmem:[%s15714_s23 + $0x5b0] sm:$0xff]   ;;  %v369_v57 = vrot.slane %v218_v55, %v15753_v42 }
  0xaa   : > { %13181 = vmatprep.subr.bf16.mxu1 %v14601_v58  ;;  %v362_v58 = vcombine.high %v218_v55, %v218_v55  ;;  %v14697_v55 = vld [vmem:[%s15714_s23 + $0x708] sm:$0xff]  }
  0xac   : > { %13160 = vmatpush3.bf16.msra.mxu0 %v14602_v59  ;;  %v14653_v59 = vld [vmem:[%s15714_s23 + $0x578] sm:$0xff]  }
  0xad   : > { %13182 = vmatpush3.bf16.msra.mxu1 %v14603_v60  ;;  %13161 = vmatprep.subr.bf16.mxu0 %v14604_v61  ;;  %v14654_v60 = vld [vmem:[%s15714_s23 + $0x5f8] sm:$0xff]   ;;  %v377_v61 = vcombine.high %v369_v57, %v369_v57 }
  0xae   : > { %13183 = vmatprep.subr.bf16.mxu1 %v14605_v62  ;;  %v376_v62 = vrot.slane %v362_v58, %v15753_v42  ;;  %v14700_v58 = vld [vmem:[%s15714_s23 + $0x7d0] sm:$0xff]  }
  0xb0   : > { %13162 = vmatpush3.bf16.msra.mxu0 %v14606_v63  ;;  %v14655_v63 = vld [vmem:[%s15714_s23 + $0x538] sm:$0xff]  }
  0xb1   : > { %13184 = vmatpush3.bf16.msra.mxu1 %v14607_v0  ;;  %13163 = vmatprep.subr.bf16.mxu0 %v14608_v1  ;;  %v14656_v0 = vld [vmem:[%s15714_s23 + $0x5b8] sm:$0xff]   ;;  %v970_v1 = vpack.c.bf16 %v377_v61, %v377_v61 }
  0xb2   : > { %13185 = vmatprep.subr.bf16.mxu1 %v14609_v2  ;;  %v378_v2 = vcombine.high %v376_v62, %v376_v62  ;;  %v14703_v61 = vld [vmem:[%s15714_s23 + $0x758] sm:$0xff]  }
  0xb4   : > { %13164 = vmatpush3.bf16.msra.mxu0 %v14610_v3  ;;  %v14658_v3 = vld [vmem:[%s15714_s23 + $0x640] sm:$0xff]  }
  0xb5   : > { %13186 = vmatpush3.bf16.msra.mxu1 %v14611_v4  ;;  %13165 = vmatprep.subr.bf16.mxu0 %v14612_v5  ;;  %v972_v4 = vpack.c.bf16 %v378_v2, %v378_v2  ;;  %v14659_v5 = vld [vmem:[%s15714_s23 + $0x6c0] sm:$0xff]  }
  0xb6   : > { %13187 = vmatprep.subr.bf16.mxu1 %v14613_v6  ;;  %v14660_v6 = vld [vmem:[%s15714_s23 + $0x600] sm:$0xff]  }
  0xb7   : > { %v14708_v2 = vld [vmem:[%s15714_s23 + $0x7e0] sm:$0xff]  }
  0xb8   : > { %13166 = vmatpush3.bf16.msra.mxu0 %v14614_v7  ;;  %v969_v7 = vpack.c.bf16 %v369_v57, %v369_v57  ;;  %v14699_v57 = vld [vmem:[%s15714_s23 + $0x750] sm:$0xff]  }
  0xb9   : > { %13188 = vmatpush3.bf16.msra.mxu1 %v14615_v8  ;;  %13167 = vmatprep.subr.bf16.mxu0 %v14616_v9  ;;  %v971_v8 = vpack.c.bf16 %v376_v62, %v376_v62  ;;  %v14661_v9 = vld [vmem:[%s15714_s23 + $0x680] sm:$0xff]   ;;  %v14704_v62 = vld [vmem:[%s15714_s23 + $0x7d8] sm:$0xff]  }
  0xba   : > { %13189 = vmatprep.subr.bf16.mxu1 %v14617_v10  ;;  %v14662_v10 = vld [vmem:[%s15714_s23 + $0x648] sm:$0xff]  }
  0xbc   : > { %13168 = vmatpush3.bf16.msra.mxu0 %v14618_v11  ;;  %v14663_v11 = vld [vmem:[%s15714_s23 + $0x6c8] sm:$0xff]  }
  0xbd   : > { %13190 = vmatpush3.bf16.msra.mxu1 %v14619_v13  ;;  %13169 = vmatprep.subr.bf16.mxu0 %v14620_v16  ;;  %v14665_v13 = vld [vmem:[%s15714_s23 + $0x688] sm:$0xff]   ;;  %v14668_v16 = vld [vmem:[%s15714_s23 + $0x610] sm:$0xff]  }
  0xbe   : > { %13191 = vmatprep.subr.bf16.mxu1 %v14621_v17  ;;  %v14669_v17 = vld [vmem:[%s15714_s23 + $0x690] sm:$0xff]  }
  0xc0   : > { %13170 = vmatpush3.bf16.msra.mxu0 %v14622_v20  ;;  %v14672_v20 = vld [vmem:[%s15714_s23 + $0x618] sm:$0xff]  }
  0xc1   : > { %13192 = vmatpush3.bf16.msra.mxu1 %v14623_v21  ;;  %13199 = vmatprep.subr.bf16.mxu0 %v14625_v24  ;;  %v14673_v21 = vld [vmem:[%s15714_s23 + $0x698] sm:$0xff]   ;;  %v14676_v24 = vld [vmem:[%s15714_s23 + $0x620] sm:$0xff]  }
  0xc2   : > { %13221 = vmatprep.subr.bf16.mxu1 %v14626_v26  ;;  %v14678_v26 = vld [vmem:[%s15714_s23 + $0x668] sm:$0xff]  }
  0xc3   : > { %9622 = vmatmul.mubr.bf16.vlgmr.msra.gmra.mrb[16].mxu0 %v965_v28  ;;  %v14680_v28 = vld [vmem:[%s15714_s23 + $0x628] sm:$0xff]  }
  0xc4   : > { %9662 = vmatmul.mubr.bf16.vlgmr.msra.gmra.mrb[16].mxu1 %v967_v29  ;;  %13200 = vmatpush3.bf16.msra.mxu0 %v14627_v27  ;;  %v14679_v27 = vld [vmem:[%s15714_s23 + $0x6e8] sm:$0xff]  }
  0xc5   : > { %13222 = vmatpush3.bf16.msra.mxu1 %v14628_v30  ;;  %13201 = vmatprep.subr.bf16.mxu0 %v14629_v31  ;;  %v14681_v29 = vld [vmem:[%s15714_s23 + $0x6a8] sm:$0xff]   ;;  %v14682_v30 = vld [vmem:[%s15714_s23 + $0x670] sm:$0xff]  }
  0xc6   : > { %13223 = vmatprep.subr.bf16.mxu1 %v14630_v32  ;;  %9701 = vmatprep.mubr.bf16.mxu0 %v970_v1  ;;  %v14683_v31 = vld [vmem:[%s15714_s23 + $0x6f0] sm:$0xff]   ;;  %v14707_v1 = vld [vmem:[%s15714_s23 + $0x760] sm:$0xff]  }
  0xc7   : > { %9741 = vmatprep.mubr.bf16.mxu1 %v972_v4  ;;  %v14684_v32 = vld [vmem:[%s15714_s23 + $0x630] sm:$0xff]   ;;  %v14710_v4 = vld [vmem:[%s15714_s23 + $0x7a0] sm:$0xff]  }
  0xc8   : > { %13202 = vmatpush3.bf16.msra.mxu0 %v14631_v33  ;;  %v14685_v33 = vld [vmem:[%s15714_s23 + $0x6b0] sm:$0xff]  }
  0xc9   : > { %13224 = vmatpush3.bf16.msra.mxu1 %v14632_v34  ;;  %13203 = vmatprep.subr.bf16.mxu0 %v14633_v35  ;;  %v219_v34 = vld [vmem:[%s15709_s7 + $0x30] sm:$0xff]  ;;  %v14686_v35 = vld [vmem:[%s15714_s23 + $0x678] sm:$0xff]  }
  0xca   : > { %13225 = vmatprep.subr.bf16.mxu1 %v14634_v36  ;;  %v386_v36 = vrot.slane %v219_v34, %v15753_v42 }
  0xcc   : > { %13204 = vmatpush3.bf16.msra.mxu0 %v14635_v37  ;;  %v379_v37 = vcombine.high %v219_v34, %v219_v34  ;;  %v14724_v34 = vld [vmem:[%s15714_s23 + $0x840] sm:$0xff]  }
  0xcd   : > { %13226 = vmatpush3.bf16.msra.mxu1 %v14636_v38  ;;  %13205 = vmatprep.subr.bf16.mxu0 %v14637_v39  ;;  %v14687_v38 = vld [vmem:[%s15714_s23 + $0x6f8] sm:$0xff]  }
  0xce   : > { %13227 = vmatprep.subr.bf16.mxu1 %v14638_v40  ;;  %v14688_v39 = vld [vmem:[%s15714_s23 + $0x638] sm:$0xff]   ;;  %v394_v40 = vcombine.high %v386_v36, %v386_v36 }
  0xd0   : > { %13206 = vmatpush3.bf16.msra.mxu0 %v14639_v41  ;;  %v393_v41 = vrot.slane %v379_v37, %v15753_v42  ;;  %v14726_v37 = vld [vmem:[%s15714_s23 + $0x800] sm:$0xff]  }
  0xd1   : > { %13228 = vmatpush3.bf16.msra.mxu1 %v14640_v43  ;;  %13207 = vmatprep.subr.bf16.mxu0 %v14641_v44  ;;  %v14689_v43 = vld [vmem:[%s15714_s23 + $0x6b8] sm:$0xff]   ;;  %v974_v44 = vpack.c.bf16 %v394_v40, %v394_v40 }
  0xd2   : > { %13229 = vmatprep.subr.bf16.mxu1 %v14642_v45  ;;  %v395_v45 = vcombine.high %v393_v41, %v393_v41 }
  0xd4   : > { %13208 = vmatpush3.bf16.msra.mxu0 %v14643_v46  ;;  %v14691_v46 = vld [vmem:[%s15714_s23 + $0x740] sm:$0xff]  }
  0xd5   : > { %13230 = vmatpush3.bf16.msra.mxu1 %v14644_v47  ;;  %13209 = vmatprep.subr.bf16.mxu0 %v14645_v48  ;;  %v14692_v47 = vld [vmem:[%s15714_s23 + $0x7c0] sm:$0xff]   ;;  %v976_v48 = vpack.c.bf16 %v395_v45, %v395_v45  ;;  %v14730_v45 = vld [vmem:[%s15714_s23 + $0x808] sm:$0xff]  }
  0xd6   : > { %13231 = vmatprep.subr.bf16.mxu1 %v14646_v49  ;;  %v14693_v49 = vld [vmem:[%s15714_s23 + $0x700] sm:$0xff]  }
  0xd8   : > { %13210 = vmatpush3.bf16.msra.mxu0 %v14647_v50  ;;  %v973_v50 = vpack.c.bf16 %v386_v36, %v386_v36  ;;  %v14725_v36 = vld [vmem:[%s15714_s23 + $0x8c0] sm:$0xff]  }
  0xd9   : > { %13232 = vmatpush3.bf16.msra.mxu1 %v14648_v51  ;;  %13211 = vmatprep.subr.bf16.mxu0 %v14649_v52  ;;  %v975_v51 = vpack.c.bf16 %v393_v41, %v393_v41  ;;  %v14694_v52 = vld [vmem:[%s15714_s23 + $0x780] sm:$0xff]  }
  0xda   : > { %13233 = vmatprep.subr.bf16.mxu1 %v14650_v53  ;;  %v14695_v53 = vld [vmem:[%s15714_s23 + $0x748] sm:$0xff]   ;;  %v14727_v41 = vld [vmem:[%s15714_s23 + $0x880] sm:$0xff]  }
  0xdc   : > { %13212 = vmatpush3.bf16.msra.mxu0 %v14651_v54  ;;  %v14696_v54 = vld [vmem:[%s15714_s23 + $0x7c8] sm:$0xff]  }
  0xdd   : > { %13234 = vmatpush3.bf16.msra.mxu1 %v14652_v56  ;;  %13213 = vmatprep.subr.bf16.mxu0 %v14653_v59  ;;  %v14698_v56 = vld [vmem:[%s15714_s23 + $0x788] sm:$0xff]   ;;  %v14701_v59 = vld [vmem:[%s15714_s23 + $0x710] sm:$0xff]  }
  0xde   : > { %13235 = vmatprep.subr.bf16.mxu1 %v14654_v60  ;;  %v14702_v60 = vld [vmem:[%s15714_s23 + $0x790] sm:$0xff]  }
  0xe0   : > { %13214 = vmatpush3.bf16.msra.mxu0 %v14655_v63  ;;  %v14705_v63 = vld [vmem:[%s15714_s23 + $0x718] sm:$0xff]  }
  0xe1   : > { %13236 = vmatpush3.bf16.msra.mxu1 %v14656_v0  ;;  %13243 = vmatprep.subr.bf16.mxu0 %v14658_v3  ;;  %v14706_v0 = vld [vmem:[%s15714_s23 + $0x798] sm:$0xff]   ;;  %v14709_v3 = vld [vmem:[%s15714_s23 + $0x720] sm:$0xff]  }
  0xe2   : > { %13265 = vmatprep.subr.bf16.mxu1 %v14659_v5  ;;  %v14711_v5 = vld [vmem:[%s15714_s23 + $0x768] sm:$0xff]  }
  0xe3   : > { %9702 = vmatmul.mubr.bf16.vlgmr.msra.gmra.mrb[20].mxu0 %v969_v7  ;;  %v14713_v7 = vld [vmem:[%s15714_s23 + $0x728] sm:$0xff]  }
  0xe4   : > { %9742 = vmatmul.mubr.bf16.vlgmr.msra.gmra.mrb[20].mxu1 %v971_v8  ;;  %13244 = vmatpush3.bf16.msra.mxu0 %v14660_v6  ;;  %v14712_v6 = vld [vmem:[%s15714_s23 + $0x7e8] sm:$0xff]  }
  0xe5   : > { %13266 = vmatpush3.bf16.msra.mxu1 %v14661_v9  ;;  %13245 = vmatprep.subr.bf16.mxu0 %v14662_v10  ;;  %v14714_v8 = vld [vmem:[%s15714_s23 + $0x7a8] sm:$0xff]   ;;  %v14715_v9 = vld [vmem:[%s15714_s23 + $0x770] sm:$0xff]  }
  0xe6   : > { %13267 = vmatprep.subr.bf16.mxu1 %v14663_v11  ;;  %9781 = vmatprep.mubr.bf16.mxu0 %v974_v44  ;;  %v14716_v10 = vld [vmem:[%s15714_s23 + $0x7f0] sm:$0xff]   ;;  %v14729_v44 = vld [vmem:[%s15714_s23 + $0x8c8] sm:$0xff]  }
  0xe7   : > { %9821 = vmatprep.mubr.bf16.mxu1 %v976_v48  ;;  %v14733_v48 = vld [vmem:[%s15714_s23 + $0x8d0] sm:$0xff]  }
  0xe8   : > { %13246 = vmatpush3.bf16.msra.mxu0 %v14664_v12 }
  0xe9   : > { %13268 = vmatpush3.bf16.msra.mxu1 %v14665_v13  ;;  %13247 = vmatprep.subr.bf16.mxu0 %v14666_v14  ;;  %v14717_v13 = vld [vmem:[%s15714_s23 + $0x730] sm:$0xff]  }
  0xea   : > { %13269 = vmatprep.subr.bf16.mxu1 %v14667_v15  ;;  %v14718_v14 = vld [vmem:[%s15714_s23 + $0x7b0] sm:$0xff]  }
  0xec   : > { %13248 = vmatpush3.bf16.msra.mxu0 %v14668_v16 }
  0xed   : > { %13270 = vmatpush3.bf16.msra.mxu1 %v14669_v17  ;;  %13249 = vmatprep.subr.bf16.mxu0 %v14670_v18  ;;  %v14719_v17 = vld [vmem:[%s15714_s23 + $0x778] sm:$0xff]  }
  0xee   : > { %13271 = vmatprep.subr.bf16.mxu1 %v14671_v19  ;;  %v14720_v18 = vld [vmem:[%s15714_s23 + $0x7f8] sm:$0xff]  }
  0xef   : > { %v220_v19 = vld [vmem:[%s15709_s7 + $0x38] sm:$0xff] }
  0xf0   : > { %13250 = vmatpush3.bf16.msra.mxu0 %v14672_v20 }
  0xf1   : > { %13272 = vmatpush3.bf16.msra.mxu1 %v14673_v21  ;;  %13251 = vmatprep.subr.bf16.mxu0 %v14674_v22 }
  0xf2   : > { %13273 = vmatprep.subr.bf16.mxu1 %v14675_v23 }
  0xf4   : > { %13252 = vmatpush3.bf16.msra.mxu0 %v14676_v24  ;;  %v403_v24 = vrot.slane %v220_v19, %v15753_v42 }
  0xf5   : > { %13274 = vmatpush3.bf16.msra.mxu1 %v14677_v25  ;;  %13253 = vmatprep.subr.bf16.mxu0 %v14678_v26 }
  0xf6   : > { %13275 = vmatprep.subr.bf16.mxu1 %v14679_v27  ;;  %v396_v27 = vcombine.high %v220_v19, %v220_v19  ;;  %v14754_v19 = vld [vmem:[%s15714_s23 + $0x838] sm:$0xff]  }
  0xf8   : > { %13254 = vmatpush3.bf16.msra.mxu0 %v14680_v28 }
  0xf9   : > { %13276 = vmatpush3.bf16.msra.mxu1 %v14681_v29  ;;  %13255 = vmatprep.subr.bf16.mxu0 %v14682_v30  ;;  %v14721_v29 = vld [vmem:[%s15714_s23 + $0x738] sm:$0xff]   ;;  %v411_v30 = vcombine.high %v403_v24, %v403_v24 }
  0xfa   : > { %13277 = vmatprep.subr.bf16.mxu1 %v14683_v31  ;;  %v14722_v31 = vld [vmem:[%s15714_s23 + $0x7b8] sm:$0xff]  }
  0xfc   : > { %13256 = vmatpush3.bf16.msra.mxu0 %v14684_v32  ;;  %v410_v32 = vrot.slane %v396_v27, %v15753_v42  ;;  %v14758_v27 = vld [vmem:[%s15714_s23 + $0x9c0] sm:$0xff]  }
  0xfd   : > { %13278 = vmatpush3.bf16.msra.mxu1 %v14685_v33  ;;  %13257 = vmatprep.subr.bf16.mxu0 %v14686_v35  ;;  %v978_v33 = vpack.c.bf16 %v411_v30, %v411_v30 }
  0xfe   : > { %13279 = vmatprep.subr.bf16.mxu1 %v14687_v38  ;;  %v412_v35 = vcombine.high %v410_v32, %v410_v32  ;;  %v979_v40 = vpack.c.bf16 %v410_v32, %v410_v32  ;;  %v14760_v32 = vld [vmem:[%s15714_s23 + $0x980] sm:$0xff]  }
 0x100   : > { %13258 = vmatpush3.bf16.msra.mxu0 %v14688_v39  ;;  %v980_v38 = vpack.c.bf16 %v412_v35, %v412_v35  ;;  %v977_v39 = vpack.c.bf16 %v403_v24, %v403_v24  ;;  %v14757_v24 = vld [vmem:[%s15714_s23 + $0x940] sm:$0xff]   ;;  %v14763_v35 = vld [vmem:[%s15714_s23 + $0x908] sm:$0xff]  }
 0x101   : > { %13280 = vmatpush3.bf16.msra.mxu1 %v14689_v43  ;;  %13287 = vmatprep.subr.bf16.mxu0 %v14691_v46  ;;  %v14728_v43 = vld [vmem:[%s15714_s23 + $0x848] sm:$0xff]  }
 0x102   : > { %13309 = vmatprep.subr.bf16.mxu1 %v14692_v47  ;;  %v14731_v46 = vld [vmem:[%s15714_s23 + $0x888] sm:$0xff]   ;;  %v14732_v47 = vld [vmem:[%s15714_s23 + $0x850] sm:$0xff]  }
 0x103   : > { %9782 = vmatmul.mubr.bf16.vlgmr.msra.gmra.mrb[24].mxu0 %v973_v50  ;;  %v14735_v50 = vld [vmem:[%s15714_s23 + $0x890] sm:$0xff]  }
 0x104   : > { %9822 = vmatmul.mubr.bf16.vlgmr.msra.gmra.mrb[24].mxu1 %v975_v51  ;;  %13288 = vmatpush3.bf16.msra.mxu0 %v14693_v49  ;;  %v14734_v49 = vld [vmem:[%s15714_s23 + $0x810] sm:$0xff]   ;;  %v14736_v51 = vld [vmem:[%s15714_s23 + $0x858] sm:$0xff]  }
 0x105   : > { %13310 = vmatpush3.bf16.msra.mxu1 %v14694_v52  ;;  %13289 = vmatprep.subr.bf16.mxu0 %v14695_v53  ;;  %v14737_v52 = vld [vmem:[%s15714_s23 + $0x8d8] sm:$0xff]  }
 0x106   : > { %13311 = vmatprep.subr.bf16.mxu1 %v14696_v54  ;;  %9861 = vmatprep.mubr.bf16.mxu0 %v978_v33  ;;  %v14738_v53 = vld [vmem:[%s15714_s23 + $0x818] sm:$0xff]   ;;  %v14761_v33 = vld [vmem:[%s15714_s23 + $0x948] sm:$0xff]  }
 0x107   : > { %9901 = vmatprep.mubr.bf16.mxu1 %v980_v38  ;;  %v14739_v54 = vld [vmem:[%s15714_s23 + $0x898] sm:$0xff]   ;;  %v14766_v38 = vld [vmem:[%s15714_s23 + $0x9d0] sm:$0xff]  }
 0x108   : > { %13290 = vmatpush3.bf16.msra.mxu0 %v14697_v55  ;;  %v14740_v55 = vld [vmem:[%s15714_s23 + $0x860] sm:$0xff]  }
 0x109   : > { %13312 = vmatpush3.bf16.msra.mxu1 %v14698_v56  ;;  %13291 = vmatprep.subr.bf16.mxu0 %v14699_v57  ;;  %v14741_v56 = vld [vmem:[%s15714_s23 + $0x8e0] sm:$0xff]  }
 0x10a   : > { %13313 = vmatprep.subr.bf16.mxu1 %v14700_v58  ;;  %v14742_v57 = vld [vmem:[%s15714_s23 + $0x820] sm:$0xff]  }
 0x10b   : > { %v14743_v58 = vld [vmem:[%s15714_s23 + $0x8a0] sm:$0xff]  }
 0x10c   : > { %13292 = vmatpush3.bf16.msra.mxu0 %v14701_v59  ;;  %v14744_v59 = vld [vmem:[%s15714_s23 + $0x868] sm:$0xff]  }
 0x10d   : > { %13314 = vmatpush3.bf16.msra.mxu1 %v14702_v60  ;;  %13293 = vmatprep.subr.bf16.mxu0 %v14703_v61  ;;  %v14745_v60 = vld [vmem:[%s15714_s23 + $0x8e8] sm:$0xff]  }
 0x10e   : > { %13315 = vmatprep.subr.bf16.mxu1 %v14704_v62  ;;  %v14746_v61 = vld [vmem:[%s15714_s23 + $0x828] sm:$0xff]  }
 0x10f   : > { %v14747_v62 = vld [vmem:[%s15714_s23 + $0x8a8] sm:$0xff]  }
 0x110   : > { %13294 = vmatpush3.bf16.msra.mxu0 %v14705_v63  ;;  %v14748_v63 = vld [vmem:[%s15714_s23 + $0x870] sm:$0xff]  }
 0x111   : > { %13316 = vmatpush3.bf16.msra.mxu1 %v14706_v0  ;;  %13295 = vmatprep.subr.bf16.mxu0 %v14707_v1  ;;  %v14749_v0 = vld [vmem:[%s15714_s23 + $0x8f0] sm:$0xff]  }
 0x112   : > { %13317 = vmatprep.subr.bf16.mxu1 %v14708_v2 }
 0x114   : > { %13296 = vmatpush3.bf16.msra.mxu0 %v14709_v3  ;;  %v14750_v3 = vld [vmem:[%s15714_s23 + $0x830] sm:$0xff]  }
 0x115   : > { %13318 = vmatpush3.bf16.msra.mxu1 %v14710_v4  ;;  %13297 = vmatprep.subr.bf16.mxu0 %v14711_v5  ;;  %v14751_v4 = vld [vmem:[%s15714_s23 + $0x8b0] sm:$0xff]  }
 0x116   : > { %13319 = vmatprep.subr.bf16.mxu1 %v14712_v6  ;;  %v12995_v11 = vpop.f32.mrb[0].mxu0 }
 0x117   : > { %v13017_v12 = vpop.f32.mrb[0].mxu1  ;;  %v12996_v15 = vpop.f32.mrb[1].mxu0 }
 0x118   : > { %v13018_v16 = vpop.f32.mrb[1].mxu1  ;;  %v12997_v20 = vadd.f32 %v12996_v15, %v12995_v11  ;;  %v12998_v22 = vpop.f32.mrb[2].mxu0  ;;  %13298 = vmatpush3.bf16.msra.mxu0 %v14713_v7  ;;  %v14752_v7 = vld [vmem:[%s15714_s23 + $0x878] sm:$0xff]  }
 0x119   : > { %v13019_v21 = vadd.f32 %v13018_v16, %v13017_v12  ;;  %v13020_v23 = vpop.f32.mrb[2].mxu1  ;;  %13320 = vmatpush3.bf16.msra.mxu1 %v14714_v8  ;;  %v12999_v25 = vpop.f32.mrb[3].mxu0  ;;  %13299 = vmatprep.subr.bf16.mxu0 %v14715_v9  ;;  %v14753_v12 = vld [vmem:[%s15714_s23 + $0x8f8] sm:$0xff]  }
 0x11a   : > { %v13021_v26 = vpop.f32.mrb[3].mxu1  ;;  %13321 = vmatprep.subr.bf16.mxu1 %v14716_v10 }
 0x11b   : > { %v15997_v28 = vadd.f32 %v13019_v21, %v12997_v20  ;;  %v14755_v20 = vld [vmem:[%s15714_s23 + $0x8b8] sm:$0xff]  }
 0x11c   : > { %13300 = vmatpush3.bf16.msra.mxu0 %v14717_v13  ;;  %v221_v13 = vld [vmem:[%s15709_s7 + $0x40] sm:$0xff] }
 0x11d   : > { %13322 = vmatpush3.bf16.msra.mxu1 %v14718_v14  ;;  %13301 = vmatprep.subr.bf16.mxu0 %v14719_v17  ;;  %v420_v16 = vrot.slane %v221_v13, %v15753_v42  ;;  %v413_v17 = vcombine.high %v221_v13, %v221_v13 }
 0x11e   : > { %13323 = vmatprep.subr.bf16.mxu1 %v14720_v18 }
 0x11f   : > { %v428_v21 = vcombine.high %v420_v16, %v420_v16  ;;  %v427_v22 = vrot.slane %v413_v17, %v15753_v42  ;;  %v981_v30 = vpack.c.bf16 %v420_v16, %v420_v16  ;;  %v14791_v16 = vld [vmem:[%s15714_s23 + $0xac0] sm:$0xff]  }
 0x120   : > { %13302 = vmatpush3.bf16.msra.mxu0 %v14721_v29 }
 0x121   : > { %13324 = vmatpush3.bf16.msra.mxu1 %v14722_v31  ;;  %13331 = vmatprep.subr.bf16.mxu0 %v14724_v34  ;;  %v982_v25 = vpack.c.bf16 %v428_v21, %v428_v21  ;;  %v429_v26 = vcombine.high %v427_v22, %v427_v22  ;;  %v983_v31 = vpack.c.bf16 %v427_v22, %v427_v22  ;;  %v14762_v34 = vld [vmem:[%s15714_s23 + $0x9c8] sm:$0xff]   ;;  %v14793_v22 = vld [vmem:[%s15714_s23 + $0xa80] sm:$0xff]  }
 0x122   : > { %13353 = vmatprep.subr.bf16.mxu1 %v14725_v36  ;;  %v14764_v36 = vld [vmem:[%s15714_s23 + $0x988] sm:$0xff]  }
 0x123   : > { %9862 = vmatmul.mubr.bf16.vlgmr.msra.gmra.mrb[28].mxu0 %v977_v39  ;;  %v984_v29 = vpack.c.bf16 %v429_v26, %v429_v26  ;;  %v14767_v39 = vld [vmem:[%s15714_s23 + $0x910] sm:$0xff]   ;;  %v14796_v26 = vld [vmem:[%s15714_s23 + $0xa08] sm:$0xff]  }
 0x124   : > { %9902 = vmatmul.mubr.bf16.vlgmr.msra.gmra.mrb[28].mxu1 %v979_v40  ;;  %13332 = vmatpush3.bf16.msra.mxu0 %v14726_v37  ;;  %v14765_v37 = vld [vmem:[%s15714_s23 + $0x950] sm:$0xff]  }
 0x125   : > { %13354 = vmatpush3.bf16.msra.mxu1 %v14727_v41  ;;  %13333 = vmatprep.subr.bf16.mxu0 %v14728_v43  ;;  %v14768_v40 = vld [vmem:[%s15714_s23 + $0x990] sm:$0xff]   ;;  %v14769_v41 = vld [vmem:[%s15714_s23 + $0x958] sm:$0xff]  }
 0x126   : > { %13355 = vmatprep.subr.bf16.mxu1 %v14729_v44  ;;  %9941 = vmatprep.mubr.bf16.mxu0 %v982_v25  ;;  %v14770_v43 = vld [vmem:[%s15714_s23 + $0x9d8] sm:$0xff]   ;;  %v14795_v25 = vld [vmem:[%s15714_s23 + $0xac8] sm:$0xff]  }
 0x127   : > { %9981 = vmatprep.mubr.bf16.mxu1 %v984_v29  ;;  %v14771_v44 = vld [vmem:[%s15714_s23 + $0x918] sm:$0xff]   ;;  %v14799_v29 = vld [vmem:[%s15714_s23 + $0xad0] sm:$0xff]  }
 0x128   : > { %13334 = vmatpush3.bf16.msra.mxu0 %v14730_v45  ;;  %v14772_v45 = vld [vmem:[%s15714_s23 + $0x998] sm:$0xff]  }
 0x129   : > { %13356 = vmatpush3.bf16.msra.mxu1 %v14731_v46  ;;  %13335 = vmatprep.subr.bf16.mxu0 %v14732_v47  ;;  %v14773_v46 = vld [vmem:[%s15714_s23 + $0x960] sm:$0xff]  }
 0x12a   : > { %13357 = vmatprep.subr.bf16.mxu1 %v14733_v48  ;;  %v14774_v47 = vld [vmem:[%s15714_s23 + $0x9e0] sm:$0xff]  }
 0x12b   : > { %v14775_v48 = vld [vmem:[%s15714_s23 + $0x920] sm:$0xff]  }
 0x12c   : > { %13336 = vmatpush3.bf16.msra.mxu0 %v14734_v49  ;;  %v14776_v49 = vld [vmem:[%s15714_s23 + $0x9a0] sm:$0xff]  }
 0x12d   : > { %13358 = vmatpush3.bf16.msra.mxu1 %v14735_v50  ;;  %13337 = vmatprep.subr.bf16.mxu0 %v14736_v51  ;;  %v14777_v50 = vld [vmem:[%s15714_s23 + $0x968] sm:$0xff]  }
 0x12e   : > { %13359 = vmatprep.subr.bf16.mxu1 %v14737_v52  ;;  %v14778_v51 = vld [vmem:[%s15714_s23 + $0x9e8] sm:$0xff]  }
 0x12f   : > { %v14779_v52 = vld [vmem:[%s15714_s23 + $0x928] sm:$0xff]  }
 0x130   : > { %13338 = vmatpush3.bf16.msra.mxu0 %v14738_v53  ;;  %v14780_v53 = vld [vmem:[%s15714_s23 + $0x9a8] sm:$0xff]  }
 0x131   : > { %13360 = vmatpush3.bf16.msra.mxu1 %v14739_v54  ;;  %13339 = vmatprep.subr.bf16.mxu0 %v14740_v55  ;;  %v14781_v54 = vld [vmem:[%s15714_s23 + $0x970] sm:$0xff]  }
 0x132   : > { %13361 = vmatprep.subr.bf16.mxu1 %v14741_v56  ;;  %v14782_v55 = vld [vmem:[%s15714_s23 + $0x9f0] sm:$0xff]  }
 0x134   : > { %13340 = vmatpush3.bf16.msra.mxu0 %v14742_v57 }
 0x135   : > { %13362 = vmatpush3.bf16.msra.mxu1 %v14743_v58  ;;  %13341 = vmatprep.subr.bf16.mxu0 %v14744_v59  ;;  %v14783_v58 = vld [vmem:[%s15714_s23 + $0x930] sm:$0xff]  }
 0x136   : > { %13363 = vmatprep.subr.bf16.mxu1 %v14745_v60  ;;  %v13039_v1 = vpop.f32.mrb[4].mxu0  ;;  %v14784_v59 = vld [vmem:[%s15714_s23 + $0x9b0] sm:$0xff]  }
 0x137   : > { %v13061_v2 = vpop.f32.mrb[4].mxu1  ;;  %v13040_v5 = vpop.f32.mrb[5].mxu0 }
 0x138   : > { %v13062_v6 = vpop.f32.mrb[5].mxu1  ;;  %v13041_v8 = vadd.f32 %v13040_v5, %v13039_v1  ;;  %v13042_v10 = vpop.f32.mrb[6].mxu0  ;;  %13342 = vmatpush3.bf16.msra.mxu0 %v14746_v61 }
 0x139   : > { %v13063_v9 = vadd.f32 %v13062_v6, %v13061_v2  ;;  %v13064_v11 = vpop.f32.mrb[6].mxu1  ;;  %13364 = vmatpush3.bf16.msra.mxu1 %v14747_v62  ;;  %v13043_v14 = vpop.f32.mrb[7].mxu0  ;;  %13343 = vmatprep.subr.bf16.mxu0 %v14748_v63  ;;  %v14785_v2 = vld [vmem:[%s15714_s23 + $0x978] sm:$0xff]  }
 0x13a   : > { %v13065_v15 = vpop.f32.mrb[7].mxu1  ;;  %13365 = vmatprep.subr.bf16.mxu1 %v14749_v0  ;;  %v9384_v18 = vadd.f32 %v13041_v8, %v15997_v28  ;;  %v14759_v28 = vld [vmem:[%s15714_s23 + $0x900] sm:$0xff]   ;;  %v14787_v8 = vld [vmem:[%s15714_s23 + $0x938] sm:$0xff]  }
 0x13b   : > { %v14790_v15 = vld [vmem:[%s15714_s23 + $0xa40] sm:$0xff]  }
 0x13c   : > { %v16038_v23 = vadd.f32 %v13063_v9, %v9384_v18  ;;  %13344 = vmatpush3.bf16.msra.mxu0 %v14750_v3  ;;  %v14786_v3 = vld [vmem:[%s15714_s23 + $0x9f8] sm:$0xff]  }
 0x13d   : > { %13366 = vmatpush3.bf16.msra.mxu1 %v14751_v4  ;;  %13345 = vmatprep.subr.bf16.mxu0 %v14752_v7  ;;  %v222_v7 = vld [vmem:[%s15709_s7 + $0x48] sm:$0xff] }
 0x13e   : > { %13367 = vmatprep.subr.bf16.mxu1 %v14753_v12  ;;  %v437_v9 = vrot.slane %v222_v7, %v15753_v42  ;;  %v430_v10 = vcombine.high %v222_v7, %v222_v7  ;;  %v14788_v12 = vld [vmem:[%s15714_s23 + $0x9b8] sm:$0xff]   ;;  %v14824_v7 = vld [vmem:[%s15714_s23 + $0xbc0] sm:$0xff]  }
 0x140   : > { %13346 = vmatpush3.bf16.msra.mxu0 %v14754_v19  ;;  %v445_v13 = vcombine.high %v437_v9, %v437_v9  ;;  %v444_v14 = vrot.slane %v430_v10, %v15753_v42  ;;  %v985_v19 = vpack.c.bf16 %v437_v9, %v437_v9  ;;  %v14825_v9 = vld [vmem:[%s15714_s23 + $0xb00] sm:$0xff]  }
 0x141   : > { %13368 = vmatpush3.bf16.msra.mxu1 %v14755_v20  ;;  %13375 = vmatprep.subr.bf16.mxu0 %v14757_v24  ;;  %v14792_v20 = vld [vmem:[%s15714_s23 + $0xa00] sm:$0xff]   ;;  %v14794_v24 = vld [vmem:[%s15714_s23 + $0xa48] sm:$0xff]  }
 0x142   : > { %13397 = vmatprep.subr.bf16.mxu1 %v14758_v27  ;;  %v986_v17 = vpack.c.bf16 %v445_v13, %v445_v13  ;;  %v446_v18 = vcombine.high %v444_v14, %v444_v14  ;;  %v987_v21 = vpack.c.bf16 %v444_v14, %v444_v14  ;;  %v14797_v27 = vld [vmem:[%s15714_s23 + $0xa88] sm:$0xff]  }
 0x143   : > { %9942 = vmatmul.mubr.bf16.vlgmr.msra.gmra.mrb[32].mxu0 %v981_v30  ;;  %v14800_v30 = vld [vmem:[%s15714_s23 + $0xa10] sm:$0xff]   ;;  %v14827_v14 = vld [vmem:[%s15714_s23 + $0xb48] sm:$0xff]  }
 0x144   : > { %9982 = vmatmul.mubr.bf16.vlgmr.msra.gmra.mrb[32].mxu1 %v983_v31  ;;  %13376 = vmatpush3.bf16.msra.mxu0 %v14759_v28  ;;  %v14798_v28 = vld [vmem:[%s15714_s23 + $0xa50] sm:$0xff]  }
 0x145   : > { %13398 = vmatpush3.bf16.msra.mxu1 %v14760_v32  ;;  %13377 = vmatprep.subr.bf16.mxu0 %v14761_v33  ;;  %v14801_v31 = vld [vmem:[%s15714_s23 + $0xa90] sm:$0xff]   ;;  %v14802_v32 = vld [vmem:[%s15714_s23 + $0xa58] sm:$0xff]  }
 0x146   : > { %13399 = vmatprep.subr.bf16.mxu1 %v14762_v34  ;;  %10021 = vmatprep.mubr.bf16.mxu0 %v986_v17  ;;  %v14803_v33 = vld [vmem:[%s15714_s23 + $0xad8] sm:$0xff]   ;;  %v14829_v17 = vld [vmem:[%s15714_s23 + $0xb08] sm:$0xff]  }
 0x147   : > { %v14804_v34 = vld [vmem:[%s15714_s23 + $0xa18] sm:$0xff]  }
 0x148   : > { %13378 = vmatpush3.bf16.msra.mxu0 %v14763_v35  ;;  %v14805_v35 = vld [vmem:[%s15714_s23 + $0xa98] sm:$0xff]  }
 0x149   : > { %13400 = vmatpush3.bf16.msra.mxu1 %v14764_v36  ;;  %13379 = vmatprep.subr.bf16.mxu0 %v14765_v37  ;;  %v14806_v36 = vld [vmem:[%s15714_s23 + $0xa60] sm:$0xff]  }
 0x14a   : > { %13401 = vmatprep.subr.bf16.mxu1 %v14766_v38  ;;  %v14807_v37 = vld [vmem:[%s15714_s23 + $0xae0] sm:$0xff]  }
 0x14b   : > { %v14808_v38 = vld [vmem:[%s15714_s23 + $0xa20] sm:$0xff]  }
 0x14c   : > { %13380 = vmatpush3.bf16.msra.mxu0 %v14767_v39  ;;  %v14809_v39 = vld [vmem:[%s15714_s23 + $0xaa0] sm:$0xff]  }
 0x14d   : > { %13402 = vmatpush3.bf16.msra.mxu1 %v14768_v40  ;;  %13381 = vmatprep.subr.bf16.mxu0 %v14769_v41  ;;  %v14810_v40 = vld [vmem:[%s15714_s23 + $0xa68] sm:$0xff]  }
 0x14e   : > { %13403 = vmatprep.subr.bf16.mxu1 %v14770_v43  ;;  %v14811_v41 = vld [vmem:[%s15714_s23 + $0xae8] sm:$0xff]  }
 0x14f   : > { %v14812_v43 = vld [vmem:[%s15714_s23 + $0xa28] sm:$0xff]  }
 0x150   : > { %13382 = vmatpush3.bf16.msra.mxu0 %v14771_v44  ;;  %v14813_v44 = vld [vmem:[%s15714_s23 + $0xaa8] sm:$0xff]  }
 0x151   : > { %13404 = vmatpush3.bf16.msra.mxu1 %v14772_v45  ;;  %13383 = vmatprep.subr.bf16.mxu0 %v14773_v46  ;;  %v14814_v45 = vld [vmem:[%s15714_s23 + $0xa70] sm:$0xff]  }
 0x152   : > { %13405 = vmatprep.subr.bf16.mxu1 %v14774_v47 }
 0x154   : > { %13384 = vmatpush3.bf16.msra.mxu0 %v14775_v48  ;;  %v14815_v48 = vld [vmem:[%s15714_s23 + $0xaf0] sm:$0xff]  }
 0x155   : > { %13406 = vmatpush3.bf16.msra.mxu1 %v14776_v49  ;;  %13385 = vmatprep.subr.bf16.mxu0 %v14777_v50  ;;  %v14816_v49 = vld [vmem:[%s15714_s23 + $0xa30] sm:$0xff]  }
 0x156   : > { %13407 = vmatprep.subr.bf16.mxu1 %v14778_v51  ;;  %v13083_v56 = vpop.f32.mrb[8].mxu0 }
 0x157   : > { %v13105_v57 = vpop.f32.mrb[8].mxu1  ;;  %v13084_v60 = vpop.f32.mrb[9].mxu0 }
 0x158   : > { %v13106_v61 = vpop.f32.mrb[9].mxu1  ;;  %v13085_v62 = vadd.f32 %v13084_v60, %v13083_v56  ;;  %v13086_v0 = vpop.f32.mrb[10].mxu0  ;;  %13386 = vmatpush3.bf16.msra.mxu0 %v14779_v52  ;;  %v14817_v52 = vld [vmem:[%s15714_s23 + $0xab0] sm:$0xff]  }
 0x159   : > { %v13107_v63 = vadd.f32 %v13106_v61, %v13105_v57  ;;  %v13108_v1 = vpop.f32.mrb[10].mxu1  ;;  %13408 = vmatpush3.bf16.msra.mxu1 %v14780_v53  ;;  %v13087_v4 = vpop.f32.mrb[11].mxu0  ;;  %13387 = vmatprep.subr.bf16.mxu0 %v14781_v54  ;;  %v14818_v57 = vld [vmem:[%s15714_s23 + $0xa78] sm:$0xff]  }
 0x15a   : > { %v13109_v5 = vpop.f32.mrb[11].mxu1  ;;  %13409 = vmatprep.subr.bf16.mxu1 %v14782_v55  ;;  %v9464_v6 = vadd.f32 %v13085_v62, %v16038_v23  ;;  %v988_v23 = vpack.c.bf16 %v446_v18, %v446_v18  ;;  %v14820_v62 = vld [vmem:[%s15714_s23 + $0xa38] sm:$0xff]   ;;  %v14823_v4 = vld [vmem:[%s15714_s23 + $0xb40] sm:$0xff]   ;;  %v14830_v18 = vld [vmem:[%s15714_s23 + $0xb88] sm:$0xff]  }
 0x15b   : > { %v14821_v1 = vld [vmem:[%s15714_s23 + $0xab8] sm:$0xff]  }
 0x15c   : > { %v16074_v11 = vadd.f32 %v13107_v63, %v9464_v6  ;;  %13388 = vmatpush3.bf16.msra.mxu0 %v14783_v58  ;;  %10061 = vmatprep.mubr.bf16.mxu1 %v988_v23  ;;  %v14819_v58 = vld [vmem:[%s15714_s23 + $0xaf8] sm:$0xff]   ;;  %v223_v63 = vld [vmem:[%s15709_s7 + $0x50] sm:$0xff] }
 0x15d   : > { %13410 = vmatpush3.bf16.msra.mxu1 %v14784_v59  ;;  %13389 = vmatprep.subr.bf16.mxu0 %v14785_v2  ;;  %v454_v2 = vrot.slane %v223_v63, %v15753_v42  ;;  %v14835_v23 = vld [vmem:[%s15714_s23 + $0xb58] sm:$0xff]  }
 0x15e   : > { %13411 = vmatprep.subr.bf16.mxu1 %v14786_v3  ;;  %v447_v3 = vcombine.high %v223_v63, %v223_v63 }
 0x15f   : > { %v462_v5 = vcombine.high %v454_v2, %v454_v2 }
 0x160   : > { %13390 = vmatpush3.bf16.msra.mxu0 %v14787_v8  ;;  %v461_v6 = vrot.slane %v447_v3, %v15753_v42  ;;  %v989_v8 = vpack.c.bf16 %v454_v2, %v454_v2  ;;  %v14858_v2 = vld [vmem:[%s15714_s23 + $0xc00] sm:$0xff]  }
 0x161   : > { %13412 = vmatpush3.bf16.msra.mxu1 %v14788_v12  ;;  %13419 = vmatprep.subr.bf16.mxu0 %v14790_v15  ;;  %v990_v10 = vpack.c.bf16 %v462_v5, %v462_v5  ;;  %v14826_v12 = vld [vmem:[%s15714_s23 + $0xb80] sm:$0xff]  }
 0x162   : > { %13441 = vmatprep.subr.bf16.mxu1 %v14791_v16  ;;  %v991_v13 = vpack.c.bf16 %v461_v6, %v461_v6  ;;  %v14828_v16 = vld [vmem:[%s15714_s23 + $0xbc8] sm:$0xff]  }
 0x163   : > { %10022 = vmatmul.mubr.bf16.vlgmr.msra.gmra.mrb[36].mxu0 %v985_v19  ;;  %v14831_v19 = vld [vmem:[%s15714_s23 + $0xb50] sm:$0xff]  }
 0x164   : > { %10062 = vmatmul.mubr.bf16.vlgmr.msra.gmra.mrb[36].mxu1 %v987_v21  ;;  %13420 = vmatpush3.bf16.msra.mxu0 %v14792_v20  ;;  %v14832_v20 = vld [vmem:[%s15714_s23 + $0xbd0] sm:$0xff]  }
 0x165   : > { %13442 = vmatpush3.bf16.msra.mxu1 %v14793_v22  ;;  %13421 = vmatprep.subr.bf16.mxu0 %v14794_v24  ;;  %v14833_v21 = vld [vmem:[%s15714_s23 + $0xb10] sm:$0xff]   ;;  %v14836_v24 = vld [vmem:[%s15714_s23 + $0xbd8] sm:$0xff]  }
 0x166   : > { %13443 = vmatprep.subr.bf16.mxu1 %v14795_v25  ;;  %10101 = vmatprep.mubr.bf16.mxu0 %v990_v10  ;;  %v14834_v22 = vld [vmem:[%s15714_s23 + $0xb90] sm:$0xff]   ;;  %v14837_v25 = vld [vmem:[%s15714_s23 + $0xb18] sm:$0xff]   ;;  %v14863_v10 = vld [vmem:[%s15714_s23 + $0xc88] sm:$0xff]  }
 0x168   : > { %13422 = vmatpush3.bf16.msra.mxu0 %v14796_v26  ;;  %v14838_v26 = vld [vmem:[%s15714_s23 + $0xb98] sm:$0xff]  }
 0x169   : > { %13444 = vmatpush3.bf16.msra.mxu1 %v14797_v27  ;;  %13423 = vmatprep.subr.bf16.mxu0 %v14798_v28  ;;  %v14839_v27 = vld [vmem:[%s15714_s23 + $0xb60] sm:$0xff]  }
 0x16a   : > { %13445 = vmatprep.subr.bf16.mxu1 %v14799_v29  ;;  %v14840_v28 = vld [vmem:[%s15714_s23 + $0xbe0] sm:$0xff]  }
 0x16b   : > { %v14841_v29 = vld [vmem:[%s15714_s23 + $0xb20] sm:$0xff]  }
 0x16c   : > { %13424 = vmatpush3.bf16.msra.mxu0 %v14800_v30  ;;  %v14842_v30 = vld [vmem:[%s15714_s23 + $0xba0] sm:$0xff]  }
 0x16d   : > { %13446 = vmatpush3.bf16.msra.mxu1 %v14801_v31  ;;  %13425 = vmatprep.subr.bf16.mxu0 %v14802_v32  ;;  %v14843_v31 = vld [vmem:[%s15714_s23 + $0xb68] sm:$0xff]  }
 0x16e   : > { %13447 = vmatprep.subr.bf16.mxu1 %v14803_v33  ;;  %v14844_v32 = vld [vmem:[%s15714_s23 + $0xbe8] sm:$0xff]  }
 0x16f   : > { %v14845_v33 = vld [vmem:[%s15714_s23 + $0xb28] sm:$0xff]  }
 0x170   : > { %13426 = vmatpush3.bf16.msra.mxu0 %v14804_v34  ;;  %v14846_v34 = vld [vmem:[%s15714_s23 + $0xba8] sm:$0xff]  }
 0x171   : > { %13448 = vmatpush3.bf16.msra.mxu1 %v14805_v35  ;;  %13427 = vmatprep.subr.bf16.mxu0 %v14806_v36  ;;  %v14847_v35 = vld [vmem:[%s15714_s23 + $0xb70] sm:$0xff]  }
 0x172   : > { %13449 = vmatprep.subr.bf16.mxu1 %v14807_v37 }
 0x174   : > { %13428 = vmatpush3.bf16.msra.mxu0 %v14808_v38  ;;  %v14848_v38 = vld [vmem:[%s15714_s23 + $0xbf0] sm:$0xff]  }
 0x175   : > { %13450 = vmatpush3.bf16.msra.mxu1 %v14809_v39  ;;  %13429 = vmatprep.subr.bf16.mxu0 %v14810_v40  ;;  %v14849_v39 = vld [vmem:[%s15714_s23 + $0xb30] sm:$0xff]  }
 0x176   : > { %v13127_v46 = vpop.f32.mrb[12].mxu0  ;;  %13451 = vmatprep.subr.bf16.mxu1 %v14811_v41 }
 0x177   : > { %v13149_v47 = vpop.f32.mrb[12].mxu1  ;;  %v13128_v50 = vpop.f32.mrb[13].mxu0 }
 0x178   : > { %v13150_v51 = vpop.f32.mrb[13].mxu1  ;;  %v13129_v53 = vadd.f32 %v13128_v50, %v13127_v46  ;;  %v13130_v55 = vpop.f32.mrb[14].mxu0  ;;  %13430 = vmatpush3.bf16.msra.mxu0 %v14812_v43 }
 0x179   : > { %v13151_v54 = vadd.f32 %v13150_v51, %v13149_v47  ;;  %v13152_v56 = vpop.f32.mrb[14].mxu1  ;;  %13452 = vmatpush3.bf16.msra.mxu1 %v14813_v44  ;;  %v13131_v59 = vpop.f32.mrb[15].mxu0  ;;  %13431 = vmatprep.subr.bf16.mxu0 %v14814_v45  ;;  %v14850_v47 = vld [vmem:[%s15714_s23 + $0xbb0] sm:$0xff]   ;;  %v224_v55 = vld [vmem:[%s15709_s7 + $0x58] sm:$0xff] }
 0x17a   : > { %v13153_v60 = vpop.f32.mrb[15].mxu1  ;;  %v9544_v61 = vadd.f32 %v13129_v53, %v16074_v11  ;;  %13453 = vmatprep.subr.bf16.mxu1 %v14815_v48  ;;  %v463_v11 = vcombine.high %v461_v6, %v461_v6  ;;  %v14851_v48 = vld [vmem:[%s15714_s23 + $0xb78] sm:$0xff]   ;;  %v471_v56 = vrot.slane %v224_v55, %v15753_v42  ;;  %v14859_v6 = vld [vmem:[%s15714_s23 + $0xc80] sm:$0xff]  }
 0x17b   : > { %v14853_v53 = vld [vmem:[%s15714_s23 + $0xb38] sm:$0xff]  }
 0x17c   : > { %v16111_v0 = vadd.f32 %v13151_v54, %v9544_v61  ;;  %13432 = vmatpush3.bf16.msra.mxu0 %v14816_v49  ;;  %v992_v15 = vpack.c.bf16 %v463_v11, %v463_v11  ;;  %v14854_v59 = vld [vmem:[%s15714_s23 + $0xbb8] sm:$0xff]   ;;  %v479_v60 = vcombine.high %v471_v56, %v471_v56  ;;  %v993_v63 = vpack.c.bf16 %v471_v56, %v471_v56  ;;  %v14865_v11 = vld [vmem:[%s15714_s23 + $0xcd0] sm:$0xff]  }
 0x17d   : > { %13454 = vmatpush3.bf16.msra.mxu1 %v14817_v52  ;;  %13433 = vmatprep.subr.bf16.mxu0 %v14818_v57  ;;  %v14852_v52 = vld [vmem:[%s15714_s23 + $0xbf8] sm:$0xff]   ;;  %v464_v57 = vcombine.high %v224_v55, %v224_v55  ;;  %v14891_v55 = vld [vmem:[%s15714_s23 + $0xd00] sm:$0xff]  }
 0x17e   : > { %13455 = vmatprep.subr.bf16.mxu1 %v14819_v58  ;;  %10141 = vmatprep.mubr.bf16.mxu1 %v992_v15  ;;  %v14856_v58 = vld [vmem:[%s15714_s23 + $0xc40] sm:$0xff]   ;;  %v14869_v15 = vld [vmem:[%s15714_s23 + $0xcd8] sm:$0xff]  }
 0x17f   : > { %v478_v61 = vrot.slane %v464_v57, %v15753_v42 }
 0x180   : > { %13434 = vmatpush3.bf16.msra.mxu0 %v14820_v62  ;;  %v14857_v62 = vld [vmem:[%s15714_s23 + $0xcc0] sm:$0xff]  }
 0x181   : > { %13456 = vmatpush3.bf16.msra.mxu1 %v14821_v1  ;;  %13463 = vmatprep.subr.bf16.mxu0 %v14823_v4  ;;  %v480_v1 = vcombine.high %v478_v61, %v478_v61  ;;  %v995_v3 = vpack.c.bf16 %v478_v61, %v478_v61  ;;  %v14860_v4 = vld [vmem:[%s15714_s23 + $0xc48] sm:$0xff]  }
 0x182   : > { %13485 = vmatprep.subr.bf16.mxu1 %v14824_v7  ;;  %v14861_v7 = vld [vmem:[%s15714_s23 + $0xcc8] sm:$0xff]  }
 0x183   : > { %10102 = vmatmul.mubr.bf16.vlgmr.msra.gmra.mrb[40].mxu0 %v989_v8  ;;  %v996_v5 = vpack.c.bf16 %v480_v1, %v480_v1  ;;  %v14862_v8 = vld [vmem:[%s15714_s23 + $0xc08] sm:$0xff]   ;;  %v14897_v1 = vld [vmem:[%s15714_s23 + $0xd50] sm:$0xff]  }
 0x184   : > { %13464 = vmatpush3.bf16.msra.mxu0 %v14825_v9  ;;  %10142 = vmatmul.mubr.bf16.vlgmr.msra.gmra.mrb[40].mxu1 %v991_v13  ;;  %v14864_v9 = vld [vmem:[%s15714_s23 + $0xc50] sm:$0xff]   ;;  %v14868_v13 = vld [vmem:[%s15714_s23 + $0xc58] sm:$0xff]  }
 0x185   : > { %13465 = vmatprep.subr.bf16.mxu0 %v14827_v14  ;;  %13486 = vmatpush3.bf16.msra.mxu1 %v14826_v12  ;;  %v14866_v12 = vld [vmem:[%s15714_s23 + $0xc10] sm:$0xff]  }
 0x186   : > { %13487 = vmatprep.subr.bf16.mxu1 %v14828_v16  ;;  %10221 = vmatprep.mubr.bf16.mxu1 %v996_v5  ;;  %v14867_v14 = vld [vmem:[%s15714_s23 + $0xc90] sm:$0xff]   ;;  %v14870_v16 = vld [vmem:[%s15714_s23 + $0xc18] sm:$0xff]  }
 0x187   : > { %v14901_v5 = vld [vmem:[%s15714_s23 + $0xd58] sm:$0xff]  }
 0x188   : > { %13466 = vmatpush3.bf16.msra.mxu0 %v14829_v17  ;;  %v14872_v17 = vld [vmem:[%s15714_s23 + $0xc60] sm:$0xff]  }
 0x189   : > { %13467 = vmatprep.subr.bf16.mxu0 %v14831_v19  ;;  %13488 = vmatpush3.bf16.msra.mxu1 %v14830_v18  ;;  %v14871_v18 = vld [vmem:[%s15714_s23 + $0xc98] sm:$0xff]   ;;  %v14873_v19 = vld [vmem:[%s15714_s23 + $0xce0] sm:$0xff]  }
 0x18a   : > { %13489 = vmatprep.subr.bf16.mxu1 %v14832_v20  ;;  %v14874_v20 = vld [vmem:[%s15714_s23 + $0xc20] sm:$0xff]  }
 0x18c   : > { %13468 = vmatpush3.bf16.msra.mxu0 %v14833_v21  ;;  %v14876_v21 = vld [vmem:[%s15714_s23 + $0xc68] sm:$0xff]  }
 0x18d   : > { %13469 = vmatprep.subr.bf16.mxu0 %v14835_v23  ;;  %13490 = vmatpush3.bf16.msra.mxu1 %v14834_v22  ;;  %v14875_v22 = vld [vmem:[%s15714_s23 + $0xca0] sm:$0xff]   ;;  %v14877_v23 = vld [vmem:[%s15714_s23 + $0xce8] sm:$0xff]  }
 0x18e   : > { %13491 = vmatprep.subr.bf16.mxu1 %v14836_v24  ;;  %v14878_v24 = vld [vmem:[%s15714_s23 + $0xc28] sm:$0xff]  }
 0x190   : > { %13470 = vmatpush3.bf16.msra.mxu0 %v14837_v25 }
 0x191   : > { %13471 = vmatprep.subr.bf16.mxu0 %v14839_v27  ;;  %13492 = vmatpush3.bf16.msra.mxu1 %v14838_v26  ;;  %v14879_v27 = vld [vmem:[%s15714_s23 + $0xca8] sm:$0xff]  }
 0x192   : > { %13493 = vmatprep.subr.bf16.mxu1 %v14840_v28  ;;  %v14880_v28 = vld [vmem:[%s15714_s23 + $0xc70] sm:$0xff]  }
 0x194   : > { %13472 = vmatpush3.bf16.msra.mxu0 %v14841_v29 }
 0x195   : > { %13473 = vmatprep.subr.bf16.mxu0 %v14843_v31  ;;  %13494 = vmatpush3.bf16.msra.mxu1 %v14842_v30 }
 0x196   : > { %v13171_v36 = vpop.f32.mrb[16].mxu0  ;;  %13495 = vmatprep.subr.bf16.mxu1 %v14844_v32 }
 0x197   : > { %v13193_v37 = vpop.f32.mrb[16].mxu1  ;;  %v13172_v40 = vpop.f32.mrb[17].mxu0 }
 0x198   : > { %v13194_v41 = vpop.f32.mrb[17].mxu1  ;;  %v13173_v43 = vadd.f32 %v13172_v40, %v13171_v36  ;;  %v13174_v45 = vpop.f32.mrb[18].mxu0  ;;  %13474 = vmatpush3.bf16.msra.mxu0 %v14845_v33  ;;  %v14882_v36 = vld [vmem:[%s15714_s23 + $0xc30] sm:$0xff]  }
 0x199   : > { %v13195_v44 = vadd.f32 %v13194_v41, %v13193_v37  ;;  %v13196_v46 = vpop.f32.mrb[18].mxu1  ;;  %v13175_v49 = vpop.f32.mrb[19].mxu0  ;;  %13475 = vmatprep.subr.bf16.mxu0 %v14847_v35  ;;  %13496 = vmatpush3.bf16.msra.mxu1 %v14846_v34  ;;  %v14881_v35 = vld [vmem:[%s15714_s23 + $0xcf0] sm:$0xff]   ;;  %v14884_v41 = vld [vmem:[%s15714_s23 + $0xc78] sm:$0xff]  }
 0x19a   : > { %v13197_v50 = vpop.f32.mrb[19].mxu1  ;;  %v9624_v51 = vadd.f32 %v13173_v43, %v16111_v0  ;;  %13497 = vmatprep.subr.bf16.mxu1 %v14848_v38  ;;  %v994_v0 = vpack.c.bf16 %v479_v60, %v479_v60  ;;  %v14885_v43 = vld [vmem:[%s15714_s23 + $0xcf8] sm:$0xff]   ;;  %v225_v46 = vld [vmem:[%s15709_s7 + $0x60] sm:$0xff]  ;;  %v14893_v60 = vld [vmem:[%s15714_s23 + $0xd48] sm:$0xff]  }
 0x19b   : > { %v14886_v45 = vld [vmem:[%s15714_s23 + $0xc38] sm:$0xff]   ;;  %v14889_v49 = vld [vmem:[%s15714_s23 + $0xd40] sm:$0xff]  }
 0x19c   : > { %v16148_v54 = vadd.f32 %v13195_v44, %v9624_v51  ;;  %13476 = vmatpush3.bf16.msra.mxu0 %v14849_v39  ;;  %10181 = vmatprep.mubr.bf16.mxu0 %v994_v0  ;;  %v14883_v39 = vld [vmem:[%s15714_s23 + $0xcb0] sm:$0xff]   ;;  %v14887_v50 = vld [vmem:[%s15714_s23 + $0xcb8] sm:$0xff]   ;;  %v14896_v0 = vld [vmem:[%s15714_s23 + $0xd88] sm:$0xff]  }
 0x19d   : > { %13477 = vmatprep.subr.bf16.mxu0 %v14851_v48  ;;  %13498 = vmatpush3.bf16.msra.mxu1 %v14850_v47  ;;  %v488_v47 = vrot.slane %v225_v46, %v15753_v42  ;;  %v481_v48 = vcombine.high %v225_v46, %v225_v46 }
 0x19e   : > { %13499 = vmatprep.subr.bf16.mxu1 %v14852_v52 }
 0x19f   : > { %v496_v51 = vcombine.high %v488_v47, %v488_v47  ;;  %v495_v52 = vrot.slane %v481_v48, %v15753_v42  ;;  %v14924_v48 = vld [vmem:[%s15714_s23 + $0xe00] sm:$0xff]  }
 0x1a0   : > { %13478 = vmatpush3.bf16.msra.mxu0 %v14853_v53  ;;  %v14890_v53 = vld [vmem:[%s15714_s23 + $0xdc0] sm:$0xff]  }
 0x1a1   : > { %13507 = vmatprep.subr.bf16.mxu0 %v14856_v58  ;;  %13500 = vmatpush3.bf16.msra.mxu1 %v14854_v59  ;;  %v998_v56 = vpack.c.bf16 %v496_v51, %v496_v51  ;;  %v497_v57 = vcombine.high %v495_v52, %v495_v52  ;;  %v14892_v58 = vld [vmem:[%s15714_s23 + $0xd80] sm:$0xff]   ;;  %v999_v59 = vpack.c.bf16 %v495_v52, %v495_v52 }
 0x1a2   : > { %13529 = vmatprep.subr.bf16.mxu1 %v14857_v62  ;;  %v14894_v62 = vld [vmem:[%s15714_s23 + $0xdc8] sm:$0xff]   ;;  %v14925_v52 = vld [vmem:[%s15714_s23 + $0xe80] sm:$0xff]  }
 0x1a3   : > { %10182 = vmatmul.mubr.bf16.vlgmr.msra.gmra.mrb[44].mxu0 %v993_v63  ;;  %v1000_v61 = vpack.c.bf16 %v497_v57, %v497_v57  ;;  %v14895_v63 = vld [vmem:[%s15714_s23 + $0xd08] sm:$0xff]   ;;  %v14931_v57 = vld [vmem:[%s15714_s23 + $0xed0] sm:$0xff]  }
 0x1a4   : > { %13508 = vmatpush3.bf16.msra.mxu0 %v14858_v2  ;;  %10222 = vmatmul.mubr.bf16.vlgmr.msra.gmra.mrb[44].mxu1 %v995_v3  ;;  %v14898_v2 = vld [vmem:[%s15714_s23 + $0xdd0] sm:$0xff]  }
 0x1a5   : > { %13509 = vmatprep.subr.bf16.mxu0 %v14860_v4  ;;  %13530 = vmatpush3.bf16.msra.mxu1 %v14859_v6  ;;  %v14899_v3 = vld [vmem:[%s15714_s23 + $0xd10] sm:$0xff]   ;;  %v14902_v6 = vld [vmem:[%s15714_s23 + $0xdd8] sm:$0xff]  }
 0x1a6   : > { %13531 = vmatprep.subr.bf16.mxu1 %v14861_v7  ;;  %10261 = vmatprep.mubr.bf16.mxu0 %v998_v56  ;;  %v14900_v4 = vld [vmem:[%s15714_s23 + $0xd90] sm:$0xff]   ;;  %v14903_v7 = vld [vmem:[%s15714_s23 + $0xd18] sm:$0xff]   ;;  %v14929_v56 = vld [vmem:[%s15714_s23 + $0xe88] sm:$0xff]  }
 0x1a7   : > { %10301 = vmatprep.mubr.bf16.mxu1 %v1000_v61  ;;  %v14935_v61 = vld [vmem:[%s15714_s23 + $0xed8] sm:$0xff]  }
 0x1a8   : > { %13510 = vmatpush3.bf16.msra.mxu0 %v14862_v8  ;;  %v14904_v8 = vld [vmem:[%s15714_s23 + $0xd98] sm:$0xff]  }
 0x1a9   : > { %13511 = vmatprep.subr.bf16.mxu0 %v14864_v9  ;;  %13532 = vmatpush3.bf16.msra.mxu1 %v14863_v10  ;;  %v14905_v9 = vld [vmem:[%s15714_s23 + $0xd60] sm:$0xff]  }
 0x1aa   : > { %13533 = vmatprep.subr.bf16.mxu1 %v14865_v11  ;;  %v14906_v10 = vld [vmem:[%s15714_s23 + $0xde0] sm:$0xff]  }
 0x1ab   : > { %v14907_v11 = vld [vmem:[%s15714_s23 + $0xd20] sm:$0xff]  }
 0x1ac   : > { %13512 = vmatpush3.bf16.msra.mxu0 %v14866_v12  ;;  %v14908_v12 = vld [vmem:[%s15714_s23 + $0xda0] sm:$0xff]  }
 0x1ad   : > { %13513 = vmatprep.subr.bf16.mxu0 %v14868_v13  ;;  %13534 = vmatpush3.bf16.msra.mxu1 %v14867_v14  ;;  %v14909_v13 = vld [vmem:[%s15714_s23 + $0xd68] sm:$0xff]  }
 0x1ae   : > { %13535 = vmatprep.subr.bf16.mxu1 %v14869_v15  ;;  %v14910_v14 = vld [vmem:[%s15714_s23 + $0xde8] sm:$0xff]  }
 0x1af   : > { %v14911_v15 = vld [vmem:[%s15714_s23 + $0xd28] sm:$0xff]  }
 0x1b0   : > { %13514 = vmatpush3.bf16.msra.mxu0 %v14870_v16 }
 0x1b1   : > { %13515 = vmatprep.subr.bf16.mxu0 %v14872_v17  ;;  %13536 = vmatpush3.bf16.msra.mxu1 %v14871_v18  ;;  %v14912_v18 = vld [vmem:[%s15714_s23 + $0xda8] sm:$0xff]  }
 0x1b2   : > { %13537 = vmatprep.subr.bf16.mxu1 %v14873_v19  ;;  %v14913_v19 = vld [vmem:[%s15714_s23 + $0xd70] sm:$0xff]  }
 0x1b4   : > { %13516 = vmatpush3.bf16.msra.mxu0 %v14874_v20 }
 0x1b5   : > { %13517 = vmatprep.subr.bf16.mxu0 %v14876_v21  ;;  %13538 = vmatpush3.bf16.msra.mxu1 %v14875_v22 }
 0x1b6   : > { %v13215_v25 = vpop.f32.mrb[20].mxu0  ;;  %13539 = vmatprep.subr.bf16.mxu1 %v14877_v23 }
 0x1b7   : > { %v13237_v26 = vpop.f32.mrb[20].mxu1  ;;  %v13216_v29 = vpop.f32.mrb[21].mxu0 }
 0x1b8   : > { %v13238_v30 = vpop.f32.mrb[21].mxu1  ;;  %v13217_v31 = vadd.f32 %v13216_v29, %v13215_v25  ;;  %v13218_v33 = vpop.f32.mrb[22].mxu0  ;;  %13518 = vmatpush3.bf16.msra.mxu0 %v14878_v24 }
 0x1b9   : > { %v13239_v32 = vadd.f32 %v13238_v30, %v13237_v26  ;;  %v13240_v34 = vpop.f32.mrb[22].mxu1  ;;  %v13219_v37 = vpop.f32.mrb[23].mxu0  ;;  %13519 = vmatprep.subr.bf16.mxu0 %v14880_v28  ;;  %13540 = vmatpush3.bf16.msra.mxu1 %v14879_v27  ;;  %v14914_v26 = vld [vmem:[%s15714_s23 + $0xdf0] sm:$0xff]  }
 0x1ba   : > { %v13241_v38 = vpop.f32.mrb[23].mxu1  ;;  %v9704_v40 = vadd.f32 %v13217_v31, %v16148_v54  ;;  %13541 = vmatprep.subr.bf16.mxu1 %v14881_v35  ;;  %v997_v54 = vpack.c.bf16 %v488_v47, %v488_v47  ;;  %v14915_v27 = vld [vmem:[%s15714_s23 + $0xd30] sm:$0xff]   ;;  %v14918_v34 = vld [vmem:[%s15714_s23 + $0xdf8] sm:$0xff]  }
 0x1bb   : > { %v14916_v31 = vld [vmem:[%s15714_s23 + $0xdb0] sm:$0xff]   ;;  %v14919_v35 = vld [vmem:[%s15714_s23 + $0xd38] sm:$0xff]  }
 0x1bc   : > { %v16185_v44 = vadd.f32 %v13239_v32, %v9704_v40  ;;  %13520 = vmatpush3.bf16.msra.mxu0 %v14882_v36  ;;  %v14917_v32 = vld [vmem:[%s15714_s23 + $0xd78] sm:$0xff]   ;;  %v226_v36 = vld [vmem:[%s15709_s7 + $0x68] sm:$0xff] }
 0x1bd   : > { %13521 = vmatprep.subr.bf16.mxu0 %v14884_v41  ;;  %13542 = vmatpush3.bf16.msra.mxu1 %v14883_v39  ;;  %v505_v37 = vrot.slane %v226_v36, %v15753_v42  ;;  %v498_v38 = vcombine.high %v226_v36, %v226_v36  ;;  %v14922_v39 = vld [vmem:[%s15714_s23 + $0xe40] sm:$0xff]   ;;  %v14920_v40 = vld [vmem:[%s15714_s23 + $0xdb8] sm:$0xff]  }
 0x1be   : > { %13543 = vmatprep.subr.bf16.mxu1 %v14885_v43  ;;  %v14957_v36 = vld [vmem:[%s15714_s23 + $0xf00] sm:$0xff]  }
 0x1bf   : > { %v513_v41 = vcombine.high %v505_v37, %v505_v37  ;;  %v512_v43 = vrot.slane %v498_v38, %v15753_v42 }
 0x1c0   : > { %13522 = vmatpush3.bf16.msra.mxu0 %v14886_v45  ;;  %v1001_v45 = vpack.c.bf16 %v505_v37, %v505_v37 }
 0x1c1   : > { %13551 = vmatprep.subr.bf16.mxu0 %v14889_v49  ;;  %13544 = vmatpush3.bf16.msra.mxu1 %v14887_v50  ;;  %v1002_v46 = vpack.c.bf16 %v513_v41, %v513_v41  ;;  %v514_v47 = vcombine.high %v512_v43, %v512_v43  ;;  %v1003_v49 = vpack.c.bf16 %v512_v43, %v512_v43  ;;  %v14926_v50 = vld [vmem:[%s15714_s23 + $0xe48] sm:$0xff]  }
 0x1c2   : > { %13573 = vmatprep.subr.bf16.mxu1 %v14890_v53  ;;  %v14927_v53 = vld [vmem:[%s15714_s23 + $0xec8] sm:$0xff]  }
 0x1c3   : > { %10262 = vmatmul.mubr.bf16.vlgmr.msra.gmra.mrb[48].mxu0 %v997_v54  ;;  %v1004_v51 = vpack.c.bf16 %v514_v47, %v514_v47  ;;  %v14928_v54 = vld [vmem:[%s15714_s23 + $0xe08] sm:$0xff]   ;;  %v14963_v47 = vld [vmem:[%s15714_s23 + $0xf50] sm:$0xff]  }
 0x1c4   : > { %13552 = vmatpush3.bf16.msra.mxu0 %v14891_v55  ;;  %10302 = vmatmul.mubr.bf16.vlgmr.msra.gmra.mrb[48].mxu1 %v999_v59  ;;  %v14930_v55 = vld [vmem:[%s15714_s23 + $0xe50] sm:$0xff]   ;;  %v14934_v59 = vld [vmem:[%s15714_s23 + $0xe58] sm:$0xff]   ;;  %v14959_v41 = vld [vmem:[%s15714_s23 + $0xf48] sm:$0xff]  }
 0x1c5   : > { %13553 = vmatprep.subr.bf16.mxu0 %v14893_v60  ;;  %13574 = vmatpush3.bf16.msra.mxu1 %v14892_v58  ;;  %v14932_v58 = vld [vmem:[%s15714_s23 + $0xe10] sm:$0xff]  }
 0x1c6   : > { %13575 = vmatprep.subr.bf16.mxu1 %v14894_v62  ;;  %10341 = vmatprep.mubr.bf16.mxu0 %v1002_v46  ;;  %v14933_v60 = vld [vmem:[%s15714_s23 + $0xe90] sm:$0xff]   ;;  %v14936_v62 = vld [vmem:[%s15714_s23 + $0xe18] sm:$0xff]   ;;  %v14962_v46 = vld [vmem:[%s15714_s23 + $0xf88] sm:$0xff]  }
 0x1c7   : > { %10381 = vmatprep.mubr.bf16.mxu1 %v1004_v51  ;;  %v14967_v51 = vld [vmem:[%s15714_s23 + $0xf58] sm:$0xff]  }
 0x1c8   : > { %13554 = vmatpush3.bf16.msra.mxu0 %v14895_v63  ;;  %v14938_v63 = vld [vmem:[%s15714_s23 + $0xe60] sm:$0xff]  }
 0x1c9   : > { %13555 = vmatprep.subr.bf16.mxu0 %v14897_v1  ;;  %13576 = vmatpush3.bf16.msra.mxu1 %v14896_v0  ;;  %v14937_v0 = vld [vmem:[%s15714_s23 + $0xe98] sm:$0xff]   ;;  %v14939_v1 = vld [vmem:[%s15714_s23 + $0xee0] sm:$0xff]  }
 0x1ca   : > { %13577 = vmatprep.subr.bf16.mxu1 %v14898_v2  ;;  %v14940_v2 = vld [vmem:[%s15714_s23 + $0xe20] sm:$0xff]  }
 0x1cc   : > { %13556 = vmatpush3.bf16.msra.mxu0 %v14899_v3  ;;  %v14942_v3 = vld [vmem:[%s15714_s23 + $0xe68] sm:$0xff]  }
 0x1cd   : > { %13557 = vmatprep.subr.bf16.mxu0 %v14901_v5  ;;  %13578 = vmatpush3.bf16.msra.mxu1 %v14900_v4  ;;  %v14941_v4 = vld [vmem:[%s15714_s23 + $0xea0] sm:$0xff]  }
 0x1ce   : > { %13579 = vmatprep.subr.bf16.mxu1 %v14902_v6 }
 0x1d0   : > { %13558 = vmatpush3.bf16.msra.mxu0 %v14903_v7  ;;  %v14943_v7 = vld [vmem:[%s15714_s23 + $0xee8] sm:$0xff]  }
 0x1d1   : > { %13559 = vmatprep.subr.bf16.mxu0 %v14905_v9  ;;  %13580 = vmatpush3.bf16.msra.mxu1 %v14904_v8  ;;  %v14944_v8 = vld [vmem:[%s15714_s23 + $0xe28] sm:$0xff]  }
 0x1d2   : > { %13581 = vmatprep.subr.bf16.mxu1 %v14906_v10 }
 0x1d4   : > { %13560 = vmatpush3.bf16.msra.mxu0 %v14907_v11  ;;  %v14945_v11 = vld [vmem:[%s15714_s23 + $0xea8] sm:$0xff]  }
 0x1d5   : > { %13561 = vmatprep.subr.bf16.mxu0 %v14909_v13  ;;  %13582 = vmatpush3.bf16.msra.mxu1 %v14908_v12 }
 0x1d6   : > { %v13259_v16 = vpop.f32.mrb[24].mxu0  ;;  %13583 = vmatprep.subr.bf16.mxu1 %v14910_v14 }
 0x1d7   : > { %v13281_v17 = vpop.f32.mrb[24].mxu1  ;;  %v13260_v20 = vpop.f32.mrb[25].mxu0 }
 0x1d8   : > { %v13282_v21 = vpop.f32.mrb[25].mxu1  ;;  %v13261_v22 = vadd.f32 %v13260_v20, %v13259_v16  ;;  %v13262_v24 = vpop.f32.mrb[26].mxu0  ;;  %13562 = vmatpush3.bf16.msra.mxu0 %v14911_v15  ;;  %v14946_v16 = vld [vmem:[%s15714_s23 + $0xe70] sm:$0xff]  }
 0x1d9   : > { %v13283_v23 = vadd.f32 %v13282_v21, %v13281_v17  ;;  %v13284_v25 = vpop.f32.mrb[26].mxu1  ;;  %v13263_v28 = vpop.f32.mrb[27].mxu0  ;;  %13563 = vmatprep.subr.bf16.mxu0 %v14913_v19  ;;  %13584 = vmatpush3.bf16.msra.mxu1 %v14912_v18  ;;  %v14947_v17 = vld [vmem:[%s15714_s23 + $0xef0] sm:$0xff]   ;;  %v14950_v24 = vld [vmem:[%s15714_s23 + $0xe78] sm:$0xff]  }
 0x1da   : > { %v13285_v29 = vpop.f32.mrb[27].mxu1  ;;  %v9784_v30 = vadd.f32 %v13261_v22, %v16185_v44  ;;  %13585 = vmatprep.subr.bf16.mxu1 %v14914_v26  ;;  %v14923_v44 = vld [vmem:[%s15714_s23 + $0xec0] sm:$0xff]   ;;  %v14948_v21 = vld [vmem:[%s15714_s23 + $0xe30] sm:$0xff]   ;;  %v14951_v25 = vld [vmem:[%s15714_s23 + $0xef8] sm:$0xff]  }
 0x1db   : > { %v14949_v22 = vld [vmem:[%s15714_s23 + $0xeb0] sm:$0xff]   ;;  %v14952_v26 = vld [vmem:[%s15714_s23 + $0xe38] sm:$0xff]  }
 0x1dc   : > { %v16222_v33 = vadd.f32 %v13283_v23, %v9784_v30  ;;  %13564 = vmatpush3.bf16.msra.mxu0 %v14915_v27  ;;  %v227_v27 = vld [vmem:[%s15709_s7 + $0x70] sm:$0xff]  ;;  %v14955_v30 = vld [vmem:[%s15714_s23 + $0xf40] sm:$0xff]  }
 0x1dd   : > { %13565 = vmatprep.subr.bf16.mxu0 %v14917_v32  ;;  %13586 = vmatpush3.bf16.msra.mxu1 %v14916_v31  ;;  %v522_v28 = vrot.slane %v227_v27, %v15753_v42  ;;  %v515_v29 = vcombine.high %v227_v27, %v227_v27  ;;  %v14953_v31 = vld [vmem:[%s15714_s23 + $0xeb8] sm:$0xff]   ;;  %v14990_v27 = vld [vmem:[%s15714_s23 + $0x1000] sm:$0xff]  }
 0x1de   : > { %13587 = vmatprep.subr.bf16.mxu1 %v14918_v34  ;;  %v14956_v34 = vld [vmem:[%s15714_s23 + $0xfc0] sm:$0xff]  }
 0x1df   : > { %v530_v32 = vcombine.high %v522_v28, %v522_v28 }
 0x1e0   : > { %13566 = vmatpush3.bf16.msra.mxu0 %v14919_v35  ;;  %v1005_v35 = vpack.c.bf16 %v522_v28, %v522_v28 }
 0x1e1   : > { %13595 = vmatprep.subr.bf16.mxu0 %v14922_v39  ;;  %13588 = vmatpush3.bf16.msra.mxu1 %v14920_v40  ;;  %v1006_v37 = vpack.c.bf16 %v530_v32, %v530_v32  ;;  %v14958_v39 = vld [vmem:[%s15714_s23 + $0xf80] sm:$0xff]   ;;  %v14992_v32 = vld [vmem:[%s15714_s23 + $0x1048] sm:$0xff]  }
 0x1e2   : > { %13617 = vmatprep.subr.bf16.mxu1 %v14923_v44  ;;  %v14960_v44 = vld [vmem:[%s15714_s23 + $0xfc8] sm:$0xff]  }
 0x1e3   : > { %10342 = vmatmul.mubr.bf16.vlgmr.msra.gmra.mrb[52].mxu0 %v1001_v45  ;;  %v14961_v45 = vld [vmem:[%s15714_s23 + $0xf08] sm:$0xff]  }
 0x1e4   : > { %13596 = vmatpush3.bf16.msra.mxu0 %v14924_v48  ;;  %10382 = vmatmul.mubr.bf16.vlgmr.msra.gmra.mrb[52].mxu1 %v1003_v49  ;;  %v14964_v48 = vld [vmem:[%s15714_s23 + $0xfd0] sm:$0xff]  }
 0x1e5   : > { %13597 = vmatprep.subr.bf16.mxu0 %v14926_v50  ;;  %13618 = vmatpush3.bf16.msra.mxu1 %v14925_v52  ;;  %v14965_v49 = vld [vmem:[%s15714_s23 + $0xf10] sm:$0xff]   ;;  %v14968_v52 = vld [vmem:[%s15714_s23 + $0xfd8] sm:$0xff]  }
 0x1e6   : > { %13619 = vmatprep.subr.bf16.mxu1 %v14927_v53  ;;  %10421 = vmatprep.mubr.bf16.mxu0 %v1006_v37  ;;  %v14966_v50 = vld [vmem:[%s15714_s23 + $0xf90] sm:$0xff]   ;;  %v14969_v53 = vld [vmem:[%s15714_s23 + $0xf18] sm:$0xff]  }
 0x1e7   : > { %v14996_v37 = vld [vmem:[%s15714_s23 + $0x1050] sm:$0xff]  }
 0x1e8   : > { %13598 = vmatpush3.bf16.msra.mxu0 %v14928_v54  ;;  %v14970_v54 = vld [vmem:[%s15714_s23 + $0xf98] sm:$0xff]  }
 0x1e9   : > { %13599 = vmatprep.subr.bf16.mxu0 %v14930_v55  ;;  %13620 = vmatpush3.bf16.msra.mxu1 %v14929_v56  ;;  %v14971_v55 = vld [vmem:[%s15714_s23 + $0xf60] sm:$0xff]  }
 0x1ea   : > { %13621 = vmatprep.subr.bf16.mxu1 %v14931_v57  ;;  %v14972_v56 = vld [vmem:[%s15714_s23 + $0xfe0] sm:$0xff]  }
 0x1eb   : > { %v14973_v57 = vld [vmem:[%s15714_s23 + $0xf20] sm:$0xff]  }
 0x1ec   : > { %13600 = vmatpush3.bf16.msra.mxu0 %v14932_v58  ;;  %v14974_v58 = vld [vmem:[%s15714_s23 + $0xfa0] sm:$0xff]  }
 0x1ed   : > { %13601 = vmatprep.subr.bf16.mxu0 %v14934_v59  ;;  %13622 = vmatpush3.bf16.msra.mxu1 %v14933_v60  ;;  %v14975_v59 = vld [vmem:[%s15714_s23 + $0xf68] sm:$0xff]  }
 0x1ee   : > { %13623 = vmatprep.subr.bf16.mxu1 %v14935_v61 }
 0x1f0   : > { %13602 = vmatpush3.bf16.msra.mxu0 %v14936_v62  ;;  %v14976_v62 = vld [vmem:[%s15714_s23 + $0xfe8] sm:$0xff]  }
 0x1f1   : > { %13603 = vmatprep.subr.bf16.mxu0 %v14938_v63  ;;  %13624 = vmatpush3.bf16.msra.mxu1 %v14937_v0  ;;  %v14977_v63 = vld [vmem:[%s15714_s23 + $0xf28] sm:$0xff]  }
 0x1f2   : > { %13625 = vmatprep.subr.bf16.mxu1 %v14939_v1 }
 0x1f4   : > { %13604 = vmatpush3.bf16.msra.mxu0 %v14940_v2 }
 0x1f5   : > { %13605 = vmatprep.subr.bf16.mxu0 %v14942_v3  ;;  %13626 = vmatpush3.bf16.msra.mxu1 %v14941_v4 }
 0x1f6   : > { %v13303_v5 = vpop.f32.mrb[28].mxu0  ;;  %13627 = vmatprep.subr.bf16.mxu1 %v14943_v7  ;;  %v14979_v7 = vld [vmem:[%s15714_s23 + $0xf70] sm:$0xff]  }
 0x1f7   : > { %v13325_v6 = vpop.f32.mrb[28].mxu1  ;;  %v13304_v9 = vpop.f32.mrb[29].mxu0 }
 0x1f8   : > { %v13326_v10 = vpop.f32.mrb[29].mxu1  ;;  %v13305_v12 = vadd.f32 %v13304_v9, %v13303_v5  ;;  %v13306_v14 = vpop.f32.mrb[30].mxu0  ;;  %13606 = vmatpush3.bf16.msra.mxu0 %v14944_v8 }
 0x1f9   : > { %v13327_v13 = vadd.f32 %v13326_v10, %v13325_v6  ;;  %v13328_v15 = vpop.f32.mrb[30].mxu1  ;;  %v13307_v18 = vpop.f32.mrb[31].mxu0  ;;  %13607 = vmatprep.subr.bf16.mxu0 %v14946_v16  ;;  %13628 = vmatpush3.bf16.msra.mxu1 %v14945_v11  ;;  %v14978_v6 = vld [vmem:[%s15714_s23 + $0xfa8] sm:$0xff]   ;;  %v14980_v11 = vld [vmem:[%s15714_s23 + $0xff0] sm:$0xff]   ;;  %v14984_v16 = vld [vmem:[%s15714_s23 + $0xff8] sm:$0xff]  }
 0x1fa   : > { %v13329_v19 = vpop.f32.mrb[31].mxu1  ;;  %v9864_v20 = vadd.f32 %v13305_v12, %v16222_v33  ;;  %13629 = vmatprep.subr.bf16.mxu1 %v14947_v17  ;;  %v529_v33 = vrot.slane %v515_v29, %v15753_v42  ;;  %v14981_v12 = vld [vmem:[%s15714_s23 + $0xf30] sm:$0xff]   ;;  %v14983_v15 = vld [vmem:[%s15714_s23 + $0xf78] sm:$0xff]  }
 0x1fb   : > { %v14982_v14 = vld [vmem:[%s15714_s23 + $0xfb0] sm:$0xff]   ;;  %v14985_v17 = vld [vmem:[%s15714_s23 + $0xf38] sm:$0xff]  }
 0x1fc   : > { %v16259_v23 = vadd.f32 %v13327_v13, %v9864_v20  ;;  %13608 = vmatpush3.bf16.msra.mxu0 %v14948_v21  ;;  %v531_v38 = vcombine.high %v529_v33, %v529_v33  ;;  %v1007_v40 = vpack.c.bf16 %v529_v33, %v529_v33  ;;  %v228_v18 = vld [vmem:[%s15709_s7 + $0x78] sm:$0xff]  ;;  %v14988_v21 = vld [vmem:[%s15714_s23 + $0x1040] sm:$0xff]  }
 0x1fd   : > { %13609 = vmatprep.subr.bf16.mxu0 %v14950_v24  ;;  %13630 = vmatpush3.bf16.msra.mxu1 %v14949_v22  ;;  %v539_v19 = vrot.slane %v228_v18, %v15753_v42  ;;  %v532_v20 = vcombine.high %v228_v18, %v228_v18  ;;  %v14986_v22 = vld [vmem:[%s15714_s23 + $0xfb8] sm:$0xff]   ;;  %v15023_v18 = vld [vmem:[%s15714_s23 + $0x1100] sm:$0xff]  }
 0x1fe   : > { %13631 = vmatprep.subr.bf16.mxu1 %v14951_v25  ;;  %v1008_v43 = vpack.c.bf16 %v531_v38, %v531_v38  ;;  %v14989_v25 = vld [vmem:[%s15714_s23 + $0x10c0] sm:$0xff]   ;;  %v14997_v38 = vld [vmem:[%s15714_s23 + $0x10d0] sm:$0xff]  }
 0x1ff   : > { %v546_v24 = vrot.slane %v532_v20, %v15753_v42 }
 0x200   : > { %13610 = vmatpush3.bf16.msra.mxu0 %v14952_v26  ;;  %10461 = vmatprep.mubr.bf16.mxu1 %v1008_v43  ;;  %v1009_v26 = vpack.c.bf16 %v539_v19, %v539_v19  ;;  %v15001_v43 = vld [vmem:[%s15714_s23 + $0x10d8] sm:$0xff]  }
 0x201   : > { %13639 = vmatprep.subr.bf16.mxu0 %v14955_v30  ;;  %13632 = vmatpush3.bf16.msra.mxu1 %v14953_v31  ;;  %v548_v29 = vcombine.high %v546_v24, %v546_v24  ;;  %v14991_v30 = vld [vmem:[%s15714_s23 + $0x1080] sm:$0xff]   ;;  %v1011_v31 = vpack.c.bf16 %v546_v24, %v546_v24 }
 0x202   : > { %13661 = vmatprep.subr.bf16.mxu1 %v14956_v34  ;;  %v14993_v34 = vld [vmem:[%s15714_s23 + $0x10c8] sm:$0xff]  }
 0x203   : > { %10422 = vmatmul.mubr.bf16.vlgmr.msra.gmra.mrb[56].mxu0 %v1005_v35  ;;  %v1012_v33 = vpack.c.bf16 %v548_v29, %v548_v29  ;;  %v14994_v35 = vld [vmem:[%s15714_s23 + $0x1008] sm:$0xff]   ;;  %v15030_v29 = vld [vmem:[%s15714_s23 + $0x11d0] sm:$0xff]  }
 0x204   : > { %13640 = vmatpush3.bf16.msra.mxu0 %v14957_v36  ;;  %10462 = vmatmul.mubr.bf16.vlgmr.msra.gmra.mrb[56].mxu1 %v1007_v40  ;;  %v14995_v36 = vld [vmem:[%s15714_s23 + $0x1088] sm:$0xff]   ;;  %v14999_v40 = vld [vmem:[%s15714_s23 + $0x1090] sm:$0xff]  }
 0x205   : > { %13641 = vmatprep.subr.bf16.mxu0 %v14959_v41  ;;  %13662 = vmatpush3.bf16.msra.mxu1 %v14958_v39  ;;  %v14998_v39 = vld [vmem:[%s15714_s23 + $0x1010] sm:$0xff]   ;;  %v15000_v41 = vld [vmem:[%s15714_s23 + $0x1058] sm:$0xff]  }
 0x206   : > { %13663 = vmatprep.subr.bf16.mxu1 %v14960_v44  ;;  %10541 = vmatprep.mubr.bf16.mxu1 %v1012_v33  ;;  %v15002_v44 = vld [vmem:[%s15714_s23 + $0x1018] sm:$0xff]  }
 0x207   : > { %v15034_v33 = vld [vmem:[%s15714_s23 + $0x11d8] sm:$0xff]  }
 0x208   : > { %13642 = vmatpush3.bf16.msra.mxu0 %v14961_v45  ;;  %v15003_v45 = vld [vmem:[%s15714_s23 + $0x1098] sm:$0xff]  }
 0x209   : > { %13643 = vmatprep.subr.bf16.mxu0 %v14963_v47  ;;  %13664 = vmatpush3.bf16.msra.mxu1 %v14962_v46  ;;  %v15004_v46 = vld [vmem:[%s15714_s23 + $0x1060] sm:$0xff]  }
 0x20a   : > { %13665 = vmatprep.subr.bf16.mxu1 %v14964_v48  ;;  %v15005_v47 = vld [vmem:[%s15714_s23 + $0x10e0] sm:$0xff]  }
 0x20b   : > { %v15006_v48 = vld [vmem:[%s15714_s23 + $0x1020] sm:$0xff]  }
 0x20c   : > { %13644 = vmatpush3.bf16.msra.mxu0 %v14965_v49  ;;  %v15007_v49 = vld [vmem:[%s15714_s23 + $0x10a0] sm:$0xff]  }
 0x20d   : > { %13645 = vmatprep.subr.bf16.mxu0 %v14967_v51  ;;  %13666 = vmatpush3.bf16.msra.mxu1 %v14966_v50  ;;  %v15008_v51 = vld [vmem:[%s15714_s23 + $0x1068] sm:$0xff]  }
 0x20e   : > { %13667 = vmatprep.subr.bf16.mxu1 %v14968_v52 }
 0x210   : > { %13646 = vmatpush3.bf16.msra.mxu0 %v14969_v53 }
 0x211   : > { %13647 = vmatprep.subr.bf16.mxu0 %v14971_v55  ;;  %13668 = vmatpush3.bf16.msra.mxu1 %v14970_v54  ;;  %v15009_v54 = vld [vmem:[%s15714_s23 + $0x10e8] sm:$0xff]  }
 0x212   : > { %13669 = vmatprep.subr.bf16.mxu1 %v14972_v56  ;;  %v15010_v55 = vld [vmem:[%s15714_s23 + $0x1028] sm:$0xff]  }
 0x214   : > { %13648 = vmatpush3.bf16.msra.mxu0 %v14973_v57 }
 0x215   : > { %13649 = vmatprep.subr.bf16.mxu0 %v14975_v59  ;;  %13670 = vmatpush3.bf16.msra.mxu1 %v14974_v58 }
 0x216   : > { %v13347_v60 = vpop.f32.mrb[32].mxu0  ;;  %13671 = vmatprep.subr.bf16.mxu1 %v14976_v62 }
 0x217   : > { %v13369_v61 = vpop.f32.mrb[32].mxu1  ;;  %v13348_v0 = vpop.f32.mrb[33].mxu0 }
 0x218   : > { %v13370_v1 = vpop.f32.mrb[33].mxu1  ;;  %v13349_v2 = vadd.f32 %v13348_v0, %v13347_v60  ;;  %v13350_v4 = vpop.f32.mrb[34].mxu0  ;;  %13650 = vmatpush3.bf16.msra.mxu0 %v14977_v63  ;;  %v15012_v63 = vld [vmem:[%s15714_s23 + $0x1070] sm:$0xff]  }
 0x219   : > { %v13371_v3 = vadd.f32 %v13370_v1, %v13369_v61  ;;  %v13372_v5 = vpop.f32.mrb[34].mxu1  ;;  %v13351_v8 = vpop.f32.mrb[35].mxu0  ;;  %13651 = vmatprep.subr.bf16.mxu0 %v14979_v7  ;;  %13672 = vmatpush3.bf16.msra.mxu1 %v14978_v6  ;;  %v15011_v61 = vld [vmem:[%s15714_s23 + $0x10a8] sm:$0xff]   ;;  %v15014_v4 = vld [vmem:[%s15714_s23 + $0x1030] sm:$0xff]   ;;  %v15016_v6 = vld [vmem:[%s15714_s23 + $0x1078] sm:$0xff]  }
 0x21a   : > { %v13373_v9 = vpop.f32.mrb[35].mxu1  ;;  %v9944_v10 = vadd.f32 %v13349_v2, %v16259_v23  ;;  %13673 = vmatprep.subr.bf16.mxu1 %v14980_v11  ;;  %v547_v23 = vcombine.high %v539_v19, %v539_v19  ;;  %v15013_v2 = vld [vmem:[%s15714_s23 + $0x10f0] sm:$0xff]   ;;  %v15017_v7 = vld [vmem:[%s15714_s23 + $0x10f8] sm:$0xff]  }
 0x21b   : > { %v15015_v5 = vld [vmem:[%s15714_s23 + $0x10b0] sm:$0xff]   ;;  %v15018_v8 = vld [vmem:[%s15714_s23 + $0x1038] sm:$0xff]   ;;  %v229_v9 = vld [vmem:[%s15709_s7 + $0x80] sm:$0xff] }
 0x21c   : > { %v16296_v13 = vadd.f32 %v13371_v3, %v9944_v10  ;;  %13652 = vmatpush3.bf16.msra.mxu0 %v14981_v12  ;;  %v1010_v28 = vpack.c.bf16 %v547_v23, %v547_v23  ;;  %v15019_v10 = vld [vmem:[%s15714_s23 + $0x10b8] sm:$0xff]   ;;  %v556_v11 = vrot.slane %v229_v9, %v15753_v42  ;;  %v549_v12 = vcombine.high %v229_v9, %v229_v9  ;;  %v15025_v23 = vld [vmem:[%s15714_s23 + $0x1148] sm:$0xff]  }
 0x21d   : > { %13653 = vmatprep.subr.bf16.mxu0 %v14983_v15  ;;  %13674 = vmatpush3.bf16.msra.mxu1 %v14982_v14 }
 0x21e   : > { %13675 = vmatprep.subr.bf16.mxu1 %v14984_v16  ;;  %10501 = vmatprep.mubr.bf16.mxu0 %v1010_v28  ;;  %v564_v14 = vcombine.high %v556_v11, %v556_v11  ;;  %v563_v15 = vrot.slane %v549_v12, %v15753_v42  ;;  %v15022_v16 = vld [vmem:[%s15714_s23 + $0x11c0] sm:$0xff]   ;;  %v15029_v28 = vld [vmem:[%s15714_s23 + $0x1150] sm:$0xff]  }
 0x220   : > { %13654 = vmatpush3.bf16.msra.mxu0 %v14985_v17  ;;  %v1013_v17 = vpack.c.bf16 %v556_v11, %v556_v11  ;;  %v1014_v19 = vpack.c.bf16 %v564_v14, %v564_v14  ;;  %v565_v20 = vcombine.high %v563_v15, %v563_v15  ;;  %v15056_v11 = vld [vmem:[%s15714_s23 + $0x1200] sm:$0xff]  }
 0x221   : > { %13683 = vmatprep.subr.bf16.mxu0 %v14988_v21  ;;  %13676 = vmatpush3.bf16.msra.mxu1 %v14986_v22  ;;  %v15024_v21 = vld [vmem:[%s15714_s23 + $0x1180] sm:$0xff]   ;;  %v1015_v22 = vpack.c.bf16 %v563_v15, %v563_v15 }
 0x222   : > { %13705 = vmatprep.subr.bf16.mxu1 %v14989_v25  ;;  %v1016_v24 = vpack.c.bf16 %v565_v20, %v565_v20  ;;  %v15026_v25 = vld [vmem:[%s15714_s23 + $0x11c8] sm:$0xff]   ;;  %v15057_v15 = vld [vmem:[%s15714_s23 + $0x1280] sm:$0xff]   ;;  %v15063_v20 = vld [vmem:[%s15714_s23 + $0x12d0] sm:$0xff]  }
 0x223   : > { %10502 = vmatmul.mubr.bf16.vlgmr.msra.gmra.mrb[60].mxu0 %v1009_v26  ;;  %v15027_v26 = vld [vmem:[%s15714_s23 + $0x1108] sm:$0xff]  }
 0x224   : > { %13684 = vmatpush3.bf16.msra.mxu0 %v14990_v27  ;;  %10542 = vmatmul.mubr.bf16.vlgmr.msra.gmra.mrb[60].mxu1 %v1011_v31  ;;  %v15028_v27 = vld [vmem:[%s15714_s23 + $0x1188] sm:$0xff]   ;;  %v15032_v31 = vld [vmem:[%s15714_s23 + $0x1190] sm:$0xff]  }
 0x225   : > { %13685 = vmatprep.subr.bf16.mxu0 %v14992_v32  ;;  %13706 = vmatpush3.bf16.msra.mxu1 %v14991_v30  ;;  %v15031_v30 = vld [vmem:[%s15714_s23 + $0x1110] sm:$0xff]   ;;  %v15033_v32 = vld [vmem:[%s15714_s23 + $0x1158] sm:$0xff]  }
 0x226   : > { %13707 = vmatprep.subr.bf16.mxu1 %v14993_v34  ;;  %10581 = vmatprep.mubr.bf16.mxu0 %v1014_v19  ;;  %v15035_v34 = vld [vmem:[%s15714_s23 + $0x1118] sm:$0xff]   ;;  %v15061_v19 = vld [vmem:[%s15714_s23 + $0x1288] sm:$0xff]  }
 0x227   : > { %10621 = vmatprep.mubr.bf16.mxu1 %v1016_v24  ;;  %v15067_v24 = vld [vmem:[%s15714_s23 + $0x12d8] sm:$0xff]  }
 0x228   : > { %13686 = vmatpush3.bf16.msra.mxu0 %v14994_v35  ;;  %v15036_v35 = vld [vmem:[%s15714_s23 + $0x1198] sm:$0xff]  }
 0x229   : > { %13687 = vmatprep.subr.bf16.mxu0 %v14996_v37  ;;  %13708 = vmatpush3.bf16.msra.mxu1 %v14995_v36  ;;  %v15037_v36 = vld [vmem:[%s15714_s23 + $0x1160] sm:$0xff]  }
 0x22a   : > { %13709 = vmatprep.subr.bf16.mxu1 %v14997_v38  ;;  %v15038_v37 = vld [vmem:[%s15714_s23 + $0x11e0] sm:$0xff]  }
 0x22b   : > { %v15039_v38 = vld [vmem:[%s15714_s23 + $0x1120] sm:$0xff]  }
 0x22c   : > { %13688 = vmatpush3.bf16.msra.mxu0 %v14998_v39  ;;  %v15040_v39 = vld [vmem:[%s15714_s23 + $0x11a0] sm:$0xff]  }
 0x22d   : > { %13689 = vmatprep.subr.bf16.mxu0 %v15000_v41  ;;  %13710 = vmatpush3.bf16.msra.mxu1 %v14999_v40  ;;  %v15041_v41 = vld [vmem:[%s15714_s23 + $0x1168] sm:$0xff]  }
 0x22e   : > { %13711 = vmatprep.subr.bf16.mxu1 %v15001_v43 }
 0x230   : > { %13690 = vmatpush3.bf16.msra.mxu0 %v15002_v44  ;;  %v15042_v44 = vld [vmem:[%s15714_s23 + $0x11e8] sm:$0xff]  }
 0x231   : > { %13691 = vmatprep.subr.bf16.mxu0 %v15004_v46  ;;  %13712 = vmatpush3.bf16.msra.mxu1 %v15003_v45 }
 0x232   : > { %13713 = vmatprep.subr.bf16.mxu1 %v15005_v47 }
 0x234   : > { %13692 = vmatpush3.bf16.msra.mxu0 %v15006_v48 }
 0x235   : > { %13693 = vmatprep.subr.bf16.mxu0 %v15008_v51  ;;  %13714 = vmatpush3.bf16.msra.mxu1 %v15007_v49  ;;  %v15043_v49 = vld [vmem:[%s15714_s23 + $0x1128] sm:$0xff]  }
 0x236   : > { %v13391_v50 = vpop.f32.mrb[36].mxu0  ;;  %13715 = vmatprep.subr.bf16.mxu1 %v15009_v54 }
 0x237   : > { %v13413_v52 = vpop.f32.mrb[36].mxu1  ;;  %v13392_v53 = vpop.f32.mrb[37].mxu0 }
 0x238   : > { %v13393_v56 = vadd.f32 %v13392_v53, %v13391_v50  ;;  %v13414_v57 = vpop.f32.mrb[37].mxu1  ;;  %v13394_v58 = vpop.f32.mrb[38].mxu0  ;;  %13694 = vmatpush3.bf16.msra.mxu0 %v15010_v55  ;;  %v15044_v50 = vld [vmem:[%s15714_s23 + $0x11a8] sm:$0xff]   ;;  %v15045_v55 = vld [vmem:[%s15714_s23 + $0x1170] sm:$0xff]  }
 0x239   : > { %v13415_v59 = vadd.f32 %v13414_v57, %v13413_v52  ;;  %v13416_v60 = vpop.f32.mrb[38].mxu1  ;;  %v13395_v62 = vpop.f32.mrb[39].mxu0  ;;  %13695 = vmatprep.subr.bf16.mxu0 %v15012_v63  ;;  %13716 = vmatpush3.bf16.msra.mxu1 %v15011_v61  ;;  %v15046_v57 = vld [vmem:[%s15714_s23 + $0x11f0] sm:$0xff]   ;;  %v15051_v63 = vld [vmem:[%s15714_s23 + $0x1138] sm:$0xff]  }
 0x23a   : > { %v10024_v0 = vadd.f32 %v13393_v56, %v16296_v13  ;;  %v13417_v1 = vpop.f32.mrb[39].mxu1  ;;  %13717 = vmatprep.subr.bf16.mxu1 %v15013_v2  ;;  %v15021_v13 = vld [vmem:[%s15714_s23 + $0x1140] sm:$0xff]   ;;  %v15049_v60 = vld [vmem:[%s15714_s23 + $0x1178] sm:$0xff]   ;;  %v15048_v61 = vld [vmem:[%s15714_s23 + $0x11b0] sm:$0xff]  }
 0x23b   : > { %v15050_v62 = vld [vmem:[%s15714_s23 + $0x11f8] sm:$0xff]  }
 0x23c   : > { %v16333_v3 = vadd.f32 %v13415_v59, %v10024_v0  ;;  %13696 = vmatpush3.bf16.msra.mxu0 %v15014_v4  ;;  %v15047_v59 = vld [vmem:[%s15714_s23 + $0x1130] sm:$0xff]   ;;  %v230_v0 = vld [vmem:[%s15709_s7 + $0x88] sm:$0xff]  ;;  %v15052_v4 = vld [vmem:[%s15714_s23 + $0x11b8] sm:$0xff]  }
 0x23d   : > { %13697 = vmatprep.subr.bf16.mxu0 %v15016_v6  ;;  %13718 = vmatpush3.bf16.msra.mxu1 %v15015_v5  ;;  %v573_v1 = vrot.slane %v230_v0, %v15753_v42  ;;  %v566_v2 = vcombine.high %v230_v0, %v230_v0 }
 0x23e   : > { %13719 = vmatprep.subr.bf16.mxu1 %v15017_v7  ;;  %v15055_v7 = vld [vmem:[%s15714_s23 + $0x12c0] sm:$0xff]  }
 0x23f   : > { %v581_v5 = vcombine.high %v573_v1, %v573_v1  ;;  %v580_v6 = vrot.slane %v566_v2, %v15753_v42  ;;  %v15089_v2 = vld [vmem:[%s15714_s23 + $0x1300] sm:$0xff]  }
 0x240   : > { %13698 = vmatpush3.bf16.msra.mxu0 %v15018_v8  ;;  %v1017_v8 = vpack.c.bf16 %v573_v1, %v573_v1 }
 0x241   : > { %13727 = vmatprep.subr.bf16.mxu0 %v15021_v13  ;;  %13720 = vmatpush3.bf16.msra.mxu1 %v15019_v10  ;;  %v1018_v9 = vpack.c.bf16 %v581_v5, %v581_v5  ;;  %v582_v10 = vcombine.high %v580_v6, %v580_v6  ;;  %v1019_v12 = vpack.c.bf16 %v580_v6, %v580_v6  ;;  %v15058_v13 = vld [vmem:[%s15714_s23 + $0x1248] sm:$0xff]   ;;  %v15090_v6 = vld [vmem:[%s15714_s23 + $0x1380] sm:$0xff]  }
 0x242   : > { %13749 = vmatprep.subr.bf16.mxu1 %v15022_v16  ;;  %v15059_v16 = vld [vmem:[%s15714_s23 + $0x12c8] sm:$0xff]  }
 0x243   : > { %10582 = vmatmul.mubr.bf16.vlgmr.msra.gmra.mrb[64].mxu0 %v1013_v17  ;;  %v1020_v14 = vpack.c.bf16 %v582_v10, %v582_v10  ;;  %v15060_v17 = vld [vmem:[%s15714_s23 + $0x1208] sm:$0xff]  }
 0x244   : > { %13728 = vmatpush3.bf16.msra.mxu0 %v15023_v18  ;;  %10622 = vmatmul.mubr.bf16.vlgmr.msra.gmra.mrb[64].mxu1 %v1015_v22  ;;  %v15062_v18 = vld [vmem:[%s15714_s23 + $0x1250] sm:$0xff]   ;;  %v15066_v22 = vld [vmem:[%s15714_s23 + $0x1258] sm:$0xff]   ;;  %v15094_v10 = vld [vmem:[%s15714_s23 + $0x1388] sm:$0xff]  }
 0x245   : > { %13729 = vmatprep.subr.bf16.mxu0 %v15025_v23  ;;  %13750 = vmatpush3.bf16.msra.mxu1 %v15024_v21  ;;  %v15064_v21 = vld [vmem:[%s15714_s23 + $0x1210] sm:$0xff]  }
 0x246   : > { %13751 = vmatprep.subr.bf16.mxu1 %v15026_v25  ;;  %10661 = vmatprep.mubr.bf16.mxu0 %v1018_v9  ;;  %v15065_v23 = vld [vmem:[%s15714_s23 + $0x1290] sm:$0xff]   ;;  %v15068_v25 = vld [vmem:[%s15714_s23 + $0x1218] sm:$0xff]  }
 0x247   : > { %10701 = vmatprep.mubr.bf16.mxu1 %v1020_v14  ;;  %v15095_v9 = vld [vmem:[%s15714_s23 + $0x1350] sm:$0xff]  }
 0x248   : > { %13730 = vmatpush3.bf16.msra.mxu0 %v15027_v26  ;;  %v15070_v26 = vld [vmem:[%s15714_s23 + $0x1260] sm:$0xff]   ;;  %v15098_v14 = vld [vmem:[%s15714_s23 + $0x1390] sm:$0xff]  }
 0x249   : > { %13731 = vmatprep.subr.bf16.mxu0 %v15029_v28  ;;  %13752 = vmatpush3.bf16.msra.mxu1 %v15028_v27  ;;  %v15069_v27 = vld [vmem:[%s15714_s23 + $0x1298] sm:$0xff]   ;;  %v15071_v28 = vld [vmem:[%s15714_s23 + $0x12e0] sm:$0xff]  }
 0x24a   : > { %13753 = vmatprep.subr.bf16.mxu1 %v15030_v29  ;;  %v15072_v29 = vld [vmem:[%s15714_s23 + $0x1220] sm:$0xff]  }
 0x24c   : > { %13732 = vmatpush3.bf16.msra.mxu0 %v15031_v30 }
 0x24d   : > { %13733 = vmatprep.subr.bf16.mxu0 %v15033_v32  ;;  %13754 = vmatpush3.bf16.msra.mxu1 %v15032_v31  ;;  %v15074_v31 = vld [vmem:[%s15714_s23 + $0x1268] sm:$0xff]   ;;  %v15073_v32 = vld [vmem:[%s15714_s23 + $0x12a0] sm:$0xff]  }
 0x24e   : > { %13755 = vmatprep.subr.bf16.mxu1 %v15034_v33 }
 0x250   : > { %13734 = vmatpush3.bf16.msra.mxu0 %v15035_v34 }
 0x251   : > { %13735 = vmatprep.subr.bf16.mxu0 %v15037_v36  ;;  %13756 = vmatpush3.bf16.msra.mxu1 %v15036_v35  ;;  %v15075_v36 = vld [vmem:[%s15714_s23 + $0x12e8] sm:$0xff]  }
 0x252   : > { %13757 = vmatprep.subr.bf16.mxu1 %v15038_v37 }
 0x254   : > { %13736 = vmatpush3.bf16.msra.mxu0 %v15039_v38  ;;  %v15076_v38 = vld [vmem:[%s15714_s23 + $0x1228] sm:$0xff]  }
 0x255   : > { %13737 = vmatprep.subr.bf16.mxu0 %v15041_v41  ;;  %13758 = vmatpush3.bf16.msra.mxu1 %v15040_v39 }
 0x256   : > { %v13435_v40 = vpop.f32.mrb[40].mxu0  ;;  %13759 = vmatprep.subr.bf16.mxu1 %v15042_v44 }
 0x257   : > { %v13436_v43 = vpop.f32.mrb[41].mxu0  ;;  %v13457_v45 = vpop.f32.mrb[40].mxu1 }
 0x258   : > { %v13437_v46 = vadd.f32 %v13436_v43, %v13435_v40  ;;  %v13438_v47 = vpop.f32.mrb[42].mxu0  ;;  %v13458_v48 = vpop.f32.mrb[41].mxu1  ;;  %13738 = vmatpush3.bf16.msra.mxu0 %v15043_v49  ;;  %v15077_v40 = vld [vmem:[%s15714_s23 + $0x12a8] sm:$0xff]  }
 0x259   : > { %v13439_v51 = vpop.f32.mrb[43].mxu0  ;;  %v13459_v53 = vadd.f32 %v13458_v48, %v13457_v45  ;;  %v13460_v54 = vpop.f32.mrb[42].mxu1  ;;  %13739 = vmatprep.subr.bf16.mxu0 %v15045_v55  ;;  %13760 = vmatpush3.bf16.msra.mxu1 %v15044_v50  ;;  %v15079_v48 = vld [vmem:[%s15714_s23 + $0x12f0] sm:$0xff]  }
 0x25a   : > { %v10104_v52 = vadd.f32 %v13437_v46, %v16333_v3  ;;  %v13461_v56 = vpop.f32.mrb[43].mxu1  ;;  %13761 = vmatprep.subr.bf16.mxu1 %v15046_v57  ;;  %v15054_v3 = vld [vmem:[%s15714_s23 + $0x1240] sm:$0xff]   ;;  %v15078_v46 = vld [vmem:[%s15714_s23 + $0x1270] sm:$0xff]   ;;  %v15084_v54 = vld [vmem:[%s15714_s23 + $0x1238] sm:$0xff]  }
 0x25b   : > { %v15080_v50 = vld [vmem:[%s15714_s23 + $0x1230] sm:$0xff]  }
 0x25c   : > { %v16371_v58 = vadd.f32 %v13459_v53, %v10104_v52  ;;  %13740 = vmatpush3.bf16.msra.mxu0 %v15047_v59  ;;  %v15081_v51 = vld [vmem:[%s15714_s23 + $0x12b0] sm:$0xff]   ;;  %v15082_v52 = vld [vmem:[%s15714_s23 + $0x1278] sm:$0xff]  }
 0x25d   : > { %13741 = vmatprep.subr.bf16.mxu0 %v15049_v60  ;;  %13762 = vmatpush3.bf16.msra.mxu1 %v15048_v61  ;;  %v15083_v53 = vld [vmem:[%s15714_s23 + $0x12f8] sm:$0xff]   ;;  %v231_v55 = vld [vmem:[%s15709_s7 + $0x90] sm:$0xff] }
 0x25e   : > { %13763 = vmatprep.subr.bf16.mxu1 %v15050_v62  ;;  %v590_v56 = vrot.slane %v231_v55, %v15753_v42  ;;  %v583_v57 = vcombine.high %v231_v55, %v231_v55  ;;  %v15085_v59 = vld [vmem:[%s15714_s23 + $0x12b8] sm:$0xff]   ;;  %v15088_v62 = vld [vmem:[%s15714_s23 + $0x13c0] sm:$0xff]  }
 0x25f   : > { %v15122_v55 = vld [vmem:[%s15714_s23 + $0x1400] sm:$0xff]  }
 0x260   : > { %13742 = vmatpush3.bf16.msra.mxu0 %v15051_v63  ;;  %v598_v60 = vcombine.high %v590_v56, %v590_v56  ;;  %v597_v61 = vrot.slane %v583_v57, %v15753_v42  ;;  %v1021_v63 = vpack.c.bf16 %v590_v56, %v590_v56 }
 0x261   : > { %13771 = vmatprep.subr.bf16.mxu0 %v15054_v3  ;;  %13764 = vmatpush3.bf16.msra.mxu1 %v15052_v4  ;;  %v15091_v4 = vld [vmem:[%s15714_s23 + $0x1348] sm:$0xff]  }
 0x262   : > { %13793 = vmatprep.subr.bf16.mxu1 %v15055_v7  ;;  %v1022_v0 = vpack.c.bf16 %v598_v60, %v598_v60  ;;  %v599_v1 = vcombine.high %v597_v61, %v597_v61  ;;  %v1023_v3 = vpack.c.bf16 %v597_v61, %v597_v61  ;;  %v15092_v7 = vld [vmem:[%s15714_s23 + $0x13c8] sm:$0xff]  }
 0x263   : > { %10662 = vmatmul.mubr.bf16.vlgmr.msra.gmra.mrb[68].mxu0 %v1017_v8  ;;  %v15093_v8 = vld [vmem:[%s15714_s23 + $0x1308] sm:$0xff]  }
 0x264   : > { %13772 = vmatpush3.bf16.msra.mxu0 %v15056_v11  ;;  %10702 = vmatmul.mubr.bf16.vlgmr.msra.gmra.mrb[68].mxu1 %v1019_v12  ;;  %v1024_v5 = vpack.c.bf16 %v599_v1, %v599_v1  ;;  %v15096_v11 = vld [vmem:[%s15714_s23 + $0x13d0] sm:$0xff]   ;;  %v15124_v60 = vld [vmem:[%s15714_s23 + $0x1448] sm:$0xff]  }
 0x265   : > { %13773 = vmatprep.subr.bf16.mxu0 %v15058_v13  ;;  %13794 = vmatpush3.bf16.msra.mxu1 %v15057_v15  ;;  %v15097_v12 = vld [vmem:[%s15714_s23 + $0x1310] sm:$0xff]   ;;  %v15099_v13 = vld [vmem:[%s15714_s23 + $0x1358] sm:$0xff]  }
 0x266   : > { %13795 = vmatprep.subr.bf16.mxu1 %v15059_v16  ;;  %10741 = vmatprep.mubr.bf16.mxu0 %v1022_v0  ;;  %v15100_v15 = vld [vmem:[%s15714_s23 + $0x13d8] sm:$0xff]   ;;  %v15127_v0 = vld [vmem:[%s15714_s23 + $0x1488] sm:$0xff]   ;;  %v15128_v1 = vld [vmem:[%s15714_s23 + $0x1450] sm:$0xff]  }
 0x267   : > { %10781 = vmatprep.mubr.bf16.mxu1 %v1024_v5  ;;  %v15101_v16 = vld [vmem:[%s15714_s23 + $0x1318] sm:$0xff]  }
 0x268   : > { %13774 = vmatpush3.bf16.msra.mxu0 %v15060_v17  ;;  %v15103_v17 = vld [vmem:[%s15714_s23 + $0x1360] sm:$0xff]   ;;  %v15132_v5 = vld [vmem:[%s15714_s23 + $0x1458] sm:$0xff]  }
 0x269   : > { %13775 = vmatprep.subr.bf16.mxu0 %v15062_v18  ;;  %13796 = vmatpush3.bf16.msra.mxu1 %v15061_v19  ;;  %v15102_v18 = vld [vmem:[%s15714_s23 + $0x1398] sm:$0xff]   ;;  %v15104_v19 = vld [vmem:[%s15714_s23 + $0x13e0] sm:$0xff]  }
 0x26a   : > { %13797 = vmatprep.subr.bf16.mxu1 %v15063_v20  ;;  %v15105_v20 = vld [vmem:[%s15714_s23 + $0x1320] sm:$0xff]  }
 0x26c   : > { %13776 = vmatpush3.bf16.msra.mxu0 %v15064_v21 }
 0x26d   : > { %13777 = vmatprep.subr.bf16.mxu0 %v15066_v22  ;;  %13798 = vmatpush3.bf16.msra.mxu1 %v15065_v23  ;;  %v15107_v22 = vld [vmem:[%s15714_s23 + $0x1368] sm:$0xff]   ;;  %v15106_v23 = vld [vmem:[%s15714_s23 + $0x13a0] sm:$0xff]  }
 0x26e   : > { %13799 = vmatprep.subr.bf16.mxu1 %v15067_v24 }
 0x270   : > { %13778 = vmatpush3.bf16.msra.mxu0 %v15068_v25 }
 0x271   : > { %13779 = vmatprep.subr.bf16.mxu0 %v15070_v26  ;;  %13800 = vmatpush3.bf16.msra.mxu1 %v15069_v27  ;;  %v15108_v27 = vld [vmem:[%s15714_s23 + $0x13e8] sm:$0xff]  }
 0x272   : > { %13801 = vmatprep.subr.bf16.mxu1 %v15071_v28 }
 0x274   : > { %13780 = vmatpush3.bf16.msra.mxu0 %v15072_v29  ;;  %v15109_v29 = vld [vmem:[%s15714_s23 + $0x1328] sm:$0xff]  }
 0x275   : > { %13781 = vmatprep.subr.bf16.mxu0 %v15074_v31  ;;  %13802 = vmatpush3.bf16.msra.mxu1 %v15073_v32  ;;  %v15110_v31 = vld [vmem:[%s15714_s23 + $0x13a8] sm:$0xff]  }
 0x276   : > { %v13479_v30 = vpop.f32.mrb[44].mxu0  ;;  %13803 = vmatprep.subr.bf16.mxu1 %v15075_v36  ;;  %v15111_v36 = vld [vmem:[%s15714_s23 + $0x1370] sm:$0xff]  }
 0x277   : > { %v13480_v33 = vpop.f32.mrb[45].mxu0  ;;  %v13501_v34 = vpop.f32.mrb[44].mxu1 }
 0x278   : > { %v13481_v35 = vadd.f32 %v13480_v33, %v13479_v30  ;;  %v13482_v37 = vpop.f32.mrb[46].mxu0  ;;  %v13502_v39 = vpop.f32.mrb[45].mxu1  ;;  %13782 = vmatpush3.bf16.msra.mxu0 %v15076_v38  ;;  %v15112_v38 = vld [vmem:[%s15714_s23 + $0x13f0] sm:$0xff]  }
 0x279   : > { %v13483_v41 = vpop.f32.mrb[47].mxu0  ;;  %v13503_v44 = vadd.f32 %v13502_v39, %v13501_v34  ;;  %v13504_v45 = vpop.f32.mrb[46].mxu1  ;;  %13783 = vmatprep.subr.bf16.mxu0 %v15078_v46  ;;  %13804 = vmatpush3.bf16.msra.mxu1 %v15077_v40  ;;  %v15113_v40 = vld [vmem:[%s15714_s23 + $0x1330] sm:$0xff]   ;;  %v232_v46 = vld [vmem:[%s15709_s7 + $0x98] sm:$0xff] }
 0x27a   : > { %v10184_v43 = vadd.f32 %v13481_v35, %v16371_v58  ;;  %v13505_v47 = vpop.f32.mrb[47].mxu1  ;;  %13805 = vmatprep.subr.bf16.mxu1 %v15079_v48  ;;  %v15087_v58 = vld [vmem:[%s15714_s23 + $0x1340] sm:$0xff]   ;;  %v15114_v41 = vld [vmem:[%s15714_s23 + $0x13b0] sm:$0xff]   ;;  %v15117_v45 = vld [vmem:[%s15714_s23 + $0x1338] sm:$0xff]   ;;  %v607_v48 = vrot.slane %v232_v46, %v15753_v42 }
 0x27b   : > { %v15118_v47 = vld [vmem:[%s15714_s23 + $0x13b8] sm:$0xff]  }
 0x27c   : > { %v16409_v49 = vadd.f32 %v13503_v44, %v10184_v43  ;;  %13784 = vmatpush3.bf16.msra.mxu0 %v15080_v50  ;;  %v15115_v43 = vld [vmem:[%s15714_s23 + $0x1378] sm:$0xff]   ;;  %v15120_v50 = vld [vmem:[%s15714_s23 + $0x1440] sm:$0xff]  }
 0x27d   : > { %13785 = vmatprep.subr.bf16.mxu0 %v15082_v52  ;;  %13806 = vmatpush3.bf16.msra.mxu1 %v15081_v51  ;;  %v15116_v44 = vld [vmem:[%s15714_s23 + $0x13f8] sm:$0xff]   ;;  %v615_v51 = vcombine.high %v607_v48, %v607_v48 }
 0x27e   : > { %13807 = vmatprep.subr.bf16.mxu1 %v15083_v53  ;;  %v15121_v53 = vld [vmem:[%s15714_s23 + $0x14c0] sm:$0xff]  }
 0x27f   : > { %v1026_v56 = vpack.c.bf16 %v615_v51, %v615_v51  ;;  %v15157_v51 = vld [vmem:[%s15714_s23 + $0x1548] sm:$0xff]  }
 0x280   : > { %13786 = vmatpush3.bf16.msra.mxu0 %v15084_v54  ;;  %v1025_v54 = vpack.c.bf16 %v607_v48, %v607_v48 }
 0x281   : > { %13815 = vmatprep.subr.bf16.mxu0 %v15087_v58  ;;  %13808 = vmatpush3.bf16.msra.mxu1 %v15085_v59  ;;  %v15123_v58 = vld [vmem:[%s15714_s23 + $0x1480] sm:$0xff]  }
 0x282   : > { %13837 = vmatprep.subr.bf16.mxu1 %v15088_v62  ;;  %v15125_v62 = vld [vmem:[%s15714_s23 + $0x14c8] sm:$0xff]  }
 0x283   : > { %10742 = vmatmul.mubr.bf16.vlgmr.msra.gmra.mrb[72].mxu0 %v1021_v63  ;;  %v15126_v63 = vld [vmem:[%s15714_s23 + $0x1408] sm:$0xff]  }
 0x284   : > { %13816 = vmatpush3.bf16.msra.mxu0 %v15089_v2  ;;  %10782 = vmatmul.mubr.bf16.vlgmr.msra.gmra.mrb[72].mxu1 %v1023_v3  ;;  %v15129_v2 = vld [vmem:[%s15714_s23 + $0x14d0] sm:$0xff]  }
 0x285   : > { %13817 = vmatprep.subr.bf16.mxu0 %v15091_v4  ;;  %13838 = vmatpush3.bf16.msra.mxu1 %v15090_v6  ;;  %v15130_v3 = vld [vmem:[%s15714_s23 + $0x1410] sm:$0xff]   ;;  %v15133_v6 = vld [vmem:[%s15714_s23 + $0x14d8] sm:$0xff]  }
 0x286   : > { %13839 = vmatprep.subr.bf16.mxu1 %v15092_v7  ;;  %10821 = vmatprep.mubr.bf16.mxu0 %v1026_v56  ;;  %v15131_v4 = vld [vmem:[%s15714_s23 + $0x1490] sm:$0xff]   ;;  %v15134_v7 = vld [vmem:[%s15714_s23 + $0x1418] sm:$0xff]  }
 0x287   : > { %v15161_v56 = vld [vmem:[%s15714_s23 + $0x1550] sm:$0xff]  }
 0x288   : > { %13818 = vmatpush3.bf16.msra.mxu0 %v15093_v8  ;;  %v15135_v8 = vld [vmem:[%s15714_s23 + $0x1498] sm:$0xff]  }
 0x289   : > { %13819 = vmatprep.subr.bf16.mxu0 %v15095_v9  ;;  %13840 = vmatpush3.bf16.msra.mxu1 %v15094_v10  ;;  %v15136_v9 = vld [vmem:[%s15714_s23 + $0x1460] sm:$0xff]  }
 0x28a   : > { %13841 = vmatprep.subr.bf16.mxu1 %v15096_v11  ;;  %v15137_v10 = vld [vmem:[%s15714_s23 + $0x14e0] sm:$0xff]  }
 0x28b   : > { %v15138_v11 = vld [vmem:[%s15714_s23 + $0x1420] sm:$0xff]  }
 0x28c   : > { %13820 = vmatpush3.bf16.msra.mxu0 %v15097_v12  ;;  %v15139_v12 = vld [vmem:[%s15714_s23 + $0x14a0] sm:$0xff]  }
 0x28d   : > { %13821 = vmatprep.subr.bf16.mxu0 %v15099_v13  ;;  %13842 = vmatpush3.bf16.msra.mxu1 %v15098_v14  ;;  %v15140_v13 = vld [vmem:[%s15714_s23 + $0x1468] sm:$0xff]  }
 0x28e   : > { %13843 = vmatprep.subr.bf16.mxu1 %v15100_v15  ;;  %v15141_v15 = vld [vmem:[%s15714_s23 + $0x14e8] sm:$0xff]  }
 0x290   : > { %13822 = vmatpush3.bf16.msra.mxu0 %v15101_v16 }
 0x291   : > { %13823 = vmatprep.subr.bf16.mxu0 %v15103_v17  ;;  %13844 = vmatpush3.bf16.msra.mxu1 %v15102_v18  ;;  %v15142_v17 = vld [vmem:[%s15714_s23 + $0x1428] sm:$0xff]  }
 0x292   : > { %13845 = vmatprep.subr.bf16.mxu1 %v15104_v19 }
 0x294   : > { %13824 = vmatpush3.bf16.msra.mxu0 %v15105_v20 }
 0x295   : > { %13825 = vmatprep.subr.bf16.mxu0 %v15107_v22  ;;  %13846 = vmatpush3.bf16.msra.mxu1 %v15106_v23  ;;  %v15143_v22 = vld [vmem:[%s15714_s23 + $0x14a8] sm:$0xff]  }
 0x296   : > { %v13523_v21 = vpop.f32.mrb[48].mxu0  ;;  %13847 = vmatprep.subr.bf16.mxu1 %v15108_v27 }
 0x297   : > { %v13524_v24 = vpop.f32.mrb[49].mxu0  ;;  %v13545_v25 = vpop.f32.mrb[48].mxu1 }
 0x298   : > { %v13525_v26 = vadd.f32 %v13524_v24, %v13523_v21  ;;  %v13526_v28 = vpop.f32.mrb[50].mxu0  ;;  %v13546_v30 = vpop.f32.mrb[49].mxu1  ;;  %13826 = vmatpush3.bf16.msra.mxu0 %v15109_v29  ;;  %v15144_v24 = vld [vmem:[%s15714_s23 + $0x1470] sm:$0xff]  }
 0x299   : > { %v13527_v32 = vpop.f32.mrb[51].mxu0  ;;  %v13547_v34 = vadd.f32 %v13546_v30, %v13545_v25  ;;  %v13548_v35 = vpop.f32.mrb[50].mxu1  ;;  %13827 = vmatprep.subr.bf16.mxu0 %v15111_v36  ;;  %13848 = vmatpush3.bf16.msra.mxu1 %v15110_v31  ;;  %v15145_v28 = vld [vmem:[%s15714_s23 + $0x14f0] sm:$0xff]   ;;  %v233_v36 = vld [vmem:[%s15709_s7 + $0xa0] sm:$0xff] }
 0x29a   : > { %v10264_v33 = vadd.f32 %v13525_v26, %v16409_v49  ;;  %v13549_v37 = vpop.f32.mrb[51].mxu1  ;;  %13849 = vmatprep.subr.bf16.mxu1 %v15112_v38  ;;  %v600_v49 = vcombine.high %v232_v46, %v232_v46  ;;  %v15146_v30 = vld [vmem:[%s15714_s23 + $0x1430] sm:$0xff]   ;;  %v15148_v32 = vld [vmem:[%s15714_s23 + $0x1478] sm:$0xff]   ;;  %v617_v38 = vcombine.high %v233_v36, %v233_v36  ;;  %v15155_v46 = vld [vmem:[%s15714_s23 + $0x1500] sm:$0xff]  }
 0x29b   : > { %v15150_v35 = vld [vmem:[%s15714_s23 + $0x1438] sm:$0xff]   ;;  %v624_v37 = vrot.slane %v233_v36, %v15753_v42  ;;  %v15188_v36 = vld [vmem:[%s15714_s23 + $0x1600] sm:$0xff]  }
 0x29c   : > { %v16447_v39 = vadd.f32 %v13547_v34, %v10264_v33  ;;  %13828 = vmatpush3.bf16.msra.mxu0 %v15113_v40  ;;  %v614_v52 = vrot.slane %v600_v49, %v15753_v42  ;;  %v15147_v33 = vld [vmem:[%s15714_s23 + $0x14b0] sm:$0xff]   ;;  %v15149_v34 = vld [vmem:[%s15714_s23 + $0x14f8] sm:$0xff]   ;;  %v15156_v49 = vld [vmem:[%s15714_s23 + $0x1580] sm:$0xff]  }
 0x29d   : > { %13829 = vmatprep.subr.bf16.mxu0 %v15115_v43  ;;  %13850 = vmatpush3.bf16.msra.mxu1 %v15114_v41  ;;  %v15151_v40 = vld [vmem:[%s15714_s23 + $0x14b8] sm:$0xff]   ;;  %v632_v41 = vcombine.high %v624_v37, %v624_v37  ;;  %v631_v43 = vrot.slane %v617_v38, %v15753_v42 }
 0x29e   : > { %13851 = vmatprep.subr.bf16.mxu1 %v15116_v44  ;;  %v616_v57 = vcombine.high %v614_v52, %v614_v52  ;;  %v1027_v59 = vpack.c.bf16 %v614_v52, %v614_v52  ;;  %v15154_v44 = vld [vmem:[%s15714_s23 + $0x15c0] sm:$0xff]  }
 0x29f   : > { %v633_v48 = vcombine.high %v631_v43, %v631_v43 }
 0x2a0   : > { %13830 = vmatpush3.bf16.msra.mxu0 %v15117_v45  ;;  %v1028_v61 = vpack.c.bf16 %v616_v57, %v616_v57  ;;  %v1029_v45 = vpack.c.bf16 %v624_v37, %v624_v37  ;;  %v15162_v57 = vld [vmem:[%s15714_s23 + $0x15d0] sm:$0xff]  }
 0x2a1   : > { %13859 = vmatprep.subr.bf16.mxu0 %v15120_v50  ;;  %13852 = vmatpush3.bf16.msra.mxu1 %v15118_v47  ;;  %v1030_v47 = vpack.c.bf16 %v632_v41, %v632_v41  ;;  %v1031_v50 = vpack.c.bf16 %v631_v43, %v631_v43  ;;  %v1032_v52 = vpack.c.bf16 %v633_v48, %v633_v48  ;;  %v15190_v41 = vld [vmem:[%s15714_s23 + $0x1648] sm:$0xff]   ;;  %v15195_v48 = vld [vmem:[%s15714_s23 + $0x16d0] sm:$0xff]  }
 0x2a2   : > { %13881 = vmatprep.subr.bf16.mxu1 %v15121_v53  ;;  %10861 = vmatprep.mubr.bf16.mxu1 %v1028_v61  ;;  %v15158_v53 = vld [vmem:[%s15714_s23 + $0x15c8] sm:$0xff]   ;;  %v15166_v61 = vld [vmem:[%s15714_s23 + $0x15d8] sm:$0xff]  }
 0x2a3   : > { %10822 = vmatmul.mubr.bf16.vlgmr.msra.gmra.mrb[76].mxu0 %v1025_v54  ;;  %v15159_v54 = vld [vmem:[%s15714_s23 + $0x1508] sm:$0xff]  }
 0x2a4   : > { %13860 = vmatpush3.bf16.msra.mxu0 %v15122_v55  ;;  %10862 = vmatmul.mubr.bf16.vlgmr.msra.gmra.mrb[76].mxu1 %v1027_v59  ;;  %v15160_v55 = vld [vmem:[%s15714_s23 + $0x1588] sm:$0xff]   ;;  %v15164_v59 = vld [vmem:[%s15714_s23 + $0x1590] sm:$0xff]  }
 0x2a5   : > { %13861 = vmatprep.subr.bf16.mxu0 %v15124_v60  ;;  %13882 = vmatpush3.bf16.msra.mxu1 %v15123_v58  ;;  %v15163_v58 = vld [vmem:[%s15714_s23 + $0x1510] sm:$0xff]   ;;  %v15165_v60 = vld [vmem:[%s15714_s23 + $0x1558] sm:$0xff]  }
 0x2a6   : > { %13883 = vmatprep.subr.bf16.mxu1 %v15125_v62  ;;  %10901 = vmatprep.mubr.bf16.mxu0 %v1030_v47  ;;  %v15167_v62 = vld [vmem:[%s15714_s23 + $0x1518] sm:$0xff]   ;;  %v15194_v47 = vld [vmem:[%s15714_s23 + $0x1650] sm:$0xff]  }
 0x2a7   : > { %10941 = vmatprep.mubr.bf16.mxu1 %v1032_v52  ;;  %v15199_v52 = vld [vmem:[%s15714_s23 + $0x16d8] sm:$0xff]  }
 0x2a8   : > { %13862 = vmatpush3.bf16.msra.mxu0 %v15126_v63  ;;  %v15168_v63 = vld [vmem:[%s15714_s23 + $0x1598] sm:$0xff]  }
 0x2a9   : > { %13863 = vmatprep.subr.bf16.mxu0 %v15128_v1  ;;  %13884 = vmatpush3.bf16.msra.mxu1 %v15127_v0  ;;  %v15169_v0 = vld [vmem:[%s15714_s23 + $0x1560] sm:$0xff]  }
 0x2aa   : > { %13885 = vmatprep.subr.bf16.mxu1 %v15129_v2  ;;  %v15170_v1 = vld [vmem:[%s15714_s23 + $0x15e0] sm:$0xff]  }
 0x2ab   : > { %v15171_v2 = vld [vmem:[%s15714_s23 + $0x1520] sm:$0xff]  }
 0x2ac   : > { %13864 = vmatpush3.bf16.msra.mxu0 %v15130_v3  ;;  %v15172_v3 = vld [vmem:[%s15714_s23 + $0x15a0] sm:$0xff]  }
 0x2ad   : > { %13865 = vmatprep.subr.bf16.mxu0 %v15132_v5  ;;  %13886 = vmatpush3.bf16.msra.mxu1 %v15131_v4  ;;  %v15173_v4 = vld [vmem:[%s15714_s23 + $0x1568] sm:$0xff]  }
 0x2ae   : > { %13887 = vmatprep.subr.bf16.mxu1 %v15133_v6  ;;  %v15174_v6 = vld [vmem:[%s15714_s23 + $0x15e8] sm:$0xff]  }
 0x2b0   : > { %13866 = vmatpush3.bf16.msra.mxu0 %v15134_v7 }
 0x2b1   : > { %13867 = vmatprep.subr.bf16.mxu0 %v15136_v9  ;;  %13888 = vmatpush3.bf16.msra.mxu1 %v15135_v8  ;;  %v15175_v8 = vld [vmem:[%s15714_s23 + $0x1528] sm:$0xff]  }
 0x2b2   : > { %13889 = vmatprep.subr.bf16.mxu1 %v15137_v10 }
 0x2b4   : > { %13868 = vmatpush3.bf16.msra.mxu0 %v15138_v11 }
 0x2b5   : > { %13869 = vmatprep.subr.bf16.mxu0 %v15140_v13  ;;  %13890 = vmatpush3.bf16.msra.mxu1 %v15139_v12  ;;  %v15176_v12 = vld [vmem:[%s15714_s23 + $0x15a8] sm:$0xff]   ;;  %v15177_v13 = vld [vmem:[%s15714_s23 + $0x1570] sm:$0xff]  }
 0x2b6   : > { %v13567_v14 = vpop.f32.mrb[52].mxu0  ;;  %13891 = vmatprep.subr.bf16.mxu1 %v15141_v15 }
 0x2b7   : > { %v13568_v16 = vpop.f32.mrb[53].mxu0  ;;  %v13589_v18 = vpop.f32.mrb[52].mxu1 }
 0x2b8   : > { %v13569_v19 = vadd.f32 %v13568_v16, %v13567_v14  ;;  %v13570_v20 = vpop.f32.mrb[54].mxu0  ;;  %v13590_v21 = vpop.f32.mrb[53].mxu1  ;;  %13870 = vmatpush3.bf16.msra.mxu0 %v15142_v17 }
 0x2b9   : > { %v13571_v23 = vpop.f32.mrb[55].mxu0  ;;  %v13591_v26 = vadd.f32 %v13590_v21, %v13589_v18  ;;  %v13592_v27 = vpop.f32.mrb[54].mxu1  ;;  %13871 = vmatprep.subr.bf16.mxu0 %v15144_v24  ;;  %13892 = vmatpush3.bf16.msra.mxu1 %v15143_v22  ;;  %v15179_v21 = vld [vmem:[%s15714_s23 + $0x1530] sm:$0xff]   ;;  %v15181_v24 = vld [vmem:[%s15714_s23 + $0x1578] sm:$0xff]  }
 0x2ba   : > { %v10344_v25 = vadd.f32 %v13569_v19, %v16447_v39  ;;  %v13593_v29 = vpop.f32.mrb[55].mxu1  ;;  %13893 = vmatprep.subr.bf16.mxu1 %v15145_v28  ;;  %v15153_v39 = vld [vmem:[%s15714_s23 + $0x1540] sm:$0xff]   ;;  %v15178_v19 = vld [vmem:[%s15714_s23 + $0x15f0] sm:$0xff]   ;;  %v234_v27 = vld [vmem:[%s15709_s7 + $0xa8] sm:$0xff] }
 0x2bb   : > { %v15180_v23 = vld [vmem:[%s15714_s23 + $0x15b0] sm:$0xff]   ;;  %v641_v28 = vrot.slane %v234_v27, %v15753_v42  ;;  %v634_v29 = vcombine.high %v234_v27, %v234_v27  ;;  %v15221_v27 = vld [vmem:[%s15714_s23 + $0x1700] sm:$0xff]  }
 0x2bc   : > { %v16486_v31 = vadd.f32 %v13591_v26, %v10344_v25  ;;  %13872 = vmatpush3.bf16.msra.mxu0 %v15146_v30  ;;  %v15182_v25 = vld [vmem:[%s15714_s23 + $0x15f8] sm:$0xff]   ;;  %v15186_v30 = vld [vmem:[%s15714_s23 + $0x1640] sm:$0xff]  }
 0x2bd   : > { %13873 = vmatprep.subr.bf16.mxu0 %v15148_v32  ;;  %13894 = vmatpush3.bf16.msra.mxu1 %v15147_v33  ;;  %v15183_v26 = vld [vmem:[%s15714_s23 + $0x1538] sm:$0xff]   ;;  %v649_v32 = vcombine.high %v641_v28, %v641_v28  ;;  %v648_v33 = vrot.slane %v634_v29, %v15753_v42 }
 0x2be   : > { %13895 = vmatprep.subr.bf16.mxu1 %v15149_v34  ;;  %v15187_v34 = vld [vmem:[%s15714_s23 + $0x16c0] sm:$0xff]  }
 0x2bf   : > { %v1034_v37 = vpack.c.bf16 %v649_v32, %v649_v32  ;;  %v650_v38 = vcombine.high %v648_v33, %v648_v33  ;;  %v15223_v32 = vld [vmem:[%s15714_s23 + $0x1748] sm:$0xff]  }
 0x2c0   : > { %13874 = vmatpush3.bf16.msra.mxu0 %v15150_v35  ;;  %v1033_v35 = vpack.c.bf16 %v641_v28, %v641_v28 }
 0x2c1   : > { %13903 = vmatprep.subr.bf16.mxu0 %v15153_v39  ;;  %13896 = vmatpush3.bf16.msra.mxu1 %v15151_v40  ;;  %v15189_v39 = vld [vmem:[%s15714_s23 + $0x1680] sm:$0xff]   ;;  %v1035_v40 = vpack.c.bf16 %v648_v33, %v648_v33  ;;  %v1036_v43 = vpack.c.bf16 %v650_v38, %v650_v38  ;;  %v15228_v38 = vld [vmem:[%s15714_s23 + $0x17d0] sm:$0xff]  }
 0x2c2   : > { %13925 = vmatprep.subr.bf16.mxu1 %v15154_v44  ;;  %v15191_v44 = vld [vmem:[%s15714_s23 + $0x16c8] sm:$0xff]  }
 0x2c3   : > { %10902 = vmatmul.mubr.bf16.vlgmr.msra.gmra.mrb[80].mxu0 %v1029_v45  ;;  %v15192_v45 = vld [vmem:[%s15714_s23 + $0x1608] sm:$0xff]  }
 0x2c4   : > { %13904 = vmatpush3.bf16.msra.mxu0 %v15155_v46  ;;  %10942 = vmatmul.mubr.bf16.vlgmr.msra.gmra.mrb[80].mxu1 %v1031_v50  ;;  %v15193_v46 = vld [vmem:[%s15714_s23 + $0x1688] sm:$0xff]   ;;  %v15197_v50 = vld [vmem:[%s15714_s23 + $0x1690] sm:$0xff]  }
 0x2c5   : > { %13905 = vmatprep.subr.bf16.mxu0 %v15157_v51  ;;  %13926 = vmatpush3.bf16.msra.mxu1 %v15156_v49  ;;  %v15196_v49 = vld [vmem:[%s15714_s23 + $0x1610] sm:$0xff]   ;;  %v15198_v51 = vld [vmem:[%s15714_s23 + $0x1658] sm:$0xff]  }
 0x2c6   : > { %13927 = vmatprep.subr.bf16.mxu1 %v15158_v53  ;;  %10981 = vmatprep.mubr.bf16.mxu0 %v1034_v37  ;;  %v15200_v53 = vld [vmem:[%s15714_s23 + $0x1618] sm:$0xff]   ;;  %v15227_v37 = vld [vmem:[%s15714_s23 + $0x1750] sm:$0xff]  }
 0x2c7   : > { %11021 = vmatprep.mubr.bf16.mxu1 %v1036_v43  ;;  %v15232_v43 = vld [vmem:[%s15714_s23 + $0x17d8] sm:$0xff]  }
 0x2c8   : > { %13906 = vmatpush3.bf16.msra.mxu0 %v15159_v54  ;;  %v15201_v54 = vld [vmem:[%s15714_s23 + $0x1698] sm:$0xff]  }
 0x2c9   : > { %13907 = vmatprep.subr.bf16.mxu0 %v15161_v56  ;;  %13928 = vmatpush3.bf16.msra.mxu1 %v15160_v55  ;;  %v15202_v55 = vld [vmem:[%s15714_s23 + $0x1660] sm:$0xff]  }
 0x2ca   : > { %13929 = vmatprep.subr.bf16.mxu1 %v15162_v57  ;;  %v15203_v56 = vld [vmem:[%s15714_s23 + $0x16e0] sm:$0xff]  }
 0x2cb   : > { %v15204_v57 = vld [vmem:[%s15714_s23 + $0x1620] sm:$0xff]  }
 0x2cc   : > { %13908 = vmatpush3.bf16.msra.mxu0 %v15163_v58  ;;  %v15205_v58 = vld [vmem:[%s15714_s23 + $0x16a0] sm:$0xff]  }
 0x2cd   : > { %13909 = vmatprep.subr.bf16.mxu0 %v15165_v60  ;;  %13930 = vmatpush3.bf16.msra.mxu1 %v15164_v59  ;;  %v15206_v59 = vld [vmem:[%s15714_s23 + $0x1668] sm:$0xff]  }
 0x2ce   : > { %13931 = vmatprep.subr.bf16.mxu1 %v15166_v61  ;;  %v15207_v61 = vld [vmem:[%s15714_s23 + $0x16e8] sm:$0xff]  }
 0x2d0   : > { %13910 = vmatpush3.bf16.msra.mxu0 %v15167_v62 }
 0x2d1   : > { %13911 = vmatprep.subr.bf16.mxu0 %v15169_v0  ;;  %13932 = vmatpush3.bf16.msra.mxu1 %v15168_v63  ;;  %v15208_v63 = vld [vmem:[%s15714_s23 + $0x1628] sm:$0xff]  }
 0x2d2   : > { %13933 = vmatprep.subr.bf16.mxu1 %v15170_v1 }
 0x2d4   : > { %13912 = vmatpush3.bf16.msra.mxu0 %v15171_v2 }
 0x2d5   : > { %13913 = vmatprep.subr.bf16.mxu0 %v15173_v4  ;;  %13934 = vmatpush3.bf16.msra.mxu1 %v15172_v3  ;;  %v15209_v3 = vld [vmem:[%s15714_s23 + $0x16a8] sm:$0xff]   ;;  %v15210_v4 = vld [vmem:[%s15714_s23 + $0x1670] sm:$0xff]  }
 0x2d6   : > { %v13611_v5 = vpop.f32.mrb[56].mxu0  ;;  %13935 = vmatprep.subr.bf16.mxu1 %v15174_v6 }
 0x2d7   : > { %v13612_v7 = vpop.f32.mrb[57].mxu0  ;;  %v13633_v9 = vpop.f32.mrb[56].mxu1 }
 0x2d8   : > { %v13613_v10 = vadd.f32 %v13612_v7, %v13611_v5  ;;  %v13614_v11 = vpop.f32.mrb[58].mxu0  ;;  %v13634_v14 = vpop.f32.mrb[57].mxu1  ;;  %13914 = vmatpush3.bf16.msra.mxu0 %v15175_v8 }
 0x2d9   : > { %v13615_v15 = vpop.f32.mrb[59].mxu0  ;;  %v13635_v17 = vadd.f32 %v13634_v14, %v13633_v9  ;;  %v13636_v18 = vpop.f32.mrb[58].mxu1  ;;  %13915 = vmatprep.subr.bf16.mxu0 %v15177_v13  ;;  %13936 = vmatpush3.bf16.msra.mxu1 %v15176_v12  ;;  %v15212_v12 = vld [vmem:[%s15714_s23 + $0x1630] sm:$0xff]  }
 0x2da   : > { %v10424_v16 = vadd.f32 %v13613_v10, %v16486_v31  ;;  %v13637_v20 = vpop.f32.mrb[59].mxu1  ;;  %13937 = vmatprep.subr.bf16.mxu1 %v15178_v19  ;;  %v15184_v31 = vld [vmem:[%s15714_s23 + $0x15b8] sm:$0xff]   ;;  %v15211_v10 = vld [vmem:[%s15714_s23 + $0x16f0] sm:$0xff]  }
 0x2db   : > { %v15213_v14 = vld [vmem:[%s15714_s23 + $0x16b0] sm:$0xff]   ;;  %v15214_v15 = vld [vmem:[%s15714_s23 + $0x1678] sm:$0xff]  }
 0x2dc   : > { %v16524_v22 = vadd.f32 %v13635_v17, %v10424_v16  ;;  %13916 = vmatpush3.bf16.msra.mxu0 %v15179_v21  ;;  %v15215_v16 = vld [vmem:[%s15714_s23 + $0x16f8] sm:$0xff]   ;;  %v235_v18 = vld [vmem:[%s15709_s7 + $0xb0] sm:$0xff] }
 0x2dd   : > { %13917 = vmatprep.subr.bf16.mxu0 %v15181_v24  ;;  %13938 = vmatpush3.bf16.msra.mxu1 %v15180_v23  ;;  %v15216_v17 = vld [vmem:[%s15714_s23 + $0x1638] sm:$0xff]   ;;  %v658_v20 = vrot.slane %v235_v18, %v15753_v42  ;;  %v651_v21 = vcombine.high %v235_v18, %v235_v18  ;;  %v15254_v18 = vld [vmem:[%s15714_s23 + $0x1800] sm:$0xff]  }
 0x2de   : > { %13939 = vmatprep.subr.bf16.mxu1 %v15182_v25  ;;  %v15217_v19 = vld [vmem:[%s15714_s23 + $0x16b8] sm:$0xff]   ;;  %v15220_v25 = vld [vmem:[%s15714_s23 + $0x17c0] sm:$0xff]  }
 0x2df   : > { %v666_v23 = vcombine.high %v658_v20, %v658_v20  ;;  %v665_v24 = vrot.slane %v651_v21, %v15753_v42  ;;  %v15255_v21 = vld [vmem:[%s15714_s23 + $0x1880] sm:$0xff]  }
 0x2e0   : > { %13918 = vmatpush3.bf16.msra.mxu0 %v15183_v26  ;;  %v1037_v26 = vpack.c.bf16 %v658_v20, %v658_v20 }
 0x2e1   : > { %13947 = vmatprep.subr.bf16.mxu0 %v15186_v30  ;;  %13940 = vmatpush3.bf16.msra.mxu1 %v15184_v31  ;;  %v1038_v28 = vpack.c.bf16 %v666_v23, %v666_v23  ;;  %v667_v29 = vcombine.high %v665_v24, %v665_v24  ;;  %v15222_v30 = vld [vmem:[%s15714_s23 + $0x1780] sm:$0xff]   ;;  %v1039_v31 = vpack.c.bf16 %v665_v24, %v665_v24  ;;  %v15256_v23 = vld [vmem:[%s15714_s23 + $0x1848] sm:$0xff]  }
 0x2e2   : > { %13969 = vmatprep.subr.bf16.mxu1 %v15187_v34  ;;  %v15224_v34 = vld [vmem:[%s15714_s23 + $0x17c8] sm:$0xff]  }
 0x2e3   : > { %10982 = vmatmul.mubr.bf16.vlgmr.msra.gmra.mrb[84].mxu0 %v1033_v35  ;;  %v1040_v33 = vpack.c.bf16 %v667_v29, %v667_v29  ;;  %v15225_v35 = vld [vmem:[%s15714_s23 + $0x1708] sm:$0xff]   ;;  %v15261_v29 = vld [vmem:[%s15714_s23 + $0x18d0] sm:$0xff]  }
 0x2e4   : > { %13948 = vmatpush3.bf16.msra.mxu0 %v15188_v36  ;;  %11022 = vmatmul.mubr.bf16.vlgmr.msra.gmra.mrb[84].mxu1 %v1035_v40  ;;  %v15226_v36 = vld [vmem:[%s15714_s23 + $0x1788] sm:$0xff]   ;;  %v15230_v40 = vld [vmem:[%s15714_s23 + $0x1790] sm:$0xff]  }
 0x2e5   : > { %13949 = vmatprep.subr.bf16.mxu0 %v15190_v41  ;;  %13970 = vmatpush3.bf16.msra.mxu1 %v15189_v39  ;;  %v15229_v39 = vld [vmem:[%s15714_s23 + $0x1710] sm:$0xff]   ;;  %v15231_v41 = vld [vmem:[%s15714_s23 + $0x1758] sm:$0xff]  }
 0x2e6   : > { %13971 = vmatprep.subr.bf16.mxu1 %v15191_v44  ;;  %11061 = vmatprep.mubr.bf16.mxu0 %v1038_v28  ;;  %v15233_v44 = vld [vmem:[%s15714_s23 + $0x1718] sm:$0xff]   ;;  %v15260_v28 = vld [vmem:[%s15714_s23 + $0x1850] sm:$0xff]  }
 0x2e7   : > { %11101 = vmatprep.mubr.bf16.mxu1 %v1040_v33  ;;  %v15265_v33 = vld [vmem:[%s15714_s23 + $0x18d8] sm:$0xff]  }
 0x2e8   : > { %13950 = vmatpush3.bf16.msra.mxu0 %v15192_v45  ;;  %v15234_v45 = vld [vmem:[%s15714_s23 + $0x1798] sm:$0xff]  }
 0x2e9   : > { %13951 = vmatprep.subr.bf16.mxu0 %v15194_v47  ;;  %13972 = vmatpush3.bf16.msra.mxu1 %v15193_v46  ;;  %v15235_v46 = vld [vmem:[%s15714_s23 + $0x1760] sm:$0xff]  }
 0x2ea   : > { %13973 = vmatprep.subr.bf16.mxu1 %v15195_v48  ;;  %v15236_v47 = vld [vmem:[%s15714_s23 + $0x17e0] sm:$0xff]  }
 0x2eb   : > { %v15237_v48 = vld [vmem:[%s15714_s23 + $0x1720] sm:$0xff]  }
 0x2ec   : > { %13952 = vmatpush3.bf16.msra.mxu0 %v15196_v49  ;;  %v15238_v49 = vld [vmem:[%s15714_s23 + $0x17a0] sm:$0xff]  }
 0x2ed   : > { %13953 = vmatprep.subr.bf16.mxu0 %v15198_v51  ;;  %13974 = vmatpush3.bf16.msra.mxu1 %v15197_v50  ;;  %v15239_v50 = vld [vmem:[%s15714_s23 + $0x1768] sm:$0xff]  }
 0x2ee   : > { %13975 = vmatprep.subr.bf16.mxu1 %v15199_v52  ;;  %v15240_v52 = vld [vmem:[%s15714_s23 + $0x17e8] sm:$0xff]  }
 0x2f0   : > { %13954 = vmatpush3.bf16.msra.mxu0 %v15200_v53 }
 0x2f1   : > { %13955 = vmatprep.subr.bf16.mxu0 %v15202_v55  ;;  %13976 = vmatpush3.bf16.msra.mxu1 %v15201_v54  ;;  %v15241_v54 = vld [vmem:[%s15714_s23 + $0x1728] sm:$0xff]  }
 0x2f2   : > { %13977 = vmatprep.subr.bf16.mxu1 %v15203_v56 }
 0x2f4   : > { %13956 = vmatpush3.bf16.msra.mxu0 %v15204_v57 }
 0x2f5   : > { %13957 = vmatprep.subr.bf16.mxu0 %v15206_v59  ;;  %13978 = vmatpush3.bf16.msra.mxu1 %v15205_v58  ;;  %v15242_v59 = vld [vmem:[%s15714_s23 + $0x17a8] sm:$0xff]  }
 0x2f6   : > { %v13655_v60 = vpop.f32.mrb[60].mxu0  ;;  %13979 = vmatprep.subr.bf16.mxu1 %v15207_v61  ;;  %v15243_v61 = vld [vmem:[%s15714_s23 + $0x1770] sm:$0xff]  }
 0x2f7   : > { %v13656_v62 = vpop.f32.mrb[61].mxu0  ;;  %v13677_v0 = vpop.f32.mrb[60].mxu1 }
 0x2f8   : > { %v13657_v1 = vadd.f32 %v13656_v62, %v13655_v60  ;;  %v13658_v2 = vpop.f32.mrb[62].mxu0  ;;  %v13678_v5 = vpop.f32.mrb[61].mxu1  ;;  %13958 = vmatpush3.bf16.msra.mxu0 %v15208_v63 }
 0x2f9   : > { %v13659_v6 = vpop.f32.mrb[63].mxu0  ;;  %v13679_v8 = vadd.f32 %v13678_v5, %v13677_v0  ;;  %v13680_v9 = vpop.f32.mrb[62].mxu1  ;;  %13959 = vmatprep.subr.bf16.mxu0 %v15210_v4  ;;  %13980 = vmatpush3.bf16.msra.mxu1 %v15209_v3  ;;  %v15245_v3 = vld [vmem:[%s15714_s23 + $0x1730] sm:$0xff]   ;;  %v15247_v5 = vld [vmem:[%s15714_s23 + $0x1778] sm:$0xff]  }
 0x2fa   : > { %v10504_v7 = vadd.f32 %v13657_v1, %v16524_v22  ;;  %v13681_v11 = vpop.f32.mrb[63].mxu1  ;;  %13981 = vmatprep.subr.bf16.mxu1 %v15211_v10  ;;  %v15219_v22 = vld [vmem:[%s15714_s23 + $0x1740] sm:$0xff]   ;;  %v15244_v1 = vld [vmem:[%s15714_s23 + $0x17f0] sm:$0xff]   ;;  %v236_v9 = vld [vmem:[%s15709_s7 + $0xb8] sm:$0xff] }
 0x2fb   : > { %v15246_v6 = vld [vmem:[%s15714_s23 + $0x17b0] sm:$0xff]   ;;  %v675_v10 = vrot.slane %v236_v9, %v15753_v42  ;;  %v668_v11 = vcombine.high %v236_v9, %v236_v9  ;;  %v15287_v9 = vld [vmem:[%s15714_s23 + $0x1900] sm:$0xff]  }
 0x2fc   : > { %v16562_v13 = vadd.f32 %v13679_v8, %v10504_v7  ;;  %13960 = vmatpush3.bf16.msra.mxu0 %v15212_v12  ;;  %v15248_v7 = vld [vmem:[%s15714_s23 + $0x17f8] sm:$0xff]   ;;  %v15252_v12 = vld [vmem:[%s15714_s23 + $0x1840] sm:$0xff]  }
 0x2fd   : > { %13961 = vmatprep.subr.bf16.mxu0 %v15214_v15  ;;  %13982 = vmatpush3.bf16.msra.mxu1 %v15213_v14  ;;  %v15249_v8 = vld [vmem:[%s15714_s23 + $0x1738] sm:$0xff]   ;;  %v683_v14 = vcombine.high %v675_v10, %v675_v10  ;;  %v682_v15 = vrot.slane %v668_v11, %v15753_v42 }
 0x2fe   : > { %13983 = vmatprep.subr.bf16.mxu1 %v15215_v16  ;;  %v15253_v16 = vld [vmem:[%s15714_s23 + $0x18c0] sm:$0xff]  }
 0x2ff   : > { %v684_v20 = vcombine.high %v682_v15, %v682_v15 }
 0x300   : > { %13962 = vmatpush3.bf16.msra.mxu0 %v15216_v17  ;;  %v1041_v17 = vpack.c.bf16 %v675_v10, %v675_v10 }
 0x301   : > { %13991 = vmatprep.subr.bf16.mxu0 %v15219_v22  ;;  %13984 = vmatpush3.bf16.msra.mxu1 %v15217_v19  ;;  %v1042_v19 = vpack.c.bf16 %v683_v14, %v683_v14  ;;  %v1043_v22 = vpack.c.bf16 %v682_v15, %v682_v15  ;;  %v1044_v24 = vpack.c.bf16 %v684_v20, %v684_v20  ;;  %v15289_v14 = vld [vmem:[%s15714_s23 + $0x1948] sm:$0xff]   ;;  %v15294_v20 = vld [vmem:[%s15714_s23 + $0x19d0] sm:$0xff]  }
 0x302   : > { %14013 = vmatprep.subr.bf16.mxu1 %v15220_v25  ;;  %v15257_v25 = vld [vmem:[%s15714_s23 + $0x18c8] sm:$0xff]  }
 0x303   : > { %11062 = vmatmul.mubr.bf16.vlgmr.msra.gmra.mrb[88].mxu0 %v1037_v26  ;;  %v15258_v26 = vld [vmem:[%s15714_s23 + $0x1808] sm:$0xff]  }
 0x304   : > { %13992 = vmatpush3.bf16.msra.mxu0 %v15221_v27  ;;  %11102 = vmatmul.mubr.bf16.vlgmr.msra.gmra.mrb[88].mxu1 %v1039_v31  ;;  %v15259_v27 = vld [vmem:[%s15714_s23 + $0x1888] sm:$0xff]   ;;  %v15263_v31 = vld [vmem:[%s15714_s23 + $0x1890] sm:$0xff]  }
 0x305   : > { %13993 = vmatprep.subr.bf16.mxu0 %v15223_v32  ;;  %14014 = vmatpush3.bf16.msra.mxu1 %v15222_v30  ;;  %v15262_v30 = vld [vmem:[%s15714_s23 + $0x1810] sm:$0xff]   ;;  %v15264_v32 = vld [vmem:[%s15714_s23 + $0x1858] sm:$0xff]  }
 0x306   : > { %14015 = vmatprep.subr.bf16.mxu1 %v15224_v34  ;;  %11141 = vmatprep.mubr.bf16.mxu0 %v1042_v19  ;;  %v15266_v34 = vld [vmem:[%s15714_s23 + $0x1818] sm:$0xff]   ;;  %v15293_v19 = vld [vmem:[%s15714_s23 + $0x1950] sm:$0xff]  }
 0x307   : > { %11181 = vmatprep.mubr.bf16.mxu1 %v1044_v24  ;;  %v15298_v24 = vld [vmem:[%s15714_s23 + $0x19d8] sm:$0xff]  }
 0x308   : > { %13994 = vmatpush3.bf16.msra.mxu0 %v15225_v35  ;;  %v15267_v35 = vld [vmem:[%s15714_s23 + $0x1898] sm:$0xff]  }
 0x309   : > { %13995 = vmatprep.subr.bf16.mxu0 %v15227_v37  ;;  %14016 = vmatpush3.bf16.msra.mxu1 %v15226_v36  ;;  %v15268_v36 = vld [vmem:[%s15714_s23 + $0x1860] sm:$0xff]  }
 0x30a   : > { %14017 = vmatprep.subr.bf16.mxu1 %v15228_v38  ;;  %v15269_v37 = vld [vmem:[%s15714_s23 + $0x18e0] sm:$0xff]  }
 0x30b   : > { %v15270_v38 = vld [vmem:[%s15714_s23 + $0x1820] sm:$0xff]  }
 0x30c   : > { %13996 = vmatpush3.bf16.msra.mxu0 %v15229_v39  ;;  %v15271_v39 = vld [vmem:[%s15714_s23 + $0x18a0] sm:$0xff]  }
 0x30d   : > { %13997 = vmatprep.subr.bf16.mxu0 %v15231_v41  ;;  %14018 = vmatpush3.bf16.msra.mxu1 %v15230_v40  ;;  %v15272_v40 = vld [vmem:[%s15714_s23 + $0x1868] sm:$0xff]  }
 0x30e   : > { %14019 = vmatprep.subr.bf16.mxu1 %v15232_v43  ;;  %v15273_v43 = vld [vmem:[%s15714_s23 + $0x18e8] sm:$0xff]  }
 0x310   : > { %13998 = vmatpush3.bf16.msra.mxu0 %v15233_v44 }
 0x311   : > { %13999 = vmatprep.subr.bf16.mxu0 %v15235_v46  ;;  %14020 = vmatpush3.bf16.msra.mxu1 %v15234_v45  ;;  %v15274_v45 = vld [vmem:[%s15714_s23 + $0x1828] sm:$0xff]  }
 0x312   : > { %14021 = vmatprep.subr.bf16.mxu1 %v15236_v47 }
 0x314   : > { %14000 = vmatpush3.bf16.msra.mxu0 %v15237_v48 }
 0x315   : > { %14001 = vmatprep.subr.bf16.mxu0 %v15239_v50  ;;  %14022 = vmatpush3.bf16.msra.mxu1 %v15238_v49  ;;  %v15275_v49 = vld [vmem:[%s15714_s23 + $0x18a8] sm:$0xff]   ;;  %v15276_v50 = vld [vmem:[%s15714_s23 + $0x1870] sm:$0xff]  }
 0x316   : > { %v13699_v51 = vpop.f32.mrb[64].mxu0  ;;  %14023 = vmatprep.subr.bf16.mxu1 %v15240_v52 }
 0x317   : > { %v13700_v53 = vpop.f32.mrb[65].mxu0  ;;  %v13721_v55 = vpop.f32.mrb[64].mxu1 }
 0x318   : > { %v13701_v56 = vadd.f32 %v13700_v53, %v13699_v51  ;;  %v13702_v57 = vpop.f32.mrb[66].mxu0  ;;  %v13722_v58 = vpop.f32.mrb[65].mxu1  ;;  %14002 = vmatpush3.bf16.msra.mxu0 %v15241_v54 }
 0x319   : > { %v13703_v60 = vpop.f32.mrb[67].mxu0  ;;  %v13723_v63 = vadd.f32 %v13722_v58, %v13721_v55  ;;  %v13724_v0 = vpop.f32.mrb[66].mxu1  ;;  %14003 = vmatprep.subr.bf16.mxu0 %v15243_v61  ;;  %14024 = vmatpush3.bf16.msra.mxu1 %v15242_v59  ;;  %v15278_v58 = vld [vmem:[%s15714_s23 + $0x1830] sm:$0xff]   ;;  %v15280_v61 = vld [vmem:[%s15714_s23 + $0x1878] sm:$0xff]  }
 0x31a   : > { %v10584_v62 = vadd.f32 %v13701_v56, %v16562_v13  ;;  %v13725_v2 = vpop.f32.mrb[67].mxu1  ;;  %14025 = vmatprep.subr.bf16.mxu1 %v15244_v1  ;;  %v15250_v13 = vld [vmem:[%s15714_s23 + $0x17b8] sm:$0xff]   ;;  %v15277_v56 = vld [vmem:[%s15714_s23 + $0x18f0] sm:$0xff]   ;;  %v237_v0 = vld [vmem:[%s15709_s7 + $0xc0] sm:$0xff] }
 0x31b   : > { %v15279_v60 = vld [vmem:[%s15714_s23 + $0x18b0] sm:$0xff]   ;;  %v692_v1 = vrot.slane %v237_v0, %v15753_v42  ;;  %v685_v2 = vcombine.high %v237_v0, %v237_v0  ;;  %v15320_v0 = vld [vmem:[%s15714_s23 + $0x1a00] sm:$0xff]  }
 0x31c   : > { %v16600_v4 = vadd.f32 %v13723_v63, %v10584_v62  ;;  %14004 = vmatpush3.bf16.msra.mxu0 %v15245_v3  ;;  %v15281_v62 = vld [vmem:[%s15714_s23 + $0x18f8] sm:$0xff]   ;;  %v15285_v3 = vld [vmem:[%s15714_s23 + $0x1940] sm:$0xff]  }
 0x31d   : > { %14005 = vmatprep.subr.bf16.mxu0 %v15247_v5  ;;  %14026 = vmatpush3.bf16.msra.mxu1 %v15246_v6  ;;  %v15282_v63 = vld [vmem:[%s15714_s23 + $0x1838] sm:$0xff]   ;;  %v700_v5 = vcombine.high %v692_v1, %v692_v1  ;;  %v699_v6 = vrot.slane %v685_v2, %v15753_v42 }
 0x31e   : > { %14027 = vmatprep.subr.bf16.mxu1 %v15248_v7  ;;  %v15286_v7 = vld [vmem:[%s15714_s23 + $0x19c0] sm:$0xff]  }
 0x31f   : > { %v1046_v10 = vpack.c.bf16 %v700_v5, %v700_v5  ;;  %v701_v11 = vcombine.high %v699_v6, %v699_v6  ;;  %v15322_v5 = vld [vmem:[%s15714_s23 + $0x1a48] sm:$0xff]  }
 0x320   : > { %14006 = vmatpush3.bf16.msra.mxu0 %v15249_v8  ;;  %v1045_v8 = vpack.c.bf16 %v692_v1, %v692_v1 }
 0x321   : > { %14035 = vmatprep.subr.bf16.mxu0 %v15252_v12  ;;  %14028 = vmatpush3.bf16.msra.mxu1 %v15250_v13  ;;  %v15288_v12 = vld [vmem:[%s15714_s23 + $0x1980] sm:$0xff]   ;;  %v1047_v13 = vpack.c.bf16 %v699_v6, %v699_v6  ;;  %v1048_v15 = vpack.c.bf16 %v701_v11, %v701_v11  ;;  %v15327_v11 = vld [vmem:[%s15714_s23 + $0x1ad0] sm:$0xff]  }
 0x322   : > { %14057 = vmatprep.subr.bf16.mxu1 %v15253_v16  ;;  %v15290_v16 = vld [vmem:[%s15714_s23 + $0x19c8] sm:$0xff]  }
 0x323   : > { %11142 = vmatmul.mubr.bf16.vlgmr.msra.gmra.mrb[92].mxu0 %v1041_v17  ;;  %v15291_v17 = vld [vmem:[%s15714_s23 + $0x1908] sm:$0xff]  }
 0x324   : > { %14036 = vmatpush3.bf16.msra.mxu0 %v15254_v18  ;;  %11182 = vmatmul.mubr.bf16.vlgmr.msra.gmra.mrb[92].mxu1 %v1043_v22  ;;  %v15292_v18 = vld [vmem:[%s15714_s23 + $0x1988] sm:$0xff]   ;;  %v15296_v22 = vld [vmem:[%s15714_s23 + $0x1990] sm:$0xff]  }
 0x325   : > { %14037 = vmatprep.subr.bf16.mxu0 %v15256_v23  ;;  %14058 = vmatpush3.bf16.msra.mxu1 %v15255_v21  ;;  %v15295_v21 = vld [vmem:[%s15714_s23 + $0x1910] sm:$0xff]   ;;  %v15297_v23 = vld [vmem:[%s15714_s23 + $0x1958] sm:$0xff]  }
 0x326   : > { %14059 = vmatprep.subr.bf16.mxu1 %v15257_v25  ;;  %11221 = vmatprep.mubr.bf16.mxu0 %v1046_v10  ;;  %v15299_v25 = vld [vmem:[%s15714_s23 + $0x1918] sm:$0xff]   ;;  %v15326_v10 = vld [vmem:[%s15714_s23 + $0x1a50] sm:$0xff]  }
 0x327   : > { %11261 = vmatprep.mubr.bf16.mxu1 %v1048_v15  ;;  %v15331_v15 = vld [vmem:[%s15714_s23 + $0x1ad8] sm:$0xff]  }
 0x328   : > { %14038 = vmatpush3.bf16.msra.mxu0 %v15258_v26  ;;  %v15300_v26 = vld [vmem:[%s15714_s23 + $0x1998] sm:$0xff]  }
 0x329   : > { %14039 = vmatprep.subr.bf16.mxu0 %v15260_v28  ;;  %14060 = vmatpush3.bf16.msra.mxu1 %v15259_v27  ;;  %v15301_v27 = vld [vmem:[%s15714_s23 + $0x1960] sm:$0xff]  }
 0x32a   : > { %14061 = vmatprep.subr.bf16.mxu1 %v15261_v29  ;;  %v15302_v28 = vld [vmem:[%s15714_s23 + $0x19e0] sm:$0xff]  }
 0x32b   : > { %v15303_v29 = vld [vmem:[%s15714_s23 + $0x1920] sm:$0xff]  }
 0x32c   : > { %14040 = vmatpush3.bf16.msra.mxu0 %v15262_v30  ;;  %v15304_v30 = vld [vmem:[%s15714_s23 + $0x19a0] sm:$0xff]  }
 0x32d   : > { %14041 = vmatprep.subr.bf16.mxu0 %v15264_v32  ;;  %14062 = vmatpush3.bf16.msra.mxu1 %v15263_v31  ;;  %v15305_v31 = vld [vmem:[%s15714_s23 + $0x1968] sm:$0xff]  }
 0x32e   : > { %14063 = vmatprep.subr.bf16.mxu1 %v15265_v33  ;;  %v15306_v33 = vld [vmem:[%s15714_s23 + $0x19e8] sm:$0xff]  }
 0x330   : > { %14042 = vmatpush3.bf16.msra.mxu0 %v15266_v34 }
 0x331   : > { %14043 = vmatprep.subr.bf16.mxu0 %v15268_v36  ;;  %14064 = vmatpush3.bf16.msra.mxu1 %v15267_v35  ;;  %v15307_v35 = vld [vmem:[%s15714_s23 + $0x1928] sm:$0xff]  }
 0x332   : > { %14065 = vmatprep.subr.bf16.mxu1 %v15269_v37 }
 0x334   : > { %14044 = vmatpush3.bf16.msra.mxu0 %v15270_v38 }
 0x335   : > { %14045 = vmatprep.subr.bf16.mxu0 %v15272_v40  ;;  %14066 = vmatpush3.bf16.msra.mxu1 %v15271_v39  ;;  %v15308_v39 = vld [vmem:[%s15714_s23 + $0x19a8] sm:$0xff]   ;;  %v15309_v40 = vld [vmem:[%s15714_s23 + $0x1970] sm:$0xff]  }
 0x336   : > { %v13743_v41 = vpop.f32.mrb[68].mxu0  ;;  %14067 = vmatprep.subr.bf16.mxu1 %v15273_v43 }
 0x337   : > { %v13744_v44 = vpop.f32.mrb[69].mxu0  ;;  %v13765_v46 = vpop.f32.mrb[68].mxu1 }
 0x338   : > { %v13745_v47 = vadd.f32 %v13744_v44, %v13743_v41  ;;  %v13746_v48 = vpop.f32.mrb[70].mxu0  ;;  %v13766_v51 = vpop.f32.mrb[69].mxu1  ;;  %14046 = vmatpush3.bf16.msra.mxu0 %v15274_v45 }
 0x339   : > { %v13747_v52 = vpop.f32.mrb[71].mxu0  ;;  %v13767_v54 = vadd.f32 %v13766_v51, %v13765_v46  ;;  %v13768_v55 = vpop.f32.mrb[70].mxu1  ;;  %14047 = vmatprep.subr.bf16.mxu0 %v15276_v50  ;;  %14068 = vmatpush3.bf16.msra.mxu1 %v15275_v49  ;;  %v15311_v49 = vld [vmem:[%s15714_s23 + $0x1930] sm:$0xff]  }
 0x33a   : > { %v10664_v53 = vadd.f32 %v13745_v47, %v16600_v4  ;;  %v13769_v57 = vpop.f32.mrb[71].mxu1  ;;  %14069 = vmatprep.subr.bf16.mxu1 %v15277_v56  ;;  %v15283_v4 = vld [vmem:[%s15714_s23 + $0x18b8] sm:$0xff]   ;;  %v15310_v47 = vld [vmem:[%s15714_s23 + $0x19f0] sm:$0xff]   ;;  %v238_v55 = vld [vmem:[%s15709_s7 + $0xc8] sm:$0xff] }
 0x33b   : > { %v15312_v51 = vld [vmem:[%s15714_s23 + $0x19b0] sm:$0xff]   ;;  %v15313_v52 = vld [vmem:[%s15714_s23 + $0x1978] sm:$0xff]   ;;  %v709_v57 = vrot.slane %v238_v55, %v15753_v42 }
 0x33c   : > { %v16638_v59 = vadd.f32 %v13767_v54, %v10664_v53  ;;  %14048 = vmatpush3.bf16.msra.mxu0 %v15278_v58  ;;  %v15314_v53 = vld [vmem:[%s15714_s23 + $0x19f8] sm:$0xff]   ;;  %v702_v58 = vcombine.high %v238_v55, %v238_v55  ;;  %v15353_v55 = vld [vmem:[%s15714_s23 + $0x1b00] sm:$0xff]  }
 0x33d   : > { %14049 = vmatprep.subr.bf16.mxu0 %v15280_v61  ;;  %14070 = vmatpush3.bf16.msra.mxu1 %v15279_v60  ;;  %v15315_v54 = vld [vmem:[%s15714_s23 + $0x1938] sm:$0xff]   ;;  %v717_v60 = vcombine.high %v709_v57, %v709_v57 }
 0x33e   : > { %14071 = vmatprep.subr.bf16.mxu1 %v15281_v62  ;;  %v15316_v56 = vld [vmem:[%s15714_s23 + $0x19b8] sm:$0xff]   ;;  %v716_v61 = vrot.slane %v702_v58, %v15753_v42  ;;  %v15319_v62 = vld [vmem:[%s15714_s23 + $0x1ac0] sm:$0xff]  }
 0x33f   : > { %v1050_v1 = vpack.c.bf16 %v717_v60, %v717_v60  ;;  %v15354_v58 = vld [vmem:[%s15714_s23 + $0x1b80] sm:$0xff]   ;;  %v15355_v60 = vld [vmem:[%s15714_s23 + $0x1b48] sm:$0xff]  }
 0x340   : > { %14050 = vmatpush3.bf16.msra.mxu0 %v15282_v63  ;;  %v1049_v63 = vpack.c.bf16 %v709_v57, %v709_v57  ;;  %v718_v2 = vcombine.high %v716_v61, %v716_v61 }
 0x341   : > { %14079 = vmatprep.subr.bf16.mxu0 %v15285_v3  ;;  %14072 = vmatpush3.bf16.msra.mxu1 %v15283_v4  ;;  %v15321_v3 = vld [vmem:[%s15714_s23 + $0x1a80] sm:$0xff]   ;;  %v1051_v4 = vpack.c.bf16 %v716_v61, %v716_v61 }
 0x342   : > { %14101 = vmatprep.subr.bf16.mxu1 %v15286_v7  ;;  %v1052_v6 = vpack.c.bf16 %v718_v2, %v718_v2  ;;  %v15323_v7 = vld [vmem:[%s15714_s23 + $0x1ac8] sm:$0xff]   ;;  %v15360_v2 = vld [vmem:[%s15714_s23 + $0x1bd0] sm:$0xff]  }
 0x343   : > { %11222 = vmatmul.mubr.bf16.vlgmr.msra.gmra.mrb[96].mxu0 %v1045_v8  ;;  %v15324_v8 = vld [vmem:[%s15714_s23 + $0x1a08] sm:$0xff]  }
 0x344   : > { %14080 = vmatpush3.bf16.msra.mxu0 %v15287_v9  ;;  %11262 = vmatmul.mubr.bf16.vlgmr.msra.gmra.mrb[96].mxu1 %v1047_v13  ;;  %v15325_v9 = vld [vmem:[%s15714_s23 + $0x1a88] sm:$0xff]   ;;  %v15329_v13 = vld [vmem:[%s15714_s23 + $0x1a90] sm:$0xff]  }
 0x345   : > { %14081 = vmatprep.subr.bf16.mxu0 %v15289_v14  ;;  %14102 = vmatpush3.bf16.msra.mxu1 %v15288_v12  ;;  %v15328_v12 = vld [vmem:[%s15714_s23 + $0x1a10] sm:$0xff]   ;;  %v15330_v14 = vld [vmem:[%s15714_s23 + $0x1a58] sm:$0xff]  }
 0x346   : > { %14103 = vmatprep.subr.bf16.mxu1 %v15290_v16  ;;  %11301 = vmatprep.mubr.bf16.mxu0 %v1050_v1  ;;  %v15332_v16 = vld [vmem:[%s15714_s23 + $0x1a18] sm:$0xff]   ;;  %v15359_v1 = vld [vmem:[%s15714_s23 + $0x1b50] sm:$0xff]  }
 0x347   : > { %11341 = vmatprep.mubr.bf16.mxu1 %v1052_v6  ;;  %v15364_v6 = vld [vmem:[%s15714_s23 + $0x1bd8] sm:$0xff]  }
 0x348   : > { %14082 = vmatpush3.bf16.msra.mxu0 %v15291_v17  ;;  %v15333_v17 = vld [vmem:[%s15714_s23 + $0x1a98] sm:$0xff]  }
 0x349   : > { %14083 = vmatprep.subr.bf16.mxu0 %v15293_v19  ;;  %14104 = vmatpush3.bf16.msra.mxu1 %v15292_v18  ;;  %v15334_v18 = vld [vmem:[%s15714_s23 + $0x1a60] sm:$0xff]  }
 0x34a   : > { %14105 = vmatprep.subr.bf16.mxu1 %v15294_v20  ;;  %v15335_v19 = vld [vmem:[%s15714_s23 + $0x1ae0] sm:$0xff]  }
 0x34b   : > { %v15336_v20 = vld [vmem:[%s15714_s23 + $0x1a20] sm:$0xff]  }
 0x34c   : > { %14084 = vmatpush3.bf16.msra.mxu0 %v15295_v21  ;;  %v15337_v21 = vld [vmem:[%s15714_s23 + $0x1aa0] sm:$0xff]  }
 0x34d   : > { %14085 = vmatprep.subr.bf16.mxu0 %v15297_v23  ;;  %14106 = vmatpush3.bf16.msra.mxu1 %v15296_v22  ;;  %v15338_v22 = vld [vmem:[%s15714_s23 + $0x1a68] sm:$0xff]  }
 0x34e   : > { %14107 = vmatprep.subr.bf16.mxu1 %v15298_v24  ;;  %v15339_v24 = vld [vmem:[%s15714_s23 + $0x1ae8] sm:$0xff]  }
 0x350   : > { %14086 = vmatpush3.bf16.msra.mxu0 %v15299_v25 }
 0x351   : > { %14087 = vmatprep.subr.bf16.mxu0 %v15301_v27  ;;  %14108 = vmatpush3.bf16.msra.mxu1 %v15300_v26  ;;  %v15340_v26 = vld [vmem:[%s15714_s23 + $0x1a28] sm:$0xff]  }
 0x352   : > { %14109 = vmatprep.subr.bf16.mxu1 %v15302_v28 }
 0x354   : > { %14088 = vmatpush3.bf16.msra.mxu0 %v15303_v29 }
 0x355   : > { %14089 = vmatprep.subr.bf16.mxu0 %v15305_v31  ;;  %14110 = vmatpush3.bf16.msra.mxu1 %v15304_v30  ;;  %v15341_v31 = vld [vmem:[%s15714_s23 + $0x1aa8] sm:$0xff]  }
 0x356   : > { %v13787_v32 = vpop.f32.mrb[72].mxu0  ;;  %14111 = vmatprep.subr.bf16.mxu1 %v15306_v33  ;;  %v15342_v33 = vld [vmem:[%s15714_s23 + $0x1a70] sm:$0xff]  }
 0x357   : > { %v13788_v34 = vpop.f32.mrb[73].mxu0  ;;  %v13809_v36 = vpop.f32.mrb[72].mxu1 }
 0x358   : > { %v13789_v37 = vadd.f32 %v13788_v34, %v13787_v32  ;;  %v13790_v38 = vpop.f32.mrb[74].mxu0  ;;  %v13810_v41 = vpop.f32.mrb[73].mxu1  ;;  %14090 = vmatpush3.bf16.msra.mxu0 %v15307_v35 }
 0x359   : > { %v13791_v43 = vpop.f32.mrb[75].mxu0  ;;  %v13811_v45 = vadd.f32 %v13810_v41, %v13809_v36  ;;  %v13812_v46 = vpop.f32.mrb[74].mxu1  ;;  %14091 = vmatprep.subr.bf16.mxu0 %v15309_v40  ;;  %14112 = vmatpush3.bf16.msra.mxu1 %v15308_v39  ;;  %v15344_v39 = vld [vmem:[%s15714_s23 + $0x1a30] sm:$0xff]   ;;  %v15346_v41 = vld [vmem:[%s15714_s23 + $0x1a78] sm:$0xff]  }
 0x35a   : > { %v10744_v44 = vadd.f32 %v13789_v37, %v16638_v59  ;;  %v13813_v48 = vpop.f32.mrb[75].mxu1  ;;  %14113 = vmatprep.subr.bf16.mxu1 %v15310_v47  ;;  %v15318_v59 = vld [vmem:[%s15714_s23 + $0x1a40] sm:$0xff]   ;;  %v15343_v37 = vld [vmem:[%s15714_s23 + $0x1af0] sm:$0xff]  }
 0x35b   : > { %v15345_v43 = vld [vmem:[%s15714_s23 + $0x1ab0] sm:$0xff]  }
 0x35c   : > { %v16676_v50 = vadd.f32 %v13811_v45, %v10744_v44  ;;  %14092 = vmatpush3.bf16.msra.mxu0 %v15311_v49  ;;  %v15347_v44 = vld [vmem:[%s15714_s23 + $0x1af8] sm:$0xff]   ;;  %v239_v46 = vld [vmem:[%s15709_s7 + $0xd0] sm:$0xff]  ;;  %v15351_v49 = vld [vmem:[%s15714_s23 + $0x1b40] sm:$0xff]  }
 0x35d   : > { %14093 = vmatprep.subr.bf16.mxu0 %v15313_v52  ;;  %14114 = vmatpush3.bf16.msra.mxu1 %v15312_v51  ;;  %v15348_v45 = vld [vmem:[%s15714_s23 + $0x1a38] sm:$0xff]   ;;  %v726_v47 = vrot.slane %v239_v46, %v15753_v42  ;;  %v719_v48 = vcombine.high %v239_v46, %v239_v46  ;;  %v15386_v46 = vld [vmem:[%s15714_s23 + $0x1c00] sm:$0xff]  }
 0x35e   : > { %14115 = vmatprep.subr.bf16.mxu1 %v15314_v53  ;;  %v15352_v53 = vld [vmem:[%s15714_s23 + $0x1bc0] sm:$0xff]  }
 0x35f   : > { %v734_v51 = vcombine.high %v726_v47, %v726_v47  ;;  %v733_v52 = vrot.slane %v719_v48, %v15753_v42 }
 0x360   : > { %14094 = vmatpush3.bf16.msra.mxu0 %v15315_v54  ;;  %v1053_v54 = vpack.c.bf16 %v726_v47, %v726_v47 }
 0x361   : > { %14123 = vmatprep.subr.bf16.mxu0 %v15318_v59  ;;  %14116 = vmatpush3.bf16.msra.mxu1 %v15316_v56  ;;  %v1054_v56 = vpack.c.bf16 %v734_v51, %v734_v51  ;;  %v735_v57 = vcombine.high %v733_v52, %v733_v52  ;;  %v1055_v59 = vpack.c.bf16 %v733_v52, %v733_v52  ;;  %v15388_v51 = vld [vmem:[%s15714_s23 + $0x1c48] sm:$0xff]  }
 0x362   : > { %14145 = vmatprep.subr.bf16.mxu1 %v15319_v62  ;;  %v15356_v62 = vld [vmem:[%s15714_s23 + $0x1bc8] sm:$0xff]  }
 0x363   : > { %11302 = vmatmul.mubr.bf16.vlgmr.msra.gmra.mrb[100].mxu0 %v1049_v63  ;;  %v1056_v61 = vpack.c.bf16 %v735_v57, %v735_v57  ;;  %v15357_v63 = vld [vmem:[%s15714_s23 + $0x1b08] sm:$0xff]   ;;  %v15393_v57 = vld [vmem:[%s15714_s23 + $0x1cd0] sm:$0xff]  }
 0x364   : > { %14124 = vmatpush3.bf16.msra.mxu0 %v15320_v0  ;;  %11342 = vmatmul.mubr.bf16.vlgmr.msra.gmra.mrb[100].mxu1 %v1051_v4  ;;  %v15358_v0 = vld [vmem:[%s15714_s23 + $0x1b88] sm:$0xff]   ;;  %v15362_v4 = vld [vmem:[%s15714_s23 + $0x1b90] sm:$0xff]  }
 0x365   : > { %14125 = vmatprep.subr.bf16.mxu0 %v15322_v5  ;;  %14146 = vmatpush3.bf16.msra.mxu1 %v15321_v3  ;;  %v15361_v3 = vld [vmem:[%s15714_s23 + $0x1b10] sm:$0xff]   ;;  %v15363_v5 = vld [vmem:[%s15714_s23 + $0x1b58] sm:$0xff]  }
 0x366   : > { %14147 = vmatprep.subr.bf16.mxu1 %v15323_v7  ;;  %11381 = vmatprep.mubr.bf16.mxu0 %v1054_v56  ;;  %v15365_v7 = vld [vmem:[%s15714_s23 + $0x1b18] sm:$0xff]   ;;  %v15392_v56 = vld [vmem:[%s15714_s23 + $0x1c50] sm:$0xff]  }
 0x367   : > { %11421 = vmatprep.mubr.bf16.mxu1 %v1056_v61  ;;  %v15397_v61 = vld [vmem:[%s15714_s23 + $0x1cd8] sm:$0xff]  }
 0x368   : > { %14126 = vmatpush3.bf16.msra.mxu0 %v15324_v8  ;;  %v15366_v8 = vld [vmem:[%s15714_s23 + $0x1b98] sm:$0xff]  }
 0x369   : > { %14127 = vmatprep.subr.bf16.mxu0 %v15326_v10  ;;  %14148 = vmatpush3.bf16.msra.mxu1 %v15325_v9  ;;  %v15367_v9 = vld [vmem:[%s15714_s23 + $0x1b60] sm:$0xff]  }
 0x36a   : > { %14149 = vmatprep.subr.bf16.mxu1 %v15327_v11  ;;  %v15368_v10 = vld [vmem:[%s15714_s23 + $0x1be0] sm:$0xff]  }
 0x36b   : > { %v15369_v11 = vld [vmem:[%s15714_s23 + $0x1b20] sm:$0xff]  }
 0x36c   : > { %14128 = vmatpush3.bf16.msra.mxu0 %v15328_v12  ;;  %v15370_v12 = vld [vmem:[%s15714_s23 + $0x1ba0] sm:$0xff]  }
 0x36d   : > { %14129 = vmatprep.subr.bf16.mxu0 %v15330_v14  ;;  %14150 = vmatpush3.bf16.msra.mxu1 %v15329_v13  ;;  %v15371_v13 = vld [vmem:[%s15714_s23 + $0x1b68] sm:$0xff]  }
 0x36e   : > { %14151 = vmatprep.subr.bf16.mxu1 %v15331_v15  ;;  %v15372_v15 = vld [vmem:[%s15714_s23 + $0x1be8] sm:$0xff]  }
 0x370   : > { %14130 = vmatpush3.bf16.msra.mxu0 %v15332_v16 }
 0x371   : > { %14131 = vmatprep.subr.bf16.mxu0 %v15334_v18  ;;  %14152 = vmatpush3.bf16.msra.mxu1 %v15333_v17  ;;  %v15373_v17 = vld [vmem:[%s15714_s23 + $0x1b28] sm:$0xff]  }
 0x372   : > { %14153 = vmatprep.subr.bf16.mxu1 %v15335_v19 }
 0x374   : > { %14132 = vmatpush3.bf16.msra.mxu0 %v15336_v20 }
 0x375   : > { %14133 = vmatprep.subr.bf16.mxu0 %v15338_v22  ;;  %14154 = vmatpush3.bf16.msra.mxu1 %v15337_v21  ;;  %v15374_v21 = vld [vmem:[%s15714_s23 + $0x1ba8] sm:$0xff]   ;;  %v15375_v22 = vld [vmem:[%s15714_s23 + $0x1b70] sm:$0xff]  }
 0x376   : > { %v13831_v23 = vpop.f32.mrb[76].mxu0  ;;  %14155 = vmatprep.subr.bf16.mxu1 %v15339_v24 }
 0x377   : > { %v13832_v25 = vpop.f32.mrb[77].mxu0  ;;  %v13853_v27 = vpop.f32.mrb[76].mxu1 }
 0x378   : > { %v13833_v28 = vadd.f32 %v13832_v25, %v13831_v23  ;;  %v13834_v29 = vpop.f32.mrb[78].mxu0  ;;  %v13854_v30 = vpop.f32.mrb[77].mxu1  ;;  %14134 = vmatpush3.bf16.msra.mxu0 %v15340_v26 }
 0x379   : > { %v13835_v32 = vpop.f32.mrb[79].mxu0  ;;  %v13855_v35 = vadd.f32 %v13854_v30, %v13853_v27  ;;  %v13856_v36 = vpop.f32.mrb[78].mxu1  ;;  %14135 = vmatprep.subr.bf16.mxu0 %v15342_v33  ;;  %14156 = vmatpush3.bf16.msra.mxu1 %v15341_v31  ;;  %v15377_v30 = vld [vmem:[%s15714_s23 + $0x1b30] sm:$0xff]   ;;  %v15379_v33 = vld [vmem:[%s15714_s23 + $0x1b78] sm:$0xff]  }
 0x37a   : > { %v10824_v34 = vadd.f32 %v13833_v28, %v16676_v50  ;;  %v13857_v38 = vpop.f32.mrb[79].mxu1  ;;  %14157 = vmatprep.subr.bf16.mxu1 %v15343_v37  ;;  %v15349_v50 = vld [vmem:[%s15714_s23 + $0x1ab8] sm:$0xff]   ;;  %v15376_v28 = vld [vmem:[%s15714_s23 + $0x1bf0] sm:$0xff]  }
 0x37b   : > { %v15378_v32 = vld [vmem:[%s15714_s23 + $0x1bb0] sm:$0xff]   ;;  %v240_v36 = vld [vmem:[%s15709_s7 + $0xd8] sm:$0xff] }
 0x37c   : > { %v16714_v40 = vadd.f32 %v13855_v35, %v10824_v34  ;;  %14136 = vmatpush3.bf16.msra.mxu0 %v15344_v39  ;;  %v15380_v34 = vld [vmem:[%s15714_s23 + $0x1bf8] sm:$0xff]   ;;  %v743_v37 = vrot.slane %v240_v36, %v15753_v42  ;;  %v736_v38 = vcombine.high %v240_v36, %v240_v36  ;;  %v15384_v39 = vld [vmem:[%s15714_s23 + $0x1c40] sm:$0xff]  }
 0x37d   : > { %14137 = vmatprep.subr.bf16.mxu0 %v15346_v41  ;;  %14158 = vmatpush3.bf16.msra.mxu1 %v15345_v43  ;;  %v15381_v35 = vld [vmem:[%s15714_s23 + $0x1b38] sm:$0xff]   ;;  %v15419_v36 = vld [vmem:[%s15714_s23 + $0x1d00] sm:$0xff]  }
 0x37e   : > { %14159 = vmatprep.subr.bf16.mxu1 %v15347_v44  ;;  %v751_v41 = vcombine.high %v743_v37, %v743_v37  ;;  %v750_v43 = vrot.slane %v736_v38, %v15753_v42  ;;  %v15385_v44 = vld [vmem:[%s15714_s23 + $0x1cc0] sm:$0xff]  }
 0x380   : > { %14138 = vmatpush3.bf16.msra.mxu0 %v15348_v45  ;;  %v1057_v45 = vpack.c.bf16 %v743_v37, %v743_v37  ;;  %v1058_v47 = vpack.c.bf16 %v751_v41, %v751_v41  ;;  %v752_v48 = vcombine.high %v750_v43, %v750_v43  ;;  %v15421_v41 = vld [vmem:[%s15714_s23 + $0x1d48] sm:$0xff]  }
 0x381   : > { %14167 = vmatprep.subr.bf16.mxu0 %v15351_v49  ;;  %14160 = vmatpush3.bf16.msra.mxu1 %v15349_v50  ;;  %v15387_v49 = vld [vmem:[%s15714_s23 + $0x1c80] sm:$0xff]   ;;  %v1059_v50 = vpack.c.bf16 %v750_v43, %v750_v43 }
 0x382   : > { %14189 = vmatprep.subr.bf16.mxu1 %v15352_v53  ;;  %v1060_v52 = vpack.c.bf16 %v752_v48, %v752_v48  ;;  %v15389_v53 = vld [vmem:[%s15714_s23 + $0x1cc8] sm:$0xff]   ;;  %v15426_v48 = vld [vmem:[%s15714_s23 + $0x1dd0] sm:$0xff]  }
 0x383   : > { %11382 = vmatmul.mubr.bf16.vlgmr.msra.gmra.mrb[104].mxu0 %v1053_v54  ;;  %v15390_v54 = vld [vmem:[%s15714_s23 + $0x1c08] sm:$0xff]  }
 0x384   : > { %14168 = vmatpush3.bf16.msra.mxu0 %v15353_v55  ;;  %11422 = vmatmul.mubr.bf16.vlgmr.msra.gmra.mrb[104].mxu1 %v1055_v59  ;;  %v15391_v55 = vld [vmem:[%s15714_s23 + $0x1c88] sm:$0xff]   ;;  %v15395_v59 = vld [vmem:[%s15714_s23 + $0x1c90] sm:$0xff]  }
 0x385   : > { %14169 = vmatprep.subr.bf16.mxu0 %v15355_v60  ;;  %14190 = vmatpush3.bf16.msra.mxu1 %v15354_v58  ;;  %v15394_v58 = vld [vmem:[%s15714_s23 + $0x1c10] sm:$0xff]   ;;  %v15396_v60 = vld [vmem:[%s15714_s23 + $0x1c58] sm:$0xff]  }
 0x386   : > { %14191 = vmatprep.subr.bf16.mxu1 %v15356_v62  ;;  %11461 = vmatprep.mubr.bf16.mxu0 %v1058_v47  ;;  %v15398_v62 = vld [vmem:[%s15714_s23 + $0x1c18] sm:$0xff]   ;;  %v15425_v47 = vld [vmem:[%s15714_s23 + $0x1d50] sm:$0xff]  }
 0x387   : > { %11501 = vmatprep.mubr.bf16.mxu1 %v1060_v52  ;;  %v15430_v52 = vld [vmem:[%s15714_s23 + $0x1dd8] sm:$0xff]  }
 0x388   : > { %14170 = vmatpush3.bf16.msra.mxu0 %v15357_v63  ;;  %v15399_v63 = vld [vmem:[%s15714_s23 + $0x1c98] sm:$0xff]  }
 0x389   : > { %14171 = vmatprep.subr.bf16.mxu0 %v15359_v1  ;;  %14192 = vmatpush3.bf16.msra.mxu1 %v15358_v0  ;;  %v15400_v0 = vld [vmem:[%s15714_s23 + $0x1c60] sm:$0xff]  }
 0x38a   : > { %14193 = vmatprep.subr.bf16.mxu1 %v15360_v2  ;;  %v15401_v1 = vld [vmem:[%s15714_s23 + $0x1ce0] sm:$0xff]  }
 0x38b   : > { %v15402_v2 = vld [vmem:[%s15714_s23 + $0x1c20] sm:$0xff]  }
 0x38c   : > { %14172 = vmatpush3.bf16.msra.mxu0 %v15361_v3  ;;  %v15403_v3 = vld [vmem:[%s15714_s23 + $0x1ca0] sm:$0xff]  }
 0x38d   : > { %14173 = vmatprep.subr.bf16.mxu0 %v15363_v5  ;;  %14194 = vmatpush3.bf16.msra.mxu1 %v15362_v4  ;;  %v15404_v4 = vld [vmem:[%s15714_s23 + $0x1c68] sm:$0xff]  }
 0x38e   : > { %14195 = vmatprep.subr.bf16.mxu1 %v15364_v6  ;;  %v15405_v6 = vld [vmem:[%s15714_s23 + $0x1ce8] sm:$0xff]  }
 0x390   : > { %14174 = vmatpush3.bf16.msra.mxu0 %v15365_v7 }
 0x391   : > { %14175 = vmatprep.subr.bf16.mxu0 %v15367_v9  ;;  %14196 = vmatpush3.bf16.msra.mxu1 %v15366_v8  ;;  %v15406_v8 = vld [vmem:[%s15714_s23 + $0x1c28] sm:$0xff]  }
 0x392   : > { %14197 = vmatprep.subr.bf16.mxu1 %v15368_v10 }
 0x394   : > { %14176 = vmatpush3.bf16.msra.mxu0 %v15369_v11 }
 0x395   : > { %14177 = vmatprep.subr.bf16.mxu0 %v15371_v13  ;;  %14198 = vmatpush3.bf16.msra.mxu1 %v15370_v12  ;;  %v15407_v12 = vld [vmem:[%s15714_s23 + $0x1ca8] sm:$0xff]   ;;  %v15408_v13 = vld [vmem:[%s15714_s23 + $0x1c70] sm:$0xff]  }
 0x396   : > { %v13875_v14 = vpop.f32.mrb[80].mxu0  ;;  %14199 = vmatprep.subr.bf16.mxu1 %v15372_v15 }
 0x397   : > { %v13876_v16 = vpop.f32.mrb[81].mxu0  ;;  %v13897_v18 = vpop.f32.mrb[80].mxu1 }
 0x398   : > { %v13877_v19 = vadd.f32 %v13876_v16, %v13875_v14  ;;  %v13878_v20 = vpop.f32.mrb[82].mxu0  ;;  %v13898_v23 = vpop.f32.mrb[81].mxu1  ;;  %14178 = vmatpush3.bf16.msra.mxu0 %v15373_v17 }
 0x399   : > { %v13879_v24 = vpop.f32.mrb[83].mxu0  ;;  %v13899_v26 = vadd.f32 %v13898_v23, %v13897_v18  ;;  %v13900_v27 = vpop.f32.mrb[82].mxu1  ;;  %14179 = vmatprep.subr.bf16.mxu0 %v15375_v22  ;;  %14200 = vmatpush3.bf16.msra.mxu1 %v15374_v21  ;;  %v15410_v21 = vld [vmem:[%s15714_s23 + $0x1c30] sm:$0xff]  }
 0x39a   : > { %v10904_v25 = vadd.f32 %v13877_v19, %v16714_v40  ;;  %v13901_v29 = vpop.f32.mrb[83].mxu1  ;;  %14201 = vmatprep.subr.bf16.mxu1 %v15376_v28  ;;  %v15382_v40 = vld [vmem:[%s15714_s23 + $0x1bb8] sm:$0xff]   ;;  %v15409_v19 = vld [vmem:[%s15714_s23 + $0x1cf0] sm:$0xff]   ;;  %v241_v27 = vld [vmem:[%s15709_s7 + $0xe0] sm:$0xff] }
 0x39b   : > { %v15411_v23 = vld [vmem:[%s15714_s23 + $0x1cb0] sm:$0xff]   ;;  %v15412_v24 = vld [vmem:[%s15714_s23 + $0x1c78] sm:$0xff]   ;;  %v760_v29 = vrot.slane %v241_v27, %v15753_v42 }
 0x39c   : > { %v16752_v31 = vadd.f32 %v13899_v26, %v10904_v25  ;;  %14180 = vmatpush3.bf16.msra.mxu0 %v15377_v30  ;;  %v15413_v25 = vld [vmem:[%s15714_s23 + $0x1cf8] sm:$0xff]   ;;  %v753_v30 = vcombine.high %v241_v27, %v241_v27  ;;  %v15452_v27 = vld [vmem:[%s15714_s23 + $0x1e00] sm:$0xff]  }
 0x39d   : > { %14181 = vmatprep.subr.bf16.mxu0 %v15379_v33  ;;  %14202 = vmatpush3.bf16.msra.mxu1 %v15378_v32  ;;  %v15414_v26 = vld [vmem:[%s15714_s23 + $0x1c38] sm:$0xff]   ;;  %v768_v32 = vcombine.high %v760_v29, %v760_v29 }
 0x39e   : > { %14203 = vmatprep.subr.bf16.mxu1 %v15380_v34  ;;  %v15415_v28 = vld [vmem:[%s15714_s23 + $0x1cb8] sm:$0xff]   ;;  %v767_v33 = vrot.slane %v753_v30, %v15753_v42  ;;  %v15418_v34 = vld [vmem:[%s15714_s23 + $0x1dc0] sm:$0xff]  }
 0x39f   : > { %v1062_v37 = vpack.c.bf16 %v768_v32, %v768_v32  ;;  %v15453_v30 = vld [vmem:[%s15714_s23 + $0x1e80] sm:$0xff]   ;;  %v15454_v32 = vld [vmem:[%s15714_s23 + $0x1e48] sm:$0xff]  }
 0x3a0   : > { %14182 = vmatpush3.bf16.msra.mxu0 %v15381_v35  ;;  %v1061_v35 = vpack.c.bf16 %v760_v29, %v760_v29  ;;  %v769_v38 = vcombine.high %v767_v33, %v767_v33 }
 0x3a1   : > { %14211 = vmatprep.subr.bf16.mxu0 %v15384_v39  ;;  %14204 = vmatpush3.bf16.msra.mxu1 %v15382_v40  ;;  %v15420_v39 = vld [vmem:[%s15714_s23 + $0x1d80] sm:$0xff]   ;;  %v1063_v40 = vpack.c.bf16 %v767_v33, %v767_v33 }
 0x3a2   : > { %14233 = vmatprep.subr.bf16.mxu1 %v15385_v44  ;;  %v1064_v43 = vpack.c.bf16 %v769_v38, %v769_v38  ;;  %v15422_v44 = vld [vmem:[%s15714_s23 + $0x1dc8] sm:$0xff]   ;;  %v15459_v38 = vld [vmem:[%s15714_s23 + $0x1ed0] sm:$0xff]  }
 0x3a3   : > { %11462 = vmatmul.mubr.bf16.vlgmr.msra.gmra.mrb[108].mxu0 %v1057_v45  ;;  %v15423_v45 = vld [vmem:[%s15714_s23 + $0x1d08] sm:$0xff]  }
 0x3a4   : > { %14212 = vmatpush3.bf16.msra.mxu0 %v15386_v46  ;;  %11502 = vmatmul.mubr.bf16.vlgmr.msra.gmra.mrb[108].mxu1 %v1059_v50  ;;  %v15424_v46 = vld [vmem:[%s15714_s23 + $0x1d88] sm:$0xff]   ;;  %v15428_v50 = vld [vmem:[%s15714_s23 + $0x1d90] sm:$0xff]  }
 0x3a5   : > { %14213 = vmatprep.subr.bf16.mxu0 %v15388_v51  ;;  %14234 = vmatpush3.bf16.msra.mxu1 %v15387_v49  ;;  %v15427_v49 = vld [vmem:[%s15714_s23 + $0x1d10] sm:$0xff]   ;;  %v15429_v51 = vld [vmem:[%s15714_s23 + $0x1d58] sm:$0xff]  }
 0x3a6   : > { %14235 = vmatprep.subr.bf16.mxu1 %v15389_v53  ;;  %11541 = vmatprep.mubr.bf16.mxu0 %v1062_v37  ;;  %v15431_v53 = vld [vmem:[%s15714_s23 + $0x1d18] sm:$0xff]   ;;  %v15458_v37 = vld [vmem:[%s15714_s23 + $0x1e50] sm:$0xff]  }
 0x3a7   : > { %11581 = vmatprep.mubr.bf16.mxu1 %v1064_v43  ;;  %v15463_v43 = vld [vmem:[%s15714_s23 + $0x1ed8] sm:$0xff]  }
 0x3a8   : > { %14214 = vmatpush3.bf16.msra.mxu0 %v15390_v54  ;;  %v15432_v54 = vld [vmem:[%s15714_s23 + $0x1d98] sm:$0xff]  }
 0x3a9   : > { %14215 = vmatprep.subr.bf16.mxu0 %v15392_v56  ;;  %14236 = vmatpush3.bf16.msra.mxu1 %v15391_v55  ;;  %v15433_v55 = vld [vmem:[%s15714_s23 + $0x1d60] sm:$0xff]  }
 0x3aa   : > { %14237 = vmatprep.subr.bf16.mxu1 %v15393_v57  ;;  %v15434_v56 = vld [vmem:[%s15714_s23 + $0x1de0] sm:$0xff]  }
 0x3ab   : > { %v15435_v57 = vld [vmem:[%s15714_s23 + $0x1d20] sm:$0xff]  }
 0x3ac   : > { %14216 = vmatpush3.bf16.msra.mxu0 %v15394_v58  ;;  %v15436_v58 = vld [vmem:[%s15714_s23 + $0x1da0] sm:$0xff]  }
 0x3ad   : > { %14217 = vmatprep.subr.bf16.mxu0 %v15396_v60  ;;  %14238 = vmatpush3.bf16.msra.mxu1 %v15395_v59  ;;  %v15437_v59 = vld [vmem:[%s15714_s23 + $0x1d68] sm:$0xff]  }
 0x3ae   : > { %14239 = vmatprep.subr.bf16.mxu1 %v15397_v61  ;;  %v15438_v61 = vld [vmem:[%s15714_s23 + $0x1de8] sm:$0xff]  }
 0x3b0   : > { %14218 = vmatpush3.bf16.msra.mxu0 %v15398_v62 }
 0x3b1   : > { %14219 = vmatprep.subr.bf16.mxu0 %v15400_v0  ;;  %14240 = vmatpush3.bf16.msra.mxu1 %v15399_v63  ;;  %v15439_v63 = vld [vmem:[%s15714_s23 + $0x1d28] sm:$0xff]  }
 0x3b2   : > { %14241 = vmatprep.subr.bf16.mxu1 %v15401_v1 }
 0x3b4   : > { %14220 = vmatpush3.bf16.msra.mxu0 %v15402_v2 }
 0x3b5   : > { %14221 = vmatprep.subr.bf16.mxu0 %v15404_v4  ;;  %14242 = vmatpush3.bf16.msra.mxu1 %v15403_v3  ;;  %v15440_v4 = vld [vmem:[%s15714_s23 + $0x1da8] sm:$0xff]  }
 0x3b6   : > { %v13919_v5 = vpop.f32.mrb[84].mxu0  ;;  %14243 = vmatprep.subr.bf16.mxu1 %v15405_v6  ;;  %v15441_v6 = vld [vmem:[%s15714_s23 + $0x1d70] sm:$0xff]  }
 0x3b7   : > { %v13920_v7 = vpop.f32.mrb[85].mxu0  ;;  %v13941_v9 = vpop.f32.mrb[84].mxu1 }
 0x3b8   : > { %v13921_v10 = vadd.f32 %v13920_v7, %v13919_v5  ;;  %v13922_v11 = vpop.f32.mrb[86].mxu0  ;;  %v13942_v14 = vpop.f32.mrb[85].mxu1  ;;  %14222 = vmatpush3.bf16.msra.mxu0 %v15406_v8 }
 0x3b9   : > { %v13923_v15 = vpop.f32.mrb[87].mxu0  ;;  %v13943_v17 = vadd.f32 %v13942_v14, %v13941_v9  ;;  %v13944_v18 = vpop.f32.mrb[86].mxu1  ;;  %14223 = vmatprep.subr.bf16.mxu0 %v15408_v13  ;;  %14244 = vmatpush3.bf16.msra.mxu1 %v15407_v12  ;;  %v15443_v12 = vld [vmem:[%s15714_s23 + $0x1d30] sm:$0xff]   ;;  %v15445_v14 = vld [vmem:[%s15714_s23 + $0x1d78] sm:$0xff]  }
 0x3ba   : > { %v10984_v16 = vadd.f32 %v13921_v10, %v16752_v31  ;;  %v13945_v20 = vpop.f32.mrb[87].mxu1  ;;  %14245 = vmatprep.subr.bf16.mxu1 %v15409_v19  ;;  %v15417_v31 = vld [vmem:[%s15714_s23 + $0x1d40] sm:$0xff]   ;;  %v15442_v10 = vld [vmem:[%s15714_s23 + $0x1df0] sm:$0xff]   ;;  %v242_v18 = vld [vmem:[%s15709_s7 + $0xe8] sm:$0xff] }
 0x3bb   : > { %v15444_v15 = vld [vmem:[%s15714_s23 + $0x1db0] sm:$0xff]   ;;  %v777_v19 = vrot.slane %v242_v18, %v15753_v42  ;;  %v770_v20 = vcombine.high %v242_v18, %v242_v18 }
 0x3bc   : > { %v16790_v22 = vadd.f32 %v13943_v17, %v10984_v16  ;;  %14224 = vmatpush3.bf16.msra.mxu0 %v15410_v21  ;;  %v15446_v16 = vld [vmem:[%s15714_s23 + $0x1df8] sm:$0xff]   ;;  %v15450_v21 = vld [vmem:[%s15714_s23 + $0x1e40] sm:$0xff]  }
 0x3bd   : > { %14225 = vmatprep.subr.bf16.mxu0 %v15412_v24  ;;  %14246 = vmatpush3.bf16.msra.mxu1 %v15411_v23  ;;  %v15447_v17 = vld [vmem:[%s15714_s23 + $0x1d38] sm:$0xff]   ;;  %v785_v23 = vcombine.high %v777_v19, %v777_v19  ;;  %v784_v24 = vrot.slane %v770_v20, %v15753_v42  ;;  %v15485_v20 = vld [vmem:[%s15714_s23 + $0x1f00] sm:$0xff]  }
 0x3be   : > { %14247 = vmatprep.subr.bf16.mxu1 %v15413_v25  ;;  %v15451_v25 = vld [vmem:[%s15714_s23 + $0x1ec0] sm:$0xff]  }
 0x3bf   : > { %v786_v29 = vcombine.high %v784_v24, %v784_v24 }
 0x3c0   : > { %14226 = vmatpush3.bf16.msra.mxu0 %v15414_v26  ;;  %v1065_v26 = vpack.c.bf16 %v777_v19, %v777_v19 }
 0x3c1   : > { %14255 = vmatprep.subr.bf16.mxu0 %v15417_v31  ;;  %14248 = vmatpush3.bf16.msra.mxu1 %v15415_v28  ;;  %v1066_v28 = vpack.c.bf16 %v785_v23, %v785_v23  ;;  %v1067_v31 = vpack.c.bf16 %v784_v24, %v784_v24  ;;  %v1068_v33 = vpack.c.bf16 %v786_v29, %v786_v29  ;;  %v15486_v24 = vld [vmem:[%s15714_s23 + $0x1f80] sm:$0xff]   ;;  %v15492_v29 = vld [vmem:[%s15714_s23 + $0x1fd0] sm:$0xff]  }
 0x3c2   : > { %14277 = vmatprep.subr.bf16.mxu1 %v15418_v34  ;;  %v15455_v34 = vld [vmem:[%s15714_s23 + $0x1ec8] sm:$0xff]  }
 0x3c3   : > { %11542 = vmatmul.mubr.bf16.vlgmr.msra.gmra.mrb[112].mxu0 %v1061_v35  ;;  %v15456_v35 = vld [vmem:[%s15714_s23 + $0x1e08] sm:$0xff]  }
 0x3c4   : > { %14256 = vmatpush3.bf16.msra.mxu0 %v15419_v36  ;;  %11582 = vmatmul.mubr.bf16.vlgmr.msra.gmra.mrb[112].mxu1 %v1063_v40  ;;  %v15457_v36 = vld [vmem:[%s15714_s23 + $0x1e88] sm:$0xff]   ;;  %v15461_v40 = vld [vmem:[%s15714_s23 + $0x1e90] sm:$0xff]  }
 0x3c5   : > { %14257 = vmatprep.subr.bf16.mxu0 %v15421_v41  ;;  %14278 = vmatpush3.bf16.msra.mxu1 %v15420_v39  ;;  %v15460_v39 = vld [vmem:[%s15714_s23 + $0x1e10] sm:$0xff]   ;;  %v15462_v41 = vld [vmem:[%s15714_s23 + $0x1e58] sm:$0xff]  }
 0x3c6   : > { %14279 = vmatprep.subr.bf16.mxu1 %v15422_v44  ;;  %11621 = vmatprep.mubr.bf16.mxu0 %v1066_v28  ;;  %v15464_v44 = vld [vmem:[%s15714_s23 + $0x1e18] sm:$0xff]   ;;  %v15490_v28 = vld [vmem:[%s15714_s23 + $0x1f88] sm:$0xff]  }
 0x3c7   : > { %11661 = vmatprep.mubr.bf16.mxu1 %v1068_v33  ;;  %v15496_v33 = vld [vmem:[%s15714_s23 + $0x1fd8] sm:$0xff]  }
 0x3c8   : > { %14258 = vmatpush3.bf16.msra.mxu0 %v15423_v45  ;;  %v15465_v45 = vld [vmem:[%s15714_s23 + $0x1e98] sm:$0xff]  }
 0x3c9   : > { %14259 = vmatprep.subr.bf16.mxu0 %v15425_v47  ;;  %14280 = vmatpush3.bf16.msra.mxu1 %v15424_v46  ;;  %v15466_v46 = vld [vmem:[%s15714_s23 + $0x1e60] sm:$0xff]  }
 0x3ca   : > { %14281 = vmatprep.subr.bf16.mxu1 %v15426_v48  ;;  %v15467_v47 = vld [vmem:[%s15714_s23 + $0x1ee0] sm:$0xff]  }
 0x3cb   : > { %v15468_v48 = vld [vmem:[%s15714_s23 + $0x1e20] sm:$0xff]  }
 0x3cc   : > { %14260 = vmatpush3.bf16.msra.mxu0 %v15427_v49  ;;  %v15469_v49 = vld [vmem:[%s15714_s23 + $0x1ea0] sm:$0xff]  }
 0x3cd   : > { %14261 = vmatprep.subr.bf16.mxu0 %v15429_v51  ;;  %14282 = vmatpush3.bf16.msra.mxu1 %v15428_v50  ;;  %v15470_v50 = vld [vmem:[%s15714_s23 + $0x1e68] sm:$0xff]  }
 0x3ce   : > { %14283 = vmatprep.subr.bf16.mxu1 %v15430_v52  ;;  %v15471_v52 = vld [vmem:[%s15714_s23 + $0x1ee8] sm:$0xff]  }
 0x3d0   : > { %14262 = vmatpush3.bf16.msra.mxu0 %v15431_v53 }
 0x3d1   : > { %14263 = vmatprep.subr.bf16.mxu0 %v15433_v55  ;;  %14284 = vmatpush3.bf16.msra.mxu1 %v15432_v54  ;;  %v15472_v54 = vld [vmem:[%s15714_s23 + $0x1e28] sm:$0xff]  }
 0x3d2   : > { %14285 = vmatprep.subr.bf16.mxu1 %v15434_v56 }
 0x3d4   : > { %14264 = vmatpush3.bf16.msra.mxu0 %v15435_v57 }
 0x3d5   : > { %14265 = vmatprep.subr.bf16.mxu0 %v15437_v59  ;;  %14286 = vmatpush3.bf16.msra.mxu1 %v15436_v58  ;;  %v15473_v58 = vld [vmem:[%s15714_s23 + $0x1ea8] sm:$0xff]   ;;  %v15474_v59 = vld [vmem:[%s15714_s23 + $0x1e70] sm:$0xff]  }
 0x3d6   : > { %v13963_v60 = vpop.f32.mrb[88].mxu0  ;;  %14287 = vmatprep.subr.bf16.mxu1 %v15438_v61 }
 0x3d7   : > { %v13964_v62 = vpop.f32.mrb[89].mxu0  ;;  %v13985_v0 = vpop.f32.mrb[88].mxu1 }
 0x3d8   : > { %v13965_v1 = vadd.f32 %v13964_v62, %v13963_v60  ;;  %v13966_v2 = vpop.f32.mrb[90].mxu0  ;;  %v13986_v3 = vpop.f32.mrb[89].mxu1  ;;  %14266 = vmatpush3.bf16.msra.mxu0 %v15439_v63 }
 0x3d9   : > { %v13967_v5 = vpop.f32.mrb[91].mxu0  ;;  %v13987_v8 = vadd.f32 %v13986_v3, %v13985_v0  ;;  %v13988_v9 = vpop.f32.mrb[90].mxu1  ;;  %14267 = vmatprep.subr.bf16.mxu0 %v15441_v6  ;;  %14288 = vmatpush3.bf16.msra.mxu1 %v15440_v4  ;;  %v15476_v3 = vld [vmem:[%s15714_s23 + $0x1e30] sm:$0xff]   ;;  %v15478_v6 = vld [vmem:[%s15714_s23 + $0x1e78] sm:$0xff]  }
 0x3da   : > { %v11064_v7 = vadd.f32 %v13965_v1, %v16790_v22  ;;  %v13989_v11 = vpop.f32.mrb[91].mxu1  ;;  %14289 = vmatprep.subr.bf16.mxu1 %v15442_v10  ;;  %v15448_v22 = vld [vmem:[%s15714_s23 + $0x1db8] sm:$0xff]   ;;  %v15475_v1 = vld [vmem:[%s15714_s23 + $0x1ef0] sm:$0xff]  }
 0x3db   : > { %v15477_v5 = vld [vmem:[%s15714_s23 + $0x1eb0] sm:$0xff]  }
 0x3dc   : > { %v16828_v13 = vadd.f32 %v13987_v8, %v11064_v7  ;;  %14268 = vmatpush3.bf16.msra.mxu0 %v15443_v12  ;;  %v15479_v7 = vld [vmem:[%s15714_s23 + $0x1ef8] sm:$0xff]   ;;  %v243_v9 = vld [vmem:[%s15709_s7 + $0xf0] sm:$0xff]  ;;  %v15483_v12 = vld [vmem:[%s15714_s23 + $0x1f40] sm:$0xff]  }
 0x3dd   : > { %14269 = vmatprep.subr.bf16.mxu0 %v15445_v14  ;;  %14290 = vmatpush3.bf16.msra.mxu1 %v15444_v15  ;;  %v15480_v8 = vld [vmem:[%s15714_s23 + $0x1e38] sm:$0xff]   ;;  %v794_v10 = vrot.slane %v243_v9, %v15753_v42  ;;  %v787_v11 = vcombine.high %v243_v9, %v243_v9 }
 0x3de   : > { %14291 = vmatprep.subr.bf16.mxu1 %v15446_v16  ;;  %v15484_v16 = vld [vmem:[%s15714_s23 + $0x1fc0] sm:$0xff]  }
 0x3df   : > { %v802_v14 = vcombine.high %v794_v10, %v794_v10  ;;  %v801_v15 = vrot.slane %v787_v11, %v15753_v42 }
 0x3e0   : > { %14270 = vmatpush3.bf16.msra.mxu0 %v15447_v17  ;;  %v1069_v17 = vpack.c.bf16 %v794_v10, %v794_v10 }
 0x3e1   : > { %14299 = vmatprep.subr.bf16.mxu0 %v15450_v21  ;;  %14292 = vmatpush3.bf16.msra.mxu1 %v15448_v22  ;;  %v1070_v18 = vpack.c.bf16 %v802_v14, %v802_v14  ;;  %v803_v19 = vcombine.high %v801_v15, %v801_v15  ;;  %v1071_v21 = vpack.c.bf16 %v801_v15, %v801_v15  ;;  %v15487_v22 = vld [vmem:[%s15714_s23 + $0x1f48] sm:$0xff]  }
 0x3e2   : > { %14321 = vmatprep.subr.bf16.mxu1 %v15451_v25  ;;  %v15488_v25 = vld [vmem:[%s15714_s23 + $0x1fc8] sm:$0xff]  }
 0x3e3   : > { %11622 = vmatmul.mubr.bf16.vlgmr.msra.gmra.mrb[116].mxu0 %v1065_v26  ;;  %v1072_v23 = vpack.c.bf16 %v803_v19, %v803_v19  ;;  %v15489_v26 = vld [vmem:[%s15714_s23 + $0x1f08] sm:$0xff]  }
 0x3e4   : > { %14300 = vmatpush3.bf16.msra.mxu0 %v15452_v27  ;;  %11662 = vmatmul.mubr.bf16.vlgmr.msra.gmra.mrb[116].mxu1 %v1067_v31  ;;  %v15491_v27 = vld [vmem:[%s15714_s23 + $0x1f50] sm:$0xff]   ;;  %v15495_v31 = vld [vmem:[%s15714_s23 + $0x1f58] sm:$0xff]  }
 0x3e5   : > { %14301 = vmatprep.subr.bf16.mxu0 %v15454_v32  ;;  %14322 = vmatpush3.bf16.msra.mxu1 %v15453_v30  ;;  %v15493_v30 = vld [vmem:[%s15714_s23 + $0x1f10] sm:$0xff]  }
 0x3e6   : > { %14323 = vmatprep.subr.bf16.mxu1 %v15455_v34  ;;  %11701 = vmatprep.mubr.bf16.mxu0 %v1070_v18  ;;  %v15494_v32 = vld [vmem:[%s15714_s23 + $0x1f90] sm:$0xff]   ;;  %v15497_v34 = vld [vmem:[%s15714_s23 + $0x1f18] sm:$0xff]  }
 0x3e7   : > { %11741 = vmatprep.mubr.bf16.mxu1 %v1072_v23 }
 0x3e8   : > { %14302 = vmatpush3.bf16.msra.mxu0 %v15456_v35  ;;  %v15499_v35 = vld [vmem:[%s15714_s23 + $0x1f60] sm:$0xff]  }
 0x3e9   : > { %14303 = vmatprep.subr.bf16.mxu0 %v15458_v37  ;;  %14324 = vmatpush3.bf16.msra.mxu1 %v15457_v36  ;;  %v15498_v36 = vld [vmem:[%s15714_s23 + $0x1f98] sm:$0xff]   ;;  %v15500_v37 = vld [vmem:[%s15714_s23 + $0x1fe0] sm:$0xff]  }
 0x3ea   : > { %14325 = vmatprep.subr.bf16.mxu1 %v15459_v38  ;;  %v15501_v38 = vld [vmem:[%s15714_s23 + $0x1f20] sm:$0xff]  }
 0x3ec   : > { %14304 = vmatpush3.bf16.msra.mxu0 %v15460_v39  ;;  %v15503_v39 = vld [vmem:[%s15714_s23 + $0x1f68] sm:$0xff]  }
 0x3ed   : > { %14305 = vmatprep.subr.bf16.mxu0 %v15462_v41  ;;  %14326 = vmatpush3.bf16.msra.mxu1 %v15461_v40  ;;  %v15502_v40 = vld [vmem:[%s15714_s23 + $0x1fa0] sm:$0xff]  }
 0x3ee   : > { %14327 = vmatprep.subr.bf16.mxu1 %v15463_v43 }
 0x3f0   : > { %14306 = vmatpush3.bf16.msra.mxu0 %v15464_v44  ;;  %v15504_v44 = vld [vmem:[%s15714_s23 + $0x1fe8] sm:$0xff]  }
 0x3f1   : > { %14307 = vmatprep.subr.bf16.mxu0 %v15466_v46  ;;  %14328 = vmatpush3.bf16.msra.mxu1 %v15465_v45 }
 0x3f2   : > { %14329 = vmatprep.subr.bf16.mxu1 %v15467_v47 }
 0x3f4   : > { %14308 = vmatpush3.bf16.msra.mxu0 %v15468_v48  ;;  %v15505_v48 = vld [vmem:[%s15714_s23 + $0x1f28] sm:$0xff]  }
 0x3f5   : > { %14309 = vmatprep.subr.bf16.mxu0 %v15470_v50  ;;  %14330 = vmatpush3.bf16.msra.mxu1 %v15469_v49  ;;  %v15507_v49 = vld [vmem:[%s15714_s23 + $0x1f70] sm:$0xff]  }
 0x3f6   : > { %v14007_v51 = vpop.f32.mrb[92].mxu0  ;;  %14331 = vmatprep.subr.bf16.mxu1 %v15471_v52 }
 0x3f7   : > { %v14008_v53 = vpop.f32.mrb[93].mxu0  ;;  %v14029_v55 = vpop.f32.mrb[92].mxu1 }
 0x3f8   : > { %v14009_v56 = vadd.f32 %v14008_v53, %v14007_v51  ;;  %v14010_v57 = vpop.f32.mrb[94].mxu0  ;;  %v14030_v60 = vpop.f32.mrb[93].mxu1  ;;  %14310 = vmatpush3.bf16.msra.mxu0 %v15472_v54 }
 0x3f9   : > { %v14011_v61 = vpop.f32.mrb[95].mxu0  ;;  %v14031_v63 = vadd.f32 %v14030_v60, %v14029_v55  ;;  %v14032_v0 = vpop.f32.mrb[94].mxu1  ;;  %14311 = vmatprep.subr.bf16.mxu0 %v15474_v59  ;;  %14332 = vmatpush3.bf16.msra.mxu1 %v15473_v58  ;;  %v15506_v55 = vld [vmem:[%s15714_s23 + $0x1fa8] sm:$0xff]   ;;  %v15508_v57 = vld [vmem:[%s15714_s23 + $0x1ff0] sm:$0xff]   ;;  %v15511_v60 = vld [vmem:[%s15714_s23 + $0x1f78] sm:$0xff]  }
 0x3fa   : > { %v11144_v62 = vadd.f32 %v14009_v56, %v16828_v13  ;;  %v14033_v2 = vpop.f32.mrb[95].mxu1  ;;  %14333 = vmatprep.subr.bf16.mxu1 %v15475_v1  ;;  %v15481_v13 = vld [vmem:[%s15714_s23 + $0x1eb8] sm:$0xff]   ;;  %v15509_v59 = vld [vmem:[%s15714_s23 + $0x1f30] sm:$0xff]  }
 0x3fb   : > { %v15510_v61 = vld [vmem:[%s15714_s23 + $0x1fb0] sm:$0xff]   ;;  %v15513_v0 = vld [vmem:[%s15714_s23 + $0x1f38] sm:$0xff]  }
 0x3fc   : > { %v16866_v4 = vadd.f32 %v14031_v63, %v11144_v62  ;;  %14312 = vmatpush3.bf16.msra.mxu0 %v15476_v3  ;;  %v15512_v62 = vld [vmem:[%s15714_s23 + $0x1ff8] sm:$0xff]  }
 0x3fd   : > { %14313 = vmatprep.subr.bf16.mxu0 %v15478_v6  ;;  %14334 = vmatpush3.bf16.msra.mxu1 %v15477_v5  ;;  %v244_v63 = vld [vmem:[%s15709_s7 + $0xf8] sm:$0xff] }
 0x3fe   : > { %14335 = vmatprep.subr.bf16.mxu1 %v15479_v7  ;;  %v811_v1 = vrot.slane %v244_v63, %v15753_v42  ;;  %v804_v2 = vcombine.high %v244_v63, %v244_v63  ;;  %v15514_v3 = vld [vmem:[%s15714_s23 + $0x1fb8] sm:$0xff]  }
 0x400   : > { %14314 = vmatpush3.bf16.msra.mxu0 %v15480_v8  ;;  %v818_v5 = vrot.slane %v804_v2, %v15753_v42  ;;  %v1073_v6 = vpack.c.bf16 %v811_v1, %v811_v1 }
 0x401   : > { %14343 = vmatprep.subr.bf16.mxu0 %v15483_v12  ;;  %14336 = vmatpush3.bf16.msra.mxu1 %v15481_v13 }
 0x402   : > { %14365 = vmatprep.subr.bf16.mxu1 %v15484_v16  ;;  %v820_v8 = vcombine.high %v818_v5, %v818_v5  ;;  %v1075_v9 = vpack.c.bf16 %v818_v5, %v818_v5 }
 0x403   : > { %11702 = vmatmul.mubr.bf16.vlgmr.msra.gmra.mrb[120].mxu0 %v1069_v17 }
 0x404   : > { %14344 = vmatpush3.bf16.msra.mxu0 %v15485_v20  ;;  %11742 = vmatmul.mubr.bf16.vlgmr.msra.gmra.mrb[120].mxu1 %v1071_v21  ;;  %v1076_v10 = vpack.c.bf16 %v820_v8, %v820_v8 }
 0x405   : > { %14345 = vmatprep.subr.bf16.mxu0 %v15487_v22  ;;  %14366 = vmatpush3.bf16.msra.mxu1 %v15486_v24 }
 0x406   : > { %14367 = vmatprep.subr.bf16.mxu1 %v15488_v25  ;;  %11821 = vmatprep.mubr.bf16.mxu1 %v1076_v10 }
 0x408   : > { %14346 = vmatpush3.bf16.msra.mxu0 %v15489_v26 }
 0x409   : > { %14347 = vmatprep.subr.bf16.mxu0 %v15491_v27  ;;  %14368 = vmatpush3.bf16.msra.mxu1 %v15490_v28 }
 0x40a   : > { %14369 = vmatprep.subr.bf16.mxu1 %v15492_v29 }
 0x40c   : > { %14348 = vmatpush3.bf16.msra.mxu0 %v15493_v30 }
 0x40d   : > { %14349 = vmatprep.subr.bf16.mxu0 %v15495_v31  ;;  %14370 = vmatpush3.bf16.msra.mxu1 %v15494_v32 }
 0x40e   : > { %14371 = vmatprep.subr.bf16.mxu1 %v15496_v33 }
 0x410   : > { %14350 = vmatpush3.bf16.msra.mxu0 %v15497_v34 }
 0x411   : > { %14351 = vmatprep.subr.bf16.mxu0 %v15499_v35  ;;  %14372 = vmatpush3.bf16.msra.mxu1 %v15498_v36 }
 0x412   : > { %14373 = vmatprep.subr.bf16.mxu1 %v15500_v37 }
 0x414   : > { %14352 = vmatpush3.bf16.msra.mxu0 %v15501_v38 }
 0x415   : > { %14353 = vmatprep.subr.bf16.mxu0 %v15503_v39  ;;  %14374 = vmatpush3.bf16.msra.mxu1 %v15502_v40 }
 0x416   : > { %v14051_v41 = vpop.f32.mrb[96].mxu0  ;;  %14375 = vmatprep.subr.bf16.mxu1 %v15504_v44 }
 0x417   : > { %v14052_v43 = vpop.f32.mrb[97].mxu0  ;;  %v14073_v45 = vpop.f32.mrb[96].mxu1 }
 0x418   : > { %v14053_v46 = vadd.f32 %v14052_v43, %v14051_v41  ;;  %v14054_v47 = vpop.f32.mrb[98].mxu0  ;;  %v14074_v50 = vpop.f32.mrb[97].mxu1  ;;  %14354 = vmatpush3.bf16.msra.mxu0 %v15505_v48 }
 0x419   : > { %v14055_v51 = vpop.f32.mrb[99].mxu0  ;;  %v14075_v53 = vadd.f32 %v14074_v50, %v14073_v45  ;;  %v14076_v54 = vpop.f32.mrb[98].mxu1  ;;  %14355 = vmatprep.subr.bf16.mxu0 %v15507_v49  ;;  %14376 = vmatpush3.bf16.msra.mxu1 %v15506_v55 }
 0x41a   : > { %v11224_v52 = vadd.f32 %v14053_v46, %v16866_v4  ;;  %v14077_v56 = vpop.f32.mrb[99].mxu1  ;;  %14377 = vmatprep.subr.bf16.mxu1 %v15508_v57  ;;  %v819_v4 = vcombine.high %v811_v1, %v811_v1 }
 0x41c   : > { %v11264_v58 = vadd.f32 %v14075_v53, %v11224_v52  ;;  %14356 = vmatpush3.bf16.msra.mxu0 %v15509_v59  ;;  %v1074_v7 = vpack.c.bf16 %v819_v4, %v819_v4 }
 0x41d   : > { %14357 = vmatprep.subr.bf16.mxu0 %v15511_v60  ;;  %14378 = vmatpush3.bf16.msra.mxu1 %v15510_v61 }
 0x41e   : > { %14379 = vmatprep.subr.bf16.mxu1 %v15512_v62  ;;  %11781 = vmatprep.mubr.bf16.mxu0 %v1074_v7 }
 0x420   : > { %14358 = vmatpush3.bf16.msra.mxu0 %v15513_v0 }
 0x421   : > { %14380 = vmatpush3.bf16.msra.mxu1 %v15514_v3 }
 0x423   : > { %11782 = vmatmul.mubr.bf16.vlgmr.msra.gmra.mrb[124].mxu0 %v1073_v6 }
 0x424   : > { %11822 = vmatmul.mubr.bf16.vlgmr.msra.gmra.mrb[124].mxu1 %v1075_v9 }
 0x436   : > { %v14095_v11 = vpop.f32.mrb[100].mxu0 }
 0x437   : > { %v14096_v12 = vpop.f32.mrb[101].mxu0  ;;  %v14117_v13 = vpop.f32.mrb[100].mxu1 }
 0x438   : > { %v14097_v14 = vadd.f32 %v14096_v12, %v14095_v11  ;;  %v14098_v15 = vpop.f32.mrb[102].mxu0  ;;  %v14118_v16 = vpop.f32.mrb[101].mxu1 }
 0x439   : > { %v14099_v17 = vpop.f32.mrb[103].mxu0  ;;  %v14119_v18 = vadd.f32 %v14118_v16, %v14117_v13  ;;  %v14120_v19 = vpop.f32.mrb[102].mxu1 }
 0x43a   : > { %v11304_v42 = vadd.f32 %v14097_v14, %v11264_v58  ;;  %v14121_v20 = vpop.f32.mrb[103].mxu1 }
 0x43c   : > { %v11344_v21 = vadd.f32 %v14119_v18, %v11304_v42 }
 0x456   : > { %v14139_v22 = vpop.f32.mrb[104].mxu0 }
 0x457   : > { %v14140_v23 = vpop.f32.mrb[105].mxu0  ;;  %v14161_v24 = vpop.f32.mrb[104].mxu1 }
 0x458   : > { %v14141_v25 = vadd.f32 %v14140_v23, %v14139_v22  ;;  %v14142_v26 = vpop.f32.mrb[106].mxu0  ;;  %v14162_v27 = vpop.f32.mrb[105].mxu1 }
 0x459   : > { %v14143_v28 = vpop.f32.mrb[107].mxu0  ;;  %v14163_v30 = vadd.f32 %v14162_v27, %v14161_v24  ;;  %v14164_v31 = vpop.f32.mrb[106].mxu1 }
 0x45a   : > { %v11384_v29 = vadd.f32 %v14141_v25, %v11344_v21  ;;  %v14165_v32 = vpop.f32.mrb[107].mxu1  ;;  %v212_v28 = vld [vmem:[#allocation2] sm:$0x3] }
 0x45c   : > { %v11424_v33 = vadd.f32 %v14163_v30, %v11384_v29 }
 0x476   : > { %v14183_v34 = vpop.f32.mrb[108].mxu0 }
 0x477   : > { %v14184_v35 = vpop.f32.mrb[109].mxu0  ;;  %v14205_v36 = vpop.f32.mrb[108].mxu1 }
 0x478   : > { %v14185_v37 = vadd.f32 %v14184_v35, %v14183_v34  ;;  %v14186_v38 = vpop.f32.mrb[110].mxu0  ;;  %v14206_v39 = vpop.f32.mrb[109].mxu1 }
 0x479   : > { %v14187_v40 = vpop.f32.mrb[111].mxu0  ;;  %v14207_v43 = vadd.f32 %v14206_v39, %v14205_v36  ;;  %v14208_v44 = vpop.f32.mrb[110].mxu1 }
 0x47a   : > { %v11464_v41 = vadd.f32 %v14185_v37, %v11424_v33  ;;  %v14209_v45 = vpop.f32.mrb[111].mxu1 }
 0x47c   : > { %v11504_v46 = vadd.f32 %v14207_v43, %v11464_v41 }
 0x496   : > { %v14227_v47 = vpop.f32.mrb[112].mxu0 }
 0x497   : > { %v14228_v48 = vpop.f32.mrb[113].mxu0  ;;  %v14249_v49 = vpop.f32.mrb[112].mxu1 }
 0x498   : > { %v14229_v50 = vadd.f32 %v14228_v48, %v14227_v47  ;;  %v14230_v51 = vpop.f32.mrb[114].mxu0  ;;  %v14250_v52 = vpop.f32.mrb[113].mxu1 }
 0x499   : > { %v14231_v53 = vpop.f32.mrb[115].mxu0  ;;  %v14251_v55 = vadd.f32 %v14250_v52, %v14249_v49  ;;  %v14252_v56 = vpop.f32.mrb[114].mxu1 }
 0x49a   : > { %v11544_v54 = vadd.f32 %v14229_v50, %v11504_v46  ;;  %v14253_v57 = vpop.f32.mrb[115].mxu1 }
 0x49c   : > { %v11584_v58 = vadd.f32 %v14251_v55, %v11544_v54 }
 0x4b6   : > { %v14271_v59 = vpop.f32.mrb[116].mxu0 }
 0x4b7   : > { %v14272_v60 = vpop.f32.mrb[117].mxu0  ;;  %v14293_v61 = vpop.f32.mrb[116].mxu1 }
 0x4b8   : > { %v14273_v62 = vadd.f32 %v14272_v60, %v14271_v59  ;;  %v14274_v63 = vpop.f32.mrb[118].mxu0  ;;  %v14294_v0 = vpop.f32.mrb[117].mxu1 }
 0x4b9   : > { %v14275_v1 = vpop.f32.mrb[119].mxu0  ;;  %v14295_v3 = vadd.f32 %v14294_v0, %v14293_v61  ;;  %v14296_v4 = vpop.f32.mrb[118].mxu1 }
 0x4ba   : > { %v11624_v2 = vadd.f32 %v14273_v62, %v11584_v58  ;;  %v14297_v5 = vpop.f32.mrb[119].mxu1 }
 0x4bc   : > { %v11664_v6 = vadd.f32 %v14295_v3, %v11624_v2 }
 0x4d6   : > { %v14315_v7 = vpop.f32.mrb[120].mxu0 }
 0x4d7   : > { %v14316_v8 = vpop.f32.mrb[121].mxu0  ;;  %v14337_v9 = vpop.f32.mrb[120].mxu1 }
 0x4d8   : > { %v14317_v10 = vadd.f32 %v14316_v8, %v14315_v7  ;;  %v14318_v11 = vpop.f32.mrb[122].mxu0  ;;  %v14338_v12 = vpop.f32.mrb[121].mxu1 }
 0x4d9   : > { %v14319_v13 = vpop.f32.mrb[123].mxu0  ;;  %v14339_v15 = vadd.f32 %v14338_v12, %v14337_v9  ;;  %v14340_v16 = vpop.f32.mrb[122].mxu1 }
 0x4da   : > { %v11704_v14 = vadd.f32 %v14317_v10, %v11664_v6  ;;  %v14341_v17 = vpop.f32.mrb[123].mxu1 }
 0x4dc   : > { %v11744_v42 = vadd.f32 %v14339_v15, %v11704_v14 }
 0x4f6   : > { %v14359_v18 = vpop.f32.mrb[124].mxu0 }
 0x4f7   : > { %v14360_v19 = vpop.f32.mrb[125].mxu0  ;;  %v14381_v20 = vpop.f32.mrb[124].mxu1 }
 0x4f8   : > { %v14361_v21 = vadd.f32 %v14360_v19, %v14359_v18  ;;  %v14362_v22 = vpop.f32.mrb[126].mxu0  ;;  %v14382_v23 = vpop.f32.mrb[125].mxu1 }
 0x4f9   : > { %v14363_v24 = vpop.f32.mrb[127].mxu0  ;;  %v14383_v26 = vadd.f32 %v14382_v23, %v14381_v20  ;;  %v14384_v27 = vpop.f32.mrb[126].mxu1 }
 0x4fa   : > { %v11784_v25 = vadd.f32 %v14361_v21, %v11744_v42  ;;  %v14385_v29 = vpop.f32.mrb[127].mxu1  ;;  %11834 = sbr.rel (%p12974_p1) target bundleno = 1289 (0x509), region = 36 }
 0x4fc   : > { %v11824_v30 = vadd.f32 %v14383_v26, %v11784_v25 }
 0x4fe   : > { %v11829_v31 = vadd.f32 %v11824_v30, %v212_v28 }
 0x500   : > { %11830 = vst [vmem:[#allocation2] sm:$0x3] %v11829_v31 }
 0x507   : > { %v11835_v32 = vld [vmem:[#allocation2] sm:$0x3] }
 0x508   : > { %11836 = vst [vmem:[%s185_s24] sm:$0x3] %v11835_v32 }
 0x509 PF: > { %s12976_s27 = sshll.u32 %s15598_s13, 5  ;;  %s11851_s4 = sshll.u32 %s185_s24, 4  ;;  %s11852_s4 = int_to_ptr.vmem [resolvable:$true] %s11851_s4 }
 0x50a   : > { %s16919_s3 = scalar_lea.hbm %s16972_s2, %s12976_s27  ;;  %s11838_s12 = scalar_lea.sflag [#allocation4], %s183_s26 }
 0x50b   : > { %s15516_s5 = scalar_lea.vmem %s11852_s4, 32  ;;  %s15614_s6 = smov [#allocation3]  }
 0x50c   : > { %p15517_p2 = scmp.ne.s32.totalorder %s11852_s4, %s15516_s5  ;;  %s15520_s7 = sshll.u32 %s15614_s6, 4  ;;  %s15521_s7 = int_to_ptr.vmem [resolvable:$false] %s15520_s7 }
 0x50d   : > { %s15522_s8 = scalar_lea.vmem %s15521_s7, 64  ;;  %p15523_p6 = scmp.lt.s32.totalorder %s11852_s4, %s15521_s7 }
 0x50e   : > { %p15518_p4 = pnand %p15517_p2, %p15679_p3  ;;  %p15524_p7 = scmp.lt.s32.totalorder %s15522_s8, %s15516_s5 }
 0x510   : > { %p15519_p5 = pneg %p15518_p4  ;;  %p15525_p8 = por %p15524_p7, %p15523_p6 }
 0x512   : > { %p15526_p10 = pnand %p15525_p8, %p15519_p5 }
 0x514   : > { %15529 = shalt.err (!%p15526_p10)
}
 0x515   : > { %s15530_s13 = scalar_lea.hbm %s16919_s3, 32  ;;  %s15534_s17 = scalar_lea.hbm %s16972_s2, 64 }
 0x516   : > { %p15531_p11 = scmp.ne.s32.totalorder %s16919_s3, %s15530_s13  ;;  %p15535_p0 = scmp.lt.u32.totalorder %s16919_s3, %s16972_s2 }
 0x517   : > { %p15536_p1 = scmp.lt.u32.totalorder %s15534_s17, %s15530_s13  ;;  %p15538_p4 = scmp.lt.u32.totalorder %s15530_s13, %s16919_s3 }
 0x518   : > { %p15532_p12 = pnand %p15531_p11, %p15679_p3 }
 0x519   : > { %p15537_p2 = por %p15536_p1, %p15535_p0 }
 0x51a   : > { %p15533_p13 = pneg %p15532_p12 }
 0x51b   : > { %p15539_p5 = por %p15538_p4, %p15537_p2 }
 0x51d   : > { %p15540_p6 = pnand %p15539_p5, %p15533_p13 }
 0x51f   : > { %15543 = shalt.err (!%p15540_p6)
}
 0x520   : > { %14387 = dma.vmem_to_hbm [thread:$0]  (%p15679_p3), %s11852_s4, 32, %s16919_s3, %s11838_s12  }
 0x521 PF: > { %p14393_p7 = scmp.ge.s32.totalorder %s15610_s16, 2  ;;  %s11863_s24 = sand.u32 1, %s15582_s9  }
 0x522   : > { %s11864_s27 = scalar_lea.sflag [#allocation4], %s11863_s24 }
 0x523   : > { %p14390_p8 = pnand %p14393_p7, %p15689_p9 }
 0x525   : > { %15577 = dma.done.wait (!%p14390_p8), %s11864_s27, 32  }
 0x526   : > { %15579 = vsyncadd (!%p14390_p8), %s11864_s27, 4294967264  ;;  %s15_s16 = sadd.s32 1, %s15610_s16   ;;  %s16975_s9 = smov %s15586_s10 }
 0x527   : > { %p12_p10 = scmp.ge.s32.totalorder %s15_s16, 10   ;;  %s16976_s10 = smov %s15590_s11 }
 0x528   : > { %s16977_s11 = smov %s15697_s25  ;;  %s16978_s12 = smov %s15602_s14 }
 0x529   : > { %s16979_s13 = smov %s15606_s15  ;;  %s16980_s14 = smov %s16983_s19 }
 0x52a   : > { %s16981_s15 = smov %s16987_s20  ;;  %14 = sbr.rel (!%p12_p10) target bundleno = 5 (0x5), region = 74 }
 0x531   :  { %11869 = vsyncpa [#allocation4], 1 }
 0x532   :  { %11871 = vsyncpa [#allocation4 + $0x1], 1 }

</bundles_post_ra>
